<compile_context>
chip_gen: v5e
topology: v5e:2x2
jax: 0.10.0
libtpu: 0.0.40
codegen_flags: <defaults>
</compile_context>

<pallas_src>
import jax
import jax.numpy as jnp
import numpy as np
from jax.experimental import pallas as pl
from jax.experimental.pallas import tpu as pltpu


def _hardswish(x):
    # PyTorch nn.Hardswish: x * relu6(x + 3) / 6  (kept in f32 on all generations).
    return x * jnp.clip(x + 3.0, 0.0, 6.0) * (1.0 / 6.0)


def birads_kernel(xpad_ref, w1_ref, b1_ref, w2_ref, b2_ref, feat_ref, h1pad_ref):
    # Per grid step: B images.
    #   xpad_ref:  (B, H+2, W+2, Cin) bf16  spatially zero-padded input
    #   w1_ref:    (9, Cin, 128)      bf16  conv1 taps (dy-major, dx-minor)
    #   b1_ref:    (1, 128)           f32
    #   w2_ref:    (9*128, 64)        bf16  conv2 taps flattened for im2col
    #   b2_ref:    (1, 64)            f32
    #   feat_ref:  (B, 1, 64)         f32   per-image global-max-pooled features
    #   h1pad_ref: (B, H+2, W+2, 128) bf16  persistent VMEM scratch (padded h1)
    B, Hp, Wp, Cin = xpad_ref.shape
    H, W = Hp - 2, Wp - 2
    C1 = b1_ref.shape[-1]
    C2 = b2_ref.shape[-1]
    M = B * H * W

    # ---- Conv2d(Cin -> 128, k=3, pad=1): per-tap accumulation (9 small matmuls) ----
    acc1 = jnp.zeros((M, C1), jnp.float32)
    t = 0
    for dy in range(3):
        for dx in range(3):
            tap = xpad_ref[:, dy:dy + H, dx:dx + W, :].reshape(M, Cin)   # bf16
            acc1 = acc1 + jnp.dot(tap, w1_ref[t],
                                  preferred_element_type=jnp.float32)
            t += 1
    h1 = _hardswish(acc1 + b1_ref[...])                                  # (M, C1) f32

    # ---- Stage padded h1 in the persistent scratch ----
    # Re-zero only the 1-pixel border every step (tiny, and safe when the
    # "parallel" batch axis is sharded across TensorCores); the interior is
    # fully overwritten below.
    h1pad_ref[:, 0:1, :, :] = jnp.zeros((B, 1, Wp, C1), jnp.bfloat16)
    h1pad_ref[:, Hp - 1:Hp, :, :] = jnp.zeros((B, 1, Wp, C1), jnp.bfloat16)
    h1pad_ref[:, :, 0:1, :] = jnp.zeros((B, Hp, 1, C1), jnp.bfloat16)
    h1pad_ref[:, :, Wp - 1:Wp, :] = jnp.zeros((B, Hp, 1, C1), jnp.bfloat16)
    h1pad_ref[:, 1:H + 1, 1:W + 1, :] = h1.astype(jnp.bfloat16).reshape(B, H, W, C1)

    # ---- Conv2d(128 -> 64, k=3, pad=1): one fused im2col matmul (K = 9*128) ----
    taps2 = [
        h1pad_ref[:, dy:dy + H, dx:dx + W, :].reshape(M, C1)
        for dy in range(3) for dx in range(3)
    ]
    patches2 = jnp.concatenate(taps2, axis=-1)                           # (M, 9*C1) bf16
    acc2 = jnp.dot(patches2, w2_ref[...],
                   preferred_element_type=jnp.float32)                   # (M, C2) f32
    h2 = _hardswish(acc2 + b2_ref[...])

    # ---- AdaptiveMaxPool2d(1) per image (must stay AFTER hardswish) ----
    feat_ref[...] = jnp.max(h2.reshape(B, H * W, C2), axis=1, keepdims=True)


def _vmem_limit_bytes():
    # Generation-aware scoped-VMEM limit: ~75% of physical VMEM
    # (48 MiB on v7x's 64 MiB, 96 MiB on v5e/v6e's 128 MiB); safe fallback 48 MiB.
    try:
        cap = int(pltpu.get_tpu_info().vmem_capacity_bytes)
    except Exception:
        cap = 64 * 1024 * 1024
    return min(cap * 3 // 4, 100 * 1024 * 1024)


def birads_head(x_nhwc, params):
    """x_nhwc: (N, H, W, Cin) float32. Returns (N, num_classes) float32."""
    w1, b1, w2, b2, wl, bl = params
    N, H, W, Cin = x_nhwc.shape
    C1 = w1.shape[-1]
    C2 = w2.shape[-1]
    Hp, Wp = H + 2, W + 2

    vmem_limit = _vmem_limit_bytes()

    # Images per grid step: keep >= 2 grid steps (v7x has 2 TensorCores), but fold
    # as many images as fit into each step to amortize per-step overhead.  Cap B
    # by a rough per-image VMEM footprint (patches2 dominates at 9*C1*2 B/pixel).
    per_img = (H * W * (9 * C1 * 2 + C1 * 4 + C2 * 4 + 9 * Cin * 2)
               + Hp * Wp * (C1 * 2 + 2 * Cin * 2))
    max_b = max(1, (vmem_limit // 2) // per_img)
    n_steps = 2 if N >= 2 else 1
    B = min(max(1, -(-N // n_steps)), max_b)
    n_steps = -(-N // B)
    Npad = n_steps * B

    # Pre-pad batch (to a multiple of B) and space (SAME halo); bf16 MXU operands.
    xpad = jnp.pad(x_nhwc, ((0, Npad - N), (1, 1), (1, 1), (0, 0))).astype(jnp.bfloat16)
    w1_taps = w1.reshape(9, Cin, C1).astype(jnp.bfloat16)    # HWIO -> (9, Cin, C1)
    w2_flat = w2.reshape(9 * C1, C2).astype(jnp.bfloat16)    # HWIO -> (9*C1, C2)

    # TODO(synk): for large feature maps, additionally tile over H-row strips
    # (1-row halo) so per-step im2col buffers stay within v7x's 64 MiB VMEM.
    feats = pl.pallas_call(
        birads_kernel,
        out_shape=jax.ShapeDtypeStruct((Npad, 1, C2), jnp.float32),
        grid=(n_steps,),
        in_specs=[
            pl.BlockSpec((B, Hp, Wp, Cin), lambda n: (n, 0, 0, 0)),
            pl.BlockSpec((9, Cin, C1), lambda n: (0, 0, 0)),
            pl.BlockSpec((1, C1), lambda n: (0, 0)),
            pl.BlockSpec((9 * C1, C2), lambda n: (0, 0)),
            pl.BlockSpec((1, C2), lambda n: (0, 0)),
        ],
        out_specs=pl.BlockSpec((B, 1, C2), lambda n: (n, 0, 0)),
        scratch_shapes=[pltpu.VMEM((B, Hp, Wp, C1), jnp.bfloat16)],
        compiler_params=pltpu.CompilerParams(
            dimension_semantics=("parallel",),
            vmem_limit_bytes=vmem_limit,
        ),
    )(xpad, w1_taps, b1, w2_flat, b2)

    # Final Linear hoisted out of the kernel: lane-dense kernel output, one XLA
    # matmul for the whole batch instead of a tiny M=1 x num_classes MXU call/step.
    pooled = feats[:N, 0, :]                                  # (N, C2) f32
    return jnp.dot(pooled, wl) + bl.reshape(1, -1)


def init_params(key, in_channels, num_classes):
    # Deterministic synthetic weights (shapes follow the module's __init__).
    ks = jax.random.split(key, 6)
    s = 0.05
    w1 = jax.random.normal(ks[0], (3, 3, in_channels, 128), jnp.float32) * s  # HWIO
    b1 = jax.random.normal(ks[1], (1, 128), jnp.float32) * s
    w2 = jax.random.normal(ks[2], (3, 3, 128, 64), jnp.float32) * s           # HWIO
    b2 = jax.random.normal(ks[3], (1, 64), jnp.float32) * s
    wl = jax.random.normal(ks[4], (64, num_classes), jnp.float32) * s
    bl = jax.random.normal(ks[5], (1, num_classes), jnp.float32) * s
    return (w1, b1, w2, b2, wl, bl)


def ref_forward(x_nhwc, params):
    # Pure-JAX f32 reference matching PyTorch semantics (NHWC / HWIO here).
    w1, b1, w2, b2, wl, bl = params
    dn = ("NHWC", "HWIO", "NHWC")
    y = jax.lax.conv_general_dilated(x_nhwc, w1, (1, 1), "SAME",
                                     dimension_numbers=dn) + b1
    y = _hardswish(y)
    y = jax.lax.conv_general_dilated(y, w2, (1, 1), "SAME",
                                     dimension_numbers=dn) + b2
    y = _hardswish(y)
    y = jnp.max(y, axis=(1, 2))          # AdaptiveMaxPool2d(1) + Flatten
    return jnp.dot(y, wl) + bl           # Linear


if __name__ == "__main__":
    key = jax.random.PRNGKey(0)
    kx, kp = jax.random.split(key)

    # Small shapes consistent with the module (in_channels is a ctor arg).
    N, Cin, H, W = 2, 32, 16, 16
    num_classes = 5

    x_nchw = jax.random.normal(kx, (N, Cin, H, W), jnp.float32)   # PyTorch NCHW
    x_nhwc = jnp.transpose(x_nchw, (0, 2, 3, 1))                  # kernel layout

    params = init_params(kp, Cin, num_classes)

    out = birads_head(x_nhwc, params)
    out = jax.block_until_ready(out)

    assert out.shape == (N, num_classes)
    ref = ref_forward(x_nhwc, params)
    # Tolerance sized for bf16 matmul operands with f32 accumulation.
    np.testing.assert_allclose(np.asarray(out), np.asarray(ref),
                               atol=2e-2, rtol=2e-2)
    print("KERNEL_OK")
</pallas_src>

<mosaic_0001>
module attributes {stable_mosaic.version = 11 : i64} {
  func.func @birads_kernel(%arg0: i32, %arg1: memref<1x18x18x32xbf16, #tpu.memory_space<vmem>>, %arg2: memref<9x32x128xbf16, #tpu.memory_space<vmem>>, %arg3: memref<1x128xf32, #tpu.memory_space<vmem>>, %arg4: memref<1152x64xbf16, #tpu.memory_space<vmem>>, %arg5: memref<1x64xf32, #tpu.memory_space<vmem>>, %arg6: memref<1x1x64xf32, #tpu.memory_space<vmem>>, %arg7: memref<1x18x18x128xbf16, #tpu.memory_space<vmem>>) attributes {dimension_semantics = [#tpu.dimension_semantics<parallel>], iteration_bounds = array<i64: 2>, scalar_prefetch = 0 : i64, scratch_operands = 1 : i64, tpu.core_type = #tpu.core_type<tc>, window_params = [{transform_indices = @transform_0, window_bounds = array<i64: 1, 18, 18, 32>}, {pipeline_mode = #tpu.pipeline_mode<synchronous>, transform_indices = @transform_1, window_bounds = array<i64: 9, 32, 128>}, {pipeline_mode = #tpu.pipeline_mode<synchronous>, transform_indices = @transform_2, window_bounds = array<i64: 1, 128>}, {pipeline_mode = #tpu.pipeline_mode<synchronous>, transform_indices = @transform_3, window_bounds = array<i64: 1152, 64>}, {pipeline_mode = #tpu.pipeline_mode<synchronous>, transform_indices = @transform_4, window_bounds = array<i64: 1, 64>}, {transform_indices = @transform_5, window_bounds = array<i64: 1, 1, 64>}]} {
    %cst = arith.constant 0.000000e+00 : f32
    %0 = vector.broadcast %cst : f32 to vector<256x128xf32>
    %c0 = arith.constant 0 : index
    %c0_0 = arith.constant 0 : index
    %c0_1 = arith.constant 0 : index
    %c0_2 = arith.constant 0 : index
    %1 = vector.load %arg1[%c0, %c0_0, %c0_1, %c0_2] : memref<1x18x18x32xbf16, #tpu.memory_space<vmem>>, vector<1x16x16x32xbf16>
    %2 = vector.shape_cast %1 : vector<1x16x16x32xbf16> to vector<256x32xbf16>
    %c0_3 = arith.constant 0 : index
    %c0_4 = arith.constant 0 : index
    %c0_5 = arith.constant 0 : index
    %3 = vector.load %arg2[%c0_3, %c0_4, %c0_5] : memref<9x32x128xbf16, #tpu.memory_space<vmem>>, vector<1x32x128xbf16>
    %4 = vector.shape_cast %3 : vector<1x32x128xbf16> to vector<32x128xbf16>
    %cst_6 = arith.constant dense<0.000000e+00> : vector<256x128xf32>
    %5 = tpu.matmul %2, %4, %cst_6 {dimension_numbers = #tpu.dot_dimension_numbers<[1], [0], [0], [1], [0, 0, 1, 1], [], []>} : vector<256x32xbf16>, vector<32x128xbf16>, vector<256x128xf32> -> vector<256x128xf32>
    %6 = arith.addf %0, %5 : vector<256x128xf32>
    %c0_7 = arith.constant 0 : index
    %c0_8 = arith.constant 0 : index
    %c1 = arith.constant 1 : index
    %c0_9 = arith.constant 0 : index
    %7 = vector.load %arg1[%c0_7, %c0_8, %c1, %c0_9] : memref<1x18x18x32xbf16, #tpu.memory_space<vmem>>, vector<1x16x16x32xbf16>
    %8 = vector.shape_cast %7 : vector<1x16x16x32xbf16> to vector<256x32xbf16>
    %c1_10 = arith.constant 1 : index
    %c0_11 = arith.constant 0 : index
    %c0_12 = arith.constant 0 : index
    %9 = vector.load %arg2[%c1_10, %c0_11, %c0_12] : memref<9x32x128xbf16, #tpu.memory_space<vmem>>, vector<1x32x128xbf16>
    %10 = vector.shape_cast %9 : vector<1x32x128xbf16> to vector<32x128xbf16>
    %cst_13 = arith.constant dense<0.000000e+00> : vector<256x128xf32>
    %11 = tpu.matmul %8, %10, %cst_13 {dimension_numbers = #tpu.dot_dimension_numbers<[1], [0], [0], [1], [0, 0, 1, 1], [], []>} : vector<256x32xbf16>, vector<32x128xbf16>, vector<256x128xf32> -> vector<256x128xf32>
    %12 = arith.addf %6, %11 : vector<256x128xf32>
    %c0_14 = arith.constant 0 : index
    %c0_15 = arith.constant 0 : index
    %c2 = arith.constant 2 : index
    %c0_16 = arith.constant 0 : index
    %13 = vector.load %arg1[%c0_14, %c0_15, %c2, %c0_16] : memref<1x18x18x32xbf16, #tpu.memory_space<vmem>>, vector<1x16x16x32xbf16>
    %14 = vector.shape_cast %13 : vector<1x16x16x32xbf16> to vector<256x32xbf16>
    %c2_17 = arith.constant 2 : index
    %c0_18 = arith.constant 0 : index
    %c0_19 = arith.constant 0 : index
    %15 = vector.load %arg2[%c2_17, %c0_18, %c0_19] : memref<9x32x128xbf16, #tpu.memory_space<vmem>>, vector<1x32x128xbf16>
    %16 = vector.shape_cast %15 : vector<1x32x128xbf16> to vector<32x128xbf16>
    %cst_20 = arith.constant dense<0.000000e+00> : vector<256x128xf32>
    %17 = tpu.matmul %14, %16, %cst_20 {dimension_numbers = #tpu.dot_dimension_numbers<[1], [0], [0], [1], [0, 0, 1, 1], [], []>} : vector<256x32xbf16>, vector<32x128xbf16>, vector<256x128xf32> -> vector<256x128xf32>
    %18 = arith.addf %12, %17 : vector<256x128xf32>
    %c0_21 = arith.constant 0 : index
    %c1_22 = arith.constant 1 : index
    %c0_23 = arith.constant 0 : index
    %c0_24 = arith.constant 0 : index
    %19 = vector.load %arg1[%c0_21, %c1_22, %c0_23, %c0_24] : memref<1x18x18x32xbf16, #tpu.memory_space<vmem>>, vector<1x16x16x32xbf16>
    %20 = vector.shape_cast %19 : vector<1x16x16x32xbf16> to vector<256x32xbf16>
    %c3 = arith.constant 3 : index
    %c0_25 = arith.constant 0 : index
    %c0_26 = arith.constant 0 : index
    %21 = vector.load %arg2[%c3, %c0_25, %c0_26] : memref<9x32x128xbf16, #tpu.memory_space<vmem>>, vector<1x32x128xbf16>
    %22 = vector.shape_cast %21 : vector<1x32x128xbf16> to vector<32x128xbf16>
    %cst_27 = arith.constant dense<0.000000e+00> : vector<256x128xf32>
    %23 = tpu.matmul %20, %22, %cst_27 {dimension_numbers = #tpu.dot_dimension_numbers<[1], [0], [0], [1], [0, 0, 1, 1], [], []>} : vector<256x32xbf16>, vector<32x128xbf16>, vector<256x128xf32> -> vector<256x128xf32>
    %24 = arith.addf %18, %23 : vector<256x128xf32>
    %c0_28 = arith.constant 0 : index
    %c1_29 = arith.constant 1 : index
    %c1_30 = arith.constant 1 : index
    %c0_31 = arith.constant 0 : index
    %25 = vector.load %arg1[%c0_28, %c1_29, %c1_30, %c0_31] : memref<1x18x18x32xbf16, #tpu.memory_space<vmem>>, vector<1x16x16x32xbf16>
    %26 = vector.shape_cast %25 : vector<1x16x16x32xbf16> to vector<256x32xbf16>
    %c4 = arith.constant 4 : index
    %c0_32 = arith.constant 0 : index
    %c0_33 = arith.constant 0 : index
    %27 = vector.load %arg2[%c4, %c0_32, %c0_33] : memref<9x32x128xbf16, #tpu.memory_space<vmem>>, vector<1x32x128xbf16>
    %28 = vector.shape_cast %27 : vector<1x32x128xbf16> to vector<32x128xbf16>
    %cst_34 = arith.constant dense<0.000000e+00> : vector<256x128xf32>
    %29 = tpu.matmul %26, %28, %cst_34 {dimension_numbers = #tpu.dot_dimension_numbers<[1], [0], [0], [1], [0, 0, 1, 1], [], []>} : vector<256x32xbf16>, vector<32x128xbf16>, vector<256x128xf32> -> vector<256x128xf32>
    %30 = arith.addf %24, %29 : vector<256x128xf32>
    %c0_35 = arith.constant 0 : index
    %c1_36 = arith.constant 1 : index
    %c2_37 = arith.constant 2 : index
    %c0_38 = arith.constant 0 : index
    %31 = vector.load %arg1[%c0_35, %c1_36, %c2_37, %c0_38] : memref<1x18x18x32xbf16, #tpu.memory_space<vmem>>, vector<1x16x16x32xbf16>
    %32 = vector.shape_cast %31 : vector<1x16x16x32xbf16> to vector<256x32xbf16>
    %c5 = arith.constant 5 : index
    %c0_39 = arith.constant 0 : index
    %c0_40 = arith.constant 0 : index
    %33 = vector.load %arg2[%c5, %c0_39, %c0_40] : memref<9x32x128xbf16, #tpu.memory_space<vmem>>, vector<1x32x128xbf16>
    %34 = vector.shape_cast %33 : vector<1x32x128xbf16> to vector<32x128xbf16>
    %cst_41 = arith.constant dense<0.000000e+00> : vector<256x128xf32>
    %35 = tpu.matmul %32, %34, %cst_41 {dimension_numbers = #tpu.dot_dimension_numbers<[1], [0], [0], [1], [0, 0, 1, 1], [], []>} : vector<256x32xbf16>, vector<32x128xbf16>, vector<256x128xf32> -> vector<256x128xf32>
    %36 = arith.addf %30, %35 : vector<256x128xf32>
    %c0_42 = arith.constant 0 : index
    %c2_43 = arith.constant 2 : index
    %c0_44 = arith.constant 0 : index
    %c0_45 = arith.constant 0 : index
    %37 = vector.load %arg1[%c0_42, %c2_43, %c0_44, %c0_45] : memref<1x18x18x32xbf16, #tpu.memory_space<vmem>>, vector<1x16x16x32xbf16>
    %38 = vector.shape_cast %37 : vector<1x16x16x32xbf16> to vector<256x32xbf16>
    %c6 = arith.constant 6 : index
    %c0_46 = arith.constant 0 : index
    %c0_47 = arith.constant 0 : index
    %39 = vector.load %arg2[%c6, %c0_46, %c0_47] : memref<9x32x128xbf16, #tpu.memory_space<vmem>>, vector<1x32x128xbf16>
    %40 = vector.shape_cast %39 : vector<1x32x128xbf16> to vector<32x128xbf16>
    %cst_48 = arith.constant dense<0.000000e+00> : vector<256x128xf32>
    %41 = tpu.matmul %38, %40, %cst_48 {dimension_numbers = #tpu.dot_dimension_numbers<[1], [0], [0], [1], [0, 0, 1, 1], [], []>} : vector<256x32xbf16>, vector<32x128xbf16>, vector<256x128xf32> -> vector<256x128xf32>
    %42 = arith.addf %36, %41 : vector<256x128xf32>
    %c0_49 = arith.constant 0 : index
    %c2_50 = arith.constant 2 : index
    %c1_51 = arith.constant 1 : index
    %c0_52 = arith.constant 0 : index
    %43 = vector.load %arg1[%c0_49, %c2_50, %c1_51, %c0_52] : memref<1x18x18x32xbf16, #tpu.memory_space<vmem>>, vector<1x16x16x32xbf16>
    %44 = vector.shape_cast %43 : vector<1x16x16x32xbf16> to vector<256x32xbf16>
    %c7 = arith.constant 7 : index
    %c0_53 = arith.constant 0 : index
    %c0_54 = arith.constant 0 : index
    %45 = vector.load %arg2[%c7, %c0_53, %c0_54] : memref<9x32x128xbf16, #tpu.memory_space<vmem>>, vector<1x32x128xbf16>
    %46 = vector.shape_cast %45 : vector<1x32x128xbf16> to vector<32x128xbf16>
    %cst_55 = arith.constant dense<0.000000e+00> : vector<256x128xf32>
    %47 = tpu.matmul %44, %46, %cst_55 {dimension_numbers = #tpu.dot_dimension_numbers<[1], [0], [0], [1], [0, 0, 1, 1], [], []>} : vector<256x32xbf16>, vector<32x128xbf16>, vector<256x128xf32> -> vector<256x128xf32>
    %48 = arith.addf %42, %47 : vector<256x128xf32>
    %c0_56 = arith.constant 0 : index
    %c2_57 = arith.constant 2 : index
    %c2_58 = arith.constant 2 : index
    %c0_59 = arith.constant 0 : index
    %49 = vector.load %arg1[%c0_56, %c2_57, %c2_58, %c0_59] : memref<1x18x18x32xbf16, #tpu.memory_space<vmem>>, vector<1x16x16x32xbf16>
    %50 = vector.shape_cast %49 : vector<1x16x16x32xbf16> to vector<256x32xbf16>
    %c8 = arith.constant 8 : index
    %c0_60 = arith.constant 0 : index
    %c0_61 = arith.constant 0 : index
    %51 = vector.load %arg2[%c8, %c0_60, %c0_61] : memref<9x32x128xbf16, #tpu.memory_space<vmem>>, vector<1x32x128xbf16>
    %52 = vector.shape_cast %51 : vector<1x32x128xbf16> to vector<32x128xbf16>
    %cst_62 = arith.constant dense<0.000000e+00> : vector<256x128xf32>
    %53 = tpu.matmul %50, %52, %cst_62 {dimension_numbers = #tpu.dot_dimension_numbers<[1], [0], [0], [1], [0, 0, 1, 1], [], []>} : vector<256x32xbf16>, vector<32x128xbf16>, vector<256x128xf32> -> vector<256x128xf32>
    %54 = arith.addf %48, %53 : vector<256x128xf32>
    %c0_63 = arith.constant 0 : index
    %c0_64 = arith.constant 0 : index
    %55 = vector.load %arg3[%c0_63, %c0_64] : memref<1x128xf32, #tpu.memory_space<vmem>>, vector<1x128xf32>
    %56 = vector.broadcast %55 : vector<1x128xf32> to vector<256x128xf32>
    %57 = arith.addf %54, %56 : vector<256x128xf32>
    %cst_65 = arith.constant 3.000000e+00 : f32
    %58 = vector.broadcast %cst_65 : f32 to vector<256x128xf32>
    %59 = arith.addf %57, %58 : vector<256x128xf32>
    %cst_66 = arith.constant 0.000000e+00 : f32
    %cst_67 = arith.constant 6.000000e+00 : f32
    %60 = vector.broadcast %cst_66 : f32 to vector<256x128xf32>
    %61 = arith.maximumf %60, %59 : vector<256x128xf32>
    %62 = vector.broadcast %cst_67 : f32 to vector<256x128xf32>
    %63 = arith.minimumf %62, %61 : vector<256x128xf32>
    %64 = arith.mulf %57, %63 : vector<256x128xf32>
    %cst_68 = arith.constant 0.166666672 : f32
    %65 = vector.broadcast %cst_68 : f32 to vector<256x128xf32>
    %66 = arith.mulf %64, %65 : vector<256x128xf32>
    %cst_69 = arith.constant 0.000000e+00 : bf16
    %67 = vector.broadcast %cst_69 : bf16 to vector<1x1x18x128xbf16>
    %c0_70 = arith.constant 0 : index
    %c0_71 = arith.constant 0 : index
    %c0_72 = arith.constant 0 : index
    %c0_73 = arith.constant 0 : index
    %68 = vector.load %arg7[%c0_70, %c0_71, %c0_72, %c0_73] : memref<1x18x18x128xbf16, #tpu.memory_space<vmem>>, vector<1x1x18x128xbf16>
    tpu.vector_store %arg7[%c0_70, %c0_71, %c0_72, %c0_73], %67 {strides = array<i32>} : memref<1x18x18x128xbf16, #tpu.memory_space<vmem>>, vector<1x1x18x128xbf16>,
    %cst_74 = arith.constant 0.000000e+00 : bf16
    %69 = vector.broadcast %cst_74 : bf16 to vector<1x1x18x128xbf16>
    %c0_75 = arith.constant 0 : index
    %c17 = arith.constant 17 : index
    %c0_76 = arith.constant 0 : index
    %c0_77 = arith.constant 0 : index
    %70 = vector.load %arg7[%c0_75, %c17, %c0_76, %c0_77] : memref<1x18x18x128xbf16, #tpu.memory_space<vmem>>, vector<1x1x18x128xbf16>
    tpu.vector_store %arg7[%c0_75, %c17, %c0_76, %c0_77], %69 {strides = array<i32>} : memref<1x18x18x128xbf16, #tpu.memory_space<vmem>>, vector<1x1x18x128xbf16>,
    %cst_78 = arith.constant 0.000000e+00 : bf16
    %71 = vector.broadcast %cst_78 : bf16 to vector<1x18x1x128xbf16>
    %c0_79 = arith.constant 0 : index
    %c0_80 = arith.constant 0 : index
    %c0_81 = arith.constant 0 : index
    %c0_82 = arith.constant 0 : index
    %72 = vector.load %arg7[%c0_79, %c0_80, %c0_81, %c0_82] : memref<1x18x18x128xbf16, #tpu.memory_space<vmem>>, vector<1x18x1x128xbf16>
    tpu.vector_store %arg7[%c0_79, %c0_80, %c0_81, %c0_82], %71 {strides = array<i32>} : memref<1x18x18x128xbf16, #tpu.memory_space<vmem>>, vector<1x18x1x128xbf16>,
    %cst_83 = arith.constant 0.000000e+00 : bf16
    %73 = vector.broadcast %cst_83 : bf16 to vector<1x18x1x128xbf16>
    %c0_84 = arith.constant 0 : index
    %c0_85 = arith.constant 0 : index
    %c17_86 = arith.constant 17 : index
    %c0_87 = arith.constant 0 : index
    %74 = vector.load %arg7[%c0_84, %c0_85, %c17_86, %c0_87] : memref<1x18x18x128xbf16, #tpu.memory_space<vmem>>, vector<1x18x1x128xbf16>
    tpu.vector_store %arg7[%c0_84, %c0_85, %c17_86, %c0_87], %73 {strides = array<i32>} : memref<1x18x18x128xbf16, #tpu.memory_space<vmem>>, vector<1x18x1x128xbf16>,
    %75 = arith.truncf %66 : vector<256x128xf32> to vector<256x128xbf16>
    %76 = vector.shape_cast %75 : vector<256x128xbf16> to vector<1x16x16x128xbf16>
    %c0_88 = arith.constant 0 : index
    %c1_89 = arith.constant 1 : index
    %c1_90 = arith.constant 1 : index
    %c0_91 = arith.constant 0 : index
    %77 = vector.load %arg7[%c0_88, %c1_89, %c1_90, %c0_91] : memref<1x18x18x128xbf16, #tpu.memory_space<vmem>>, vector<1x16x16x128xbf16>
    tpu.vector_store %arg7[%c0_88, %c1_89, %c1_90, %c0_91], %76 {strides = array<i32>} : memref<1x18x18x128xbf16, #tpu.memory_space<vmem>>, vector<1x16x16x128xbf16>,
    %c0_92 = arith.constant 0 : index
    %c0_93 = arith.constant 0 : index
    %c0_94 = arith.constant 0 : index
    %c0_95 = arith.constant 0 : index
    %78 = vector.load %arg7[%c0_92, %c0_93, %c0_94, %c0_95] : memref<1x18x18x128xbf16, #tpu.memory_space<vmem>>, vector<1x16x16x128xbf16>
    %79 = vector.shape_cast %78 : vector<1x16x16x128xbf16> to vector<256x128xbf16>
    %c0_96 = arith.constant 0 : index
    %c0_97 = arith.constant 0 : index
    %c1_98 = arith.constant 1 : index
    %c0_99 = arith.constant 0 : index
    %80 = vector.load %arg7[%c0_96, %c0_97, %c1_98, %c0_99] : memref<1x18x18x128xbf16, #tpu.memory_space<vmem>>, vector<1x16x16x128xbf16>
    %81 = vector.shape_cast %80 : vector<1x16x16x128xbf16> to vector<256x128xbf16>
    %c0_100 = arith.constant 0 : index
    %c0_101 = arith.constant 0 : index
    %c2_102 = arith.constant 2 : index
    %c0_103 = arith.constant 0 : index
    %82 = vector.load %arg7[%c0_100, %c0_101, %c2_102, %c0_103] : memref<1x18x18x128xbf16, #tpu.memory_space<vmem>>, vector<1x16x16x128xbf16>
    %83 = vector.shape_cast %82 : vector<1x16x16x128xbf16> to vector<256x128xbf16>
    %c0_104 = arith.constant 0 : index
    %c1_105 = arith.constant 1 : index
    %c0_106 = arith.constant 0 : index
    %c0_107 = arith.constant 0 : index
    %84 = vector.load %arg7[%c0_104, %c1_105, %c0_106, %c0_107] : memref<1x18x18x128xbf16, #tpu.memory_space<vmem>>, vector<1x16x16x128xbf16>
    %85 = vector.shape_cast %84 : vector<1x16x16x128xbf16> to vector<256x128xbf16>
    %c0_108 = arith.constant 0 : index
    %c1_109 = arith.constant 1 : index
    %c1_110 = arith.constant 1 : index
    %c0_111 = arith.constant 0 : index
    %86 = vector.load %arg7[%c0_108, %c1_109, %c1_110, %c0_111] : memref<1x18x18x128xbf16, #tpu.memory_space<vmem>>, vector<1x16x16x128xbf16>
    %87 = vector.shape_cast %86 : vector<1x16x16x128xbf16> to vector<256x128xbf16>
    %c0_112 = arith.constant 0 : index
    %c1_113 = arith.constant 1 : index
    %c2_114 = arith.constant 2 : index
    %c0_115 = arith.constant 0 : index
    %88 = vector.load %arg7[%c0_112, %c1_113, %c2_114, %c0_115] : memref<1x18x18x128xbf16, #tpu.memory_space<vmem>>, vector<1x16x16x128xbf16>
    %89 = vector.shape_cast %88 : vector<1x16x16x128xbf16> to vector<256x128xbf16>
    %c0_116 = arith.constant 0 : index
    %c2_117 = arith.constant 2 : index
    %c0_118 = arith.constant 0 : index
    %c0_119 = arith.constant 0 : index
    %90 = vector.load %arg7[%c0_116, %c2_117, %c0_118, %c0_119] : memref<1x18x18x128xbf16, #tpu.memory_space<vmem>>, vector<1x16x16x128xbf16>
    %91 = vector.shape_cast %90 : vector<1x16x16x128xbf16> to vector<256x128xbf16>
    %c0_120 = arith.constant 0 : index
    %c2_121 = arith.constant 2 : index
    %c1_122 = arith.constant 1 : index
    %c0_123 = arith.constant 0 : index
    %92 = vector.load %arg7[%c0_120, %c2_121, %c1_122, %c0_123] : memref<1x18x18x128xbf16, #tpu.memory_space<vmem>>, vector<1x16x16x128xbf16>
    %93 = vector.shape_cast %92 : vector<1x16x16x128xbf16> to vector<256x128xbf16>
    %c0_124 = arith.constant 0 : index
    %c2_125 = arith.constant 2 : index
    %c2_126 = arith.constant 2 : index
    %c0_127 = arith.constant 0 : index
    %94 = vector.load %arg7[%c0_124, %c2_125, %c2_126, %c0_127] : memref<1x18x18x128xbf16, #tpu.memory_space<vmem>>, vector<1x16x16x128xbf16>
    %95 = vector.shape_cast %94 : vector<1x16x16x128xbf16> to vector<256x128xbf16>
    %96 = tpu.concatenate %79, %81, %83, %85, %87, %89, %91, %93, %95 in 1 : vector<256x128xbf16>, vector<256x128xbf16>, vector<256x128xbf16>, vector<256x128xbf16>, vector<256x128xbf16>, vector<256x128xbf16>, vector<256x128xbf16>, vector<256x128xbf16>, vector<256x128xbf16> -> vector<256x1152xbf16>
    %c0_128 = arith.constant 0 : index
    %c0_129 = arith.constant 0 : index
    %97 = vector.load %arg4[%c0_128, %c0_129] : memref<1152x64xbf16, #tpu.memory_space<vmem>>, vector<1152x64xbf16>
    %cst_130 = arith.constant dense<0.000000e+00> : vector<256x64xf32>
    %98 = tpu.matmul %96, %97, %cst_130 {dimension_numbers = #tpu.dot_dimension_numbers<[1], [0], [0], [1], [0, 0, 1, 1], [], []>} : vector<256x1152xbf16>, vector<1152x64xbf16>, vector<256x64xf32> -> vector<256x64xf32>
    %c0_131 = arith.constant 0 : index
    %c0_132 = arith.constant 0 : index
    %99 = vector.load %arg5[%c0_131, %c0_132] : memref<1x64xf32, #tpu.memory_space<vmem>>, vector<1x64xf32>
    %100 = vector.broadcast %99 : vector<1x64xf32> to vector<256x64xf32>
    %101 = arith.addf %98, %100 : vector<256x64xf32>
    %cst_133 = arith.constant 3.000000e+00 : f32
    %102 = vector.broadcast %cst_133 : f32 to vector<256x64xf32>
    %103 = arith.addf %101, %102 : vector<256x64xf32>
    %cst_134 = arith.constant 0.000000e+00 : f32
    %cst_135 = arith.constant 6.000000e+00 : f32
    %104 = vector.broadcast %cst_134 : f32 to vector<256x64xf32>
    %105 = arith.maximumf %104, %103 : vector<256x64xf32>
    %106 = vector.broadcast %cst_135 : f32 to vector<256x64xf32>
    %107 = arith.minimumf %106, %105 : vector<256x64xf32>
    %108 = arith.mulf %101, %107 : vector<256x64xf32>
    %cst_136 = arith.constant 0.166666672 : f32
    %109 = vector.broadcast %cst_136 : f32 to vector<256x64xf32>
    %110 = arith.mulf %108, %109 : vector<256x64xf32>
    %111 = vector.shape_cast %110 : vector<256x64xf32> to vector<1x256x64xf32>
    %cst_137 = arith.constant dense<0xFF800000> : vector<1x64xf32>
    %112 = vector.multi_reduction <maximumf>, %111, %cst_137 [1] : vector<1x256x64xf32> to vector<1x64xf32>
    %113 = vector.shape_cast %112 : vector<1x64xf32> to vector<1x1x64xf32>
    %c0_138 = arith.constant 0 : index
    %c0_139 = arith.constant 0 : index
    %c0_140 = arith.constant 0 : index
    %114 = vector.load %arg6[%c0_138, %c0_139, %c0_140] : memref<1x1x64xf32, #tpu.memory_space<vmem>>, vector<1x1x64xf32>
    tpu.vector_store %arg6[%c0_138, %c0_139, %c0_140], %113 {strides = array<i32>} : memref<1x1x64xf32, #tpu.memory_space<vmem>>, vector<1x1x64xf32>,
    return
  }
  func.func @transform_0(%arg0: i32) -> (i32, i32, i32, i32) {
    %c0_i32 = arith.constant 0 : i32
    %c0_i32_0 = arith.constant 0 : i32
    %c0_i32_1 = arith.constant 0 : i32
    %c0_i32_2 = arith.constant 0 : i32
    return %arg0, %c0_i32, %c0_i32_0, %c0_i32_1 : i32, i32, i32, i32
  }
  func.func @transform_1(%arg0: i32) -> (i32, i32, i32) {
    %c0_i32 = arith.constant 0 : i32
    %c0_i32_0 = arith.constant 0 : i32
    %c0_i32_1 = arith.constant 0 : i32
    %c0_i32_2 = arith.constant 0 : i32
    return %c0_i32, %c0_i32_0, %c0_i32_1 : i32, i32, i32
  }
  func.func @transform_2(%arg0: i32) -> (i32, i32) {
    %c0_i32 = arith.constant 0 : i32
    %c0_i32_0 = arith.constant 0 : i32
    %c0_i32_1 = arith.constant 0 : i32
    return %c0_i32, %c0_i32_0 : i32, i32
  }
  func.func @transform_3(%arg0: i32) -> (i32, i32) {
    %c0_i32 = arith.constant 0 : i32
    %c0_i32_0 = arith.constant 0 : i32
    %c0_i32_1 = arith.constant 0 : i32
    return %c0_i32, %c0_i32_0 : i32, i32
  }
  func.func @transform_4(%arg0: i32) -> (i32, i32) {
    %c0_i32 = arith.constant 0 : i32
    %c0_i32_0 = arith.constant 0 : i32
    %c0_i32_1 = arith.constant 0 : i32
    return %c0_i32, %c0_i32_0 : i32, i32
  }
  func.func @transform_5(%arg0: i32) -> (i32, i32, i32) {
    %c0_i32 = arith.constant 0 : i32
    %c0_i32_0 = arith.constant 0 : i32
    %c0_i32_1 = arith.constant 0 : i32
    return %arg0, %c0_i32, %c0_i32_0 : i32, i32, i32
  }
}

</mosaic_0001>

<bundles_post_ra>
// kernel: tpu_custom_call.1
= control target key start
LH: loop header
LB: loop body
LE: loop exit
PB: predicated region body
PF: predicated region fallthrough
CT: control target
= control target key end

     0   :  { %10 = vsyncpa [#allocation4], 0  ;;  %s14800_s0 = inlined_call_operand.vmem [shape: bf16[2,18,18,32], index: 0, kind: input, shape index: {}]   ;;  %s14801_s1 = inlined_call_operand.vmem [shape: bf16[9,32,128], index: 1, kind: input, shape index: {}]   ;;  %s14802_s2 = inlined_call_operand.vmem [shape: f32[1,128], index: 2, kind: input, shape index: {}]   ;;  %s14803_s3 = inlined_call_operand.vmem [shape: bf16[1152,64], index: 3, kind: input, shape index: {}]   ;;  %s14804_s4 = inlined_call_operand.vmem [shape: f32[1,64], index: 4, kind: input, shape index: {}]   ;;  %s14805_s5 = inlined_call_operand.hbm [shape: f32[2,1,64], index: 5, kind: output, shape index: {}]  }
   0x1   :  { %12 = vsyncpa [#allocation4 + $0x1], 0  ;;  %s10745_s18 = smov 0   ;;  %s10747_s19 = smov 0  }
   0x2   :  { %s10749_s20 = smov 0   ;;  %s10751_s21 = smov 0  }
   0x3 LB: > { %s10766_s22 = sadd.s32 4294967295, %s10712_s21   ;;  %s9156_s23 = sadd.s32 4294967294, %s10712_s21   ;;  %s10712_s21 = sphi %s10751_s21, %s15001_s21   ;;  %s10708_s20 = sphi %s10749_s20, %s15000_s20   ;;  %s10704_s19 = sphi %s10747_s19, %s14999_s19   ;;  %s10700_s18 = sphi %s10745_s18, %s14998_s18  }
   0x4   : > { %s10770_s24 = sadd.s32 1, %s10712_s21   ;;  %s135_s25 = sadd.s32 1, %s10708_s20 }
   0x5   : > { %s132_s26 = ssub.s32 %s10712_s21, %s10770_s24  ;;  %p145_p0 = scmp.ne.s32.totalorder %s10708_s20, %s10704_s19 }
   0x6   : > { %p133_p1 = scmp.eq.s32.totalorder %s132_s26, 0  ;;  %p146_p2 = scmp.eq.s32.totalorder %s10766_s22, 1 }
   0x7   : > { %p151_p3 = scmp.ne.s32.totalorder %s10704_s19, %s10700_s18  ;;  %p152_p4 = scmp.eq.s32.totalorder %s9156_s23, 1 }
   0x8   : > { %s10781_s27 = scalar_select %p133_p1, %s10708_s20, %s135_s25  }
   0x9   : > { %p10783_p5 = por %p146_p2, %p145_p0  ;;  %p10787_p6 = por %p152_p4, %p151_p3 }
   0xa   : > { %p9159_p7 = scmp.ge.s32.totalorder %s10712_s21, 1  ;;  %p190_p8 = scmp.lt.s32.totalorder %s10712_s21, 3 }
   0xc   : > { %p191_p9 = pnand %p9159_p7, %p190_p8 }
   0xe   : > { %194 = sbr.rel (%p191_p9) target bundleno = 1504 (0x5e0), region = 40 }
  0x13   : > { %v10388_v0 = vld [vmem:[%s14801_s1 + $0x8] sm:$0xff]  ;;  %p217_p10 = scmp.lt.s32.totalorder %s10766_s22, 1  ;;  %v10390_v1 = vld [vmem:[%s14801_s1 + $0x18] sm:$0xff]  ;;  %v10387_v2 = vld [vmem:[%s14801_s1] sm:$0xff]  ;;  %vm727_vm0 = vcmask 261120   ;;  %vm1142_vm4 = vcmask 1042432   ;;  %s9097_s23 = scalar_lea.hbm %s14805_s5, %s10766_s22 }
  0x14   : > { %10559 = vmatpush.bf16.msra.mxu3 %v10388_v0  ;;  %782 = vmatpush.bf16.msra.mxu0 %v10390_v1  ;;  %v10389_v3 = vld [vmem:[%s14801_s1 + $0x10] sm:$0xff]  ;;  %v10392_v4 = vld [vmem:[%s14801_s1 + $0x28] sm:$0xff]  ;;  %v10410_v5 = vld [vmem:[%s14801_s1 + $0x38] sm:$0xff]  ;;  %vm275_vm1 = vsmask.f32 3328  ;;  %vm1143_vm5 = vcmask 1046532  }
  0x15   : > { %s218_s11 = scalar_select %p217_p10, %s10766_s22, 1  ;;  %10557 = vmatpush.bf16.msra.mxu2 %v10390_v1  ;;  %1011 = vmatpush.bf16.msra.mxu1 %v10388_v0  ;;  %v10412_v6 = vld [vmem:[%s14801_s1 + $0x48] sm:$0xff]  ;;  %vm276_vm2 = vsmask.f32 7440  ;;  %vm11069_vm6 = vmor %vm1142_vm4, %vm1143_vm5  ;;  %vm4444_vm7 = vcmask 1040384   ;;  %vm4912_vm12 = vcmask 1043456  }
  0x16   : > { %vm10843_vm3 = vmor %vm275_vm1, %vm276_vm2  ;;  %vm4445_vm8 = vsmask.f32 256  ;;  %vm4501_vm10 = vsmask.f32 7938  ;;  %vm4589_vm14 = vsmask.f32 4368 }
  0x17   : > { %s10561_s14 = smul.u32 216, %s218_s11  ;;  %vm12089_vm9 = vmand %vm4444_vm7, %vm4445_vm8  ;;  %s215_s15 = sand.u32 1, %s10704_s19   ;;  %vm9086_vm1 = vcmask 516096  }
  0x18   : > { %10560 = vmatpush.bf16.msra.mxu3 %v10387_v2  ;;  %783 = vmatpush.bf16.msra.mxu0 %v10389_v3  ;;  %vm12131_vm11 = vmand %vm4444_vm7, %vm4501_vm10  ;;  %s216_s25 = scalar_lea.vmem [#allocation3], %s215_s15  ;;  %s9101_s30 = sshll.u32 %s9097_s23, 4  ;;  %s9102_s30 = int_to_ptr.hbm [resolvable:$true] %s9101_s30 }
  0x19   : > { %s10819_s7 = scalar_lea.vmem %s14800_s0, %s10561_s14  ;;  %10558 = vmatpush.bf16.msra.mxu2 %v10389_v3  ;;  %1012 = vmatpush.bf16.msra.mxu1 %v10387_v2  ;;  %vm12260_vm13 = vmand %vm4912_vm12, %vm4501_vm10  ;;  %s9099_s26 = sshll.u32 %s216_s25, 4  ;;  %s9100_s26 = int_to_ptr.vmem [resolvable:$true] %s9099_s26 }
  0x1a   : > { %v10379_v7 = vld [vmem:[%s10819_s7 + $0x60] sm:$0xff]  ;;  %v10827_v10 = vld [vmem:[%s10819_s7 + $0x8] sm:$0x1]  ;;  %v225_v32 = vld [vmem:[%s10819_s7 + $0xc] sm:$0xf]  ;;  %s9089_s6 = scalar_lea.sflag [#allocation4], %s215_s15 }
  0x1b   : > { %v223_v8 = vld [vmem:[%s10819_s7] sm:$0xf]  ;;  %v10824_v9 = vld [vmem:[%s10819_s7 + $0x4] sm:$0xf]  ;;  %9269 = vmatmul.msk.bf16.vlgmr.msra.gmra.mxu3 %vm727_vm0, %v10379_v7  ;;  %v298_v15 = vshll.u32 %v10827_v10, 16  ;;  %v303_v43 = vshrl.u32 %v225_v32, 16  ;;  %vm12303_vm15 = vmor %vm4445_vm8, %vm4589_vm14 }
  0x1c   : > { %v279_v11 = vshrl.u32 %v223_v8, 16  ;;  %v282_v12 = vshll.u32 %v223_v8, 16  ;;  %v288_v13 = vshll.u32 %v10824_v9, 16  ;;  %v292_v14 = vshrl.u32 %v10824_v9, 16  ;;  %1675 = vmatpush.bf16.msrb.mxu3 %v10410_v5  ;;  %v239_v16 = vld [vmem:[%s10819_s7 + $0x60] sm:$0xf]  ;;  %2341 = vmatpush.bf16.msrb.mxu0 %v10412_v6 }
  0x1d   : > { %1376 = vmatpush.bf16.msrb.mxu2 %v10392_v4  ;;  %v240_v17 = vld [vmem:[%s10819_s7 + $0x64] sm:$0xf]  ;;  %v267_v22 = vld [vmem:[%s10819_s7 + $0x68] sm:$0x1]  ;;  %v300_v23 = vrot.slane %v298_v15, 5  ;;  %v471_v24 = vshrl.u32 %v239_v16, 16 }
  0x1e   : > { %v281_v18 = vrot.slane %v279_v11, 4  ;;  %v284_v19 = vrot.slane %v282_v12, 5  ;;  %v290_v20 = vrot.slane %v288_v13, 5  ;;  %v294_v21 = vrot.slane %v292_v14, 4  ;;  %v10371_v27 = vld [vmem:[%s10819_s7] sm:$0xff]  ;;  %v10380_v7 = vld [vmem:[%s10819_s7 + $0x6c] sm:$0xff] }
  0x1f   : > { %v474_v25 = vshll.u32 %v239_v16, 16  ;;  %v480_v26 = vshll.u32 %v240_v17, 16  ;;  %v484_v30 = vshrl.u32 %v240_v17, 16  ;;  %v490_v31 = vshll.u32 %v267_v22, 16  ;;  %v10839_v33 = vld [vmem:[%s10819_s7 + $0x10] sm:$0xf]  ;;  %9261 = vmatmul.msk.bf16.vlgmr.msra.gmra.mxu1 %vm727_vm0, %v10371_v27 }
  0x20   : > { %v285_v28 = vor.u32 %v284_v19, %v281_v18  ;;  %v295_v29 = vor.u32 %v294_v21, %v290_v20  ;;  %v473_v35 = vrot.slane %v471_v24, 4  ;;  %v306_v44 = vshll.u32 %v225_v32, 16  ;;  %v10854_v49 = vld [vmem:[%s10819_s7 + $0x14] sm:$0x1]  ;;  %v241_v51 = vld [vmem:[%s10819_s7 + $0x6c] sm:$0xf] }
  0x21   : > { %v476_v36 = vrot.slane %v474_v25, 5  ;;  %v482_v37 = vrot.slane %v480_v26, 5  ;;  %v486_v40 = vrot.slane %v484_v30, 4  ;;  %v492_v41 = vrot.slane %v490_v31, 5  ;;  %v242_v63 = vld [vmem:[%s10819_s7 + $0x70] sm:$0xf] }
  0x22   : > { %v286_v38 = vrot.slane %v285_v28, 4  ;;  %v296_v39 = vrot.slane %v295_v29, 4  ;;  %v312_v45 = vshll.u32 %v10839_v33, 16  ;;  %v316_v50 = vshrl.u32 %v10839_v33, 16  ;;  %v268_v5 = vld [vmem:[%s10819_s7 + $0x74] sm:$0x1] }
  0x23   : > { %v477_v42 = vor.u32 %v476_v36, %v473_v35  ;;  %v487_v48 = vor.u32 %v486_v40, %v482_v37  ;;  %v305_v55 = vrot.slane %v303_v43, 4  ;;  %v308_v57 = vrot.slane %v306_v44, 5  ;;  %v10869_v21 = vld [vmem:[%s10819_s7 + $0x1c] sm:$0xf]  ;;  %v10372_v28 = vld [vmem:[%s10819_s7 + $0xc] sm:$0xff]  ;;  %s10664_s8 = sshra.s32 %s9102_s30, 4  ;;  %s10665_s8 = int_to_ptr.hbm [resolvable:$true] %s10664_s8 }
  0x24   : > { %v291_v46 = vsel %vm10843_vm3, %v286_v38, %v290_v20  ;;  %v301_v47 = vsel %vm10843_vm3, %v296_v39, %v300_v23  ;;  %v314_v58 = vrot.slane %v312_v45, 5  ;;  %v318_v59 = vrot.slane %v316_v50, 4  ;;  %v227_v20 = vld [vmem:[%s10819_s7 + $0x18] sm:$0xf]  ;;  %s10666_s9 = scalar_lea.hbm %s10665_s8, 1  ;;  %s10670_s11 = scalar_lea.hbm %s14805_s5, 2 }
  0x25   : > { %v667_v52 = vunpack.c.l.b16 %v291_v46  ;;  %v668_v53 = vunpack.c.l.b16 %v301_v47  ;;  %v478_v54 = vrot.slane %v477_v42, 4  ;;  %v488_v56 = vrot.slane %v487_v48, 4  ;;  %v243_v35 = vld [vmem:[%s10819_s7 + $0x78] sm:$0xf]  ;;  %p10667_p11 = scmp.ne.s32.totalorder %s10665_s8, %s10666_s9  ;;  %p10671_p0 = scmp.lt.s32.totalorder %s10665_s8, %s14805_s5 }
  0x26   : > { %v322_v62 = vshll.u32 %v10854_v49, 16  ;;  %v495_v0 = vshrl.u32 %v241_v51, 16  ;;  %v309_v3 = vor.u32 %v308_v57, %v305_v55  ;;  %v319_v4 = vor.u32 %v318_v59, %v314_v58  ;;  %p10672_p1 = scmp.lt.s32.totalorder %s10670_s11, %s10666_s9 }
  0x27   : > { %v699_v60 = vpack.c.b16 %v668_v53, %v667_v52  ;;  %v483_v61 = vsel %vm10843_vm3, %v478_v54, %v482_v37  ;;  %v493_v1 = vsel %vm10843_vm3, %v488_v56, %v492_v41  ;;  %v498_v12 = vshll.u32 %v241_v51, 16  ;;  %v244_v41 = vld [vmem:[%s10819_s7 + $0x7c] sm:$0xf]  ;;  %v10888_v51 = vld [vmem:[%s10819_s7 + $0x20] sm:$0x1]  ;;  %p10668_p12 = pnand %p10667_p11, %p10783_p5 }
  0x28   : > { %v683_v2 = vunpack.c.l.b16 %v483_v61  ;;  %v684_v6 = vunpack.c.l.b16 %v493_v1  ;;  %v324_v8 = vrot.slane %v322_v62, 5  ;;  %v497_v11 = vrot.slane %v495_v0, 4  ;;  %p10673_p2 = por %p10672_p1, %p10671_p0 }
  0x29   : > { %9173 = vmatmul.msk.bf16.vlgmr.msra.gmra.mxu0 %vm727_vm0, %v699_v60  ;;  %v310_v13 = vrot.slane %v309_v3, 4  ;;  %v320_v14 = vrot.slane %v319_v4, 4  ;;  %v504_v15 = vshll.u32 %v242_v63, 16  ;;  %v508_v16 = vshrl.u32 %v242_v63, 16  ;;  %v269_v63 = vld [vmem:[%s10819_s7 + $0x80] sm:$0x1]  ;;  %p10669_p13 = pneg %p10668_p12 }
  0x2a   : > { %v707_v17 = vpack.c.b16 %v684_v6, %v683_v2  ;;  %v500_v18 = vrot.slane %v498_v12, 5  ;;  %v514_v19 = vshll.u32 %v268_v5, 16  ;;  %v327_v30 = vshrl.u32 %v227_v20, 16  ;;  %v10381_v2 = vld [vmem:[%s10819_s7 + $0x78] sm:$0xff]  ;;  %v229_v6 = vld [vmem:[%s10819_s7 + $0x24] sm:$0xf] }
  0x2b   : > { %v506_v22 = vrot.slane %v504_v15, 5  ;;  %v510_v23 = vrot.slane %v508_v16, 4  ;;  %9270 = vmatmul.msk.bf16.gmra.mxu3 %vm727_vm0, %v10380_v7  ;;  %v315_v24 = vsel %vm10843_vm3, %v310_v13, %v314_v58  ;;  %v325_v25 = vsel %vm10843_vm3, %v320_v14, %v324_v8  ;;  %v10896_v7 = vld [vmem:[%s10819_s7 + $0x28] sm:$0xf]  ;;  %p10674_p3 = pnand %p10673_p2, %p10669_p13 }
  0x2c   : > { %9181 = vmatmul.msk.bf16.vlgmr.msra.gmra.mxu2 %vm727_vm0, %v707_v17  ;;  %v501_v26 = vor.u32 %v500_v18, %v497_v11  ;;  %v516_v27 = vrot.slane %v514_v19, 5  ;;  %v330_v31 = vshll.u32 %v227_v20, 16  ;;  %v336_v32 = vshll.u32 %v10869_v21, 16  ;;  %v10373_v20 = vld [vmem:[%s10819_s7 + $0x18] sm:$0xff] }
  0x2d   : > { %v511_v29 = vor.u32 %v510_v23, %v506_v22  ;;  %v340_v37 = vshrl.u32 %v10869_v21, 16  ;;  %v669_v38 = vunpack.c.l.b16 %v315_v24  ;;  %v670_v39 = vunpack.c.l.b16 %v325_v25  ;;  %v245_v24 = vld [vmem:[%s10819_s7 + $0x84] sm:$0xf]  ;;  %v246_v25 = vld [vmem:[%s10819_s7 + $0x88] sm:$0xf] }
  0x2e   : > { %v502_v36 = vrot.slane %v501_v26, 4  ;;  %v329_v43 = vrot.slane %v327_v30, 4  ;;  %v332_v44 = vrot.slane %v330_v31, 5  ;;  %v519_v45 = vshrl.u32 %v243_v35, 16 }
  0x2f   : > { %v512_v40 = vrot.slane %v511_v29, 4  ;;  %9262 = vmatmul.msk.bf16.gmra.mxu1 %vm727_vm0, %v10372_v28  ;;  %v338_v47 = vrot.slane %v336_v32, 5  ;;  %v342_v48 = vrot.slane %v340_v37, 4  ;;  %v522_v50 = vshll.u32 %v243_v35, 16 }
  0x30   : > { %v507_v42 = vsel %vm10843_vm3, %v502_v36, %v506_v22  ;;  %v528_v52 = vshll.u32 %v244_v41, 16  ;;  %v700_v53 = vpack.c.b16 %v670_v39, %v669_v38  ;;  %v532_v55 = vshrl.u32 %v244_v41, 16  ;;  %v10915_v36 = vld [vmem:[%s10819_s7 + $0x2c] sm:$0x1] }
  0x31   : > { %v517_v46 = vsel %vm10843_vm3, %v512_v40, %v516_v27  ;;  %v685_v54 = vunpack.c.l.b16 %v507_v42  ;;  %v521_v57 = vrot.slane %v519_v45, 4  ;;  %v524_v58 = vrot.slane %v522_v50, 5 }
  0x32   : > { %v686_v56 = vunpack.c.l.b16 %v517_v46  ;;  %v530_v59 = vrot.slane %v528_v52, 5  ;;  %v333_v60 = vor.u32 %v332_v44, %v329_v43  ;;  %v343_v61 = vor.u32 %v342_v48, %v338_v47 }
  0x33   : > { %v346_v62 = vshll.u32 %v10888_v51, 16  ;;  %v534_v0 = vrot.slane %v532_v55, 4  ;;  %v525_v3 = vor.u32 %v524_v58, %v521_v57  ;;  %v538_v5 = vshll.u32 %v269_v63, 16  ;;  %v10382_v58 = vld [vmem:[%s10819_s7 + $0x84] sm:$0xff]  ;;  %v10923_v63 = vld [vmem:[%s10819_s7 + $0x34] sm:$0xf] }
  0x34   : > { %v708_v1 = vpack.c.b16 %v686_v56, %v685_v54  ;;  %v334_v8 = vrot.slane %v333_v60, 4  ;;  %v344_v11 = vrot.slane %v343_v61, 4  ;;  %v351_v13 = vshrl.u32 %v229_v6, 16 }
  0x35   : > { %v535_v4 = vor.u32 %v534_v0, %v530_v59  ;;  %v348_v12 = vrot.slane %v346_v62, 5  ;;  %v354_v14 = vshll.u32 %v229_v6, 16  ;;  %v360_v15 = vshll.u32 %v10896_v7, 16  ;;  %v231_v62 = vld [vmem:[%s10819_s7 + $0x30] sm:$0xf] }
  0x36   : > { %v364_v16 = vshrl.u32 %v10896_v7, 16  ;;  %v526_v17 = vrot.slane %v525_v3, 4  ;;  %v540_v19 = vrot.slane %v538_v5, 5  ;;  %v339_v22 = vsel %vm10843_vm3, %v334_v8, %v338_v47  ;;  %v247_v3 = vld [vmem:[%s10819_s7 + $0x90] sm:$0xf] }
  0x37   : > { %v536_v18 = vrot.slane %v535_v4, 4  ;;  %v349_v23 = vsel %vm10843_vm3, %v344_v11, %v348_v12  ;;  %v353_v26 = vrot.slane %v351_v13, 4  ;;  %v356_v27 = vrot.slane %v354_v14, 5  ;;  %v248_v4 = vld [vmem:[%s10819_s7 + $0x94] sm:$0xf]  ;;  %v10391_v12 = vld [vmem:[%s14801_s1 + $0x20] sm:$0xff] }
  0x38   : > { %v362_v28 = vrot.slane %v360_v15, 5  ;;  %v366_v29 = vrot.slane %v364_v16, 4  ;;  %v671_v30 = vunpack.c.l.b16 %v339_v22  ;;  %v672_v31 = vunpack.c.l.b16 %v349_v23  ;;  %v10409_v13 = vld [vmem:[%s14801_s1 + $0x30] sm:$0xff]  ;;  %1377 = vmatpush.bf16.msrb.mxu2 %v10391_v12 }
  0x39   : > { %9174 = vmatmul.msk.bf16.gmra.mxu0 %vm727_vm0, %v700_v53  ;;  %v531_v32 = vsel %vm10843_vm3, %v526_v17, %v530_v59  ;;  %v541_v35 = vsel %vm10843_vm3, %v536_v18, %v540_v19  ;;  %v543_v37 = vshrl.u32 %v245_v24, 16  ;;  %v546_v38 = vshll.u32 %v245_v24, 16  ;;  %v270_v53 = vld [vmem:[%s10819_s7 + $0x8c] sm:$0x1]  ;;  %v10411_v17 = vld [vmem:[%s14801_s1 + $0x40] sm:$0xff]  ;;  %1676 = vmatpush.bf16.msrb.mxu3 %v10409_v13 }
  0x3a   : > { %v552_v39 = vshll.u32 %v246_v25, 16  ;;  %v556_v40 = vshrl.u32 %v246_v25, 16  ;;  %v357_v41 = vor.u32 %v356_v27, %v353_v26  ;;  %v367_v42 = vor.u32 %v366_v29, %v362_v28  ;;  %2342 = vmatpush.bf16.msrb.mxu0 %v10411_v17 }
  0x3b   : > { %9271 = vmatmul.msk.bf16.gmra.mxu3 %vm727_vm0, %v10381_v2  ;;  %v370_v43 = vshll.u32 %v10915_v36, 16  ;;  %v701_v44 = vpack.c.b16 %v672_v31, %v671_v30  ;;  %v687_v45 = vunpack.c.l.b16 %v531_v32  ;;  %v688_v46 = vunpack.c.l.b16 %v541_v35  ;;  %v10374_v2 = vld [vmem:[%s10819_s7 + $0x24] sm:$0xff] }
  0x3c   : > { %9182 = vmatmul.msk.bf16.gmra.mxu2 %vm727_vm0, %v708_v1  ;;  %v545_v47 = vrot.slane %v543_v37, 4  ;;  %v548_v48 = vrot.slane %v546_v38, 5  ;;  %v554_v50 = vrot.slane %v552_v39, 5  ;;  %v558_v52 = vrot.slane %v556_v40, 4 }
  0x3d   : > { %v358_v54 = vrot.slane %v357_v41, 4  ;;  %v368_v55 = vrot.slane %v367_v42, 4  ;;  %v372_v56 = vrot.slane %v370_v43, 5  ;;  %v709_v57 = vpack.c.b16 %v688_v46, %v687_v45  ;;  %v271_v45 = vld [vmem:[%s10819_s7 + $0x98] sm:$0x1] }
  0x3e   : > { %v549_v59 = vor.u32 %v548_v48, %v545_v47  ;;  %v559_v60 = vor.u32 %v558_v52, %v554_v50  ;;  %v562_v61 = vshll.u32 %v270_v53, 16  ;;  %v375_v5 = vshrl.u32 %v231_v62, 16  ;;  %v10383_v52 = vld [vmem:[%s10819_s7 + $0x90] sm:$0xff] }
  0x3f   : > { %9263 = vmatmul.msk.bf16.gmra.mxu1 %vm727_vm0, %v10373_v20  ;;  %v363_v0 = vsel %vm10843_vm3, %v358_v54, %v362_v28  ;;  %v373_v1 = vsel %vm10843_vm3, %v368_v55, %v372_v56  ;;  %v378_v6 = vshll.u32 %v231_v62, 16  ;;  %v384_v8 = vshll.u32 %v10923_v63, 16  ;;  %v10946_v20 = vld [vmem:[%s10819_s7 + $0x38] sm:$0x1]  ;;  %v233_v56 = vld [vmem:[%s10819_s7 + $0x3c] sm:$0xf] }
  0x40   : > { %v388_v11 = vshrl.u32 %v10923_v63, 16  ;;  %v550_v14 = vrot.slane %v549_v59, 4  ;;  %v560_v15 = vrot.slane %v559_v60, 4  ;;  %v564_v16 = vrot.slane %v562_v61, 5 }
  0x41   : > { %v673_v18 = vunpack.c.l.b16 %v363_v0  ;;  %v674_v19 = vunpack.c.l.b16 %v373_v1  ;;  %v567_v22 = vshrl.u32 %v247_v3, 16  ;;  %v570_v23 = vshll.u32 %v247_v3, 16  ;;  %v10375_v0 = vld [vmem:[%s10819_s7 + $0x30] sm:$0xff] }
  0x42   : > { %v576_v24 = vshll.u32 %v248_v4, 16  ;;  %v580_v25 = vshrl.u32 %v248_v4, 16  ;;  %v377_v26 = vrot.slane %v375_v5, 4  ;;  %v380_v27 = vrot.slane %v378_v6, 5  ;;  %v249_v5 = vld [vmem:[%s10819_s7 + $0x9c] sm:$0xf] }
  0x43   : > { %v386_v28 = vrot.slane %v384_v8, 5  ;;  %v390_v29 = vrot.slane %v388_v11, 4  ;;  %v555_v30 = vsel %vm10843_vm3, %v550_v14, %v554_v50  ;;  %v565_v31 = vsel %vm10843_vm3, %v560_v15, %v564_v16  ;;  %v250_v6 = vld [vmem:[%s10819_s7 + $0xa0] sm:$0xf] }
  0x44   : > { %v702_v32 = vpack.c.b16 %v674_v19, %v673_v18  ;;  %v394_v35 = vshll.u32 %v10946_v20, 16  ;;  %v569_v37 = vrot.slane %v567_v22, 4  ;;  %v572_v38 = vrot.slane %v570_v23, 5  ;;  %v10978_v18 = vld [vmem:[%s10819_s7 + $0x44] sm:$0x1] }
  0x45   : > { %v578_v39 = vrot.slane %v576_v24, 5  ;;  %v582_v40 = vrot.slane %v580_v25, 4  ;;  %v689_v41 = vunpack.c.l.b16 %v555_v30  ;;  %v690_v42 = vunpack.c.l.b16 %v565_v31 }
  0x46   : > { %v381_v43 = vor.u32 %v380_v27, %v377_v26  ;;  %v573_v46 = vor.u32 %v572_v38, %v569_v37  ;;  %v586_v48 = vshll.u32 %v271_v45, 16  ;;  %v396_v55 = vrot.slane %v394_v35, 5 }
  0x47   : > { %v583_v47 = vor.u32 %v582_v40, %v578_v39  ;;  %v710_v50 = vpack.c.b16 %v690_v42, %v689_v41  ;;  %v399_v1 = vshrl.u32 %v233_v56, 16  ;;  %v591_v16 = vshrl.u32 %v249_v5, 16  ;;  %v10384_v41 = vld [vmem:[%s10819_s7 + $0x9c] sm:$0xff] }
  0x48   : > { %v382_v53 = vrot.slane %v381_v43, 4  ;;  %v588_v60 = vrot.slane %v586_v48, 5  ;;  %v594_v17 = vshll.u32 %v249_v5, 16  ;;  %v600_v23 = vshll.u32 %v250_v6, 16 }
  0x49   : > { %9175 = vmatmul.msk.bf16.gmra.mxu0 %vm727_vm0, %v701_v44  ;;  %v391_v44 = vor.u32 %v390_v29, %v386_v28  ;;  %v584_v59 = vrot.slane %v583_v47, 4  ;;  %v401_v14 = vrot.slane %v399_v1, 4  ;;  %v604_v24 = vshrl.u32 %v250_v6, 16 }
  0x4a   : > { %v387_v61 = vsel %vm10843_vm3, %v382_v53, %v386_v28  ;;  %v418_v29 = vshll.u32 %v10978_v18, 16  ;;  %v593_v30 = vrot.slane %v591_v16, 4  ;;  %v596_v35 = vrot.slane %v594_v17, 5 }
  0x4b   : > { %9272 = vmatmul.msk.bf16.gmra.mxu3 %vm727_vm0, %v10382_v58  ;;  %v392_v54 = vrot.slane %v391_v44, 4  ;;  %v574_v58 = vrot.slane %v573_v46, 4  ;;  %v675_v8 = vunpack.c.l.b16 %v387_v61  ;;  %v589_v13 = vsel %vm10843_vm3, %v584_v59, %v588_v60  ;;  %v10986_v44 = vld [vmem:[%s10819_s7 + $0x4c] sm:$0xf] }
  0x4c   : > { %9183 = vmatmul.msk.bf16.gmra.mxu2 %vm727_vm0, %v709_v57  ;;  %v10959_v57 = vld [vmem:[%s10819_s7 + $0x40] sm:$0xf]  ;;  %v692_v27 = vunpack.c.l.b16 %v589_v13  ;;  %v602_v37 = vrot.slane %v600_v23, 5  ;;  %v606_v38 = vrot.slane %v604_v24, 4  ;;  %v420_v42 = vrot.slane %v418_v29, 5 }
  0x4d   : > { %v397_v62 = vsel %vm10843_vm3, %v392_v54, %v396_v55  ;;  %v408_v3 = vshll.u32 %v10959_v57, 16  ;;  %v412_v4 = vshrl.u32 %v10959_v57, 16  ;;  %v579_v12 = vsel %vm10843_vm3, %v574_v58, %v578_v39  ;;  %v235_v39 = vld [vmem:[%s10819_s7 + $0x48] sm:$0xf]  ;;  %v10376_v58 = vld [vmem:[%s10819_s7 + $0x3c] sm:$0xff] }
  0x4e   : > { %v676_v11 = vunpack.c.l.b16 %v397_v62  ;;  %v691_v26 = vunpack.c.l.b16 %v579_v12  ;;  %v597_v47 = vor.u32 %v596_v35, %v593_v30  ;;  %v607_v48 = vor.u32 %v606_v38, %v602_v37  ;;  %v251_v55 = vld [vmem:[%s10819_s7 + $0xa8] sm:$0xf]  ;;  %v252_v59 = vld [vmem:[%s10819_s7 + $0xac] sm:$0xf] }
  0x4f   : > { %9264 = vmatmul.msk.bf16.gmra.mxu1 %vm727_vm0, %v10374_v2  ;;  %v402_v2 = vshll.u32 %v233_v56, 16  ;;  %v410_v19 = vrot.slane %v408_v3, 5  ;;  %v414_v22 = vrot.slane %v412_v4, 4  ;;  %v432_v53 = vshll.u32 %v10986_v44, 16 }
  0x50   : > { %v703_v25 = vpack.c.b16 %v676_v11, %v675_v8  ;;  %v711_v40 = vpack.c.b16 %v692_v27, %v691_v26  ;;  %v436_v54 = vshrl.u32 %v10986_v44, 16  ;;  %v598_v62 = vrot.slane %v597_v47, 4  ;;  %v11015_v47 = vld [vmem:[%s10819_s7 + $0x58] sm:$0xf] }
  0x51   : > { %v404_v15 = vrot.slane %v402_v2, 5  ;;  %v415_v31 = vor.u32 %v414_v22, %v410_v19  ;;  %v615_v3 = vshrl.u32 %v251_v55, 16  ;;  %v618_v4 = vshll.u32 %v251_v55, 16 }
  0x52   : > { %v434_v5 = vrot.slane %v432_v53, 5  ;;  %v438_v6 = vrot.slane %v436_v54, 4  ;;  %v624_v8 = vshll.u32 %v252_v59, 16  ;;  %v628_v11 = vshrl.u32 %v252_v59, 16  ;;  %v10377_v54 = vld [vmem:[%s10819_s7 + $0x48] sm:$0xff] }
  0x53   : > { %v405_v28 = vor.u32 %v404_v15, %v401_v14  ;;  %v416_v46 = vrot.slane %v415_v31, 4  ;;  %v11001_v14 = vld [vmem:[%s10819_s7 + $0x50] sm:$0x1]  ;;  %v603_v15 = vsel %vm10843_vm3, %v598_v62, %v602_v37  ;;  %v620_v22 = vrot.slane %v618_v4, 5  ;;  %v254_v59 = vld [vmem:[%s10819_s7 + $0xb8] sm:$0xf] }
  0x54   : > { %v439_v23 = vor.u32 %v438_v6, %v434_v5  ;;  %v442_v24 = vshll.u32 %v11001_v14, 16  ;;  %v626_v26 = vrot.slane %v624_v8, 5  ;;  %v630_v27 = vrot.slane %v628_v11, 4 }
  0x55   : > { %v406_v45 = vrot.slane %v405_v28, 4  ;;  %v421_v61 = vsel %vm10843_vm3, %v416_v46, %v420_v42  ;;  %v693_v29 = vunpack.c.l.b16 %v603_v15  ;;  %v237_v42 = vld [vmem:[%s10819_s7 + $0x54] sm:$0xf]  ;;  %v456_v55 = vshll.u32 %v11015_v47, 16 }
  0x56   : > { %v678_v13 = vunpack.c.l.b16 %v421_v61  ;;  %v440_v37 = vrot.slane %v439_v23, 4  ;;  %v444_v38 = vrot.slane %v442_v24, 5  ;;  %v450_v53 = vshll.u32 %v237_v42, 16 }
  0x57   : > { %v411_v60 = vsel %vm10843_vm3, %v406_v45, %v410_v19  ;;  %v617_v19 = vrot.slane %v615_v3, 4  ;;  %v652_v6 = vshrl.u32 %v254_v59, 16  ;;  %v458_v8 = vrot.slane %v456_v55, 5  ;;  %v10434_v55 = vld [vmem:[%s14801_s1 + $0x78] sm:$0xff] }
  0x58   : > { %v677_v12 = vunpack.c.l.b16 %v411_v60  ;;  %3716 = vmatpush.bf16.msra.mxu3 %v10434_v55 }
  0x59   : > { %9176 = vmatmul.msk.bf16.gmra.mxu0 %vm727_vm0, %v702_v32  ;;  %v272_v32 = vld [vmem:[%s10819_s7 + $0xa4] sm:$0x1]  ;;  %v654_v24 = vrot.slane %v652_v6, 4  ;;  %v10436_v6 = vld [vmem:[%s14801_s1 + $0x88] sm:$0xff] }
  0x5a   : > { %v610_v43 = vshll.u32 %v272_v32, 16  ;;  %v704_v28 = vpack.c.b16 %v678_v13, %v677_v12  ;;  %v621_v32 = vor.u32 %v620_v22, %v617_v19  ;;  %v11032_v12 = vld [vmem:[%s10819_s7 + $0x5c] sm:$0x1]  ;;  %4126 = vmatpush.bf16.msra.mxu0 %v10436_v6 }
  0x5b   : > { %9273 = vmatmul.msk.bf16.gmra.mxu3 %vm727_vm0, %v10383_v52  ;;  %v426_v52 = vshll.u32 %v235_v39, 16 }
  0x5c   : > { %9184 = vmatmul.msk.bf16.gmra.mxu2 %vm727_vm0, %v710_v50  ;;  %v423_v50 = vshrl.u32 %v235_v39, 16  ;;  %v612_v56 = vrot.slane %v610_v43, 5  ;;  %v631_v39 = vor.u32 %v630_v27, %v626_v26  ;;  %v622_v45 = vrot.slane %v621_v32, 4  ;;  %v274_v27 = vld [vmem:[%s10819_s7 + $0xbc] sm:$0x1] }
  0x5d   : > { %v428_v2 = vrot.slane %v426_v52, 5  ;;  %v447_v52 = vshrl.u32 %v237_v42, 16 }
  0x5e   : > { %v425_v1 = vrot.slane %v423_v50, 4  ;;  %v632_v50 = vrot.slane %v631_v39, 4  ;;  %v627_v62 = vsel %vm10843_vm3, %v622_v45, %v626_v26  ;;  %v466_v26 = vshll.u32 %v11032_v12, 16 }
  0x5f   : > { %9265 = vmatmul.msk.bf16.gmra.mxu1 %vm727_vm0, %v10375_v0  ;;  %v608_v0 = vrot.slane %v607_v48, 4  ;;  %v445_v48 = vsel %vm10843_vm3, %v440_v37, %v444_v38  ;;  %v695_v15 = vunpack.c.l.b16 %v627_v62  ;;  %v658_v37 = vshll.u32 %v274_v27, 16  ;;  %v9446_v38 = vld [vmem:[%s10819_s7 + $0x10] sm:$0xf] }
  0x60   : > { %v429_v17 = vor.u32 %v428_v2, %v425_v1  ;;  %v680_v61 = vunpack.c.l.b16 %v445_v48  ;;  %v449_v1 = vrot.slane %v447_v52, 4  ;;  %v452_v2 = vrot.slane %v450_v53, 5  ;;  %v10378_v53 = vld [vmem:[%s10819_s7 + $0x54] sm:$0xff] }
  0x61   : > { %v613_v16 = vsel %vm10843_vm3, %v608_v0, %v612_v56  ;;  %v460_v56 = vshrl.u32 %v11015_v47, 16  ;;  %v1848_v45 = vshll.u32 %v9446_v38, 16  ;;  %v660_v52 = vrot.slane %v658_v37, 5 }
  0x62   : > { %v694_v30 = vunpack.c.l.b16 %v613_v16  ;;  %v430_v31 = vrot.slane %v429_v17, 4  ;;  %v453_v17 = vor.u32 %v452_v2, %v449_v1  ;;  %v2522_v1 = vrot.slane %v9446_v38, 5 }
  0x63   : > { %v462_v11 = vrot.slane %v460_v56, 4 }
  0x64   : > { %v435_v43 = vsel %vm10843_vm3, %v430_v31, %v434_v5  ;;  %v648_v5 = vshll.u32 %v254_v59, 16  ;;  %v10386_v31 = vld [vmem:[%s10819_s7 + $0xb4] sm:$0xff] }
  0x65   : > { %v679_v60 = vunpack.c.l.b16 %v435_v43 }
  0x66   : > { %v650_v23 = vrot.slane %v648_v5, 5  ;;  %v9447_v5 = vld [vmem:[%s10819_s7 + $0x14] sm:$0x1] }
  0x67   : > { %v705_v13 = vpack.c.b16 %v680_v61, %v679_v60  ;;  %v1850_v61 = vrot.slane %v1848_v45, 5 }
  0x69   : > { %9177 = vmatmul.msk.bf16.gmra.mxu0 %vm727_vm0, %v703_v25  ;;  %v273_v25 = vld [vmem:[%s10819_s7 + $0xb0] sm:$0x1] }
  0x6a   : > { %v634_v35 = vshll.u32 %v273_v25, 16  ;;  %v463_v25 = vor.u32 %v462_v11, %v458_v8  ;;  %v10413_v11 = vld [vmem:[%s14801_s1 + $0x50] sm:$0xff] }
  0x6b   : > { %9274 = vmatmul.msk.bf16.gmra.mxu3 %vm727_vm0, %v10384_v41  ;;  %v10385_v41 = vld [vmem:[%s10819_s7 + $0xa8] sm:$0xff] }
  0x6c   : > { %9185 = vmatmul.msk.bf16.gmra.mxu2 %vm727_vm0, %v711_v40  ;;  %v712_v40 = vpack.c.b16 %v694_v30, %v693_v29  ;;  %v636_v46 = vrot.slane %v634_v35, 5  ;;  %v9445_v29 = vld [vmem:[%s10819_s7 + $0xc] sm:$0xf]  ;;  %v655_v35 = vor.u32 %v654_v24, %v650_v23  ;;  %v464_v39 = vrot.slane %v463_v25, 4 }
  0x6d   : > { %v1842_v43 = vshll.u32 %v9445_v29, 16 }
  0x6e   : > { %v637_v0 = vsel %vm10843_vm3, %v632_v50, %v636_v46  ;;  %v1852_v46 = vshrl.u32 %v9446_v38, 16  ;;  %v656_v50 = vrot.slane %v655_v35, 4  ;;  %v9448_v38 = vld [vmem:[%s10819_s7 + $0x18] sm:$0xf] }
  0x6f   : > { %9266 = vmatmul.msk.bf16.gmra.mxu1 %vm727_vm0, %v10376_v58  ;;  %v253_v58 = vld [vmem:[%s10819_s7 + $0xb4] sm:$0xf]  ;;  %v696_v16 = vunpack.c.l.b16 %v637_v0  ;;  %v1844_v60 = vrot.slane %v1842_v43, 5  ;;  %v10414_v0 = vld [vmem:[%s14801_s1 + $0x58] sm:$0xff]  ;;  %v1150_v43 = vrot.slane %v10827_v10, 5 }
  0x70   : > { %v639_v3 = vshrl.u32 %v253_v58, 16  ;;  %v642_v4 = vshll.u32 %v253_v58, 16  ;;  %v1854_v62 = vrot.slane %v1852_v46, 4  ;;  %2751 = vmatpush.bf16.msrb.mxu1 %v10414_v0 }
  0x71   : > { %v713_v30 = vpack.c.b16 %v696_v16, %v695_v15  ;;  %v2524_v15 = vrot.slane %v2522_v1, 4  ;;  %v2525_v16 = vrot.slane %v9447_v5, 5 }
  0x72   : > { %v641_v19 = vrot.slane %v639_v3, 4  ;;  %v644_v22 = vrot.slane %v642_v4, 5  ;;  %v661_v4 = vsel %vm10843_vm3, %v656_v50, %v660_v52  ;;  %v1855_v25 = vor.u32 %v1854_v62, %v1850_v61 }
  0x73   : > { %v1866_v50 = vshll.u32 %v9448_v38, 16 }
  0x74   : > { %v645_v32 = vor.u32 %v644_v22, %v641_v19  ;;  %v698_v22 = vunpack.c.l.b16 %v661_v4  ;;  %2752 = vmatpush.bf16.msrb.mxu1 %v10413_v11  ;;  %v9522_v4 = vld [vmem:[%s10819_s7 + $0x18] sm:$0xe] }
  0x75   : > { %v9538_v6 = vrot.slane %v9522_v4, 9 }
  0x76   : > { %v646_v48 = vrot.slane %v645_v32, 4  ;;  %v1094_v32 = vld [vmem:[%s10819_s7] sm:$0xe] }
  0x77   : > { %v9277_v45 = vrot.slane %v1094_v32, 9 }
  0x78   : > { %v651_v3 = vsel %vm10843_vm3, %v646_v48, %v650_v23  ;;  %v1863_v48 = vshrl.u32 %v9448_v38, 16 }
  0x79   : > { %9178 = vmatmul.msk.bf16.gmra.mxu0 %vm727_vm0, %v704_v28  ;;  %v454_v28 = vrot.slane %v453_v17, 4  ;;  %v697_v19 = vunpack.c.l.b16 %v651_v3  ;;  %v1868_v3 = vrot.slane %v1866_v50, 5 }
  0x7b   : > { %9275 = vmatmul.msk.bf16.gmra.mxu3 %vm727_vm0, %v10385_v41  ;;  %v1839_v41 = vshrl.u32 %v9445_v29, 16  ;;  %v459_v42 = vsel %vm10843_vm3, %v454_v28, %v458_v8  ;;  %v9521_v8 = vld [vmem:[%s10819_s7 + $0xc] sm:$0xe]  ;;  %v2526_v28 = vsel %vm11069_vm6, %v2524_v15, %v2525_v16  ;;  %v1147_v29 = vrot.slane %v10824_v9, 5 }
  0x7c   : > { %9186 = vmatmul.msk.bf16.gmra.mxu2 %vm727_vm0, %v712_v40  ;;  %v468_v40 = vrot.slane %v466_v26, 5  ;;  %v681_v58 = vunpack.c.l.b16 %v459_v42  ;;  %v1858_v26 = vshll.u32 %v9447_v5, 16  ;;  %v2638_v37 = vunpack.c.l.b16 %v2526_v28  ;;  %v9449_v42 = vld [vmem:[%s10819_s7 + $0x1c] sm:$0xf] }
  0x7d   : > { %v1841_v59 = vrot.slane %v1839_v41, 4  ;;  %v1149_v46 = vrot.slane %v1147_v29, 4  ;;  %v1872_v52 = vshll.u32 %v9449_v42, 16  ;;  %v1876_v10 = vshrl.u32 %v9449_v42, 16 }
  0x7e   : > { %v469_v56 = vsel %vm10843_vm3, %v464_v39, %v468_v40  ;;  %v1856_v40 = vrot.slane %v1855_v25, 4  ;;  %v1860_v41 = vrot.slane %v1858_v26, 5  ;;  %v2529_v62 = vrot.slane %v9449_v42, 5 }
  0x7f   : > { %9267 = vmatmul.msk.bf16.gmra.mxu1 %vm727_vm0, %v10377_v54  ;;  %v10432_v54 = vld [vmem:[%s14801_s1 + $0x68] sm:$0xff]  ;;  %v682_v2 = vunpack.c.l.b16 %v469_v56  ;;  %v1845_v24 = vor.u32 %v1844_v60, %v1841_v59  ;;  %v1151_v59 = vsel %vm11069_vm6, %v1149_v46, %v1150_v43  ;;  %v1865_v60 = vrot.slane %v1863_v48, 4 }
  0x80   : > { %3050 = vmatpush.bf16.msra.mxu2 %v10432_v54  ;;  %v1861_v55 = vsel %vm10843_vm3, %v1856_v40, %v1860_v41  ;;  %v1878_v5 = vrot.slane %v1876_v10, 4  ;;  %v1263_v15 = vunpack.c.l.b16 %v1151_v59  ;;  %v2530_v26 = vsel %vm11069_vm6, %v9538_v6, %v2529_v62  ;;  %v9451_v40 = vld [vmem:[%s10819_s7 + $0x24] sm:$0xf]  ;;  %v9452_v43 = vld [vmem:[%s10819_s7 + $0x28] sm:$0xf] }
  0x81   : > { %v706_v17 = vpack.c.b16 %v682_v2, %v681_v58  ;;  %v1846_v39 = vrot.slane %v1845_v24, 4  ;;  %v1148_v58 = vsel %vm11069_vm6, %v9277_v45, %v1147_v29  ;;  %v9450_v2 = vld [vmem:[%s10819_s7 + $0x20] sm:$0x1]  ;;  %v2639_v38 = vunpack.c.l.b16 %v2530_v26 }
  0x82   : > { %v2532_v11 = vrot.slane %v9450_v2, 5  ;;  %v1882_v25 = vshll.u32 %v9450_v2, 16  ;;  %v1157_v48 = vrot.slane %v10854_v49, 5 }
  0x83   : > { %v1851_v54 = vsel %vm10843_vm3, %v1846_v39, %v1850_v61  ;;  %v1874_v61 = vrot.slane %v1872_v52, 5  ;;  %v1890_v52 = vshll.u32 %v9451_v40, 16 }
  0x84   : > { %v2227_v0 = vunpack.c.l.b16 %v1851_v54  ;;  %v1884_v42 = vrot.slane %v1882_v25, 5 }
  0x85   : > { %v1879_v24 = vor.u32 %v1878_v5, %v1874_v61  ;;  %v9453_v5 = vld [vmem:[%s10819_s7 + $0x2c] sm:$0x1]  ;;  %v1892_v6 = vrot.slane %v1890_v52, 5  ;;  %v9455_v52 = vld [vmem:[%s10819_s7 + $0x34] sm:$0xf] }
  0x87   : > { %v1880_v41 = vrot.slane %v1879_v24, 4 }
  0x89   : > { %9179 = vmatmul.msk.bf16.gmra.mxu0 %vm727_vm0, %v705_v13  ;;  %v9537_v13 = vrot.slane %v9521_v8, 9  ;;  %v2531_v8 = vrot.slane %v2529_v62, 4  ;;  %v1885_v10 = vsel %vm10843_vm3, %v1880_v41, %v1884_v42  ;;  %v1161_v41 = vrot.slane %v10869_v21, 5 }
  0x8a   : > { %v2230_v4 = vunpack.c.l.b16 %v1885_v10 }
  0x8b   : > { %9276 = vmatmul.msk.bf16.gmra.mxu3 %vm727_vm0, %v10386_v31  ;;  %v2523_v27 = vsel %vm11069_vm6, %v9537_v13, %v2522_v1  ;;  %v10393_v31 = vld [vmem:[%s10819_s7 + $0xc] sm:$0xff]  ;;  %v2228_v1 = vunpack.c.l.b16 %v1861_v55  ;;  %v1262_v13 = vunpack.c.l.b16 %v1148_v58  ;;  %v1900_v58 = vshrl.u32 %v9452_v43, 16 }
  0x8c   : > { %9187 = vmatmul.msk.bf16.gmra.mxu2 %vm727_vm0, %v713_v30  ;;  %v714_v30 = vpack.c.b16 %v698_v22, %v697_v19  ;;  %v2637_v35 = vunpack.c.l.b16 %v2523_v27  ;;  %v2533_v27 = vsel %vm11069_vm6, %v2531_v8, %v2532_v11  ;;  %v9523_v11 = vld [vmem:[%s10819_s7 + $0x24] sm:$0xe] }
  0x8d   : > { %v2259_v16 = vpack.c.b16 %v2228_v1, %v2227_v0  ;;  %v1294_v32 = vpack.c.b16 %v1263_v15, %v1262_v13  ;;  %v2640_v39 = vunpack.c.l.b16 %v2533_v27  ;;  %v1902_v13 = vrot.slane %v1900_v58, 4 }
  0x8e   : > { %v2669_v9 = vpack.c.b16 %v2638_v37, %v2637_v35  ;;  %v10394_v35 = vld [vmem:[%s10819_s7 + $0x18] sm:$0xff]  ;;  %v9539_v15 = vrot.slane %v9523_v11, 9 }
  0x8f   : > { %9268 = vmatmul.msk.bf16.gmra.mxu1 %vm727_vm0, %v10378_v53  ;;  %v2670_v50 = vpack.c.b16 %v2640_v39, %v2639_v38 }
  0x99   : > { %9180 = vmatmul.msk.bf16.gmra.mxu0 %vm727_vm0, %v706_v17  ;;  %v1869_v17 = vor.u32 %v1868_v3, %v1865_v60  ;;  %v2536_v3 = vrot.slane %v9452_v43, 5 }
  0x9b   : > { %9429 = vmatmul.msk.bf16.vlgmr.msrb.gmra.mxu3 %vm727_vm0, %v10393_v31  ;;  %v1154_v31 = vrot.slane %v10839_v33, 5  ;;  %v1870_v37 = vrot.slane %v1869_v17, 4  ;;  %v2539_v17 = vrot.slane %v9453_v5, 5 }
  0x9c   : > { %9188 = vmatmul.msk.bf16.gmra.mxu2 %vm727_vm0, %v714_v30  ;;  %v1014_v53 = vpop.f32.mrf.mxu1  ;;  %v1095_v30 = vld [vmem:[%s10819_s7 + $0xc] sm:$0xe] }
  0x9d   : > { %v9278_v45 = vrot.slane %v1095_v30, 9  ;;  %v1156_v46 = vrot.slane %v1154_v31, 4  ;;  %v1875_v33 = vsel %vm10843_vm3, %v1870_v37, %v1874_v61  ;;  %v1906_v30 = vshll.u32 %v9453_v5, 16 }
  0x9e   : > { %v1054_v56 = vpop.f32.mrf.mxu3  ;;  %v2229_v1 = vunpack.c.l.b16 %v1875_v33 }
  0x9f   : > { %9565 = vmatmul.msk.bf16.vlgmr.msrb.gmra.mxu1 %vm727_vm0, %v2669_v9  ;;  %v1887_v9 = vshrl.u32 %v9451_v40, 16  ;;  %v1155_v59 = vsel %vm11069_vm6, %v9278_v45, %v1154_v31  ;;  %v1158_v0 = vsel %vm11069_vm6, %v1156_v46, %v1157_v48  ;;  %v2537_v31 = vsel %vm11069_vm6, %v9539_v15, %v2536_v3  ;;  %v1096_v40 = vld [vmem:[%s10819_s7 + $0x18] sm:$0xe] }
  0xa0   : > { %v2260_v24 = vpack.c.b16 %v2230_v4, %v2229_v1  ;;  %v2641_v46 = vunpack.c.l.b16 %v2537_v31 }
  0xa1   : > { %v1889_v2 = vrot.slane %v1887_v9, 4  ;;  %v9454_v9 = vld [vmem:[%s10819_s7 + $0x30] sm:$0xf] }
  0xa2   : > { %v1911_v10 = vshrl.u32 %v9454_v9, 16  ;;  %v1914_v58 = vshll.u32 %v9454_v9, 16 }
  0xa3   : > { %v1893_v25 = vor.u32 %v1892_v6, %v1889_v2  ;;  %v1924_v2 = vshrl.u32 %v9455_v52, 16 }
  0xa4   : > { %v1016_v22 = vpop.f32.mrf.mxu1  ;;  %v1913_v11 = vrot.slane %v1911_v10, 4 }
  0xa5   : > { %v1894_v45 = vrot.slane %v1893_v25, 4  ;;  %v1926_v25 = vrot.slane %v1924_v2, 4  ;;  %v1171_v2 = vrot.slane %v10915_v36, 5 }
  0xa6   : > { %v785_v19 = vpop.f32.mrf.mxu0  ;;  %v1056_v29 = vpop.f32.mrf.mxu3 }
  0xa7   : > { %v11101_v28 = vadd.f32 %v1014_v53, %v785_v19  ;;  %v1896_v53 = vshll.u32 %v9452_v43, 16  ;;  %v1264_v19 = vunpack.c.l.b16 %v1155_v59  ;;  %v10395_v43 = vld [vmem:[%s10819_s7 + $0x24] sm:$0xff]  ;;  %v1920_v59 = vshll.u32 %v9455_v52, 16 }
  0xa9   : > { %9505 = vmatmul.msk.bf16.vlgmr.msrb.gmra.mxu0 %vm727_vm0, %v2259_v16  ;;  %v1898_v8 = vrot.slane %v1896_v53, 5  ;;  %v2538_v16 = vrot.slane %v2536_v3, 4  ;;  %v9279_v53 = vrot.slane %v1096_v40, 9 }
  0xab   : > { %9430 = vmatmul.msk.bf16.gmra.mxu3 %vm727_vm0, %v10394_v35  ;;  %v1903_v27 = vor.u32 %v1902_v13, %v1898_v8  ;;  %v1899_v21 = vsel %vm10843_vm3, %v1894_v45, %v1898_v8  ;;  %v1162_v3 = vsel %vm11069_vm6, %v9279_v53, %v1161_v41  ;;  %v2543_v13 = vrot.slane %v9455_v52, 5 }
  0xac   : > { %9305 = vmatmul.msk.bf16.vlgmr.msrb.gmra.mxu2 %vm727_vm0, %v1294_v32  ;;  %v1019_v55 = vpop.f32.mrf.mxu1  ;;  %v2540_v32 = vsel %vm11069_vm6, %v2538_v16, %v2539_v17  ;;  %v2231_v8 = vunpack.c.l.b16 %v1899_v21  ;;  %v9456_v17 = vld [vmem:[%s10819_s7 + $0x38] sm:$0x1]  ;;  %v1168_v52 = vrot.slane %v10896_v7, 5 }
  0xad   : > { %v2642_v48 = vunpack.c.l.b16 %v2540_v32  ;;  %v1904_v33 = vrot.slane %v1903_v27, 4  ;;  %v2546_v27 = vrot.slane %v9456_v17, 5 }
  0xae   : > { %v787_v54 = vpop.f32.mrf.mxu0  ;;  %v11120_v62 = vpop.f32.mrf.mxu3 }
  0xaf   : > { %v11116_v49 = vadd.f32 %v1016_v22, %v787_v54  ;;  %v825_v60 = vpop.f32.mrf.mxu2  ;;  %9566 = vmatmul.msk.bf16.gmra.mxu1 %vm727_vm0, %v2670_v50  ;;  %v1265_v22 = vunpack.c.l.b16 %v1158_v0  ;;  %v1908_v50 = vrot.slane %v1906_v30, 5  ;;  %v1163_v54 = vrot.slane %v1161_v41, 4 }
  0xb0   : > { %v11124_v61 = vadd.f32 %v1054_v56, %v825_v60  ;;  %v1266_v30 = vunpack.c.l.b16 %v1162_v3  ;;  %v1930_v41 = vshll.u32 %v9456_v17, 16 }
  0xb1   : > { %v1295_v39 = vpack.c.b16 %v1265_v22, %v1264_v19  ;;  %v1909_v1 = vsel %vm10843_vm3, %v1904_v33, %v1908_v50  ;;  %v1916_v19 = vrot.slane %v1914_v58, 5  ;;  %v1922_v22 = vrot.slane %v1920_v59, 5  ;;  %v1097_v50 = vld [vmem:[%s10819_s7 + $0x24] sm:$0xe] }
  0xb2   : > { %v2232_v16 = vunpack.c.l.b16 %v1909_v1  ;;  %v1932_v59 = vrot.slane %v1930_v41, 5  ;;  %v1170_v1 = vrot.slane %v1168_v52, 4 }
  0xb3   : > { %v1927_v40 = vor.u32 %v1926_v25, %v1922_v22 }
  0xb4   : > { %v1021_v56 = vpop.f32.mrf.mxu1  ;;  %v2261_v32 = vpack.c.b16 %v2232_v16, %v2231_v8 }
  0xb5   : > { %v1928_v58 = vrot.slane %v1927_v40, 4 }
  0xb6   : > { %v790_v26 = vpop.f32.mrf.mxu0  ;;  %v11135_v38 = vpop.f32.mrf.mxu3 }
  0xb7   : > { %v11133_v35 = vadd.f32 %v1019_v55, %v790_v26  ;;  %v827_v37 = vpop.f32.mrf.mxu2  ;;  %v1164_v55 = vrot.slane %v10888_v51, 5 }
  0xb8   : > { %v11139_v42 = vadd.f32 %v1056_v29, %v827_v37  ;;  %v2671_v29 = vpack.c.b16 %v2642_v48, %v2641_v46  ;;  %v1917_v37 = vor.u32 %v1916_v19, %v1913_v11 }
  0xb9   : > { %9506 = vmatmul.msk.bf16.gmra.mxu0 %vm727_vm0, %v2260_v24  ;;  %v1165_v6 = vsel %vm11069_vm6, %v1163_v54, %v1164_v55  ;;  %v9524_v24 = vld [vmem:[%s10819_s7 + $0x30] sm:$0xe] }
  0xba   : > { %v9540_v26 = vrot.slane %v9524_v24, 9  ;;  %v1267_v31 = vunpack.c.l.b16 %v1165_v6  ;;  %v10396_v54 = vld [vmem:[%s10819_s7 + $0x30] sm:$0xff]  ;;  %v1918_v55 = vrot.slane %v1917_v37, 4 }
  0xbb   : > { %9431 = vmatmul.msk.bf16.gmra.mxu3 %vm727_vm0, %v10395_v43 }
  0xbc   : > { %9306 = vmatmul.msk.bf16.gmra.mxu2 %vm727_vm0, %v1295_v39  ;;  %v1024_v0 = vpop.f32.mrf.mxu1  ;;  %v2544_v43 = vsel %vm11069_vm6, %v9540_v26, %v2543_v13  ;;  %v1296_v33 = vpack.c.b16 %v1267_v31, %v1266_v30  ;;  %v1923_v7 = vsel %vm10843_vm3, %v1918_v55, %v1922_v22  ;;  %v1172_v22 = vsel %vm11069_vm6, %v1170_v1, %v1171_v2  ;;  %v9459_v31 = vld [vmem:[%s10819_s7 + $0x44] sm:$0x1] }
  0xbd   : > { %v2643_v10 = vunpack.c.l.b16 %v2544_v43  ;;  %v2233_v25 = vunpack.c.l.b16 %v1923_v7  ;;  %v2553_v43 = vrot.slane %v9459_v31, 5  ;;  %v1954_v55 = vshll.u32 %v9459_v31, 16 }
  0xbe   : > { %v792_v60 = vpop.f32.mrf.mxu0  ;;  %v11156_v5 = vpop.f32.mrf.mxu3  ;;  %v1175_v1 = vrot.slane %v10923_v63, 5 }
  0xbf   : > { %v11152_v51 = vadd.f32 %v1021_v56, %v792_v60  ;;  %v830_v4 = vpop.f32.mrf.mxu2  ;;  %9567 = vmatmul.msk.bf16.gmra.mxu1 %vm727_vm0, %v2671_v29  ;;  %v2545_v56 = vrot.slane %v2543_v13, 4  ;;  %v9457_v29 = vld [vmem:[%s10819_s7 + $0x3c] sm:$0xf]  ;;  %v9458_v60 = vld [vmem:[%s10819_s7 + $0x40] sm:$0xf]  ;;  %v1933_v13 = vsel %vm10843_vm3, %v1928_v58, %v1932_v59 }
  0xc0   : > { %v11161_v15 = vadd.f32 %v11120_v62, %v830_v4  ;;  %v1935_v3 = vshrl.u32 %v9457_v29, 16  ;;  %v1938_v4 = vshll.u32 %v9457_v29, 16  ;;  %v1944_v6 = vshll.u32 %v9458_v60, 16 }
  0xc1   : > { %v2547_v45 = vsel %vm11069_vm6, %v2545_v56, %v2546_v27  ;;  %v1948_v16 = vshrl.u32 %v9458_v60, 16  ;;  %v2550_v56 = vrot.slane %v9458_v60, 5  ;;  %v2234_v30 = vunpack.c.l.b16 %v1933_v13  ;;  %v9461_v13 = vld [vmem:[%s10819_s7 + $0x4c] sm:$0xf] }
  0xc2   : > { %v2644_v21 = vunpack.c.l.b16 %v2547_v45  ;;  %v1937_v26 = vrot.slane %v1935_v3, 4  ;;  %v1946_v37 = vrot.slane %v1944_v6, 5  ;;  %v10397_v3 = vld [vmem:[%s10819_s7 + $0x3c] sm:$0xff]  ;;  %v9460_v6 = vld [vmem:[%s10819_s7 + $0x48] sm:$0xf] }
  0xc3   : > { %v2552_v41 = vrot.slane %v2550_v56, 4 }
  0xc4   : > { %v1026_v62 = vpop.f32.mrf.mxu1 }
  0xc6   : > { %v795_v39 = vpop.f32.mrf.mxu0  ;;  %v11172_v9 = vpop.f32.mrf.mxu3 }
  0xc7   : > { %v11170_v46 = vadd.f32 %v1024_v0, %v795_v39  ;;  %v832_v48 = vpop.f32.mrf.mxu2  ;;  %v9280_v0 = vrot.slane %v1097_v50, 9  ;;  %v9525_v39 = vld [vmem:[%s10819_s7 + $0x3c] sm:$0xe] }
  0xc8   : > { %v11177_v53 = vadd.f32 %v11135_v38, %v832_v48  ;;  %v2672_v38 = vpack.c.b16 %v2644_v21, %v2643_v10  ;;  %v9541_v40 = vrot.slane %v9525_v39, 9  ;;  %v1269_v48 = vunpack.c.l.b16 %v1172_v22 }
  0xc9   : > { %9507 = vmatmul.msk.bf16.gmra.mxu0 %vm727_vm0, %v2261_v32  ;;  %v1169_v17 = vsel %vm11069_vm6, %v9280_v0, %v1168_v52  ;;  %v1940_v32 = vrot.slane %v1938_v4, 5  ;;  %v2554_v21 = vsel %vm11069_vm6, %v2552_v41, %v2553_v43  ;;  %v1098_v0 = vld [vmem:[%s10819_s7 + $0x30] sm:$0xe]  ;;  %v1959_v22 = vshrl.u32 %v9460_v6, 16 }
  0xca   : > { %v1268_v45 = vunpack.c.l.b16 %v1169_v17  ;;  %v2551_v10 = vsel %vm11069_vm6, %v9541_v40, %v2550_v56  ;;  %v2646_v4 = vunpack.c.l.b16 %v2554_v21  ;;  %v1178_v17 = vrot.slane %v10946_v20, 5 }
  0xcb   : > { %9432 = vmatmul.msk.bf16.gmra.mxu3 %vm727_vm0, %v10396_v54  ;;  %v1941_v50 = vor.u32 %v1940_v32, %v1937_v26  ;;  %v1968_v26 = vshll.u32 %v9461_v13, 16  ;;  %v1972_v20 = vshrl.u32 %v9461_v13, 16  ;;  %v1961_v43 = vrot.slane %v1959_v22, 4 }
  0xcc   : > { %9307 = vmatmul.msk.bf16.gmra.mxu2 %vm727_vm0, %v1296_v33  ;;  %v1029_v11 = vpop.f32.mrf.mxu1  ;;  %v2262_v33 = vpack.c.b16 %v2234_v30, %v2233_v25  ;;  %v1297_v60 = vpack.c.b16 %v1269_v48, %v1268_v45  ;;  %v1962_v25 = vshll.u32 %v9460_v6, 16  ;;  %v2557_v45 = vrot.slane %v9461_v13, 5 }
  0xcd   : > { %v1942_v7 = vrot.slane %v1941_v50, 4  ;;  %v9462_v50 = vld [vmem:[%s10819_s7 + $0x50] sm:$0x1]  ;;  %v1182_v22 = vrot.slane %v10959_v57, 5 }
  0xce   : > { %v797_v8 = vpop.f32.mrf.mxu0  ;;  %v11194_v24 = vpop.f32.mrf.mxu3  ;;  %v2559_v21 = vrot.slane %v2557_v45, 4 }
  0xcf   : > { %v11190_v36 = vadd.f32 %v1026_v62, %v797_v8  ;;  %v835_v19 = vpop.f32.mrf.mxu2  ;;  %9568 = vmatmul.msk.bf16.gmra.mxu1 %vm727_vm0, %v2672_v38  ;;  %v1950_v62 = vrot.slane %v1948_v16, 4  ;;  %v2645_v38 = vunpack.c.l.b16 %v2551_v10  ;;  %v9281_v16 = vrot.slane %v1098_v0, 9 }
  0xd0   : > { %v11199_v27 = vadd.f32 %v11156_v5, %v835_v19  ;;  %v1177_v19 = vrot.slane %v1175_v1, 4  ;;  %v1947_v63 = vsel %vm10843_vm3, %v1942_v7, %v1946_v37 }
  0xd1   : > { %v1951_v54 = vor.u32 %v1950_v62, %v1946_v37  ;;  %v1176_v39 = vsel %vm11069_vm6, %v9281_v16, %v1175_v1  ;;  %v2235_v41 = vunpack.c.l.b16 %v1947_v63 }
  0xd2   : > { %v1179_v37 = vsel %vm11069_vm6, %v1177_v19, %v1178_v17  ;;  %v1099_v19 = vld [vmem:[%s10819_s7 + $0x3c] sm:$0xe] }
  0xd3   : > { %v1952_v8 = vrot.slane %v1951_v54, 4  ;;  %v9526_v54 = vld [vmem:[%s10819_s7 + $0x48] sm:$0xe]  ;;  %v1271_v0 = vunpack.c.l.b16 %v1179_v37  ;;  %v1185_v37 = vrot.slane %v10978_v18, 5 }
  0xd4   : > { %v1031_v5 = vpop.f32.mrf.mxu1  ;;  %v9542_v10 = vrot.slane %v9526_v54, 9 }
  0xd6   : > { %v800_v52 = vpop.f32.mrf.mxu0  ;;  %v11210_v59 = vpop.f32.mrf.mxu3  ;;  %v2558_v6 = vsel %vm11069_vm6, %v9542_v10, %v2557_v45 }
  0xd7   : > { %v11208_v29 = vadd.f32 %v1029_v11, %v800_v52  ;;  %v837_v58 = vpop.f32.mrf.mxu2  ;;  %v1956_v11 = vrot.slane %v1954_v55, 5  ;;  %v1964_v52 = vrot.slane %v1962_v25, 5  ;;  %v1974_v55 = vrot.slane %v1972_v20, 4 }
  0xd8   : > { %v11215_v2 = vadd.f32 %v11172_v9, %v837_v58  ;;  %v2673_v9 = vpack.c.b16 %v2646_v4, %v2645_v38  ;;  %v2560_v58 = vrot.slane %v9462_v50, 5  ;;  %v1978_v4 = vshll.u32 %v9462_v50, 16 }
  0xd9   : > { %9508 = vmatmul.msk.bf16.gmra.mxu0 %vm727_vm0, %v2262_v33  ;;  %v1957_v31 = vsel %vm10843_vm3, %v1952_v8, %v1956_v11 }
  0xda   : > { %v2236_v33 = vunpack.c.l.b16 %v1957_v31  ;;  %v2561_v8 = vsel %vm11069_vm6, %v2559_v21, %v2560_v58  ;;  %v9463_v31 = vld [vmem:[%s10819_s7 + $0x54] sm:$0xf] }
  0xdb   : > { %9433 = vmatmul.msk.bf16.gmra.mxu3 %vm727_vm0, %v10397_v3  ;;  %v1965_v3 = vor.u32 %v1964_v52, %v1961_v43  ;;  %v1983_v43 = vshrl.u32 %v9463_v31, 16  ;;  %v1986_v45 = vshll.u32 %v9463_v31, 16 }
  0xdc   : > { %9308 = vmatmul.msk.bf16.gmra.mxu2 %vm727_vm0, %v1297_v60  ;;  %v1034_v30 = vpop.f32.mrf.mxu1  ;;  %v1270_v60 = vunpack.c.l.b16 %v1176_v39  ;;  %v2263_v1 = vpack.c.b16 %v2236_v33, %v2235_v41  ;;  %v9464_v39 = vld [vmem:[%s10819_s7 + $0x58] sm:$0xf]  ;;  %v1184_v41 = vrot.slane %v1182_v22, 4 }
  0xdd   : > { %v1966_v25 = vrot.slane %v1965_v3, 4  ;;  %v1992_v33 = vshll.u32 %v9464_v39, 16  ;;  %v1996_v18 = vshrl.u32 %v9464_v39, 16 }
  0xde   : > { %v802_v56 = vpop.f32.mrf.mxu0  ;;  %v11232_v40 = vpop.f32.mrf.mxu3  ;;  %v1298_v17 = vpack.c.b16 %v1271_v0, %v1270_v60  ;;  %v1985_v0 = vrot.slane %v1983_v43, 4 }
  0xdf   : > { %v11228_v32 = vadd.f32 %v1031_v5, %v802_v56  ;;  %v840_v62 = vpop.f32.mrf.mxu2  ;;  %9569 = vmatmul.msk.bf16.gmra.mxu1 %vm727_vm0, %v2673_v9  ;;  %v1970_v5 = vrot.slane %v1968_v26, 5  ;;  %v10398_v9 = vld [vmem:[%s10819_s7 + $0x48] sm:$0xff]  ;;  %v2647_v26 = vunpack.c.l.b16 %v2558_v6  ;;  %v2648_v56 = vunpack.c.l.b16 %v2561_v8  ;;  %v9527_v6 = vld [vmem:[%s10819_s7 + $0x54] sm:$0xe] }
  0xe0   : > { %v11237_v48 = vadd.f32 %v11194_v24, %v840_v62  ;;  %v9282_v62 = vrot.slane %v1099_v19, 9  ;;  %v1998_v8 = vrot.slane %v1996_v18, 4 }
  0xe1   : > { %v1975_v38 = vor.u32 %v1974_v55, %v1970_v5  ;;  %v1971_v57 = vsel %vm10843_vm3, %v1966_v25, %v1970_v5  ;;  %v1186_v5 = vsel %vm11069_vm6, %v1184_v41, %v1185_v37 }
  0xe2   : > { %v1183_v10 = vsel %vm11069_vm6, %v9282_v62, %v1182_v22  ;;  %v2237_v60 = vunpack.c.l.b16 %v1971_v57  ;;  %v1100_v57 = vld [vmem:[%s10819_s7 + $0x48] sm:$0xe] }
  0xe3   : > { %v1976_v20 = vrot.slane %v1975_v38, 4  ;;  %v1988_v38 = vrot.slane %v1986_v45, 5  ;;  %v1272_v22 = vunpack.c.l.b16 %v1183_v10  ;;  %v9466_v10 = vld [vmem:[%s10819_s7 + $0x60] sm:$0xf] }
  0xe4   : > { %v1036_v24 = vpop.f32.mrf.mxu1 }
  0xe6   : > { %v805_v7 = vpop.f32.mrf.mxu0  ;;  %v11248_v16 = vpop.f32.mrf.mxu3 }
  0xe7   : > { %v11246_v11 = vadd.f32 %v1034_v30, %v805_v7  ;;  %v842_v13 = vpop.f32.mrf.mxu2  ;;  %v1980_v30 = vrot.slane %v1978_v4, 5  ;;  %v1994_v4 = vrot.slane %v1992_v33, 5  ;;  %v10399_v33 = vld [vmem:[%s10819_s7 + $0x54] sm:$0xff] }
  0xe8   : > { %v11253_v63 = vadd.f32 %v11210_v59, %v842_v13  ;;  %v2674_v59 = vpack.c.b16 %v2648_v56, %v2647_v26  ;;  %v9543_v13 = vrot.slane %v9527_v6, 9  ;;  %v1989_v26 = vor.u32 %v1988_v38, %v1985_v0 }
  0xe9   : > { %9509 = vmatmul.msk.bf16.gmra.mxu0 %vm727_vm0, %v2263_v1  ;;  %v1981_v54 = vsel %vm10843_vm3, %v1976_v20, %v1980_v30  ;;  %v2564_v1 = vrot.slane %v9464_v39, 5  ;;  %v1999_v31 = vor.u32 %v1998_v8, %v1994_v4  ;;  %v1192_v0 = vrot.slane %v11001_v14, 5 }
  0xea   : > { %v2238_v7 = vunpack.c.l.b16 %v1981_v54 }
  0xeb   : > { %9434 = vmatmul.msk.bf16.gmra.mxu3 %vm727_vm0, %v10398_v9  ;;  %v1273_v9 = vunpack.c.l.b16 %v1186_v5  ;;  %v2565_v30 = vsel %vm11069_vm6, %v9543_v13, %v2564_v1  ;;  %v9467_v5 = vld [vmem:[%s10819_s7 + $0x64] sm:$0xf] }
  0xec   : > { %9309 = vmatmul.msk.bf16.gmra.mxu2 %vm727_vm0, %v1298_v17  ;;  %v1039_v52 = vpop.f32.mrf.mxu1  ;;  %v2566_v17 = vrot.slane %v2564_v1, 4  ;;  %v2264_v25 = vpack.c.b16 %v2238_v7, %v2237_v60  ;;  %v2649_v54 = vunpack.c.l.b16 %v2565_v30  ;;  %v9283_v60 = vrot.slane %v1100_v57, 9 }
  0xed   : > { %v1299_v43 = vpack.c.b16 %v1273_v9, %v1272_v22  ;;  %v2007_v7 = vshrl.u32 %v9466_v10, 16  ;;  %v2016_v38 = vshll.u32 %v9467_v5, 16  ;;  %v2020_v14 = vshrl.u32 %v9467_v5, 16 }
  0xee   : > { %v807_v50 = vpop.f32.mrf.mxu0  ;;  %v11270_v58 = vpop.f32.mrf.mxu3 }
  0xef   : > { %v11266_v55 = vadd.f32 %v1036_v24, %v807_v50  ;;  %v845_v21 = vpop.f32.mrf.mxu2  ;;  %9570 = vmatmul.msk.bf16.gmra.mxu1 %vm727_vm0, %v2674_v59  ;;  %v9465_v24 = vld [vmem:[%s10819_s7 + $0x5c] sm:$0x1]  ;;  %v1189_v59 = vrot.slane %v10986_v44, 5  ;;  %v1990_v50 = vrot.slane %v1989_v26, 4  ;;  %v2009_v26 = vrot.slane %v2007_v7, 4 }
  0xf0   : > { %v11275_v3 = vadd.f32 %v11232_v40, %v845_v21  ;;  %v2567_v19 = vrot.slane %v9465_v24, 5  ;;  %v2002_v20 = vshll.u32 %v9465_v24, 16  ;;  %v2000_v21 = vrot.slane %v1999_v31, 4 }
  0xf1   : > { %v1191_v1 = vrot.slane %v1189_v59, 4  ;;  %v1995_v44 = vsel %vm10843_vm3, %v1990_v50, %v1994_v4  ;;  %v2010_v24 = vshll.u32 %v9466_v10, 16 }
  0xf2   : > { %v2568_v39 = vsel %vm11069_vm6, %v2566_v17, %v2567_v19  ;;  %v1190_v19 = vsel %vm11069_vm6, %v9283_v60, %v1189_v59 }
  0xf3   : > { %v2650_v18 = vunpack.c.l.b16 %v2568_v39  ;;  %v1193_v4 = vsel %vm11069_vm6, %v1191_v1, %v1192_v0  ;;  %v2012_v30 = vrot.slane %v2010_v24, 5  ;;  %v2018_v39 = vrot.slane %v2016_v38, 5  ;;  %v1101_v24 = vld [vmem:[%s10819_s7 + $0x54] sm:$0xe] }
  0xf4   : > { %v1041_v40 = vpop.f32.mrf.mxu1  ;;  %v1274_v50 = vunpack.c.l.b16 %v1190_v19  ;;  %v1196_v38 = vrot.slane %v11015_v47, 5 }
  0xf5   : > { %v2013_v10 = vor.u32 %v2012_v30, %v2009_v26  ;;  %v9470_v26 = vld [vmem:[%s10819_s7 + $0x70] sm:$0xf] }
  0xf6   : > { %v810_v56 = vpop.f32.mrf.mxu0  ;;  %v11286_v41 = vpop.f32.mrf.mxu3 }
  0xf7   : > { %v11284_v62 = vadd.f32 %v1039_v52, %v810_v56  ;;  %v847_v37 = vpop.f32.mrf.mxu2  ;;  %v2004_v52 = vrot.slane %v2002_v20, 5  ;;  %v2571_v56 = vrot.slane %v9467_v5, 5 }
  0xf8   : > { %v11291_v45 = vadd.f32 %v11248_v16, %v847_v37  ;;  %v2675_v16 = vpack.c.b16 %v2650_v18, %v2649_v54  ;;  %v9528_v37 = vld [vmem:[%s10819_s7 + $0x60] sm:$0xe]  ;;  %v1275_v54 = vunpack.c.l.b16 %v1193_v4  ;;  %v9469_v4 = vld [vmem:[%s10819_s7 + $0x6c] sm:$0xf] }
  0xf9   : > { %9510 = vmatmul.msk.bf16.gmra.mxu0 %vm727_vm0, %v2264_v25  ;;  %v2005_v13 = vsel %vm10843_vm3, %v2000_v21, %v2004_v52  ;;  %v2239_v25 = vunpack.c.l.b16 %v1995_v44  ;;  %v9544_v57 = vrot.slane %v9528_v37, 9  ;;  %v2573_v59 = vrot.slane %v2571_v56, 4 }
  0xfa   : > { %v2240_v20 = vunpack.c.l.b16 %v2005_v13  ;;  %v10400_v13 = vld [vmem:[%s10819_s7 + $0x60] sm:$0xff]  ;;  %v2031_v30 = vshrl.u32 %v9469_v4, 16  ;;  %v2034_v37 = vshll.u32 %v9469_v4, 16 }
  0xfb   : > { %9435 = vmatmul.msk.bf16.gmra.mxu3 %vm727_vm0, %v10399_v33  ;;  %v2572_v60 = vsel %vm11069_vm6, %v9544_v57, %v2571_v56  ;;  %v9284_v56 = vrot.slane %v1101_v24, 9  ;;  %v10431_v57 = vld [vmem:[%s14801_s1 + $0x60] sm:$0xff] }
  0xfc   : > { %9310 = vmatmul.msk.bf16.gmra.mxu2 %vm727_vm0, %v1299_v43  ;;  %v1044_v8 = vpop.f32.mrf.mxu1  ;;  %v2022_v43 = vrot.slane %v2020_v14, 4  ;;  %v2265_v18 = vpack.c.b16 %v2240_v20, %v2239_v25  ;;  %v2014_v14 = vrot.slane %v2013_v10, 4  ;;  %v2651_v19 = vunpack.c.l.b16 %v2572_v60 }
  0xfd   : > { %v1199_v20 = vrot.slane %v11032_v12, 5  ;;  %v10433_v12 = vld [vmem:[%s14801_s1 + $0x70] sm:$0xff]  ;;  %3051 = vmatpush.bf16.msra.mxu2 %v10431_v57  ;;  %v2033_v60 = vrot.slane %v2031_v30, 4  ;;  %v2036_v24 = vrot.slane %v2034_v37, 5 }
  0xfe   : > { %v812_v6 = vpop.f32.mrf.mxu0  ;;  %v11308_v9 = vpop.f32.mrf.mxu3  ;;  %v2023_v52 = vor.u32 %v2022_v43, %v2018_v39  ;;  %v2019_v47 = vsel %vm10843_vm3, %v2014_v14, %v2018_v39  ;;  %v2040_v43 = vshll.u32 %v9470_v26, 16  ;;  %v1197_v39 = vsel %vm11069_vm6, %v9284_v56, %v1196_v38  ;;  %3717 = vmatpush.bf16.msra.mxu3 %v10433_v12 }
  0xff   : > { %v11304_v17 = vadd.f32 %v1041_v40, %v812_v6  ;;  %v850_v22 = vpop.f32.mrf.mxu2  ;;  %9571 = vmatmul.msk.bf16.gmra.mxu1 %vm727_vm0, %v2675_v16  ;;  %v9468_v40 = vld [vmem:[%s10819_s7 + $0x68] sm:$0x1]  ;;  %v1300_v16 = vpack.c.b16 %v1275_v54, %v1274_v50  ;;  %v2044_v54 = vshrl.u32 %v9470_v26, 16 }
 0x100   : > { %v11313_v31 = vadd.f32 %v11270_v58, %v850_v22  ;;  %v2574_v33 = vrot.slane %v9468_v40, 5  ;;  %v2026_v5 = vshll.u32 %v9468_v40, 16  ;;  %v2024_v25 = vrot.slane %v2023_v52, 4 }
 0x101   : > { %v1198_v40 = vrot.slane %v1196_v38, 4  ;;  %v2042_v38 = vrot.slane %v2040_v43, 5  ;;  %v2046_v14 = vrot.slane %v2044_v54, 4  ;;  %v10435_v43 = vld [vmem:[%s14801_s1 + $0x80] sm:$0xff] }
 0x102   : > { %14814 = vst [vmem:[#allocation6_spill] sm:$0xff] %v11313_v31  ;;  %v2575_v0 = vsel %vm11069_vm6, %v2573_v59, %v2574_v33  ;;  %v10604_v54 = vld [vmem:[%s10819_s7 + $0x64] sm:$0xf]  ;;  %4127 = vmatpush.bf16.msra.mxu0 %v10435_v43 }
 0x103   : > { %v2652_v22 = vunpack.c.l.b16 %v2575_v0  ;;  %v1200_v52 = vsel %vm11069_vm6, %v1198_v40, %v1199_v20  ;;  %v2578_v0 = vrot.slane %v9470_v26, 5  ;;  %v2037_v26 = vor.u32 %v2036_v24, %v2033_v60  ;;  %v9473_v24 = vld [vmem:[%s10819_s7 + $0x7c] sm:$0xf] }
 0x104   : > { %v1046_v58 = vpop.f32.mrf.mxu1  ;;  %v2047_v40 = vor.u32 %v2046_v14, %v2042_v38  ;;  %v10605_v14 = vld [vmem:[%s10819_s7 + $0x68] sm:$0x1] }
 0x106   : > { %v815_v21 = vpop.f32.mrf.mxu0  ;;  %v11324_v44 = vpop.f32.mrf.mxu3 }
 0x107   : > { %v11322_v1 = vadd.f32 %v1044_v8, %v815_v21  ;;  %v852_v7 = vpop.f32.mrf.mxu2  ;;  %v2028_v8 = vrot.slane %v2026_v5, 5  ;;  %v2241_v5 = vunpack.c.l.b16 %v2019_v47 }
 0x108   : > { %v11329_v6 = vadd.f32 %v11286_v41, %v852_v7  ;;  %v2676_v41 = vpack.c.b16 %v2652_v22, %v2651_v19  ;;  %v2580_v22 = vrot.slane %v2578_v0, 4 }
 0x109   : > { %9511 = vmatmul.msk.bf16.gmra.mxu0 %vm727_vm0, %v2265_v18  ;;  %v2029_v50 = vsel %vm10843_vm3, %v2024_v25, %v2028_v8  ;;  %v1276_v25 = vunpack.c.l.b16 %v1197_v39  ;;  %v1277_v8 = vunpack.c.l.b16 %v1200_v52  ;;  %v1203_v39 = vrot.slane %v10604_v54, 5 }
 0x10a   : > { %14815 = vst [vmem:[#allocation7_spill] sm:$0xff] %v11329_v6  ;;  %v2038_v52 = vrot.slane %v2037_v26, 4  ;;  %v2585_v54 = vrot.slane %v9473_v24, 5 }
 0x10b   : > { %9436 = vmatmul.msk.bf16.gmra.mxu3 %vm727_vm0, %v10400_v13  ;;  %v9529_v13 = vld [vmem:[%s10819_s7 + $0x6c] sm:$0xe] }
 0x10c   : > { %9311 = vmatmul.msk.bf16.gmra.mxu2 %vm727_vm0, %v1300_v16  ;;  %v1049_v33 = vpop.f32.mrf.mxu1  ;;  %v9471_v16 = vld [vmem:[%s10819_s7 + $0x74] sm:$0x1]  ;;  %v9545_v19 = vrot.slane %v9529_v13, 9 }
 0x10d   : > { %v2581_v4 = vrot.slane %v9471_v16, 5  ;;  %v2050_v30 = vshll.u32 %v9471_v16, 16 }
 0x10e   : > { %v817_v59 = vpop.f32.mrf.mxu0  ;;  %v11352_v21 = vpop.f32.mrf.mxu3  ;;  %v2579_v47 = vsel %vm11069_vm6, %v9545_v19, %v2578_v0  ;;  %v9472_v0 = vld [vmem:[%s10819_s7 + $0x78] sm:$0xf]  ;;  %v1206_v19 = vrot.slane %v10605_v14, 5 }
 0x10f   : > { %v11348_v18 = vadd.f32 %v1046_v58, %v817_v59  ;;  %v855_v10 = vpop.f32.mrf.mxu2  ;;  %v2242_v58 = vunpack.c.l.b16 %v2029_v50  ;;  %9572 = vmatmul.msk.bf16.gmra.mxu1 %vm727_vm0, %v2676_v41  ;;  %v2582_v41 = vsel %vm11069_vm6, %v2580_v22, %v2581_v4  ;;  %v1301_v59 = vpack.c.b16 %v1277_v8, %v1276_v25  ;;  %v1102_v50 = vld [vmem:[%s10819_s7 + $0x60] sm:$0xe] }
 0x110   : > { %v11357_v7 = vadd.f32 %v11308_v9, %v855_v10  ;;  %v2654_v60 = vunpack.c.l.b16 %v2582_v41  ;;  %v2052_v16 = vrot.slane %v2050_v30, 5  ;;  %v9285_v13 = vrot.slane %v1102_v50, 9 }
 0x111   : > { %v2266_v56 = vpack.c.b16 %v2242_v58, %v2241_v5  ;;  %v2653_v5 = vunpack.c.l.b16 %v2579_v47  ;;  %v2048_v58 = vrot.slane %v2047_v40, 4  ;;  %v1205_v22 = vrot.slane %v1203_v39, 4 }
 0x112   : > { %14816 = vst [vmem:[#allocation8_spill] sm:$0xff] %v11357_v7  ;;  %v2055_v4 = vshrl.u32 %v9472_v0, 16  ;;  %v2058_v8 = vshll.u32 %v9472_v0, 16  ;;  %v2068_v30 = vshrl.u32 %v9473_v24, 16  ;;  %v1204_v41 = vsel %vm11069_vm6, %v9285_v13, %v1203_v39  ;;  %v9530_v0 = vld [vmem:[%s10819_s7 + $0x78] sm:$0xe] }
 0x113   : > { %v2677_v25 = vpack.c.b16 %v2654_v60, %v2653_v5  ;;  %v1278_v14 = vunpack.c.l.b16 %v1204_v41  ;;  %v1103_v41 = vld [vmem:[%s10819_s7 + $0x6c] sm:$0xe] }
 0x114   : > { %v1051_v9 = vpop.f32.mrf.mxu1  ;;  %v2057_v50 = vrot.slane %v2055_v4, 4  ;;  %v2060_v5 = vrot.slane %v2058_v8, 5  ;;  %v2070_v39 = vrot.slane %v2068_v30, 4 }
 0x116   : > { %v820_v20 = vpop.f32.mrf.mxu0  ;;  %v11371_v12 = vpop.f32.mrf.mxu3 }
 0x117   : > { %v11366_v37 = vadd.f32 %v1049_v33, %v820_v20  ;;  %v857_v57 = vpop.f32.mrf.mxu2  ;;  %v10401_v33 = vld [vmem:[%s10819_s7 + $0x6c] sm:$0xff]  ;;  %v2053_v20 = vsel %vm10843_vm3, %v2048_v58, %v2052_v16  ;;  %v9546_v58 = vrot.slane %v9530_v0, 9  ;;  %v2587_v16 = vrot.slane %v2585_v54, 4 }
 0x118   : > { %v11376_v10 = vadd.f32 %v11324_v44, %v857_v57  ;;  %v2043_v44 = vsel %vm10843_vm3, %v2038_v52, %v2042_v38  ;;  %v1207_v38 = vsel %vm11069_vm6, %v1205_v22, %v1206_v19  ;;  %v2244_v52 = vunpack.c.l.b16 %v2053_v20 }
 0x119   : > { %9512 = vmatmul.msk.bf16.gmra.mxu0 %vm727_vm0, %v2266_v56  ;;  %v2064_v56 = vshll.u32 %v9473_v24, 16  ;;  %v1279_v19 = vunpack.c.l.b16 %v1207_v38  ;;  %v2061_v24 = vor.u32 %v2060_v5, %v2057_v50  ;;  %v2586_v8 = vsel %vm11069_vm6, %v9546_v58, %v2585_v54  ;;  %v10402_v50 = vld [vmem:[%s10819_s7 + $0x78] sm:$0xff]  ;;  %v9475_v5 = vld [vmem:[%s10819_s7 + $0x84] sm:$0xf]  ;;  %v9476_v58 = vld [vmem:[%s10819_s7 + $0x88] sm:$0xf] }
 0x11a   : > { %14817 = vst [vmem:[#allocation9_spill] sm:$0xff] %v11376_v10  ;;  %v2655_v54 = vunpack.c.l.b16 %v2586_v8  ;;  %v2088_v8 = vshll.u32 %v9476_v58, 16 }
 0x11b   : > { %9437 = vmatmul.msk.bf16.gmra.mxu3 %vm727_vm0, %v10401_v33  ;;  %v2066_v60 = vrot.slane %v2064_v56, 5  ;;  %v1302_v20 = vpack.c.b16 %v1279_v19, %v1278_v14 }
 0x11c   : > { %9312 = vmatmul.msk.bf16.gmra.mxu2 %vm727_vm0, %v1301_v59  ;;  %v11389_v40 = vpop.f32.mrf.mxu1  ;;  %v2243_v59 = vunpack.c.l.b16 %v2043_v44 }
 0x11d   : > { %v2071_v4 = vor.u32 %v2070_v39, %v2066_v60 }
 0x11e   : > { %v822_v26 = vpop.f32.mrf.mxu0  ;;  %v11395_v57 = vpop.f32.mrf.mxu3  ;;  %v2267_v22 = vpack.c.b16 %v2244_v52, %v2243_v59  ;;  %v2062_v52 = vrot.slane %v2061_v24, 4  ;;  %v2082_v24 = vshll.u32 %v9475_v5, 16 }
 0x11f   : > { %v11391_v47 = vadd.f32 %v1051_v9, %v822_v26  ;;  %v860_v43 = vpop.f32.mrf.mxu2  ;;  %9573 = vmatmul.msk.bf16.gmra.mxu1 %vm727_vm0, %v2677_v25  ;;  %v9474_v9 = vld [vmem:[%s10819_s7 + $0x80] sm:$0x1]  ;;  %v2072_v0 = vrot.slane %v2071_v4, 4 }
 0x120   : > { %v11400_v33 = vadd.f32 %v11352_v21, %v860_v43  ;;  %v2588_v13 = vrot.slane %v9474_v9, 5  ;;  %v2074_v44 = vshll.u32 %v9474_v9, 16  ;;  %v10606_v43 = vld [vmem:[%s10819_s7 + $0x70] sm:$0xf] }
 0x121   : > { %v1210_v38 = vrot.slane %v10606_v43, 5 }
 0x122   : > { %14818 = vst [vmem:[#allocation10_spill] sm:$0xff] %v11400_v33  ;;  %v2589_v56 = vsel %vm11069_vm6, %v2587_v16, %v2588_v13  ;;  %v2076_v39 = vrot.slane %v2074_v44, 5  ;;  %v9286_v16 = vrot.slane %v1103_v41, 9  ;;  %v10607_v13 = vld [vmem:[%s10819_s7 + $0x74] sm:$0x1]  ;;  %v2079_v33 = vshrl.u32 %v9475_v5, 16 }
 0x123   : > { %v2656_v9 = vunpack.c.l.b16 %v2589_v56  ;;  %v1213_v14 = vrot.slane %v10607_v13, 5  ;;  %v1212_v19 = vrot.slane %v1210_v38, 4  ;;  %v10492_v41 = vld [vmem:[%s14803_s3 + $0x38] sm:$0xff]  ;;  %v9531_v13 = vld [vmem:[%s10819_s7 + $0x84] sm:$0xe] }
 0x124   : > { %v11405_v25 = vpop.f32.mrf.mxu1  ;;  %v2077_v4 = vsel %vm10843_vm3, %v2072_v0, %v2076_v39  ;;  %v9477_v39 = vld [vmem:[%s10819_s7 + $0x8c] sm:$0x1]  ;;  %8055 = vmatpush.bf16.msra.mxu1 %v10492_v41  ;;  %v9547_v10 = vrot.slane %v9531_v13, 9 }
 0x125   : > { %v2246_v0 = vunpack.c.l.b16 %v2077_v4  ;;  %v2595_v6 = vrot.slane %v9477_v39, 5 }
 0x126   : > { %v2344_v21 = vpop.f32.mrf.mxu0  ;;  %v11411_v30 = vpop.f32.mrf.mxu3 }
 0x127   : > { %v862_v26 = vpop.f32.mrf.mxu2 }
 0x128   : > { %v11416_v59 = vadd.f32 %v11371_v12, %v862_v26  ;;  %v2067_v12 = vsel %vm10843_vm3, %v2062_v52, %v2066_v60  ;;  %v2092_v26 = vshrl.u32 %v9476_v58, 16 }
 0x129   : > { %9513 = vmatmul.msk.bf16.gmra.mxu0 %vm727_vm0, %v2267_v22  ;;  %v2678_v22 = vpack.c.b16 %v2656_v9, %v2655_v54  ;;  %v2245_v52 = vunpack.c.l.b16 %v2067_v12  ;;  %v2081_v54 = vrot.slane %v2079_v33, 4  ;;  %v2592_v9 = vrot.slane %v9476_v58, 5 }
 0x12a   : > { %14819 = vst [vmem:[#allocation11_spill] sm:$0xff] %v11416_v59  ;;  %v2094_v59 = vrot.slane %v2092_v26, 4  ;;  %v2098_v12 = vshll.u32 %v9477_v39, 16  ;;  %v9479_v39 = vld [vmem:[%s10819_s7 + $0x94] sm:$0xf] }
 0x12b   : > { %9438 = vmatmul.msk.bf16.gmra.mxu3 %vm727_vm0, %v10402_v50  ;;  %v1214_v50 = vsel %vm11069_vm6, %v1212_v19, %v1213_v14  ;;  %v2594_v7 = vrot.slane %v2592_v9, 4  ;;  %v2593_v26 = vsel %vm11069_vm6, %v9547_v10, %v2592_v9  ;;  %v10403_v10 = vld [vmem:[%s10819_s7 + $0x84] sm:$0xff] }
 0x12c   : > { %9313 = vmatmul.msk.bf16.gmra.mxu2 %vm727_vm0, %v1302_v20  ;;  %v11429_v44 = vpop.f32.mrf.mxu1  ;;  %v1211_v20 = vsel %vm11069_vm6, %v9286_v16, %v1210_v38  ;;  %v2084_v38 = vrot.slane %v2082_v24, 5  ;;  %v2090_v16 = vrot.slane %v2088_v8, 5  ;;  %v1281_v19 = vunpack.c.l.b16 %v1214_v50  ;;  %v10608_v50 = vld [vmem:[%s10819_s7 + $0x7c] sm:$0xf] }
 0x12d   : > { %v1280_v33 = vunpack.c.l.b16 %v1211_v20  ;;  %v2596_v41 = vsel %vm11069_vm6, %v2594_v7, %v2595_v6  ;;  %v2657_v9 = vunpack.c.l.b16 %v2593_v26  ;;  %v9478_v6 = vld [vmem:[%s10819_s7 + $0x90] sm:$0xf] }
 0x12e   : > { %v2346_v56 = vpop.f32.mrf.mxu0  ;;  %v11436_v43 = vpop.f32.mrf.mxu3  ;;  %v2085_v4 = vor.u32 %v2084_v38, %v2081_v54  ;;  %v2095_v24 = vor.u32 %v2094_v59, %v2090_v16  ;;  %v1217_v59 = vrot.slane %v10608_v50, 5  ;;  %v2103_v50 = vshrl.u32 %v9478_v6, 16 }
 0x12f   : > { %v1379_v60 = vpop.f32.mrf.mxu2  ;;  %9574 = vmatmul.msk.bf16.gmra.mxu1 %vm727_vm0, %v2678_v22  ;;  %v1303_v54 = vpack.c.b16 %v1281_v19, %v1280_v33  ;;  %v2106_v31 = vshll.u32 %v9478_v6, 16  ;;  %v2112_v19 = vshll.u32 %v9479_v39, 16 }
 0x130   : > { %v1459_v5 = vadd.f32 %v1379_v60, %v11101_v28  ;;  %v2268_v28 = vpack.c.b16 %v2246_v0, %v2245_v52  ;;  %v1104_v60 = vld [vmem:[%s10819_s7 + $0x78] sm:$0xe]  ;;  %v2086_v7 = vrot.slane %v2085_v4, 4  ;;  %v2100_v0 = vrot.slane %v2098_v12, 5 }
 0x131   : > { %v9287_v13 = vrot.slane %v1104_v60, 9  ;;  %v2105_v60 = vrot.slane %v2103_v50, 4  ;;  %v2114_v6 = vrot.slane %v2112_v19, 5 }
 0x132   : > { %v1758_v14 = vadd.f32 %v11395_v57, %v1459_v5  ;;  %v2658_v5 = vunpack.c.l.b16 %v2596_v41  ;;  %v2091_v12 = vsel %vm10843_vm3, %v2086_v7, %v2090_v16  ;;  %v9532_v7 = vld [vmem:[%s10819_s7 + $0x90] sm:$0xe] }
 0x134   : > { %v2424_v58 = vadd.f32 %v2344_v21, %v1758_v14  ;;  %v11445_v8 = vpop.f32.mrf.mxu1  ;;  %v10609_v14 = vld [vmem:[%s10819_s7 + $0x80] sm:$0x1]  ;;  %v2679_v33 = vpack.c.b16 %v2658_v5, %v2657_v9  ;;  %v2247_v9 = vunpack.c.l.b16 %v2091_v12 }
 0x136   : > { %v2349_v22 = vpop.f32.mrf.mxu0  ;;  %v11452_v57 = vadd.f32 %v11389_v40, %v2424_v58  ;;  %v11454_v20 = vpop.f32.mrf.mxu3  ;;  %v2096_v40 = vrot.slane %v2095_v24, 4  ;;  %v1220_v58 = vrot.slane %v10609_v14, 5  ;;  %v2116_v24 = vshrl.u32 %v9479_v39, 16 }
 0x137   : > { %v1381_v21 = vpop.f32.mrf.mxu2 }
 0x138   : > { %14820 = vst [vmem:[#allocation12_spill] sm:$0xff] %v11452_v57  ;;  %v1460_v52 = vadd.f32 %v1381_v21, %v11116_v49  ;;  %v1219_v57 = vrot.slane %v1217_v59, 4 }
 0x139   : > { %9514 = vmatmul.msk.bf16.gmra.mxu0 %vm727_vm0, %v2268_v28 }
 0x13a   : > { %v1759_v38 = vadd.f32 %v11411_v30, %v1460_v52  ;;  %v2101_v30 = vsel %vm10843_vm3, %v2096_v40, %v2100_v0  ;;  %v1221_v16 = vsel %vm11069_vm6, %v1219_v57, %v1220_v58  ;;  %v2108_v52 = vrot.slane %v2106_v31, 5 }
 0x13b   : > { %9439 = vmatmul.msk.bf16.gmra.mxu3 %vm727_vm0, %v10403_v10  ;;  %v2248_v5 = vunpack.c.l.b16 %v2101_v30  ;;  %v2118_v40 = vrot.slane %v2116_v24, 4  ;;  %v1283_v14 = vunpack.c.l.b16 %v1221_v16  ;;  %v1105_v24 = vld [vmem:[%s10819_s7 + $0x84] sm:$0xe] }
 0x13c   : > { %9314 = vmatmul.msk.bf16.gmra.mxu2 %vm727_vm0, %v1303_v54  ;;  %v2425_v49 = vadd.f32 %v2346_v56, %v1759_v38  ;;  %v11471_v4 = vpop.f32.mrf.mxu1  ;;  %v1218_v56 = vsel %vm11069_vm6, %v9287_v13, %v1217_v59  ;;  %v2599_v54 = vrot.slane %v9479_v39, 5  ;;  %v9548_v59 = vrot.slane %v9532_v7, 9  ;;  %v9482_v7 = vld [vmem:[%s10819_s7 + $0xa0] sm:$0xf] }
 0x13d   : > { %v2109_v57 = vor.u32 %v2108_v52, %v2105_v60  ;;  %v1282_v39 = vunpack.c.l.b16 %v1218_v56  ;;  %v2119_v50 = vor.u32 %v2118_v40, %v2114_v6  ;;  %v10610_v56 = vld [vmem:[%s10819_s7 + $0x88] sm:$0xf] }
 0x13e   : > { %v2351_v28 = vpop.f32.mrf.mxu0  ;;  %v11474_v26 = vadd.f32 %v11405_v25, %v2425_v49  ;;  %v11478_v21 = vpop.f32.mrf.mxu3  ;;  %v9480_v25 = vld [vmem:[%s10819_s7 + $0x98] sm:$0x1]  ;;  %v2601_v0 = vrot.slane %v2599_v54, 4  ;;  %v2600_v19 = vsel %vm11069_vm6, %v9548_v59, %v2599_v54  ;;  %v10404_v54 = vld [vmem:[%s10819_s7 + $0x90] sm:$0xff]  ;;  %v9288_v59 = vrot.slane %v1105_v24, 9 }
 0x13f   : > { %v1384_v41 = vpop.f32.mrf.mxu2  ;;  %9575 = vmatmul.msk.bf16.gmra.mxu1 %vm727_vm0, %v2679_v33  ;;  %v2602_v38 = vrot.slane %v9480_v25, 5  ;;  %v2122_v49 = vshll.u32 %v9480_v25, 16  ;;  %v2110_v16 = vrot.slane %v2109_v57, 4  ;;  %v1304_v52 = vpack.c.b16 %v1283_v14, %v1282_v39 }
 0x140   : > { %v1461_v10 = vadd.f32 %v1384_v41, %v11133_v35  ;;  %v2269_v35 = vpack.c.b16 %v2248_v5, %v2247_v9  ;;  %v1224_v41 = vrot.slane %v10610_v56, 5  ;;  %v9481_v5 = vld [vmem:[%s10819_s7 + $0x9c] sm:$0xf] }
 0x141   : > { %v2124_v25 = vrot.slane %v2122_v49, 5  ;;  %v2115_v57 = vsel %vm10843_vm3, %v2110_v16, %v2114_v6  ;;  %v2130_v14 = vshll.u32 %v9481_v5, 16 }
 0x142   : > { %v1760_v13 = vadd.f32 %v11436_v43, %v1461_v10  ;;  %v2603_v43 = vsel %vm11069_vm6, %v2601_v0, %v2602_v38  ;;  %v2659_v10 = vunpack.c.l.b16 %v2600_v19  ;;  %v10611_v0 = vld [vmem:[%s10819_s7 + $0x8c] sm:$0x1]  ;;  %v2140_v19 = vshrl.u32 %v9482_v7, 16 }
 0x143   : > { %v2660_v9 = vunpack.c.l.b16 %v2603_v43  ;;  %v1227_v38 = vrot.slane %v10611_v0, 5  ;;  %v10491_v43 = vld [vmem:[%s14803_s3 + $0x30] sm:$0xff]  ;;  %v2249_v16 = vunpack.c.l.b16 %v2115_v57 }
 0x144   : > { %v2426_v31 = vadd.f32 %v2349_v22, %v1760_v13  ;;  %v11489_v33 = vpop.f32.mrf.mxu1  ;;  %v1226_v13 = vrot.slane %v1224_v41, 4  ;;  %8056 = vmatpush.bf16.msra.mxu1 %v10491_v43  ;;  %v10612_v43 = vld [vmem:[%s10819_s7 + $0x94] sm:$0xf] }
 0x145   : > { %v2680_v39 = vpack.c.b16 %v2660_v9, %v2659_v10  ;;  %v9483_v10 = vld [vmem:[%s10819_s7 + $0xa4] sm:$0x1] }
 0x146   : > { %v11487_v58 = vpop.f32.mrf.mxu0  ;;  %v11496_v12 = vadd.f32 %v11429_v44, %v2426_v31  ;;  %v11498_v30 = vpop.f32.mrf.mxu3  ;;  %v2120_v44 = vrot.slane %v2119_v50, 4  ;;  %v1228_v56 = vsel %vm11069_vm6, %v1226_v13, %v1227_v38  ;;  %v2146_v57 = vshll.u32 %v9483_v10, 16 }
 0x147   : > { %v1386_v22 = vpop.f32.mrf.mxu2 }
 0x148   : > { %v1462_v60 = vadd.f32 %v1386_v22, %v11152_v51  ;;  %v2127_v51 = vshrl.u32 %v9481_v5, 16  ;;  %v9533_v5 = vld [vmem:[%s10819_s7 + $0x9c] sm:$0xe] }
 0x149   : > { %9515 = vmatmul.msk.bf16.gmra.mxu0 %vm727_vm0, %v2269_v35  ;;  %v2136_v35 = vshll.u32 %v9482_v7, 16 }
 0x14a   : > { %v1761_v40 = vadd.f32 %v11454_v20, %v1462_v60  ;;  %v2125_v20 = vsel %vm10843_vm3, %v2120_v44, %v2124_v25  ;;  %v2129_v60 = vrot.slane %v2127_v51, 4  ;;  %v2142_v44 = vrot.slane %v2140_v19, 4 }
 0x14b   : > { %9440 = vmatmul.msk.bf16.gmra.mxu3 %vm727_vm0, %v10404_v54  ;;  %v2138_v9 = vrot.slane %v2136_v35, 5  ;;  %v9549_v25 = vrot.slane %v9533_v5, 9  ;;  %v9485_v5 = vld [vmem:[%s10819_s7 + $0xac] sm:$0xf] }
 0x14c   : > { %9315 = vmatmul.msk.bf16.gmra.mxu2 %vm727_vm0, %v1304_v52  ;;  %v2427_v31 = vadd.f32 %v2351_v28, %v1761_v40  ;;  %v11515_v49 = vpop.f32.mrf.mxu1  ;;  %v1225_v28 = vsel %vm11069_vm6, %v9288_v59, %v1224_v41  ;;  %v2606_v52 = vrot.slane %v9482_v7, 5  ;;  %v2132_v41 = vrot.slane %v2130_v14, 5 }
 0x14d   : > { %v2609_v59 = vrot.slane %v9483_v10, 5  ;;  %v1284_v38 = vunpack.c.l.b16 %v1225_v28  ;;  %v1106_v28 = vld [vmem:[%s10819_s7 + $0x90] sm:$0xe] }
 0x14e   : > { %v2356_v50 = vpop.f32.mrf.mxu0  ;;  %v11518_v6 = vadd.f32 %v11445_v8, %v2427_v31  ;;  %v11525_v24 = vpop.f32.mrf.mxu3  ;;  %v2250_v8 = vunpack.c.l.b16 %v2125_v20  ;;  %v2608_v40 = vrot.slane %v2606_v52, 4  ;;  %v2133_v31 = vor.u32 %v2132_v41, %v2129_v60  ;;  %v10405_v60 = vld [vmem:[%s10819_s7 + $0x9c] sm:$0xff] }
 0x14f   : > { %v1389_v22 = vpop.f32.mrf.mxu2  ;;  %9576 = vmatmul.msk.bf16.gmra.mxu1 %vm727_vm0, %v2680_v39  ;;  %v2143_v39 = vor.u32 %v2142_v44, %v2138_v9  ;;  %v2607_v35 = vsel %vm11069_vm6, %v9549_v25, %v2606_v52  ;;  %v2148_v41 = vrot.slane %v2146_v57, 5  ;;  %v9289_v25 = vrot.slane %v1106_v28, 9 }
 0x150   : > { %v1463_v54 = vadd.f32 %v1389_v22, %v11170_v46  ;;  %v1285_v46 = vunpack.c.l.b16 %v1228_v56  ;;  %v2270_v13 = vpack.c.b16 %v2250_v8, %v2249_v16  ;;  %v1231_v22 = vrot.slane %v10612_v43, 5  ;;  %v9484_v8 = vld [vmem:[%s10819_s7 + $0xa8] sm:$0xf] }
 0x151   : > { %v2661_v52 = vunpack.c.l.b16 %v2607_v35  ;;  %v2134_v10 = vrot.slane %v2133_v31, 4  ;;  %v2154_v43 = vshll.u32 %v9484_v8, 16 }
 0x152   : > { %v1762_v0 = vadd.f32 %v11478_v21, %v1463_v54  ;;  %v2610_v21 = vsel %vm11069_vm6, %v2608_v40, %v2609_v59  ;;  %v1305_v16 = vpack.c.b16 %v1285_v46, %v1284_v38  ;;  %v10613_v40 = vld [vmem:[%s10819_s7 + $0x98] sm:$0x1]  ;;  %v2160_v46 = vshll.u32 %v9485_v5, 16 }
 0x153   : > { %v2662_v54 = vunpack.c.l.b16 %v2610_v21  ;;  %v1234_v59 = vrot.slane %v10613_v40, 5  ;;  %v2139_v57 = vsel %vm10843_vm3, %v2134_v10, %v2138_v9  ;;  %v9534_v10 = vld [vmem:[%s10819_s7 + $0xa8] sm:$0xe] }
 0x154   : > { %v2428_v7 = vadd.f32 %v11487_v58, %v1762_v0  ;;  %v11535_v14 = vpop.f32.mrf.mxu1  ;;  %v1233_v0 = vrot.slane %v1231_v22, 4 }
 0x155   : > { %v2681_v38 = vpack.c.b16 %v2662_v54, %v2661_v52  ;;  %v2251_v52 = vunpack.c.l.b16 %v2139_v57 }
 0x156   : > { %v2359_v51 = vpop.f32.mrf.mxu0  ;;  %v11542_v20 = vadd.f32 %v11471_v4, %v2428_v7  ;;  %v11544_v19 = vpop.f32.mrf.mxu3  ;;  %v2144_v4 = vrot.slane %v2143_v39, 4  ;;  %v2151_v7 = vshrl.u32 %v9484_v8, 16  ;;  %v2164_v39 = vshrl.u32 %v9485_v5, 16 }
 0x157   : > { %v1391_v58 = vpop.f32.mrf.mxu2  ;;  %v1235_v9 = vsel %vm11069_vm6, %v1233_v0, %v1234_v59  ;;  %v2162_v8 = vrot.slane %v2160_v46, 5 }
 0x158   : > { %v1464_v56 = vadd.f32 %v1391_v58, %v11190_v36  ;;  %v2153_v28 = vrot.slane %v2151_v7, 4  ;;  %v1287_v0 = vunpack.c.l.b16 %v1235_v9 }
 0x159   : > { %9516 = vmatmul.msk.bf16.gmra.mxu0 %vm727_vm0, %v2270_v13 }
 0x15a   : > { %v1763_v44 = vadd.f32 %v11498_v30, %v1464_v56  ;;  %v2149_v30 = vsel %vm10843_vm3, %v2144_v4, %v2148_v41  ;;  %v2156_v56 = vrot.slane %v2154_v43, 5  ;;  %v2166_v4 = vrot.slane %v2164_v39, 4  ;;  %v1107_v39 = vld [vmem:[%s10819_s7 + $0x9c] sm:$0xe] }
 0x15b   : > { %9441 = vmatmul.msk.bf16.gmra.mxu3 %vm727_vm0, %v10405_v60  ;;  %v2252_v54 = vunpack.c.l.b16 %v2149_v30 }
 0x15c   : > { %9316 = vmatmul.msk.bf16.gmra.mxu2 %vm727_vm0, %v1305_v16  ;;  %v2429_v36 = vadd.f32 %v2356_v50, %v1763_v44  ;;  %v11561_v31 = vpop.f32.mrf.mxu1  ;;  %v1232_v50 = vsel %vm11069_vm6, %v9289_v25, %v1231_v22  ;;  %v2613_v16 = vrot.slane %v9485_v5, 5  ;;  %v9550_v22 = vrot.slane %v9534_v10, 9  ;;  %v9488_v10 = vld [vmem:[%s10819_s7 + $0xb8] sm:$0xf] }
 0x15d   : > { %v2157_v40 = vor.u32 %v2156_v56, %v2153_v28  ;;  %v1286_v5 = vunpack.c.l.b16 %v1232_v50  ;;  %v2167_v43 = vor.u32 %v2166_v4, %v2162_v8  ;;  %v10614_v50 = vld [vmem:[%s10819_s7 + $0xa0] sm:$0xf] }
 0x15e   : > { %v2361_v13 = vpop.f32.mrf.mxu0  ;;  %v11564_v35 = vadd.f32 %v11489_v33, %v2429_v36  ;;  %v11568_v58 = vpop.f32.mrf.mxu3  ;;  %v9486_v33 = vld [vmem:[%s10819_s7 + $0xb0] sm:$0x1]  ;;  %v2615_v41 = vrot.slane %v2613_v16, 4  ;;  %v2614_v46 = vsel %vm11069_vm6, %v9550_v22, %v2613_v16  ;;  %v10406_v16 = vld [vmem:[%s10819_s7 + $0xa8] sm:$0xff]  ;;  %v9290_v22 = vrot.slane %v1107_v39, 9 }
 0x15f   : > { %v1394_v21 = vpop.f32.mrf.mxu2  ;;  %9577 = vmatmul.msk.bf16.gmra.mxu1 %vm727_vm0, %v2681_v38  ;;  %v2616_v44 = vrot.slane %v9486_v33, 5  ;;  %v2170_v36 = vshll.u32 %v9486_v33, 16  ;;  %v2158_v9 = vrot.slane %v2157_v40, 4  ;;  %v1306_v56 = vpack.c.b16 %v1287_v0, %v1286_v5 }
 0x160   : > { %v1465_v60 = vadd.f32 %v1394_v21, %v11208_v29  ;;  %v2271_v29 = vpack.c.b16 %v2252_v54, %v2251_v52  ;;  %v1238_v21 = vrot.slane %v10614_v50, 5  ;;  %v9487_v54 = vld [vmem:[%s10819_s7 + $0xb4] sm:$0xf] }
 0x161   : > { %v2172_v33 = vrot.slane %v2170_v36, 5  ;;  %v2163_v40 = vsel %vm10843_vm3, %v2158_v9, %v2162_v8  ;;  %v2178_v0 = vshll.u32 %v9487_v54, 16 }
 0x162   : > { %v1764_v25 = vadd.f32 %v11525_v24, %v1465_v60  ;;  %v2617_v24 = vsel %vm11069_vm6, %v2615_v41, %v2616_v44  ;;  %v2663_v60 = vunpack.c.l.b16 %v2614_v46  ;;  %v10615_v41 = vld [vmem:[%s10819_s7 + $0xa4] sm:$0x1]  ;;  %v2188_v46 = vshrl.u32 %v9488_v10, 16 }
 0x163   : > { %v2664_v52 = vunpack.c.l.b16 %v2617_v24  ;;  %v1241_v44 = vrot.slane %v10615_v41, 5  ;;  %v10490_v24 = vld [vmem:[%s14803_s3 + $0x28] sm:$0xff]  ;;  %v2253_v9 = vunpack.c.l.b16 %v2163_v40 }
 0x164   : > { %v2430_v59 = vadd.f32 %v2359_v51, %v1764_v25  ;;  %v11579_v38 = vpop.f32.mrf.mxu1  ;;  %v1240_v25 = vrot.slane %v1238_v21, 4  ;;  %8057 = vmatpush.bf16.msra.mxu1 %v10490_v24 }
 0x165   : > { %14821 = vst [vmem:[#allocation13_spill] sm:$0xff] %v11579_v38  ;;  %v2682_v5 = vpack.c.b16 %v2664_v52, %v2663_v60  ;;  %v9489_v60 = vld [vmem:[%s10819_s7 + $0xbc] sm:$0x1]  ;;  %v11695_v38 = vld [vmem:[%s10819_s7 + $0x20] sm:$0x1] }
 0x166   : > { %v11577_v7 = vpop.f32.mrf.mxu0  ;;  %v11586_v57 = vadd.f32 %v11515_v49, %v2430_v59  ;;  %v11588_v30 = vpop.f32.mrf.mxu3  ;;  %v2168_v49 = vrot.slane %v2167_v43, 4  ;;  %v1242_v50 = vsel %vm11069_vm6, %v1240_v25, %v1241_v44  ;;  %v2194_v40 = vshll.u32 %v9489_v60, 16 }
 0x167   : > { %v1396_v51 = vpop.f32.mrf.mxu2 }
 0x168   : > { %v1466_v28 = vadd.f32 %v1396_v51, %v11228_v32  ;;  %v2175_v32 = vshrl.u32 %v9487_v54, 16  ;;  %v9535_v54 = vld [vmem:[%s10819_s7 + $0xb4] sm:$0xe] }
 0x169   : > { %9517 = vmatmul.msk.bf16.gmra.mxu0 %vm727_vm0, %v2271_v29  ;;  %v2184_v29 = vshll.u32 %v9488_v10, 16 }
 0x16a   : > { %v1765_v4 = vadd.f32 %v11544_v19, %v1466_v28  ;;  %v2173_v19 = vsel %vm10843_vm3, %v2168_v49, %v2172_v33  ;;  %v2177_v28 = vrot.slane %v2175_v32, 4  ;;  %v2190_v49 = vrot.slane %v2188_v46, 4 }
 0x16b   : > { %9442 = vmatmul.msk.bf16.gmra.mxu3 %vm727_vm0, %v10406_v16  ;;  %v11624_v52 = vrot.slane %v2184_v29, 5  ;;  %v9551_v33 = vrot.slane %v9535_v54, 9  ;;  %v2196_v54 = vrot.slane %v2194_v40, 5 }
 0x16c   : > { %9317 = vmatmul.msk.bf16.gmra.mxu2 %vm727_vm0, %v1306_v56  ;;  %v2431_v59 = vadd.f32 %v2361_v13, %v1765_v4  ;;  %v11607_v36 = vpop.f32.mrf.mxu1  ;;  %v1239_v13 = vsel %vm11069_vm6, %v9290_v22, %v1238_v21  ;;  %v2620_v56 = vrot.slane %v9488_v10, 5  ;;  %v2180_v21 = vrot.slane %v2178_v0, 5 }
 0x16d   : > { %v2623_v22 = vrot.slane %v9489_v60, 5  ;;  %v1288_v44 = vunpack.c.l.b16 %v1239_v13  ;;  %v1289_v10 = vunpack.c.l.b16 %v1242_v50 }
 0x16e   : > { %v11603_v43 = vpop.f32.mrf.mxu0  ;;  %v11610_v8 = vadd.f32 %v11535_v14, %v2431_v59  ;;  %v11617_v39 = vpop.f32.mrf.mxu3  ;;  %v2254_v14 = vunpack.c.l.b16 %v2173_v19  ;;  %v2622_v4 = vrot.slane %v2620_v56, 4  ;;  %v2181_v59 = vor.u32 %v2180_v21, %v2177_v28  ;;  %v9490_v19 = vld [vmem:[%s10819_s7 + $0xc0] sm:$0xf]  ;;  %v10616_v28 = vld [vmem:[%s10819_s7 + $0xac] sm:$0xf] }
 0x16f   : > { %v1399_v51 = vpop.f32.mrf.mxu2  ;;  %9578 = vmatmul.msk.bf16.gmra.mxu1 %vm727_vm0, %v2682_v5  ;;  %v2191_v5 = vor.u32 %v2190_v49, %v11624_v52  ;;  %v1307_v13 = vpack.c.b16 %v1289_v10, %v1288_v44  ;;  %v2199_v49 = vshrl.u32 %v9490_v19, 16  ;;  %v10617_v44 = vld [vmem:[%s10819_s7 + $0xb0] sm:$0x1] }
 0x170   : > { %v1467_v16 = vadd.f32 %v1399_v51, %v11246_v11  ;;  %v2272_v25 = vpack.c.b16 %v2254_v14, %v2253_v9  ;;  %v2624_v29 = vsel %vm11069_vm6, %v2622_v4, %v2623_v22  ;;  %v11645_v51 = vld [vmem:[%s10819_s7 + $0xc4] sm:$0xf]  ;;  %v10407_v9 = vld [vmem:[%s10819_s7 + $0xb4] sm:$0xff]  ;;  %v2182_v60 = vrot.slane %v2181_v59, 4  ;;  %v11663_v59 = vld [vmem:[%s10819_s7 + $0x1c] sm:$0xf] }
 0x171   : > { %v2666_v14 = vunpack.c.l.b16 %v2624_v29  ;;  %v2192_v21 = vrot.slane %v2191_v5, 4  ;;  %v2202_v4 = vshll.u32 %v9490_v19, 16  ;;  %v2212_v22 = vshrl.u32 %v11645_v51, 16 }
 0x172   : > { %v1766_v41 = vadd.f32 %v11568_v58, %v1467_v16  ;;  %v2621_v58 = vsel %vm11069_vm6, %v9551_v33, %v2620_v56  ;;  %v1245_v56 = vrot.slane %v10616_v28, 5  ;;  %v1248_v10 = vrot.slane %v10617_v44, 5 }
 0x173   : > { %v2665_v16 = vunpack.c.l.b16 %v2621_v58  ;;  %v2187_v58 = vsel %vm10843_vm3, %v2182_v60, %v11624_v52  ;;  %v2197_v29 = vsel %vm10843_vm3, %v2192_v21, %v2196_v54  ;;  %v3227_v52 = vshrl.u32 %v11663_v59, 16 }
 0x174   : > { %v2432_v11 = vadd.f32 %v11577_v7, %v1766_v41  ;;  %v11632_v0 = vpop.f32.mrf.mxu1  ;;  %v9705_v41 = vld [vmem:[%s10819_s7 + $0x18] sm:$0xf]  ;;  %v1247_v5 = vrot.slane %v1245_v56, 4  ;;  %v2627_v60 = vrot.slane %v11645_v51, 5 }
 0x175   : > { %14822 = vst [vmem:[#allocation14_spill] sm:$0xff] %v11632_v0  ;;  %v2683_v40 = vpack.c.b16 %v2666_v14, %v2665_v16  ;;  %v9492_v14 = vld [vmem:[%s10819_s7 + $0xc8] sm:$0x1] }
 0x176   : > { %v11629_v32 = vpop.f32.mrf.mxu0  ;;  %v11639_v7 = vadd.f32 %v11561_v31, %v2432_v11  ;;  %v11642_v24 = vpop.f32.mrf.mxu3  ;;  %v1108_v31 = vld [vmem:[%s10819_s7 + $0xa8] sm:$0xe]  ;;  %v2629_v44 = vrot.slane %v2627_v60, 4  ;;  %v2630_v0 = vrot.slane %v9492_v14, 5 }
 0x177   : > { %v1401_v46 = vpop.f32.mrf.mxu2 }
 0x178   : > { %14823 = vst [vmem:[#allocation15_spill] sm:$0xff] %v11639_v7  ;;  %v1468_v50 = vadd.f32 %v1401_v46, %v11266_v55  ;;  %v2208_v55 = vshll.u32 %v11645_v51, 16  ;;  %v2204_v46 = vrot.slane %v2202_v4, 5  ;;  %v2256_v4 = vunpack.c.l.b16 %v2197_v29 }
 0x179   : > { %9518 = vmatmul.msk.bf16.gmra.mxu0 %vm727_vm0, %v2272_v25  ;;  %v9291_v25 = vrot.slane %v1108_v31, 9  ;;  %v3217_v31 = vshll.u32 %v9705_v41, 16 }
 0x17a   : > { %v1767_v33 = vadd.f32 %v11588_v30, %v1468_v50  ;;  %v2214_v50 = vrot.slane %v2212_v22, 4  ;;  %v1249_v22 = vsel %vm11069_vm6, %v1247_v5, %v1248_v10 }
 0x17b   : > { %9443 = vmatmul.msk.bf16.gmra.mxu3 %vm727_vm0, %v10407_v9  ;;  %v3214_v9 = vshrl.u32 %v9705_v41, 16  ;;  %v1246_v54 = vsel %vm11069_vm6, %v9291_v25, %v1245_v56  ;;  %v3219_v25 = vrot.slane %v3217_v31, 5  ;;  %v1291_v5 = vunpack.c.l.b16 %v1249_v22 }
 0x17c   : > { %9318 = vmatmul.msk.bf16.gmra.mxu2 %vm727_vm0, %v1307_v13  ;;  %v11659_v11 = vadd.f32 %v11603_v43, %v1767_v33  ;;  %v11672_v19 = vpop.f32.mrf.mxu1  ;;  %v2201_v43 = vrot.slane %v2199_v49, 4  ;;  %v11674_v13 = vrot.slane %v2208_v55, 5  ;;  %v3223_v33 = vshll.u32 %v11663_v59, 16  ;;  %v9536_v55 = vld [vmem:[%s10819_s7 + $0xc0] sm:$0xe] }
 0x17d   : > { %v2255_v49 = vunpack.c.l.b16 %v2187_v58  ;;  %v9552_v41 = vrot.slane %v9536_v55, 9  ;;  %v3216_v56 = vrot.slane %v3214_v9, 4  ;;  %v1290_v10 = vunpack.c.l.b16 %v1246_v54 }
 0x17e   : > { %14824 = vst [vmem:[#allocation16_spill] sm:$0xff] %v11659_v11  ;;  %v11665_v30 = vpop.f32.mrf.mxu0  ;;  %v11676_v16 = vpop.f32.mrf.mxu3  ;;  %v2205_v51 = vor.u32 %v2204_v46, %v2201_v43  ;;  %v11691_v58 = vrot.slane %v3223_v33, 5  ;;  %v2631_v46 = vsel %vm11069_vm6, %v2629_v44, %v2630_v0  ;;  %v10619_v44 = vld [vmem:[%s10819_s7 + $0xbc] sm:$0x1] }
 0x17f   : > { %v1404_v28 = vpop.f32.mrf.mxu2  ;;  %9579 = vmatmul.msk.bf16.gmra.mxu1 %vm727_vm0, %v2683_v40  ;;  %v3229_v40 = vrot.slane %v3227_v52, 4  ;;  %v2273_v55 = vpack.c.b16 %v2256_v4, %v2255_v49  ;;  %v2628_v43 = vsel %vm11069_vm6, %v9552_v41, %v2627_v60  ;;  %v1109_v52 = vld [vmem:[%s10819_s7 + $0xb4] sm:$0xe]  ;;  %v3220_v54 = vor.u32 %v3219_v25, %v3216_v56 }
 0x180   : > { %v1469_v21 = vadd.f32 %v1404_v28, %v11284_v62  ;;  %v2215_v62 = vor.u32 %v2214_v50, %v11674_v13  ;;  %v2218_v28 = vshll.u32 %v9492_v14, 16  ;;  %v2206_v9 = vrot.slane %v2205_v51, 4 }
 0x181   : > { %v3230_v60 = vor.u32 %v3229_v40, %v11691_v58  ;;  %v3233_v49 = vshll.u32 %v11695_v38, 16  ;;  %v1308_v4 = vpack.c.b16 %v1291_v5, %v1290_v10  ;;  %v2667_v22 = vunpack.c.l.b16 %v2628_v43 }
 0x182   : > { %v1768_v7 = vadd.f32 %v11617_v39, %v1469_v21  ;;  %v2220_v14 = vrot.slane %v2218_v28, 5  ;;  %v2216_v21 = vrot.slane %v2215_v62, 4  ;;  %v2668_v41 = vunpack.c.l.b16 %v2631_v46 }
 0x183   : > { %v1255_v51 = vrot.slane %v10619_v44, 5  ;;  %v9292_v62 = vrot.slane %v1109_v52, 9  ;;  %v2211_v25 = vsel %vm10843_vm3, %v2206_v9, %v11674_v13  ;;  %v3221_v40 = vrot.slane %v3220_v54, 4 }
 0x184   : > { %v2434_v29 = vadd.f32 %v11629_v32, %v1768_v7  ;;  %v11699_v39 = vpop.f32.mrf.mxu1  ;;  %v10618_v32 = vld [vmem:[%s10819_s7 + $0xb8] sm:$0xf]  ;;  %v3235_v10 = vrot.slane %v3233_v49, 5  ;;  %v2257_v9 = vunpack.c.l.b16 %v2211_v25 }
 0x185   : > { %v1252_v7 = vrot.slane %v10618_v32, 5  ;;  %v11733_v32 = vld [vmem:[%s10819_s7 + $0x28] sm:$0xf]  ;;  %v3226_v54 = vsel %vm10843_vm3, %v3221_v40, %v11691_v58  ;;  %v9781_v25 = vld [vmem:[%s10819_s7 + $0x18] sm:$0xe] }
 0x186   : > { %v11697_v11 = vpop.f32.mrf.mxu0  ;;  %v11706_v50 = vadd.f32 %v11607_v36, %v2434_v29  ;;  %v11709_v33 = vpop.f32.mrf.mxu3  ;;  %v10408_v36 = vld [vmem:[%s10819_s7 + $0xc0] sm:$0xff]  ;;  %v3231_v29 = vrot.slane %v3230_v60, 4 }
 0x187   : > { %v1406_v31 = vpop.f32.mrf.mxu2  ;;  %v1254_v56 = vrot.slane %v1252_v7, 4  ;;  %v1253_v13 = vsel %vm11069_vm6, %v9292_v62, %v1252_v7  ;;  %v3897_v62 = vrot.slane %v11663_v59, 5  ;;  %v9797_v59 = vrot.slane %v9781_v25, 9 }
 0x188   : > { %v1470_v0 = vadd.f32 %v1406_v31, %v11304_v17  ;;  %v2221_v17 = vsel %vm10843_vm3, %v2216_v21, %v2220_v14  ;;  %v10489_v31 = vld [vmem:[%s14803_s3 + $0x20] sm:$0xff]  ;;  %v3236_v60 = vsel %vm10843_vm3, %v3231_v29, %v3235_v10 }
 0x189   : > { %9519 = vmatmul.msk.bf16.gmra.mxu0 %vm727_vm0, %v2273_v55  ;;  %v9708_v55 = vld [vmem:[%s10819_s7 + $0x24] sm:$0xf]  ;;  %v2258_v14 = vunpack.c.l.b16 %v2221_v17  ;;  %v1256_v21 = vsel %vm11069_vm6, %v1254_v56, %v1255_v51  ;;  %8058 = vmatpush.bf16.msra.mxu1 %v10489_v31  ;;  %v3602_v51 = vunpack.c.l.b16 %v3226_v54 }
 0x18a   : > { %v1769_v28 = vadd.f32 %v11642_v24, %v1470_v0  ;;  %v2684_v24 = vpack.c.b16 %v2668_v41, %v2667_v22  ;;  %v3238_v7 = vshrl.u32 %v9708_v55, 16  ;;  %v3241_v0 = vshll.u32 %v9708_v55, 16  ;;  %v11760_v55 = vld [vmem:[%s10819_s7 + $0x2c] sm:$0x1] }
 0x18b   : > { %9444 = vmatmul.msk.bf16.gmra.mxu3 %vm727_vm0, %v10408_v36  ;;  %v3251_v36 = vshrl.u32 %v11733_v32, 16  ;;  %v1292_v41 = vunpack.c.l.b16 %v1253_v13  ;;  %v1293_v58 = vunpack.c.l.b16 %v1256_v21  ;;  %v2274_v44 = vpack.c.b16 %v2258_v14, %v2257_v9 }
 0x18c   : > { %9319 = vmatmul.msk.bf16.gmra.mxu2 %vm727_vm0, %v1308_v4  ;;  %v11726_v5 = vadd.f32 %v11665_v30, %v1769_v28  ;;  %v11730_v46 = vpop.f32.mrf.mxu1  ;;  %v3247_v4 = vshll.u32 %v11733_v32, 16  ;;  %v3603_v28 = vunpack.c.l.b16 %v3236_v60  ;;  %v3240_v56 = vrot.slane %v3238_v7, 4 }
 0x18d   : > { %v3243_v17 = vrot.slane %v3241_v0, 5  ;;  %v3253_v29 = vrot.slane %v3251_v36, 4  ;;  %v1309_v13 = vpack.c.b16 %v1293_v58, %v1292_v41  ;;  %v3257_v7 = vshll.u32 %v11760_v55, 16  ;;  %v9711_v58 = vld [vmem:[%s10819_s7 + $0x30] sm:$0xf] }
 0x18e   : > { %v2376_v43 = vpop.f32.mrf.mxu0  ;;  %v11740_v52 = vpop.f32.mrf.mxu3  ;;  %v3249_v40 = vrot.slane %v3247_v4, 5  ;;  %v3634_v31 = vpack.c.b16 %v3603_v28, %v3602_v51  ;;  %v3262_v25 = vshrl.u32 %v9711_v58, 16 }
 0x18f   : > { %v1409_v30 = vpop.f32.mrf.mxu2  ;;  %9580 = vmatmul.msk.bf16.gmra.mxu1 %vm727_vm0, %v2684_v24  ;;  %v3244_v54 = vor.u32 %v3243_v17, %v3240_v56  ;;  %v3259_v36 = vrot.slane %v3257_v7, 5  ;;  %v3265_v17 = vshll.u32 %v9711_v58, 16 }
 0x190   : > { %v1471_v49 = vadd.f32 %v1409_v30, %v11322_v1  ;;  %v3899_v30 = vrot.slane %v3897_v62, 4  ;;  %v3254_v60 = vor.u32 %v3253_v29, %v3249_v40 }
 0x191   : > { %v3267_v7 = vrot.slane %v3265_v17, 5  ;;  %v11819_v17 = vld [vmem:[%s10819_s7 + $0x40] sm:$0xf] }
 0x192   : > { %v1770_v22 = vadd.f32 %v11676_v16, %v1471_v49  ;;  %v3898_v49 = vsel %vm11069_vm6, %v9797_v59, %v3897_v62  ;;  %v3255_v4 = vrot.slane %v3254_v60, 4  ;;  %v3264_v60 = vrot.slane %v3262_v25, 4  ;;  %v9714_v25 = vld [vmem:[%s10819_s7 + $0x3c] sm:$0xf] }
 0x193   : > { %v4012_v28 = vunpack.c.l.b16 %v3898_v49 }
 0x194   : > { %v2436_v1 = vadd.f32 %v11697_v11, %v1770_v22  ;;  %v11757_v24 = vpop.f32.mrf.mxu1  ;;  %v3900_v11 = vrot.slane %v11695_v38, 5 }
 0x196   : > { %v2379_v10 = vpop.f32.mrf.mxu0  ;;  %v11763_v16 = vadd.f32 %v11672_v19, %v2436_v1  ;;  %v1715_v14 = vpop.f32.mrf.mxu3  ;;  %v3901_v0 = vsel %vm11069_vm6, %v3899_v30, %v3900_v11  ;;  %v3260_v1 = vsel %vm10843_vm3, %v3255_v4, %v3259_v36  ;;  %v3904_v11 = vrot.slane %v11733_v32, 5  ;;  %v10415_v32 = vld [vmem:[%s10819_s7 + $0x18] sm:$0xff] }
 0x197   : > { %v1411_v9 = vpop.f32.mrf.mxu2  ;;  %v4013_v62 = vunpack.c.l.b16 %v3901_v0 }
 0x198   : > { %v1472_v21 = vadd.f32 %v1411_v9, %v11348_v18  ;;  %v3245_v18 = vrot.slane %v3244_v54, 4 }
 0x199   : > { %9520 = vmatmul.msk.bf16.gmra.mxu0 %vm727_vm0, %v2274_v44 }
 0x19a   : > { %v1771_v19 = vadd.f32 %v11709_v33, %v1472_v21  ;;  %v11782_v33 = vld [vmem:[%s10819_s7 + $0x34] sm:$0xf]  ;;  %v3250_v56 = vsel %vm10843_vm3, %v3245_v18, %v3249_v40  ;;  %v9782_v21 = vld [vmem:[%s10819_s7 + $0x24] sm:$0xe]  ;;  %v11802_v18 = vld [vmem:[%s10819_s7 + $0x38] sm:$0x1] }
 0x19b   : > { %9765 = vmatmul.msk.bf16.vlgmr.msra.gmra.mxu3 %vm727_vm0, %v3634_v31  ;;  %v3271_v29 = vshll.u32 %v11782_v33, 16  ;;  %v4044_v31 = vpack.c.b16 %v4013_v62, %v4012_v28  ;;  %v3604_v30 = vunpack.c.l.b16 %v3250_v56  ;;  %v9798_v58 = vrot.slane %v9782_v21, 9 }
 0x19c   : > { %9320 = vmatmul.msk.bf16.gmra.mxu2 %vm727_vm0, %v1309_v13  ;;  %v11775_v38 = vadd.f32 %v2376_v43, %v1771_v19  ;;  %v11778_v41 = vpop.f32.mrf.mxu1  ;;  %v3275_v13 = vshrl.u32 %v11782_v33, 16  ;;  %v3907_v28 = vrot.slane %v11760_v55, 5  ;;  %v3268_v62 = vor.u32 %v3267_v7, %v3264_v60 }
 0x19d   : > { %v3273_v19 = vrot.slane %v3271_v29, 5  ;;  %v3295_v21 = vshll.u32 %v11819_v17, 16  ;;  %v3299_v60 = vshrl.u32 %v11819_v17, 16 }
 0x19e   : > { %v2381_v22 = vpop.f32.mrf.mxu0  ;;  %v11784_v51 = vpop.f32.mrf.mxu3  ;;  %v3277_v49 = vrot.slane %v3275_v13, 4  ;;  %v3269_v13 = vrot.slane %v3268_v62, 4 }
 0x19f   : > { %v1414_v44 = vpop.f32.mrf.mxu2 }
 0x1a0   : > { %v1473_v43 = vadd.f32 %v1414_v44, %v11366_v37  ;;  %v3605_v37 = vunpack.c.l.b16 %v3260_v1  ;;  %v3906_v44 = vrot.slane %v3904_v11, 4 }
 0x1a2   : > { %v1772_v9 = vadd.f32 %v11740_v52, %v1473_v43  ;;  %v3635_v36 = vpack.c.b16 %v3605_v37, %v3604_v30  ;;  %v3281_v43 = vshll.u32 %v11802_v18, 16  ;;  %v3908_v55 = vsel %vm11069_vm6, %v3906_v44, %v3907_v28  ;;  %v9783_v44 = vld [vmem:[%s10819_s7 + $0x30] sm:$0xe] }
 0x1a3   : > { %v3286_v37 = vshrl.u32 %v9714_v25, 16 }
 0x1a4   : > { %v2438_v59 = vadd.f32 %v2379_v10, %v1772_v9  ;;  %v11796_v54 = vpop.f32.mrf.mxu1 }
 0x1a5   : > { %v3288_v28 = vrot.slane %v3286_v37, 4 }
 0x1a6   : > { %v2384_v40 = vpop.f32.mrf.mxu0  ;;  %v11799_v0 = vadd.f32 %v11730_v46, %v2438_v59  ;;  %v11804_v10 = vpop.f32.mrf.mxu3  ;;  %v3278_v46 = vor.u32 %v3277_v49, %v3273_v19 }
 0x1a7   : > { %v1416_v52 = vpop.f32.mrf.mxu2 }
 0x1a8   : > { %v1474_v4 = vadd.f32 %v1416_v52, %v11391_v47  ;;  %v3905_v47 = vsel %vm11069_vm6, %v9798_v58, %v3904_v11  ;;  %v3279_v9 = vrot.slane %v3278_v46, 4  ;;  %v3289_v11 = vshll.u32 %v9714_v25, 16 }
 0x1a9   : > { %9825 = vmatmul.msk.bf16.vlgmr.msra.gmra.mxu0 %vm727_vm0, %v4044_v31  ;;  %v3283_v31 = vrot.slane %v3281_v43, 5  ;;  %v4014_v49 = vunpack.c.l.b16 %v3905_v47  ;;  %v4015_v52 = vunpack.c.l.b16 %v3908_v55  ;;  %v3911_v58 = vrot.slane %v11782_v33, 5  ;;  %v11839_v55 = vld [vmem:[%s10819_s7 + $0x44] sm:$0x1] }
 0x1aa   : > { %v1773_v56 = vadd.f32 %v1715_v14, %v1474_v4  ;;  %v3274_v4 = vsel %vm10843_vm3, %v3269_v13, %v3273_v19  ;;  %v3291_v62 = vrot.slane %v3289_v11, 5  ;;  %v3297_v46 = vrot.slane %v3295_v21, 5 }
 0x1ab   : > { %9766 = vmatmul.msk.bf16.gmra.mxu3 %vm727_vm0, %v3635_v36  ;;  %v3301_v43 = vrot.slane %v3299_v60, 4  ;;  %v3606_v47 = vunpack.c.l.b16 %v3274_v4  ;;  %v3913_v33 = vrot.slane %v3911_v58, 4  ;;  %v3305_v11 = vshll.u32 %v11839_v55, 16  ;;  %v10416_v60 = vld [vmem:[%s10819_s7 + $0x24] sm:$0xff] }
 0x1ac   : > { %9689 = vmatmul.msk.bf16.vlgmr.msra.gmra.mxu2 %vm727_vm0, %v10415_v32  ;;  %v11812_v1 = vadd.f32 %v2381_v22, %v1773_v56  ;;  %v11823_v14 = vpop.f32.mrf.mxu1  ;;  %v10488_v22 = vld [vmem:[%s14803_s3 + $0x18] sm:$0xff]  ;;  %v3284_v32 = vsel %vm10843_vm3, %v3279_v9, %v3283_v31  ;;  %v4045_v56 = vpack.c.b16 %v4015_v52, %v4014_v49  ;;  %v3292_v37 = vor.u32 %v3291_v62, %v3288_v28  ;;  %v11862_v28 = vld [vmem:[%s10819_s7 + $0x4c] sm:$0xf] }
 0x1ad   : > { %8059 = vmatpush.bf16.msra.mxu1 %v10488_v22  ;;  %v3607_v25 = vunpack.c.l.b16 %v3284_v32  ;;  %v3307_v32 = vrot.slane %v3305_v11, 5 }
 0x1ae   : > { %v2386_v29 = vpop.f32.mrf.mxu0  ;;  %v1723_v30 = vpop.f32.mrf.mxu3  ;;  %v3293_v52 = vrot.slane %v3292_v37, 4 }
 0x1af   : > { %v1419_v59 = vpop.f32.mrf.mxu2 }
 0x1b0   : > { %v1475_v7 = vadd.f32 %v1419_v59, %v11124_v61  ;;  %v3914_v59 = vrot.slane %v11802_v18, 5 }
 0x1b2   : > { %v1774_v36 = vadd.f32 %v11784_v51, %v1475_v7  ;;  %v9799_v51 = vrot.slane %v9783_v44, 9  ;;  %v3636_v7 = vpack.c.b16 %v3607_v25, %v3606_v47  ;;  %v3915_v18 = vsel %vm11069_vm6, %v3913_v33, %v3914_v59 }
 0x1b3   : > { %v4017_v62 = vunpack.c.l.b16 %v3915_v18  ;;  %v3319_v33 = vshll.u32 %v11862_v28, 16 }
 0x1b4   : > { %v2440_v61 = vadd.f32 %v2384_v40, %v1774_v36  ;;  %v11841_v13 = vpop.f32.mrf.mxu1  ;;  %v3302_v40 = vor.u32 %v3301_v43, %v3297_v46  ;;  %v3912_v49 = vsel %vm11069_vm6, %v9799_v51, %v3911_v58 }
 0x1b6   : > { %v2389_v19 = vpop.f32.mrf.mxu0  ;;  %v11844_v9 = vadd.f32 %v11778_v41, %v2440_v61  ;;  %v1725_v22 = vpop.f32.mrf.mxu3  ;;  %v3303_v4 = vrot.slane %v3302_v40, 4 }
 0x1b7   : > { %v1421_v31 = vpop.f32.mrf.mxu2 }
 0x1b8   : > { %v1476_v21 = vadd.f32 %v1421_v31, %v11139_v42  ;;  %v9717_v42 = vld [vmem:[%s10819_s7 + $0x48] sm:$0xf]  ;;  %v3323_v31 = vshrl.u32 %v11862_v28, 16 }
 0x1b9   : > { %9826 = vmatmul.msk.bf16.gmra.mxu0 %vm727_vm0, %v4045_v56  ;;  %v3298_v56 = vsel %vm10843_vm3, %v3293_v52, %v3297_v46  ;;  %v3310_v47 = vshrl.u32 %v9717_v42, 16  ;;  %v3313_v51 = vshll.u32 %v9717_v42, 16  ;;  %v11876_v52 = vld [vmem:[%s10819_s7 + $0x50] sm:$0x1] }
 0x1ba   : > { %v1775_v41 = vadd.f32 %v11804_v10, %v1476_v21  ;;  %v4016_v10 = vunpack.c.l.b16 %v3912_v49  ;;  %v3608_v40 = vunpack.c.l.b16 %v3298_v56  ;;  %v3918_v21 = vrot.slane %v11819_v17, 5 }
 0x1bb   : > { %9767 = vmatmul.msk.bf16.gmra.mxu3 %vm727_vm0, %v3636_v7  ;;  %v9784_v7 = vld [vmem:[%s10819_s7 + $0x3c] sm:$0xe]  ;;  %v3321_v49 = vrot.slane %v3319_v33, 5  ;;  %v3325_v18 = vrot.slane %v3323_v31, 4  ;;  %v3921_v17 = vrot.slane %v11839_v55, 5 }
 0x1bc   : > { %9690 = vmatmul.msk.bf16.gmra.mxu2 %vm727_vm0, %v10416_v60  ;;  %v11857_v36 = vadd.f32 %v2386_v29, %v1775_v41  ;;  %v11864_v43 = vpop.f32.mrf.mxu1  ;;  %v3308_v29 = vsel %vm10843_vm3, %v3303_v4, %v3307_v32  ;;  %v4046_v37 = vpack.c.b16 %v4017_v62, %v4016_v10  ;;  %v3312_v60 = vrot.slane %v3310_v47, 4 }
 0x1bd   : > { %v3609_v11 = vunpack.c.l.b16 %v3308_v29  ;;  %v3315_v41 = vrot.slane %v3313_v51, 5  ;;  %v9800_v10 = vrot.slane %v9784_v7, 9  ;;  %v3920_v62 = vrot.slane %v3918_v21, 4 }
 0x1be   : > { %v2391_v44 = vpop.f32.mrf.mxu0  ;;  %v1728_v61 = vpop.f32.mrf.mxu3  ;;  %v3329_v47 = vshll.u32 %v11876_v52, 16 }
 0x1bf   : > { %v1424_v58 = vpop.f32.mrf.mxu2  ;;  %v3637_v42 = vpack.c.b16 %v3609_v11, %v3608_v40  ;;  %v3316_v29 = vor.u32 %v3315_v41, %v3312_v60  ;;  %v3919_v51 = vsel %vm11069_vm6, %v9800_v10, %v3918_v21  ;;  %v3922_v55 = vsel %vm11069_vm6, %v3920_v62, %v3921_v17  ;;  %v9720_v40 = vld [vmem:[%s10819_s7 + $0x54] sm:$0xf]  ;;  %v11903_v11 = vld [vmem:[%s10819_s7 + $0x58] sm:$0xf] }
 0x1c0   : > { %v1477_v25 = vadd.f32 %v1424_v58, %v11161_v15  ;;  %v10417_v58 = vld [vmem:[%s10819_s7 + $0x30] sm:$0xff]  ;;  %v4019_v7 = vunpack.c.l.b16 %v3922_v55  ;;  %v3343_v10 = vshll.u32 %v11903_v11, 16  ;;  %v3347_v62 = vshrl.u32 %v11903_v11, 16 }
 0x1c1   : > { %v3317_v33 = vrot.slane %v3316_v29, 4 }
 0x1c2   : > { %v1776_v59 = vadd.f32 %v1723_v30, %v1477_v25 }
 0x1c3   : > { %v3322_v41 = vsel %vm10843_vm3, %v3317_v33, %v3321_v49  ;;  %v3345_v33 = vrot.slane %v3343_v10, 5 }
 0x1c4   : > { %v2442_v46 = vadd.f32 %v2389_v19, %v1776_v59  ;;  %v11887_v56 = vpop.f32.mrf.mxu1  ;;  %v3331_v59 = vrot.slane %v3329_v47, 5  ;;  %v3610_v29 = vunpack.c.l.b16 %v3322_v41 }
 0x1c6   : > { %v2394_v15 = vpop.f32.mrf.mxu0  ;;  %v11879_v4 = vadd.f32 %v11823_v14, %v2442_v46  ;;  %v11881_v30 = vpop.f32.mrf.mxu3  ;;  %v3326_v14 = vor.u32 %v3325_v18, %v3321_v49  ;;  %v4018_v46 = vunpack.c.l.b16 %v3919_v51  ;;  %v3925_v49 = vrot.slane %v11862_v28, 5 }
 0x1c7   : > { %v1426_v32 = vpop.f32.mrf.mxu2 }
 0x1c8   : > { %v1478_v19 = vadd.f32 %v1426_v32, %v11177_v53  ;;  %v3327_v31 = vrot.slane %v3326_v14, 4  ;;  %v3334_v32 = vshrl.u32 %v9720_v40, 16 }
 0x1c9   : > { %9827 = vmatmul.msk.bf16.gmra.mxu0 %vm727_vm0, %v4046_v37 }
 0x1ca   : > { %v1777_v25 = vadd.f32 %v1725_v22, %v1478_v19  ;;  %v10487_v22 = vld [vmem:[%s14803_s3 + $0x10] sm:$0xff]  ;;  %v3332_v18 = vsel %vm10843_vm3, %v3327_v31, %v3331_v59  ;;  %v3336_v51 = vrot.slane %v3334_v32, 4  ;;  %v3349_v31 = vrot.slane %v3347_v62, 4  ;;  %v9723_v62 = vld [vmem:[%s10819_s7 + $0x60] sm:$0xf] }
 0x1cb   : > { %9768 = vmatmul.msk.bf16.gmra.mxu3 %vm727_vm0, %v3637_v42  ;;  %8060 = vmatpush.bf16.msra.mxu1 %v10487_v22  ;;  %v3337_v42 = vshll.u32 %v9720_v40, 16  ;;  %v3611_v14 = vunpack.c.l.b16 %v3332_v18  ;;  %v11922_v22 = vld [vmem:[%s10819_s7 + $0x5c] sm:$0x1] }
 0x1cc   : > { %9691 = vmatmul.msk.bf16.gmra.mxu2 %vm727_vm0, %v10417_v58  ;;  %v11895_v53 = vadd.f32 %v2391_v44, %v1777_v25  ;;  %v11914_v19 = vpop.f32.mrf.mxu1  ;;  %v4047_v58 = vpack.c.b16 %v4019_v7, %v4018_v46  ;;  %v9785_v25 = vld [vmem:[%s10819_s7 + $0x48] sm:$0xe]  ;;  %v3927_v7 = vrot.slane %v3925_v49, 4  ;;  %v3350_v18 = vor.u32 %v3349_v31, %v3345_v33 }
 0x1cd   : > { %v3339_v55 = vrot.slane %v3337_v42, 5  ;;  %v3638_v28 = vpack.c.b16 %v3611_v14, %v3610_v29  ;;  %v9801_v46 = vrot.slane %v9785_v25, 9  ;;  %v3358_v25 = vshrl.u32 %v9723_v62, 16 }
 0x1ce   : > { %v2396_v37 = vpop.f32.mrf.mxu0  ;;  %v11905_v60 = vpop.f32.mrf.mxu3 }
 0x1cf   : > { %v1429_v21 = vpop.f32.mrf.mxu2  ;;  %v3340_v41 = vor.u32 %v3339_v55, %v3336_v51  ;;  %v3361_v51 = vshll.u32 %v9723_v62, 16 }
 0x1d0   : > { %v1479_v44 = vadd.f32 %v1429_v21, %v11199_v27 }
 0x1d2   : > { %v1778_v17 = vadd.f32 %v1728_v61, %v1479_v44  ;;  %v3928_v44 = vrot.slane %v11876_v52, 5 }
 0x1d4   : > { %v2444_v27 = vadd.f32 %v2394_v15, %v1778_v17  ;;  %v10418_v15 = vld [vmem:[%s10819_s7 + $0x3c] sm:$0xff]  ;;  %v11936_v10 = vpop.f32.mrf.mxu1  ;;  %v11940_v17 = vld [vmem:[%s10819_s7 + $0x64] sm:$0xf] }
 0x1d5   : > { %14826 = vst [vmem:[#allocation18_spill] sm:$0xff] %v11936_v10  ;;  %v3371_v55 = vshrl.u32 %v11940_v17, 16 }
 0x1d6   : > { %v2399_v47 = vpop.f32.mrf.mxu0  ;;  %v11919_v59 = vadd.f32 %v11864_v43, %v2444_v27  ;;  %v1735_v40 = vpop.f32.mrf.mxu3  ;;  %v3353_v43 = vshll.u32 %v11922_v22, 16  ;;  %v3341_v27 = vrot.slane %v3340_v41, 4  ;;  %v3360_v41 = vrot.slane %v3358_v25, 4 }
 0x1d7   : > { %v1431_v61 = vpop.f32.mrf.mxu2  ;;  %v3935_v25 = vrot.slane %v11922_v22, 5 }
 0x1d8   : > { %14825 = vst [vmem:[#allocation17_spill] sm:$0xff] %v11919_v59  ;;  %v1480_v21 = vadd.f32 %v1431_v61, %v11215_v2  ;;  %v3926_v2 = vsel %vm11069_vm6, %v9801_v46, %v3925_v49  ;;  %v3355_v29 = vrot.slane %v3353_v43, 5  ;;  %v3367_v49 = vshll.u32 %v11940_v17, 16 }
 0x1d9   : > { %9828 = vmatmul.msk.bf16.gmra.mxu0 %vm727_vm0, %v4047_v58  ;;  %v3929_v58 = vsel %vm11069_vm6, %v3927_v7, %v3928_v44  ;;  %v4020_v61 = vunpack.c.l.b16 %v3926_v2  ;;  %v3932_v7 = vrot.slane %v11903_v11, 5  ;;  %v9786_v44 = vld [vmem:[%s10819_s7 + $0x54] sm:$0xe] }
 0x1da   : > { %v1779_v32 = vadd.f32 %v11881_v30, %v1480_v21  ;;  %v3351_v30 = vrot.slane %v3350_v18, 4  ;;  %v4021_v21 = vunpack.c.l.b16 %v3929_v58  ;;  %v3363_v18 = vrot.slane %v3361_v51, 5 }
 0x1db   : > { %9769 = vmatmul.msk.bf16.gmra.mxu3 %vm727_vm0, %v3638_v28  ;;  %v3369_v43 = vrot.slane %v3367_v49, 5 }
 0x1dc   : > { %9692 = vmatmul.msk.bf16.gmra.mxu2 %vm727_vm0, %v10418_v15  ;;  %v11931_v42 = vadd.f32 %v2396_v37, %v1779_v32  ;;  %v3346_v15 = vsel %vm10843_vm3, %v3341_v27, %v3345_v33  ;;  %v3356_v28 = vsel %vm10843_vm3, %v3351_v30, %v3355_v29  ;;  %v3373_v32 = vrot.slane %v3371_v55, 4  ;;  %v2814_v30 = vpop.f32.mrf.mxu1 }
 0x1dd   : > { %v3612_v2 = vunpack.c.l.b16 %v3346_v15  ;;  %v3613_v58 = vunpack.c.l.b16 %v3356_v28  ;;  %v3934_v29 = vrot.slane %v3932_v7, 4  ;;  %v3364_v51 = vor.u32 %v3363_v18, %v3360_v41 }
 0x1de   : > { %v2401_v52 = vpop.f32.mrf.mxu0  ;;  %v11944_v14 = vpop.f32.mrf.mxu3 }
 0x1df   : > { %v1434_v37 = vpop.f32.mrf.mxu2  ;;  %v3936_v28 = vsel %vm11069_vm6, %v3934_v29, %v3935_v25  ;;  %v3365_v22 = vrot.slane %v3364_v51, 4 }
 0x1e0   : > { %v1481_v31 = vadd.f32 %v1434_v37, %v11237_v48  ;;  %v4048_v48 = vpack.c.b16 %v4021_v21, %v4020_v61  ;;  %v11957_v37 = vld [vmem:[%s10819_s7 + $0x68] sm:$0x1] }
 0x1e1   : > { %v3377_v49 = vshll.u32 %v11957_v37, 16  ;;  %v10419_v61 = vld [vmem:[%s10819_s7 + $0x48] sm:$0xff] }
 0x1e2   : > { %v1780_v46 = vadd.f32 %v11905_v60, %v1481_v31  ;;  %v9802_v60 = vrot.slane %v9786_v44, 9 }
 0x1e3   : > { %v3379_v44 = vrot.slane %v3377_v49, 5 }
 0x1e4   : > { %v2446_v62 = vadd.f32 %v2399_v47, %v1780_v46  ;;  %v3374_v47 = vor.u32 %v3373_v32, %v3369_v43  ;;  %v3933_v15 = vsel %vm11069_vm6, %v9802_v60, %v3932_v7  ;;  %v11977_v32 = vld [vmem:[%s10819_s7 + $0x70] sm:$0xf]  ;;  %v10486_v7 = vld [vmem:[%s14803_s3 + $0x8] sm:$0xff] }
 0x1e5   : > { %8061 = vmatpush.bf16.msra.mxu1 %v10486_v7  ;;  %v3391_v51 = vshll.u32 %v11977_v32, 16 }
 0x1e6   : > { %v2404_v33 = vpop.f32.mrf.mxu0  ;;  %v11960_v27 = vadd.f32 %v11914_v19, %v2446_v62  ;;  %v1740_v31 = vpop.f32.mrf.mxu3  ;;  %v3639_v19 = vpack.c.b16 %v3613_v58, %v3612_v2  ;;  %v3375_v46 = vrot.slane %v3374_v47, 4  ;;  %v4023_v62 = vunpack.c.l.b16 %v3936_v28 }
 0x1e7   : > { %v1436_v11 = vpop.f32.mrf.mxu2  ;;  %v3370_v58 = vsel %vm10843_vm3, %v3365_v22, %v3369_v43  ;;  %v3395_v47 = vshrl.u32 %v11977_v32, 16  ;;  %v3393_v22 = vrot.slane %v3391_v51, 5 }
 0x1e8   : > { %14827 = vst [vmem:[#allocation19_spill] sm:$0xff] %v11960_v27  ;;  %v1482_v55 = vadd.f32 %v1436_v11, %v11253_v63  ;;  %v9726_v63 = vld [vmem:[%s10819_s7 + $0x6c] sm:$0xf]  ;;  %v11987_v11 = vpop.f32.mrf.mxu1  ;;  %v3614_v43 = vunpack.c.l.b16 %v3370_v58  ;;  %v3942_v58 = vrot.slane %v11957_v37, 5 }
 0x1e9   : > { %9829 = vmatmul.msk.bf16.gmra.mxu0 %vm727_vm0, %v4048_v48  ;;  %v3382_v60 = vshrl.u32 %v9726_v63, 16  ;;  %14829 = vst [vmem:[#allocation21_spill] sm:$0xff] %v11987_v11  ;;  %v3385_v25 = vshll.u32 %v9726_v63, 16  ;;  %v11995_v63 = vld [vmem:[%s10819_s7 + $0x74] sm:$0x1] }
 0x1ea   : > { %v1781_v21 = vadd.f32 %v1735_v40, %v1482_v55  ;;  %v4022_v40 = vunpack.c.l.b16 %v3933_v15 }
 0x1eb   : > { %9770 = vmatmul.msk.bf16.gmra.mxu3 %vm727_vm0, %v3639_v19  ;;  %v3939_v19 = vrot.slane %v11940_v17, 5  ;;  %v3387_v28 = vrot.slane %v3385_v25, 5 }
 0x1ec   : > { %9693 = vmatmul.msk.bf16.gmra.mxu2 %vm727_vm0, %v10419_v61  ;;  %v11972_v41 = vadd.f32 %v2401_v52, %v1781_v21  ;;  %v3380_v52 = vsel %vm10843_vm3, %v3375_v46, %v3379_v44  ;;  %v4049_v55 = vpack.c.b16 %v4023_v62, %v4022_v40  ;;  %v3384_v21 = vrot.slane %v3382_v60, 4 }
 0x1ed   : > { %v3615_v61 = vunpack.c.l.b16 %v3380_v52  ;;  %v3397_v46 = vrot.slane %v3395_v47, 4  ;;  %v3941_v62 = vrot.slane %v3939_v19, 4  ;;  %v10420_v52 = vld [vmem:[%s10819_s7 + $0x54] sm:$0xff] }
 0x1ee   : > { %14828 = vst [vmem:[#allocation20_spill] sm:$0xff] %v11972_v41  ;;  %v2406_v18 = vpop.f32.mrf.mxu0  ;;  %v1743_v2 = vpop.f32.mrf.mxu3 }
 0x1ef   : > { %v1439_v48 = vpop.f32.mrf.mxu2  ;;  %v3398_v60 = vor.u32 %v3397_v46, %v3393_v22  ;;  %v3943_v47 = vsel %vm11069_vm6, %v3941_v62, %v3942_v58 }
 0x1f0   : > { %v1483_v29 = vadd.f32 %v1439_v48, %v11275_v3  ;;  %v9787_v3 = vld [vmem:[%s10819_s7 + $0x60] sm:$0xe]  ;;  %v2819_v25 = vpop.f32.mrf.mxu1 }
 0x1f1   : > { %v9803_v40 = vrot.slane %v9787_v3, 9  ;;  %v4025_v3 = vunpack.c.l.b16 %v3943_v47  ;;  %v9788_v47 = vld [vmem:[%s10819_s7 + $0x6c] sm:$0xe] }
 0x1f2   : > { %v1782_v49 = vadd.f32 %v11944_v14, %v1483_v29  ;;  %v3640_v14 = vpack.c.b16 %v3615_v61, %v3614_v43  ;;  %v3401_v29 = vshll.u32 %v11995_v63, 16  ;;  %v9729_v61 = vld [vmem:[%s10819_s7 + $0x78] sm:$0xf] }
 0x1f3   : > { %v3940_v51 = vsel %vm11069_vm6, %v9803_v40, %v3939_v19  ;;  %v3409_v40 = vshll.u32 %v9729_v61, 16 }
 0x1f4   : > { %v2448_v15 = vadd.f32 %v2404_v33, %v1782_v49  ;;  %v3388_v33 = vor.u32 %v3387_v28, %v3384_v21  ;;  %v3399_v49 = vrot.slane %v3398_v60, 4  ;;  %v12014_v21 = vld [vmem:[%s10819_s7 + $0x7c] sm:$0xf]  ;;  %v4024_v19 = vunpack.c.l.b16 %v3940_v51 }
 0x1f5   : > { %v14832_v28 = vld [vmem:[#allocation6_spill] sm:$0xff]  ;;  %v3415_v62 = vshll.u32 %v12014_v21, 16  ;;  %v3419_v58 = vshrl.u32 %v12014_v21, 16 }
 0x1f6   : > { %v2409_v44 = vpop.f32.mrf.mxu0  ;;  %v11997_v7 = vadd.f32 %v2814_v30, %v2448_v15  ;;  %v1745_v11 = vpop.f32.mrf.mxu3  ;;  %v3389_v37 = vrot.slane %v3388_v33, 4 }
 0x1f7   : > { %v1441_v48 = vpop.f32.mrf.mxu2 }
 0x1f8   : > { %14830 = vst [vmem:[#allocation22_spill] sm:$0xff] %v11997_v7  ;;  %v1484_v17 = vadd.f32 %v1441_v48, %v11291_v45  ;;  %v12025_v60 = vpop.f32.mrf.mxu1 }
 0x1f9   : > { %9830 = vmatmul.msk.bf16.gmra.mxu0 %vm727_vm0, %v4049_v55  ;;  %v3403_v55 = vrot.slane %v3401_v29, 5  ;;  %14833 = vst [vmem:[#allocation6_spill] sm:$0xff] %v12025_v60 }
 0x1fa   : > { %v1783_v30 = vadd.f32 %v1740_v31, %v1484_v17 }
 0x1fb   : > { %9771 = vmatmul.msk.bf16.gmra.mxu3 %vm727_vm0, %v3640_v14  ;;  %v3404_v48 = vsel %vm10843_vm3, %v3399_v49, %v3403_v55  ;;  %v3406_v14 = vshrl.u32 %v9729_v61, 16  ;;  %v3411_v49 = vrot.slane %v3409_v40, 5  ;;  %v3417_v55 = vrot.slane %v3415_v62, 5 }
 0x1fc   : > { %9694 = vmatmul.msk.bf16.gmra.mxu2 %vm727_vm0, %v10420_v52  ;;  %v12009_v45 = vadd.f32 %v2406_v18, %v1783_v30  ;;  %v3394_v18 = vsel %vm10843_vm3, %v3389_v37, %v3393_v22  ;;  %v4050_v52 = vpack.c.b16 %v4025_v3, %v4024_v19  ;;  %v3617_v30 = vunpack.c.l.b16 %v3404_v48 }
 0x1fd   : > { %v3616_v29 = vunpack.c.l.b16 %v3394_v18  ;;  %v3946_v22 = vrot.slane %v11977_v32, 5  ;;  %v3408_v37 = vrot.slane %v3406_v14, 4  ;;  %v3421_v61 = vrot.slane %v3419_v58, 4 }
 0x1fe   : > { %14831 = vst [vmem:[#allocation23_spill] sm:$0xff] %v12009_v45  ;;  %v2411_v43 = vpop.f32.mrf.mxu0  ;;  %v12016_v15 = vpop.f32.mrf.mxu3  ;;  %v9804_v18 = vrot.slane %v9788_v47, 9  ;;  %v3949_v14 = vrot.slane %v11995_v63, 5  ;;  %v12125_v45 = vld [vmem:[%s10819_s7 + $0x98] sm:$0x1] }
 0x1ff   : > { %v1444_v31 = vpop.f32.mrf.mxu2  ;;  %v3641_v32 = vpack.c.b16 %v3617_v30, %v3616_v29  ;;  %v3948_v48 = vrot.slane %v3946_v22, 4  ;;  %v3412_v40 = vor.u32 %v3411_v49, %v3408_v37  ;;  %v12049_v29 = vld [vmem:[%s10819_s7 + $0x88] sm:$0xf] }
 0x200   : > { %v1485_v46 = vadd.f32 %v1444_v31, %v14832_v28  ;;  %v12032_v28 = vld [vmem:[%s10819_s7 + $0x80] sm:$0x1]  ;;  %v2824_v49 = vpop.f32.mrf.mxu1 }
 0x201   : > { %v3425_v62 = vshll.u32 %v12032_v28, 16  ;;  %v3950_v63 = vsel %vm11069_vm6, %v3948_v48, %v3949_v14  ;;  %v3413_v47 = vrot.slane %v3412_v40, 4 }
 0x202   : > { %v1784_v17 = vadd.f32 %v1743_v2, %v1485_v46  ;;  %v10421_v46 = vld [vmem:[%s10819_s7 + $0x60] sm:$0xff]  ;;  %v4027_v14 = vunpack.c.l.b16 %v3950_v63 }
 0x203   : > { %v3418_v40 = vsel %vm10843_vm3, %v3413_v47, %v3417_v55  ;;  %v12073_v47 = vld [vmem:[%s10819_s7 + $0x8c] sm:$0x1] }
 0x204   : > { %v2450_v33 = vadd.f32 %v2409_v44, %v1784_v17  ;;  %v14835_v44 = vld [vmem:[#allocation7_spill] sm:$0xff] }
 0x206   : > { %v2414_v51 = vpop.f32.mrf.mxu0  ;;  %v12029_v31 = vadd.f32 %v2819_v25, %v2450_v33  ;;  %v12034_v19 = vpop.f32.mrf.mxu3  ;;  %v3422_v25 = vor.u32 %v3421_v61, %v3417_v55  ;;  %v3947_v33 = vsel %vm11069_vm6, %v9804_v18, %v3946_v22 }
 0x207   : > { %v1446_v2 = vpop.f32.mrf.mxu2  ;;  %v4026_v48 = vunpack.c.l.b16 %v3947_v33  ;;  %v10714_v33 = vmov 0  }
 0x208   : > { %14834 = vst [vmem:[#allocation24_spill] sm:$0xff] %v12029_v31  ;;  %v1486_v3 = vadd.f32 %v1446_v2, %v14835_v44  ;;  %v3423_v37 = vrot.slane %v3422_v25, 4 }
 0x209   : > { %9831 = vmatmul.msk.bf16.gmra.mxu0 %vm727_vm0, %v4050_v52  ;;  %v9732_v52 = vld [vmem:[%s10819_s7 + $0x84] sm:$0xf]  ;;  %4437 = vst [vmem:[#allocation2] sm:$0xf] %v10714_v33 }
 0x20a   : > { %v1785_v58 = vadd.f32 %v1745_v11, %v1486_v3  ;;  %v3427_v11 = vrot.slane %v3425_v62, 5  ;;  %v3430_v22 = vshrl.u32 %v9732_v52, 16  ;;  %v3433_v44 = vshll.u32 %v9732_v52, 16  ;;  %4438 = vst [vmem:[#allocation2 + $0x4] sm:$0xf] %v10714_v33 }
 0x20b   : > { %9772 = vmatmul.msk.bf16.gmra.mxu3 %vm727_vm0, %v3641_v32  ;;  %v3439_v3 = vshll.u32 %v12049_v29, 16  ;;  %v14837_v32 = vld [vmem:[#allocation8_spill] sm:$0xff]  ;;  %v3953_v52 = vrot.slane %v12014_v21, 5  ;;  %4439 = vst [vmem:[#allocation2 + $0x8] sm:$0x1] %v10714_v33 }
 0x20c   : > { %9695 = vmatmul.msk.bf16.gmra.mxu2 %vm727_vm0, %v10421_v46  ;;  %v12042_v17 = vadd.f32 %v2411_v43, %v1785_v58  ;;  %v10485_v43 = vld [vmem:[%s14803_s3] sm:$0xff]  ;;  %v3443_v46 = vshrl.u32 %v12049_v29, 16  ;;  %v3428_v25 = vsel %vm10843_vm3, %v3423_v37, %v3427_v11  ;;  %v9789_v58 = vld [vmem:[%s10819_s7 + $0x78] sm:$0xe]  ;;  %v3432_v60 = vrot.slane %v3430_v22, 4 }
 0x20d   : > { %8062 = vmatpush.bf16.msra.mxu1 %v10485_v43  ;;  %v12070_v31 = vrot.slane %v3439_v3, 5  ;;  %v4051_v43 = vpack.c.b16 %v4027_v14, %v4026_v48  ;;  %v3619_v55 = vunpack.c.l.b16 %v3428_v25  ;;  %v9805_v11 = vrot.slane %v9789_v58, 9  ;;  %v14839_v48 = vld [vmem:[#allocation9_spill] sm:$0xff]  ;;  %4441 = vst [vmem:[#allocation2 + $0xcc] sm:$0xf] %v10714_v33 }
 0x20e   : > { %14836 = vst [vmem:[#allocation7_spill] sm:$0xff] %v12042_v17  ;;  %v12051_v30 = vpop.f32.mrf.mxu0  ;;  %v12058_v2 = vpop.f32.mrf.mxu3  ;;  %v3435_v17 = vrot.slane %v3433_v44, 5  ;;  %v3955_v21 = vrot.slane %v3953_v52, 4  ;;  %v3956_v22 = vrot.slane %v12032_v28, 5 }
 0x20f   : > { %v1449_v61 = vpop.f32.mrf.mxu2  ;;  %v12085_v28 = vpop.f32.mrf.mxu1  ;;  %4442 = vst [vmem:[#allocation2 + $0xd0] sm:$0xf] %v10714_v33  ;;  %v3954_v25 = vsel %vm11069_vm6, %v9805_v11, %v3953_v52  ;;  %v12107_v11 = vld [vmem:[%s10819_s7 + $0x94] sm:$0xf] }
 0x210   : > { %v1487_v18 = vadd.f32 %v1449_v61, %v14837_v32  ;;  %v3445_v61 = vrot.slane %v3443_v46, 4  ;;  %v3618_v32 = vunpack.c.l.b16 %v3418_v40  ;;  %v3436_v46 = vor.u32 %v3435_v17, %v3432_v60  ;;  %v10422_v40 = vld [vmem:[%s10819_s7 + $0x6c] sm:$0xff]  ;;  %14840 = vst [vmem:[#allocation9_spill] sm:$0xff] %v12085_v28  ;;  %v4447_v58 = vld [vmem:[#allocation2] sm:$0x1] }
 0x211   : > { %v14841_v60 = vmov 0  ;;  %4443 = vst [vmem:[#allocation2 + $0xd4] sm:$0x1] %v10714_v33 }
 0x212   : > { %v1786_v62 = vadd.f32 %v12016_v15, %v1487_v18  ;;  %v3449_v18 = vshll.u32 %v12073_v47, 16  ;;  %v14842_v60 = vsel %vm12089_vm9, 4294967295, %v14841_v60 }
 0x213   : > { %14843 = vst [vmem:[#allocation25_spill] sm:$0xff] %v14842_v60 }
 0x214   : > { %v2452_v63 = vadd.f32 %v2414_v51, %v1786_v62  ;;  %v3446_v51 = vor.u32 %v3445_v61, %v12070_v31  ;;  %v3957_v62 = vsel %vm11069_vm6, %v3955_v21, %v3956_v22  ;;  %v3437_v61 = vrot.slane %v3436_v46, 4 }
 0x215   : > { %v4028_v21 = vunpack.c.l.b16 %v3954_v25  ;;  %v4029_v33 = vunpack.c.l.b16 %v3957_v62 }
 0x216   : > { %v2419_v37 = vpop.f32.mrf.mxu0  ;;  %v12075_v15 = vadd.f32 %v2824_v49, %v2452_v63  ;;  %v12078_v3 = vpop.f32.mrf.mxu3  ;;  %v3642_v49 = vpack.c.b16 %v3619_v55, %v3618_v32  ;;  %v3447_v63 = vrot.slane %v3446_v51, 4  ;;  %v4448_v32 = vsel %vm12089_vm9, 0, %v4447_v58 }
 0x217   : > { %v1451_v44 = vpop.f32.mrf.mxu2  ;;  %4449 = vst [vmem:[#allocation2] sm:$0x1] %v4448_v32  ;;  %v3442_v46 = vsel %vm10843_vm3, %v3437_v61, %v12070_v31  ;;  %v4052_v31 = vpack.c.b16 %v4029_v33, %v4028_v21  ;;  %v2829_v61 = vpop.f32.mrf.mxu1  ;;  %v14847_v21 = vmov 0 }
 0x218   : > { %14838 = vst [vmem:[#allocation8_spill] sm:$0xff] %v12075_v15  ;;  %v1488_v14 = vadd.f32 %v1451_v44, %v14839_v48  ;;  %v3620_v58 = vunpack.c.l.b16 %v3442_v46  ;;  %v14848_v21 = vsel %vm12131_vm11, 4294967295, %v14847_v21 }
 0x219   : > { %9832 = vmatmul.msk.bf16.gmra.mxu0 %vm727_vm0, %v4051_v43  ;;  %v3451_v43 = vrot.slane %v3449_v18, 5  ;;  %v14845_v18 = vld [vmem:[#allocation10_spill] sm:$0xff]  ;;  %14849 = vst [vmem:[#allocation27_spill] sm:$0xff] %v14848_v21 }
 0x21a   : > { %v1787_v17 = vadd.f32 %v12034_v19, %v1488_v14  ;;  %v9735_v19 = vld [vmem:[%s10819_s7 + $0x90] sm:$0xf]  ;;  %v4450_v14 = vld [vmem:[#allocation2 + $0xc] sm:$0x1] }
 0x21b   : > { %9773 = vmatmul.msk.bf16.gmra.mxu3 %vm727_vm0, %v3642_v49  ;;  %v3454_v51 = vshrl.u32 %v9735_v19, 16  ;;  %v3463_v49 = vshll.u32 %v12107_v11, 16  ;;  %v4451_v25 = vsel %vm12089_vm9, 0, %v4450_v14 }
 0x21c   : > { %9696 = vmatmul.msk.bf16.gmra.mxu2 %vm727_vm0, %v10422_v40  ;;  %v12102_v55 = vadd.f32 %v12051_v30, %v1787_v17  ;;  %v3452_v30 = vsel %vm10843_vm3, %v3447_v63, %v3451_v43  ;;  %v3457_v40 = vshll.u32 %v9735_v19, 16  ;;  %v3467_v17 = vshrl.u32 %v12107_v11, 16  ;;  %4452 = vst [vmem:[#allocation2 + $0xc] sm:$0x1] %v4451_v25 }
 0x21d   : > { %v3621_v63 = vunpack.c.l.b16 %v3452_v30  ;;  %v3960_v43 = vrot.slane %v12049_v29, 5  ;;  %v3456_v32 = vrot.slane %v3454_v51, 4  ;;  %v3963_v51 = vrot.slane %v12073_v47, 5 }
 0x21e   : > { %14844 = vst [vmem:[#allocation26_spill] sm:$0xff] %v12102_v55  ;;  %v2421_v52 = vpop.f32.mrf.mxu0  ;;  %v12109_v44 = vpop.f32.mrf.mxu3  ;;  %v10437_v19 = vld [vmem:[#allocation2] sm:$0xff]  ;;  %v3459_v28 = vrot.slane %v3457_v40, 5  ;;  %v3465_v55 = vrot.slane %v3463_v49, 5  ;;  %v3469_v15 = vrot.slane %v3467_v17, 4  ;;  %v10423_v49 = vld [vmem:[%s10819_s7 + $0x78] sm:$0xff] }
 0x21f   : > { %v1454_v22 = vpop.f32.mrf.mxu2  ;;  %8063 = vmatmul.bf16.vlgmr.msra.gmra.mxu1 %v10437_v19  ;;  %v3643_v33 = vpack.c.b16 %v3621_v63, %v3620_v58  ;;  %v3962_v30 = vrot.slane %v3960_v43, 4  ;;  %v4506_v17 = vld [vmem:[#allocation2 + $0x14] sm:$0x1]  ;;  %v9738_v63 = vld [vmem:[%s10819_s7 + $0x9c] sm:$0xf] }
 0x220   : > { %v1489_v48 = vadd.f32 %v1454_v22, %v14845_v18  ;;  %v9790_v18 = vld [vmem:[%s10819_s7 + $0x84] sm:$0xe]  ;;  %v3460_v25 = vor.u32 %v3459_v28, %v3456_v32  ;;  %v4507_v19 = vsel %vm12131_vm11, 0, %v4506_v17 }
 0x221   : > { %v9806_v46 = vrot.slane %v9790_v18, 9  ;;  %4508 = vst [vmem:[#allocation2 + $0x14] sm:$0x1] %v4507_v19  ;;  %v12155_v18 = vld [vmem:[%s10819_s7 + $0xa0] sm:$0xf] }
 0x222   : > { %v1788_v62 = vadd.f32 %v12058_v2, %v1489_v48  ;;  %v14850_v48 = vld [vmem:[#allocation11_spill] sm:$0xff]  ;;  %v9791_v19 = vld [vmem:[%s10819_s7 + $0x90] sm:$0xe] }
 0x223   : > { %v3961_v47 = vsel %vm11069_vm6, %v9806_v46, %v3960_v43 }
 0x224   : > { %v2454_v22 = vadd.f32 %v2419_v37, %v1788_v62  ;;  %v3470_v62 = vor.u32 %v3469_v15, %v3465_v55  ;;  %v3461_v15 = vrot.slane %v3460_v25, 4  ;;  %v4030_v43 = vunpack.c.l.b16 %v3961_v47 }
 0x226   : > { %v4129_v14 = vpop.f32.mrf.mxu0  ;;  %v12127_v2 = vadd.f32 %v2829_v61, %v2454_v22  ;;  %v12135_v37 = vpop.f32.mrf.mxu3  ;;  %v3473_v61 = vshll.u32 %v12125_v45, 16  ;;  %v3964_v22 = vsel %vm11069_vm6, %v3962_v30, %v3963_v51  ;;  %v3471_v28 = vrot.slane %v3470_v62, 4  ;;  %v14852_v51 = vld [vmem:[#allocation12_spill] sm:$0xff] }
 0x227   : > { %v1456_v29 = vpop.f32.mrf.mxu2  ;;  %v4031_v46 = vunpack.c.l.b16 %v3964_v22  ;;  %v3466_v17 = vsel %vm10843_vm3, %v3461_v15, %v3465_v55  ;;  %v3967_v62 = vrot.slane %v12107_v11, 5  ;;  %v12174_v22 = vld [vmem:[%s14802_s2] ss:$0 sm:$0xff]  ;;  %v12179_v15 = vld [vmem:[%s10819_s7 + $0xa4] sm:$0x1] }
 0x228   : > { %14846 = vst [vmem:[#allocation10_spill] sm:$0xff] %v12127_v2  ;;  %v1490_v40 = vadd.f32 %v1456_v29, %v14850_v48  ;;  %v3475_v32 = vrot.slane %v3473_v61, 5  ;;  %v3478_v29 = vshrl.u32 %v9738_v63, 16  ;;  %v3481_v48 = vshll.u32 %v9738_v63, 16  ;;  %v4453_v61 = vld [vmem:[#allocation2 + $0x18] sm:$0x1] }
 0x229   : > { %9833 = vmatmul.msk.bf16.gmra.mxu0 %vm727_vm0, %v4052_v31  ;;  %v4454_v55 = vsel %vm12089_vm9, 0, %v4453_v61  ;;  %v3622_v11 = vunpack.c.l.b16 %v3466_v17  ;;  %v3497_v61 = vshll.u32 %v12179_v15, 16 }
 0x22a   : > { %v1789_v58 = vadd.f32 %v12078_v3, %v1490_v40  ;;  %v3476_v25 = vsel %vm10843_vm3, %v3471_v28, %v3475_v32  ;;  %v3483_v63 = vrot.slane %v3481_v48, 5  ;;  %4455 = vst [vmem:[#allocation2 + $0x18] sm:$0x1] %v4454_v55  ;;  %v9807_v48 = vrot.slane %v9791_v19, 9  ;;  %v9741_v55 = vld [vmem:[%s10819_s7 + $0xa8] sm:$0xf] }
 0x22b   : > { %9774 = vmatmul.msk.bf16.gmra.mxu3 %vm727_vm0, %v3643_v33  ;;  %v3491_v33 = vshrl.u32 %v12155_v18, 16  ;;  %v3623_v28 = vunpack.c.l.b16 %v3476_v25 }
 0x22c   : > { %9697 = vmatmul.msk.bf16.gmra.mxu2 %vm727_vm0, %v10423_v49  ;;  %v12151_v31 = vadd.f32 %v2421_v52, %v1789_v58  ;;  %v3487_v52 = vshll.u32 %v12155_v18, 16  ;;  %v3480_v58 = vrot.slane %v3478_v29, 4 }
 0x22d   : > { %v3493_v29 = vrot.slane %v3491_v33, 4 }
 0x22e   : > { %14851 = vst [vmem:[#allocation11_spill] sm:$0xff] %v12151_v31  ;;  %v12157_v3 = vpop.f32.mrf.mxu0  ;;  %v12159_v30 = vpop.f32.mrf.mxu3  ;;  %v12181_v32 = vrot.slane %v3487_v52, 5  ;;  %v3644_v52 = vpack.c.b16 %v3623_v28, %v3622_v11  ;;  %v3499_v11 = vrot.slane %v3497_v61, 5  ;;  %v3502_v28 = vshrl.u32 %v9741_v55, 16 }
 0x22f   : > { %v3053_v40 = vpop.f32.mrf.mxu2 }
 0x230   : > { %v3133_v49 = vadd.f32 %v3053_v40, %v14852_v51  ;;  %v4053_v40 = vpack.c.b16 %v4031_v46, %v4030_v43  ;;  %v3969_v51 = vrot.slane %v3967_v62, 4  ;;  %v3484_v46 = vor.u32 %v3483_v63, %v3480_v58 }
 0x231   : > { %v3494_v33 = vor.u32 %v3493_v29, %v12181_v32  ;;  %v3968_v58 = vsel %vm11069_vm6, %v9807_v48, %v3967_v62  ;;  %v3505_v29 = vshll.u32 %v9741_v55, 16  ;;  %v10500_v62 = vld [vmem:[%s14803_s3 + $0x78] sm:$0xff] }
 0x232   : > { %v3799_v47 = vadd.f32 %v12109_v44, %v3133_v49  ;;  %v3970_v49 = vrot.slane %v12125_v45, 5  ;;  %v10424_v45 = vld [vmem:[%s10819_s7 + $0x84] sm:$0xff]  ;;  %v3485_v2 = vrot.slane %v3484_v46, 4  ;;  %v10508_v48 = vld [vmem:[%s14803_s3 + $0xb8] sm:$0xff]  ;;  %8144 = vmatpush.bf16.msrb.mxu2 %v10500_v62 }
 0x233   : > { %8233 = vmatpush.bf16.msrb.mxu3 %v10508_v48 }
 0x234   : > { %v4209_v44 = vadd.f32 %v4129_v14, %v3799_v47  ;;  %v3971_v63 = vsel %vm11069_vm6, %v3969_v51, %v3970_v49  ;;  %v12200_v47 = vld [vmem:[%s10819_s7 + $0xac] sm:$0xf]  ;;  %v3495_v51 = vrot.slane %v3494_v33, 4  ;;  %v3504_v33 = vrot.slane %v3502_v28, 4 }
 0x235   : > { %v3511_v49 = vshll.u32 %v12200_v47, 16  ;;  %v3515_v61 = vshrl.u32 %v12200_v47, 16 }
 0x236   : > { %v12184_v43 = vpop.f32.mrf.mxu0  ;;  %v4245_v31 = vadd.f32 %v12174_v22, %v4209_v44  ;;  %v12189_v25 = vpop.f32.mrf.mxu3  ;;  %v4509_v44 = vld [vmem:[#allocation2 + $0x20] sm:$0x1] }
 0x237   : > { %v3055_v17 = vpop.f32.mrf.mxu2  ;;  %v12229_v62 = vrot.slane %v3511_v49, 5  ;;  %v3517_v48 = vrot.slane %v3515_v61, 4 }
 0x238   : > { %v4277_v14 = vadd.f32 3.0, %v4245_v31  ;;  %v3134_v19 = vadd.f32 %v3055_v17, %v11474_v26  ;;  %v4510_v26 = vsel %vm12131_vm11, 0, %v4509_v44  ;;  %v3974_v17 = vrot.slane %v12155_v18, 5 }
 0x239   : > { %9834 = vmatmul.msk.bf16.gmra.mxu0 %vm727_vm0, %v4053_v40  ;;  %v9792_v40 = vld [vmem:[%s10819_s7 + $0x9c] sm:$0xe]  ;;  %4511 = vst [vmem:[#allocation2 + $0x20] sm:$0x1] %v4510_v26  ;;  %v4032_v18 = vunpack.c.l.b16 %v3968_v58  ;;  %v3507_v44 = vrot.slane %v3505_v29, 5  ;;  %v3490_v58 = vsel %vm10843_vm3, %v3485_v2, %v12181_v32 }
 0x23a   : > { %v4309_v7 = vmax.f32 %v4277_v14, 0.0  ;;  %v3800_v27 = vadd.f32 %v12135_v37, %v3134_v19  ;;  %v4033_v14 = vunpack.c.l.b16 %v3971_v63  ;;  %v9808_v19 = vrot.slane %v9792_v40, 9  ;;  %v12233_v40 = vld [vmem:[%s10819_s7 + $0xb0] sm:$0x1] }
 0x23b   : > { %9775 = vmatmul.msk.bf16.gmra.mxu3 %vm727_vm0, %v3644_v52  ;;  %v3500_v63 = vsel %vm10843_vm3, %v3495_v51, %v3499_v11  ;;  %v4456_v11 = vld [vmem:[#allocation2 + $0x24] sm:$0x1]  ;;  %v3624_v49 = vunpack.c.l.b16 %v3490_v58  ;;  %v3521_v61 = vshll.u32 %v12233_v40, 16 }
 0x23c   : > { %v4341_v46 = vmin.f32 %v4309_v7, 6.0  ;;  %v4210_v37 = vadd.f32 %v12157_v3, %v3800_v27  ;;  %9698 = vmatmul.msk.bf16.gmra.mxu2 %vm727_vm0, %v10424_v45  ;;  %v3976_v27 = vrot.slane %v3974_v17, 4  ;;  %v3977_v3 = vrot.slane %v12179_v15, 5 }
 0x23d   : > { %v4054_v15 = vpack.c.b16 %v4033_v14, %v4032_v18 }
 0x23e   : > { %v12218_v55 = vpop.f32.mrf.mxu0  ;;  %v4373_v26 = vmul.f32 %v4341_v46, %v4245_v31  ;;  %v4246_v7 = vadd.f32 %v12174_v22, %v4210_v37  ;;  %v12222_v52 = vpop.f32.mrf.mxu3  ;;  %v3975_v46 = vsel %vm11069_vm6, %v9808_v19, %v3974_v17  ;;  %v3508_v37 = vor.u32 %v3507_v44, %v3504_v33  ;;  %v10516_v33 = vld [vmem:[%s14803_s3 + $0xf8] sm:$0xff] }
 0x23f   : > { %v3058_v45 = vpop.f32.mrf.mxu2  ;;  %v3978_v51 = vsel %vm11069_vm6, %v3976_v27, %v3977_v3  ;;  %v3518_v19 = vor.u32 %v3517_v48, %v12229_v62  ;;  %v10524_v44 = vld [vmem:[%s14803_s3 + $0x138] sm:$0xff]  ;;  %v4034_v27 = vunpack.c.l.b16 %v3975_v46  ;;  %8322 = vmatpush.bf16.msrb.mxu0 %v10516_v33  ;;  %v10425_v46 = vld [vmem:[%s10819_s7 + $0x90] sm:$0xff]  ;;  %v3981_v33 = vrot.slane %v12200_v47, 5 }
 0x240   : > { %v4405_v28 = vmul.f32 0.16666667, %v4373_v26  ;;  %v4278_v29 = vadd.f32 3.0, %v4246_v7  ;;  %v3135_v31 = vadd.f32 %v3058_v45, %v11496_v12  ;;  %v4457_v12 = vsel %vm12089_vm9, 0, %v4456_v11  ;;  %8411 = vmatpush.bf16.msrb.mxu1 %v10524_v44  ;;  %v4512_v44 = vld [vmem:[#allocation2 + $0x2c] sm:$0x1] }
 0x241   : > { %v3625_v26 = vunpack.c.l.b16 %v3500_v63  ;;  %4458 = vst [vmem:[#allocation2 + $0x24] sm:$0x1] %v4457_v12  ;;  %v4035_v3 = vunpack.c.l.b16 %v3978_v51  ;;  %v12253_v45 = vrot.slane %v3508_v37, 4  ;;  %v3519_v51 = vrot.slane %v3518_v19, 4  ;;  %v9744_v12 = vld [vmem:[%s10819_s7 + $0xb4] sm:$0xf] }
 0x242   : > { %v4557_v10 = vpack.c.bf16 %v4405_v28, %v4405_v28  ;;  %v4310_v2 = vmax.f32 %v4278_v29, 0.0  ;;  %v3801_v32 = vadd.f32 %v12159_v30, %v3135_v31  ;;  %v4914_v31 = vld [vmem:[#allocation2 + $0xc] sm:$0xf]  ;;  %v12284_v19 = vld [vmem:[%s10819_s7 + $0xb8] sm:$0xf]  ;;  %v3526_v47 = vshrl.u32 %v9744_v12, 16 }
 0x244   : > { %v4592_v18 = vshrl.u32 %v4557_v10, 16  ;;  %v4342_v14 = vmin.f32 %v4310_v2, 6.0  ;;  %v4211_v17 = vadd.f32 %v12184_v43, %v3801_v32  ;;  %v4595_v43 = vshll.u32 %v4557_v10, 16 }
 0x245   : > { %v3645_v2 = vpack.c.b16 %v3625_v26, %v3624_v49  ;;  %v12267_v10 = vrot.slane %v3521_v61, 5 }
 0x246   : > { %v12245_v30 = vpop.f32.mrf.mxu0  ;;  %v12255_v58 = vrot.slane %v4592_v18, 7  ;;  %v4374_v63 = vmul.f32 %v4342_v14, %v4246_v7  ;;  %v4247_v28 = vadd.f32 %v12174_v22, %v4211_v17  ;;  %v12265_v37 = vpop.f32.mrf.mxu3  ;;  %v12273_v14 = vpack.c.b16 %v4035_v3, %v4034_v27  ;;  %v9793_v17 = vld [vmem:[%s10819_s7 + $0xa8] sm:$0xe] }
 0x247   : > { %v3060_v48 = vpop.f32.mrf.mxu2  ;;  %v4513_v27 = vsel %vm12131_vm11, 0, %v4512_v44  ;;  %v3529_v3 = vshll.u32 %v9744_v12, 16 }
 0x248   : > { %v4597_v7 = vor.u32 %v4595_v43, %v12255_v58  ;;  %v4406_v32 = vmul.f32 0.16666667, %v4374_v63  ;;  %v4279_v11 = vadd.f32 3.0, %v4247_v28  ;;  %v3136_v18 = vadd.f32 %v3060_v48, %v11518_v6  ;;  %4514 = vst [vmem:[#allocation2 + $0x2c] sm:$0x1] %v4513_v27 }
 0x249   : > { %9835 = vmatmul.msk.bf16.gmra.mxu0 %vm727_vm0, %v4054_v15  ;;  %v3514_v15 = vsel %vm10843_vm3, %v12253_v45, %v12229_v62  ;;  %v3524_v62 = vsel %vm10843_vm3, %v3519_v51, %v12267_v10  ;;  %v9809_v45 = vrot.slane %v9793_v17, 9  ;;  %v3983_v48 = vrot.slane %v3981_v33, 4 }
 0x24a   : > { %v4915_v49 = vsel %vm12260_vm13, %v4597_v7, %v4914_v31  ;;  %v4558_v26 = vpack.c.bf16 %v4406_v32, %v4406_v32  ;;  %v4311_v61 = vmax.f32 %v4279_v11, 0.0  ;;  %v3802_v6 = vadd.f32 %v12189_v25, %v3136_v18 }
 0x24b   : > { %4916 = vst [vmem:[#allocation2 + $0xc] sm:$0xf] %v4915_v49  ;;  %9776 = vmatmul.msk.bf16.gmra.mxu3 %vm727_vm0, %v3645_v2  ;;  %v3984_v7 = vrot.slane %v12233_v40, 5  ;;  %v3535_v32 = vshll.u32 %v12284_v19, 16  ;;  %v3539_v2 = vshrl.u32 %v12284_v19, 16  ;;  %v4598_v18 = vrot.slane %v12255_v58, 4 }
 0x24c   : > { %v4600_v43 = vshrl.u32 %v4558_v26, 16  ;;  %v4343_v63 = vmin.f32 %v4311_v61, 6.0  ;;  %9699 = vmatmul.msk.bf16.gmra.mxu2 %vm727_vm0, %v10425_v46  ;;  %v4212_v31 = vadd.f32 %v12218_v55, %v3802_v6  ;;  %v4603_v12 = vshll.u32 %v4558_v26, 16  ;;  %v4918_v55 = vld [vmem:[#allocation2 + $0x14] sm:$0x1] }
 0x24d   : > { %v3528_v49 = vrot.slane %v3526_v47, 4  ;;  %v3531_v26 = vrot.slane %v3529_v3, 5  ;;  %v12311_v27 = vunpack.c.l.b16 %v3514_v15  ;;  %v4459_v3 = vld [vmem:[#allocation2 + $0x30] sm:$0x1] }
 0x24e   : > { %v12295_v25 = vpop.f32.mrf.mxu0  ;;  %v4602_v11 = vrot.slane %v4600_v43, 7  ;;  %v4375_v46 = vmul.f32 %v4343_v63, %v4247_v28  ;;  %v4248_v51 = vadd.f32 %v12174_v22, %v4212_v31  ;;  %v12308_v40 = vpop.f32.mrf.mxu3  ;;  %v12313_v43 = vrot.slane %v3535_v32, 5 }
 0x24f   : > { %v3063_v17 = vpop.f32.mrf.mxu2  ;;  %v3541_v63 = vrot.slane %v3539_v2, 4  ;;  %v4460_v15 = vsel %vm12089_vm9, 0, %v4459_v3  ;;  %v3627_v32 = vunpack.c.l.b16 %v3524_v62 }
 0x250   : > { %v4605_v28 = vor.u32 %v4603_v12, %v4602_v11  ;;  %v4607_v61 = vrot.slane %v4602_v11, 4  ;;  %v4407_v44 = vmul.f32 0.16666667, %v4375_v46  ;;  %v3137_v58 = vadd.f32 %v3063_v17, %v11542_v20  ;;  %v12321_v11 = vld [vmem:[%s10819_s7 + $0xbc] sm:$0x1] }
 0x251   : > { %v4280_v6 = vadd.f32 3.0, %v4248_v51  ;;  %v3982_v12 = vsel %vm11069_vm6, %v9809_v45, %v3981_v33  ;;  %4461 = vst [vmem:[#allocation2 + $0x30] sm:$0x1] %v4460_v15  ;;  %v3545_v62 = vshll.u32 %v12321_v11, 16  ;;  %v3988_v15 = vrot.slane %v12284_v19, 5 }
 0x252   : > { %v4606_v31 = vsel %vm12303_vm15, %v4598_v18, %v4605_v28  ;;  %v4919_v41 = vsel %vm12089_vm9, %v4607_v61, %v4918_v55  ;;  %v4559_v59 = vpack.c.bf16 %v4407_v44, %v4407_v44  ;;  %v3803_v47 = vadd.f32 %v12222_v52, %v3137_v58 }
 0x253   : > { %4917 = vst [vmem:[#allocation2 + $0x10] sm:$0xf] %v4606_v31  ;;  %v4312_v20 = vmax.f32 %v4280_v6, 0.0  ;;  %v3985_v18 = vsel %vm11069_vm6, %v3983_v48, %v3984_v7  ;;  %v3532_v52 = vor.u32 %v3531_v26, %v3528_v49  ;;  %v3542_v28 = vor.u32 %v3541_v63, %v12313_v43  ;;  %v10426_v31 = vld [vmem:[%s10819_s7 + $0x9c] sm:$0xff] }
 0x254   : > { %4920 = vst [vmem:[#allocation2 + $0x14] sm:$0x1] %v4919_v41  ;;  %v4609_v46 = vshrl.u32 %v4559_v59, 16  ;;  %v4213_v2 = vadd.f32 %v12245_v30, %v3803_v47  ;;  %v4612_v41 = vshll.u32 %v4559_v59, 16  ;;  %v4921_v30 = vld [vmem:[#allocation2 + $0x18] sm:$0xf]  ;;  %v3646_v7 = vpack.c.b16 %v3627_v32, %v12311_v27 }
 0x255   : > { %v4344_v55 = vmin.f32 %v4312_v20, 6.0  ;;  %v4036_v49 = vunpack.c.l.b16 %v3982_v12  ;;  %v4037_v26 = vunpack.c.l.b16 %v3985_v18  ;;  %v3533_v59 = vrot.slane %v3532_v52, 4  ;;  %v9747_v47 = vld [vmem:[%s10819_s7 + $0xc0] sm:$0xf]  ;;  %v10507_v52 = vld [vmem:[%s14803_s3 + $0xb0] sm:$0xff] }
 0x256   : > { %v12330_v17 = vpop.f32.mrf.mxu0  ;;  %v12334_v61 = vrot.slane %v4609_v46, 7  ;;  %v4249_v33 = vadd.f32 %v12174_v22, %v4213_v2  ;;  %v12337_v48 = vpop.f32.mrf.mxu3  ;;  %v3543_v3 = vrot.slane %v3542_v28, 4  ;;  %v3547_v20 = vrot.slane %v3545_v62, 5  ;;  %v4515_v2 = vld [vmem:[#allocation2 + $0x38] sm:$0x1]  ;;  %8234 = vmatpush.bf16.msrb.mxu3 %v10507_v52 }
 0x257   : > { %v4376_v45 = vmul.f32 %v4344_v55, %v4248_v51  ;;  %v3065_v44 = vpop.f32.mrf.mxu2  ;;  %v4516_v19 = vsel %vm12131_vm11, 0, %v4515_v2  ;;  %v3550_v55 = vshrl.u32 %v9747_v47, 16  ;;  %v12361_v62 = vpack.c.b16 %v4037_v26, %v4036_v49 }
 0x258   : > { %v4614_v58 = vor.u32 %v4612_v41, %v12334_v61  ;;  %v4281_v6 = vadd.f32 3.0, %v4249_v33  ;;  %v3138_v63 = vadd.f32 %v3065_v44, %v11564_v35  ;;  %v9794_v35 = vld [vmem:[%s10819_s7 + $0xb4] sm:$0xe]  ;;  %4517 = vst [vmem:[#allocation2 + $0x38] sm:$0x1] %v4516_v19  ;;  %v3553_v41 = vshll.u32 %v9747_v47, 16 }
 0x259   : > { %9836 = vmatmul.msk.bf16.gmra.mxu0 %vm727_vm0, %v12273_v14  ;;  %v4408_v51 = vmul.f32 0.16666667, %v4376_v45  ;;  %v10499_v14 = vld [vmem:[%s14803_s3 + $0x70] sm:$0xff]  ;;  %v3538_v44 = vsel %vm10843_vm3, %v3533_v59, %v12313_v43  ;;  %v3990_v26 = vrot.slane %v3988_v15, 4  ;;  %v3991_v43 = vrot.slane %v12321_v11, 5 }
 0x25a   : > { %v4922_v27 = vsel %vm12260_vm13, %v4614_v58, %v4921_v30  ;;  %v4313_v32 = vmax.f32 %v4281_v6, 0.0  ;;  %v3804_v12 = vadd.f32 %v12265_v37, %v3138_v63  ;;  %v10438_v46 = vld [vmem:[#allocation2 + $0xc] sm:$0xff]  ;;  %8145 = vmatpush.bf16.msrb.mxu2 %v10499_v14  ;;  %v9810_v58 = vrot.slane %v9794_v35, 9  ;;  %v4462_v19 = vld [vmem:[#allocation2 + $0x3c] sm:$0x1] }
 0x25b   : > { %4923 = vst [vmem:[#allocation2 + $0x18] sm:$0xf] %v4922_v27  ;;  %v4560_v18 = vpack.c.bf16 %v4408_v51, %v4408_v51  ;;  %8068 = vmatmul.bf16.gmra.mxu1 %v10438_v46  ;;  %9777 = vmatmul.msk.bf16.gmra.mxu3 %vm727_vm0, %v3646_v7  ;;  %v4615_v6 = vrot.slane %v12334_v61, 4  ;;  %v3552_v59 = vrot.slane %v3550_v55, 4 }
 0x25c   : > { %v4345_v28 = vmin.f32 %v4313_v32, 6.0  ;;  %v4214_v37 = vadd.f32 %v12295_v25, %v3804_v12  ;;  %9700 = vmatmul.msk.bf16.gmra.mxu2 %vm727_vm0, %v10426_v31  ;;  %v3548_v25 = vsel %vm10843_vm3, %v3543_v3, %v3547_v20  ;;  %v12374_v31 = vld [vmem:[%s10819_s7 + $0xc4] sm:$0xf]  ;;  %v4925_v32 = vld [vmem:[#allocation2 + $0x20] sm:$0x1] }
 0x25d   : > { %v4617_v30 = vshrl.u32 %v4560_v18, 16  ;;  %v4620_v47 = vshll.u32 %v4560_v18, 16  ;;  %v3559_v2 = vshll.u32 %v12374_v31, 16  ;;  %v3563_v35 = vshrl.u32 %v12374_v31, 16 }
 0x25e   : > { %v12364_v45 = vpop.f32.mrf.mxu0  ;;  %v4377_v63 = vmul.f32 %v4345_v28, %v4249_v33  ;;  %v4250_v49 = vadd.f32 %v12174_v22, %v4214_v37  ;;  %v12376_v27 = vpop.f32.mrf.mxu3  ;;  %v3555_v33 = vrot.slane %v3553_v41, 5  ;;  %v3628_v28 = vunpack.c.l.b16 %v3538_v44 }
 0x25f   : > { %v4619_v7 = vrot.slane %v4617_v30, 7  ;;  %v3068_v51 = vpop.f32.mrf.mxu2  ;;  %v3629_v37 = vunpack.c.l.b16 %v3548_v25  ;;  %v10523_v25 = vld [vmem:[%s14803_s3 + $0x130] sm:$0xff] }
 0x260   : > { %v4409_v3 = vmul.f32 0.16666667, %v4377_v63  ;;  %v4282_v20 = vadd.f32 3.0, %v4250_v49  ;;  %v3139_v61 = vadd.f32 %v3068_v51, %v11586_v57  ;;  %v4463_v57 = vsel %vm12089_vm9, 0, %v4462_v19  ;;  %8412 = vmatpush.bf16.msrb.mxu1 %v10523_v25  ;;  %v10506_v19 = vld [vmem:[%s14803_s3 + $0xa8] sm:$0xff] }
 0x261   : > { %v4622_v12 = vor.u32 %v4620_v47, %v4619_v7  ;;  %v4624_v46 = vrot.slane %v4619_v7, 4  ;;  %v3992_v7 = vsel %vm11069_vm6, %v3990_v26, %v3991_v43  ;;  %v3556_v47 = vor.u32 %v3555_v33, %v3552_v59  ;;  %4464 = vst [vmem:[#allocation2 + $0x3c] sm:$0x1] %v4463_v57  ;;  %8235 = vmatpush.bf16.msrb.mxu3 %v10506_v19 }
 0x262   : > { %v4561_v14 = vpack.c.bf16 %v4409_v3, %v4409_v3  ;;  %v4314_v18 = vmax.f32 %v4282_v20, 0.0  ;;  %v3805_v52 = vadd.f32 %v12308_v40, %v3139_v61  ;;  %v3989_v40 = vsel %vm11069_vm6, %v9810_v58, %v3988_v15  ;;  %v12408_v20 = vld [vmem:[%s10819_s7 + $0xc8] sm:$0x1]  ;;  %v4928_v61 = vld [vmem:[#allocation2 + $0x24] sm:$0xf] }
 0x263   : > { %v4623_v11 = vsel %vm12303_vm15, %v4615_v6, %v4622_v12  ;;  %v4926_v55 = vsel %vm12089_vm9, %v4624_v46, %v4925_v32  ;;  %v10515_v6 = vld [vmem:[%s14803_s3 + $0xf0] sm:$0xff]  ;;  %v12402_v51 = vrot.slane %v3559_v2, 5  ;;  %v4038_v26 = vunpack.c.l.b16 %v3989_v40  ;;  %v10427_v2 = vld [vmem:[%s10819_s7 + $0xa8] sm:$0xff] }
 0x264   : > { %4924 = vst [vmem:[#allocation2 + $0x1c] sm:$0xf] %v4623_v11  ;;  %v4626_v41 = vshrl.u32 %v4561_v14, 16  ;;  %v4346_v30 = vmin.f32 %v4314_v18, 6.0  ;;  %v4215_v63 = vadd.f32 %v12330_v17, %v3805_v52  ;;  %v3565_v17 = vrot.slane %v3563_v35, 4  ;;  %8323 = vmatpush.bf16.msrb.mxu0 %v10515_v6 }
 0x265   : > { %4927 = vst [vmem:[#allocation2 + $0x20] sm:$0x1] %v4926_v55  ;;  %v4629_v58 = vshll.u32 %v4561_v14, 16  ;;  %v4039_v14 = vunpack.c.l.b16 %v3992_v7  ;;  %v3569_v52 = vshll.u32 %v12408_v20, 16  ;;  %v9750_v7 = vld [vmem:[%s10819_s7 + $0xcc] sm:$0xf] }
 0x266   : > { %v12392_v44 = vpop.f32.mrf.mxu0  ;;  %v12404_v15 = vrot.slane %v4626_v41, 7  ;;  %v4378_v32 = vmul.f32 %v4346_v30, %v4250_v49  ;;  %v4251_v3 = vadd.f32 %v12174_v22, %v4215_v63  ;;  %v12410_v46 = vpop.f32.mrf.mxu3  ;;  %v3647_v49 = vpack.c.b16 %v3629_v37, %v3628_v28  ;;  %v4518_v41 = vld [vmem:[#allocation2 + $0x44] sm:$0x1]  ;;  %v14857_v30 = vld [vmem:[#allocation16_spill] sm:$0xff]  ;;  %v14858_v63 = vld [vmem:[#allocation13_spill] sm:$0xff] }
 0x267   : > { %v3070_v12 = vpop.f32.mrf.mxu2  ;;  %v3566_v18 = vor.u32 %v3565_v17, %v12402_v51  ;;  %v4519_v37 = vsel %vm12131_vm11, 0, %v4518_v41  ;;  %v12429_v40 = vadd.f32 %v14858_v63, %v14857_v30  ;;  %v12437_v17 = vpack.c.b16 %v4039_v14, %v4038_v26  ;;  %v4932_v26 = vld [vmem:[#allocation2 + $0x2c] sm:$0x1]  ;;  %v9795_v41 = vld [vmem:[%s10819_s7 + $0xc0] sm:$0xe] }
 0x268   : > { %v4631_v43 = vor.u32 %v4629_v58, %v12404_v15  ;;  %v4410_v59 = vmul.f32 0.16666667, %v4378_v32  ;;  %v4283_v33 = vadd.f32 3.0, %v4251_v3  ;;  %v3140_v35 = vadd.f32 %v3070_v12, %v11610_v8  ;;  %4520 = vst [vmem:[#allocation2 + $0x44] sm:$0x1] %v4519_v37 }
 0x269   : > { %9837 = vmatmul.msk.bf16.gmra.mxu0 %vm727_vm0, %v12361_v62  ;;  %v3557_v62 = vrot.slane %v3556_v47, 4  ;;  %v3567_v58 = vrot.slane %v3566_v18, 4  ;;  %v3571_v32 = vrot.slane %v3569_v52, 5  ;;  %v3574_v18 = vshrl.u32 %v9750_v7, 16 }
 0x26a   : > { %v4929_v11 = vsel %vm12260_vm13, %v4631_v43, %v4928_v61  ;;  %v4562_v55 = vpack.c.bf16 %v4410_v59, %v4410_v59  ;;  %v4315_v57 = vmax.f32 %v4283_v33, 0.0  ;;  %v3806_v8 = vadd.f32 %v12337_v48, %v3140_v35  ;;  %v10505_v61 = vld [vmem:[%s14803_s3 + $0xa0] sm:$0xff]  ;;  %v12446_v33 = vld [vmem:[%s10819_s7 + $0xd0] sm:$0xf] }
 0x26b   : > { %4930 = vst [vmem:[#allocation2 + $0x24] sm:$0xf] %v4929_v11  ;;  %v10439_v28 = vld [vmem:[#allocation2 + $0x18] sm:$0xff]  ;;  %9778 = vmatmul.msk.bf16.gmra.mxu3 %vm727_vm0, %v3647_v49  ;;  %v3577_v52 = vshll.u32 %v9750_v7, 16 }
 0x26c   : > { %v4634_v6 = vshrl.u32 %v4562_v55, 16  ;;  %v4347_v25 = vmin.f32 %v4315_v57, 6.0  ;;  %9701 = vmatmul.msk.bf16.gmra.mxu2 %vm727_vm0, %v10427_v2  ;;  %v4216_v47 = vadd.f32 %v12364_v45, %v3806_v8  ;;  %8073 = vmatmul.bf16.gmra.mxu1 %v10439_v28  ;;  %v4637_v43 = vshll.u32 %v4562_v55, 16  ;;  %v14859_v55 = vld [vmem:[#allocation15_spill] sm:$0xff]  ;;  %v10504_v28 = vld [vmem:[%s14803_s3 + $0x98] sm:$0xff] }
 0x26d   : > { %v3562_v45 = vsel %vm10843_vm3, %v3557_v62, %v12402_v51  ;;  %v4632_v2 = vrot.slane %v12404_v15, 4  ;;  %8236 = vmatpush.bf16.msrb.mxu3 %v10505_v61  ;;  %v3572_v62 = vsel %vm10843_vm3, %v3567_v58, %v3571_v32  ;;  %v3583_v15 = vshll.u32 %v12446_v33, 16 }
 0x26e   : > { %v12435_v48 = vpop.f32.mrf.mxu0  ;;  %v4636_v12 = vrot.slane %v4634_v6, 7  ;;  %v4379_v59 = vmul.f32 %v4347_v25, %v4251_v3  ;;  %v4252_v49 = vadd.f32 %v12174_v22, %v4216_v47  ;;  %v12450_v14 = vpop.f32.mrf.mxu3  ;;  %v3587_v8 = vshrl.u32 %v12446_v33, 16  ;;  %v4465_v25 = vld [vmem:[#allocation2 + $0x48] sm:$0x1] }
 0x26f   : > { %v3073_v35 = vpop.f32.mrf.mxu2  ;;  %v4466_v47 = vsel %vm12089_vm9, 0, %v4465_v25  ;;  %v9811_v58 = vrot.slane %v9795_v41, 9  ;;  %v3995_v32 = vrot.slane %v12374_v31, 5  ;;  %v10514_v31 = vld [vmem:[%s14803_s3 + $0xe8] sm:$0xff] }
 0x270   : > { %v4639_v19 = vor.u32 %v4637_v43, %v4636_v12  ;;  %v4641_v11 = vrot.slane %v4636_v12, 4  ;;  %v4411_v3 = vmul.f32 0.16666667, %v4379_v59  ;;  %v3141_v57 = vadd.f32 %v3073_v35, %v14859_v55  ;;  %4467 = vst [vmem:[#allocation2 + $0x48] sm:$0x1] %v4466_v47  ;;  %v10503_v55 = vld [vmem:[%s14803_s3 + $0x90] sm:$0xff]  ;;  %8324 = vmatpush.bf16.msrb.mxu0 %v10514_v31 }
 0x271   : > { %v4284_v51 = vadd.f32 3.0, %v4252_v49  ;;  %8237 = vmatpush.bf16.msrb.mxu3 %v10504_v28  ;;  %v3576_v43 = vrot.slane %v3574_v18, 4  ;;  %v3579_v59 = vrot.slane %v3577_v52, 5  ;;  %v3631_v35 = vunpack.c.l.b16 %v3572_v62  ;;  %v12484_v52 = vld [vmem:[%s10819_s7 + $0xd4] sm:$0x1] }
 0x272   : > { %v4640_v37 = vsel %vm12303_vm15, %v4632_v2, %v4639_v19  ;;  %v4933_v30 = vsel %vm12089_vm9, %v4641_v11, %v4932_v26  ;;  %v4563_v63 = vpack.c.bf16 %v4411_v3, %v4411_v3  ;;  %v3807_v6 = vadd.f32 %v12376_v27, %v3141_v57  ;;  %v10498_v19 = vld [vmem:[%s14803_s3 + $0x68] sm:$0xff]  ;;  %v4935_v57 = vld [vmem:[#allocation2 + $0x30] sm:$0xf] }
 0x273   : > { %4931 = vst [vmem:[#allocation2 + $0x28] sm:$0xf] %v4640_v37  ;;  %v4316_v7 = vmax.f32 %v4284_v51, 0.0  ;;  %v3630_v27 = vunpack.c.l.b16 %v3562_v45  ;;  %v12478_v11 = vrot.slane %v3583_v15, 5  ;;  %v3589_v45 = vrot.slane %v3587_v8, 4  ;;  %8146 = vmatpush.bf16.msrb.mxu2 %v10498_v19  ;;  %v10428_v8 = vld [vmem:[%s10819_s7 + $0xb4] sm:$0xff] }
 0x274   : > { %4934 = vst [vmem:[#allocation2 + $0x2c] sm:$0x1] %v4933_v30  ;;  %v4643_v61 = vshrl.u32 %v4563_v63, 16  ;;  %v4217_v12 = vadd.f32 %v12392_v44, %v3807_v6  ;;  %v4646_v44 = vshll.u32 %v4563_v63, 16  ;;  %v3997_v15 = vrot.slane %v3995_v32, 4 }
 0x275   : > { %v4348_v2 = vmin.f32 %v4316_v7, 6.0  ;;  %v3998_v28 = vrot.slane %v12408_v20, 5  ;;  %v3580_v6 = vor.u32 %v3579_v59, %v3576_v43  ;;  %8238 = vmatpush.bf16.msrb.mxu3 %v10503_v55  ;;  %v3648_v25 = vpack.c.b16 %v3631_v35, %v3630_v27  ;;  %v10497_v20 = vld [vmem:[%s14803_s3 + $0x60] sm:$0xff]  ;;  %v4521_v43 = vld [vmem:[#allocation2 + $0x50] sm:$0x1] }
 0x276   : > { %v12470_v26 = vpop.f32.mrf.mxu0  ;;  %v12480_v3 = vrot.slane %v4643_v61, 7  ;;  %v4253_v18 = vadd.f32 %v12174_v22, %v4217_v12  ;;  %v12489_v62 = vpop.f32.mrf.mxu3  ;;  %v12499_v7 = vsel %vm11069_vm6, %v9811_v58, %v3995_v32  ;;  %v3593_v47 = vshll.u32 %v12484_v52, 16 }
 0x277   : > { %v4380_v41 = vmul.f32 %v4348_v2, %v4252_v49  ;;  %v3075_v51 = vpop.f32.mrf.mxu2  ;;  %v3590_v59 = vor.u32 %v3589_v45, %v12478_v11  ;;  %v4503_v2 = vld [vmem:[#allocation2 + $0x8] sm:$0x1]  ;;  %v4522_v35 = vsel %vm12131_vm11, 0, %v4521_v43  ;;  %8147 = vmatpush.bf16.msrb.mxu2 %v10497_v20 }
 0x278   : > { %v4648_v37 = vor.u32 %v4646_v44, %v12480_v3  ;;  %v4285_v30 = vadd.f32 3.0, %v4253_v18  ;;  %v3142_v63 = vadd.f32 %v3075_v51, %v12429_v40  ;;  %v10513_v40 = vld [vmem:[%s14803_s3 + $0xe0] sm:$0xff]  ;;  %4523 = vst [vmem:[#allocation2 + $0x50] sm:$0x1] %v4522_v35  ;;  %v3581_v44 = vrot.slane %v3580_v6, 4 }
 0x279   : > { %9838 = vmatmul.msk.bf16.gmra.mxu0 %vm727_vm0, %v12437_v17  ;;  %v4412_v49 = vmul.f32 0.16666667, %v4380_v41  ;;  %v10502_v17 = vld [vmem:[%s14803_s3 + $0x88] sm:$0xff]  ;;  %v10512_v41 = vld [vmem:[%s14803_s3 + $0xd8] sm:$0xff]  ;;  %v10501_v51 = vld [vmem:[%s14803_s3 + $0x80] sm:$0xff] }
 0x27a   : > { %v4936_v61 = vsel %vm12260_vm13, %v4648_v37, %v4935_v57  ;;  %v4317_v12 = vmax.f32 %v4285_v30, 0.0  ;;  %v3808_v58 = vadd.f32 %v12410_v46, %v3142_v63  ;;  %v10440_v32 = vld [vmem:[#allocation2 + $0x24] sm:$0xff]  ;;  %8325 = vmatpush.bf16.msrb.mxu0 %v10513_v40  ;;  %v3999_v46 = vsel %vm11069_vm6, %v3997_v15, %v3998_v28  ;;  %8239 = vmatpush.bf16.msrb.mxu3 %v10502_v17  ;;  %v4939_v17 = vld [vmem:[#allocation2 + $0x38] sm:$0x1] }
 0x27b   : > { %4937 = vst [vmem:[#allocation2 + $0x30] sm:$0xf] %v4936_v61  ;;  %v4564_v27 = vpack.c.bf16 %v4412_v49, %v4412_v49  ;;  %9779 = vmatmul.msk.bf16.gmra.mxu3 %vm727_vm0, %v3648_v25  ;;  %v4040_v57 = vunpack.c.l.b16 %v12499_v7  ;;  %v4504_v15 = vsel %vm12131_vm11, 0, %v4503_v2  ;;  %v3591_v30 = vrot.slane %v3590_v59, 4  ;;  %v10511_v2 = vld [vmem:[%s14803_s3 + $0xd0] sm:$0xff] }
 0x27c   : > { %v4349_v19 = vmin.f32 %v4317_v12, 6.0  ;;  %v4218_v31 = vadd.f32 %v12435_v48, %v3808_v58  ;;  %9702 = vmatmul.msk.bf16.gmra.mxu2 %vm727_vm0, %v10428_v8  ;;  %8078 = vmatmul.bf16.gmra.mxu1 %v10440_v32  ;;  %v10496_v48 = vld [vmem:[%s14803_s3 + $0x58] sm:$0xff]  ;;  %v3595_v63 = vrot.slane %v3593_v47, 5  ;;  %v12538_v8 = vld [vmem:[%s10819_s7 + $0xcc] sm:$0xe]  ;;  %v4041_v20 = vunpack.c.l.b16 %v3999_v46 }
 0x27d   : > { %v4651_v45 = vshrl.u32 %v4564_v27, 16  ;;  %4505 = vst [vmem:[#allocation2 + $0x8] sm:$0x1] %v4504_v15  ;;  %v4654_v49 = vshll.u32 %v4564_v27, 16  ;;  %v4002_v40 = vrot.slane %v12446_v33, 5  ;;  %8148 = vmatpush.bf16.msrb.mxu2 %v10496_v48  ;;  %v3586_v47 = vsel %vm10843_vm3, %v3581_v44, %v12478_v11  ;;  %v10495_v33 = vld [vmem:[%s14803_s3 + $0x50] sm:$0xff] }
 0x27e   : > { %v12522_v55 = vpop.f32.mrf.mxu0  ;;  %v4381_v28 = vmul.f32 %v4349_v19, %v4253_v18  ;;  %v4254_v37 = vadd.f32 %v12174_v22, %v4218_v31  ;;  %v12540_v7 = vpop.f32.mrf.mxu3  ;;  %8326 = vmatpush.bf16.msrb.mxu0 %v10512_v41  ;;  %8240 = vmatpush.bf16.msrb.mxu3 %v10501_v51  ;;  %v4649_v58 = vrot.slane %v12480_v3, 4  ;;  %v9812_v59 = vrot.slane %v12538_v8, 9  ;;  %v4468_v11 = vld [vmem:[#allocation2 + $0x54] sm:$0x1]  ;;  %v12558_v19 = vld [vmem:[#allocation2 + $0x4] sm:$0xf] }
 0x27f   : > { %v4653_v6 = vrot.slane %v4651_v45, 7  ;;  %v3078_v25 = vpop.f32.mrf.mxu2  ;;  %v3596_v3 = vsel %vm10843_vm3, %v3591_v30, %v3595_v63  ;;  %v4469_v44 = vsel %vm12089_vm9, 0, %v4468_v11  ;;  %v4004_v45 = vrot.slane %v4002_v40, 4  ;;  %v12567_v15 = vld [vmem:[#allocation2] sm:$0xe]  ;;  %v10522_v30 = vld [vmem:[%s14803_s3 + $0x128] sm:$0xff] }
 0x280   : > { %v4413_v61 = vmul.f32 0.16666667, %v4381_v28  ;;  %v4286_v18 = vadd.f32 3.0, %v4254_v37  ;;  %v3143_v12 = vadd.f32 %v3078_v25, %v11706_v50  ;;  %v4058_v51 = vpack.c.b16 %v4041_v20, %v4040_v57  ;;  %4470 = vst [vmem:[#allocation2 + $0x54] sm:$0x1] %v4469_v44  ;;  %8413 = vmatpush.bf16.msrb.mxu1 %v10522_v30 }
 0x281   : > { %v4656_v32 = vor.u32 %v4654_v49, %v4653_v6  ;;  %v4658_v43 = vrot.slane %v4653_v6, 4  ;;  %8149 = vmatpush.bf16.msrb.mxu2 %v10495_v33  ;;  %v3632_v63 = vunpack.c.l.b16 %v3586_v47  ;;  %v3633_v8 = vunpack.c.l.b16 %v3596_v3  ;;  %v10493_v3 = vld [vmem:[%s14803_s3 + $0x40] sm:$0xff] }
 0x282   : > { %v4565_v50 = vpack.c.bf16 %v4413_v61, %v4413_v61  ;;  %v4318_v27 = vmax.f32 %v4286_v18, 0.0  ;;  %v3809_v35 = vadd.f32 %v12450_v14, %v3143_v12  ;;  %8327 = vmatpush.bf16.msrb.mxu0 %v10511_v2  ;;  %v4005_v6 = vrot.slane %v12484_v52, 5  ;;  %v10510_v61 = vld [vmem:[%s14803_s3 + $0xc8] sm:$0xff]  ;;  %v14860_v52 = vld [vmem:[#allocation14_spill] sm:$0xff] }
 0x283   : > { %v4657_v31 = vsel %vm12303_vm15, %v4649_v58, %v4656_v32  ;;  %v4940_v46 = vsel %vm12089_vm9, %v4658_v43, %v4939_v17  ;;  %v5524_v49 = vrot.slane %v12558_v19, 5  ;;  %v2845_v18 = vadd.f32 %v14860_v52, %v11726_v5  ;;  %v4942_v12 = vld [vmem:[#allocation2 + $0x3c] sm:$0xf]  ;;  %v5026_v32 = vld [vmem:[#allocation2] sm:$0xf] }
 0x284   : > { %4938 = vst [vmem:[#allocation2 + $0x34] sm:$0xf] %v4657_v31  ;;  %v4660_v14 = vshrl.u32 %v4565_v50, 16  ;;  %v4350_v48 = vmin.f32 %v4318_v27, 6.0  ;;  %v4219_v41 = vadd.f32 %v12470_v26, %v3809_v35  ;;  %v10494_v26 = vld [vmem:[%s14803_s3 + $0x48] sm:$0xff]  ;;  %v4663_v25 = vshll.u32 %v4565_v50, 16 }
 0x285   : > { %4941 = vst [vmem:[#allocation2 + $0x38] sm:$0x1] %v4940_v46  ;;  %8150 = vmatpush.bf16.msrb.mxu2 %v10494_v26  ;;  %v12594_v2 = vsel %vm11069_vm6, %v9812_v59, %v4002_v40  ;;  %v12596_v50 = vld [vmem:[#allocation2 + $0x8] sm:$0x1]  ;;  %v3649_v27 = vpack.c.b16 %v3633_v8, %v3632_v63  ;;  %v12600_v35 = vsel %vm11069_vm6, %v4004_v45, %v4005_v6  ;;  %v9841_v11 = vrot.slane %v12567_v15, 9 }
 0x286   : > { %v12569_v28 = vpop.f32.mrf.mxu0  ;;  %v12579_v57 = vrot.slane %v4660_v14, 7  ;;  %v4382_v20 = vmul.f32 %v4350_v48, %v4254_v37  ;;  %v4255_v17 = vadd.f32 %v12174_v22, %v4219_v41  ;;  %v12587_v58 = vpop.f32.mrf.mxu3  ;;  %v10429_v22 = vld [vmem:[%s10819_s7 + $0xc0] sm:$0xff]  ;;  %8328 = vmatpush.bf16.msrb.mxu0 %v10510_v61  ;;  %v4524_v46 = vld [vmem:[#allocation2 + $0x5c] sm:$0x1]  ;;  %v5526_v44 = vrot.slane %v5524_v49, 4 }
 0x287   : > { %v3080_v47 = vpop.f32.mrf.mxu2  ;;  %v10509_v14 = vld [vmem:[%s14803_s3 + $0xc0] sm:$0xff]  ;;  %v4525_v41 = vsel %vm12131_vm11, 0, %v4524_v46  ;;  %v5075_v15 = vshrl.u32 %v5026_v32, 16  ;;  %v4042_v8 = vunpack.c.l.b16 %v12594_v2  ;;  %v4043_v6 = vunpack.c.l.b16 %v12600_v35 }
 0x288   : > { %v4665_v43 = vor.u32 %v4663_v25, %v12579_v57  ;;  %v4414_v37 = vmul.f32 0.16666667, %v4382_v20  ;;  %v4287_v33 = vadd.f32 3.0, %v4255_v17  ;;  %v3144_v5 = vadd.f32 %v3080_v47, %v2845_v18  ;;  %4526 = vst [vmem:[#allocation2 + $0x5c] sm:$0x1] %v4525_v41 }
 0x289   : > { %9839 = vmatmul.msk.bf16.gmra.mxu0 %vm727_vm0, %v4058_v51  ;;  %v5527_v51 = vrot.slane %v12596_v50, 5  ;;  %8151 = vmatpush.bf16.msrb.mxu2 %v10493_v3  ;;  %v5078_v25 = vshll.u32 %v5026_v32, 16  ;;  %v5084_v20 = vshll.u32 %v12558_v19, 16  ;;  %v5088_v61 = vshrl.u32 %v12558_v19, 16 }
 0x28a   : > { %v4943_v31 = vsel %vm12260_vm13, %v4665_v43, %v4942_v12  ;;  %v4566_v40 = vpack.c.bf16 %v4414_v37, %v4414_v37  ;;  %v4319_v59 = vmax.f32 %v4287_v33, 0.0  ;;  %v3810_v45 = vadd.f32 %v12489_v62, %v3144_v5  ;;  %8329 = vmatpush.bf16.msrb.mxu0 %v10509_v14  ;;  %v12630_v37 = vld [vmem:[%s14802_s2] ss:$0 sm:$0xff] }
 0x28b   : > { %4944 = vst [vmem:[#allocation2 + $0x3c] sm:$0xf] %v4943_v31  ;;  %v10441_v48 = vld [vmem:[#allocation2 + $0x30] sm:$0xff]  ;;  %9780 = vmatmul.msk.bf16.gmra.mxu3 %vm727_vm0, %v3649_v27  ;;  %v5525_v47 = vsel %vm11069_vm6, %v9841_v11, %v5524_v49  ;;  %v4666_v43 = vrot.slane %v12579_v57, 4  ;;  %v5528_v19 = vsel %vm11069_vm6, %v5526_v44, %v5527_v51  ;;  %v5080_v35 = vrot.slane %v5078_v25, 5 }
 0x28c   : > { %v4668_v30 = vshrl.u32 %v4566_v40, 16  ;;  %v4351_v63 = vmin.f32 %v4319_v59, 6.0  ;;  %9703 = vmatmul.msk.bf16.gmra.mxu2 %vm727_vm0, %v10429_v22  ;;  %v4220_v26 = vadd.f32 %v12522_v55, %v3810_v45  ;;  %8083 = vmatmul.bf16.gmra.mxu1 %v10441_v48  ;;  %v4671_v18 = vshll.u32 %v4566_v40, 16  ;;  %v4946_v55 = vld [vmem:[#allocation2 + $0x44] sm:$0x1] }
 0x28d   : > { %v12638_v11 = vrot.slane %v5084_v20, 5  ;;  %v5090_v3 = vrot.slane %v5088_v61, 4  ;;  %v4471_v44 = vld [vmem:[#allocation2 + $0x60] sm:$0x1]  ;;  %v2847_v14 = vadd.f32 %v11699_v39, %v11775_v38  ;;  %v4059_v51 = vpack.c.b16 %v4043_v6, %v4042_v8  ;;  %v12653_v38 = vld [vmem:[#allocation2 + $0x10] sm:$0xf] }
 0x28e   : > { %v12620_v62 = vpop.f32.mrf.mxu0  ;;  %v4670_v52 = vrot.slane %v4668_v30, 7  ;;  %v4383_v12 = vmul.f32 %v4351_v63, %v4255_v17  ;;  %v4256_v32 = vadd.f32 %v12630_v37, %v4220_v26  ;;  %v12633_v22 = vpop.f32.mrf.mxu3  ;;  %v5077_v17 = vrot.slane %v5075_v15, 4  ;;  %v5459_v30 = vld [vmem:[#allocation2 + $0xc] sm:$0xe]  ;;  %v4949_v8 = vld [vmem:[#allocation2 + $0x48] sm:$0xf] }
 0x28f   : > { %v3083_v33 = vpop.f32.mrf.mxu2  ;;  %v4472_v45 = vsel %vm12089_vm9, 0, %v4471_v44  ;;  %v6995_v15 = vunpack.c.l.b16 %v5525_v47  ;;  %v5091_v39 = vor.u32 %v5090_v3, %v12638_v11  ;;  %v9842_v47 = vrot.slane %v5459_v30, 9 }
 0x290   : > { %v4673_v2 = vor.u32 %v4671_v18, %v4670_v52  ;;  %v4675_v49 = vrot.slane %v4670_v52, 4  ;;  %v4415_v5 = vmul.f32 0.16666667, %v4383_v12  ;;  %v3145_v57 = vadd.f32 %v3083_v33, %v11763_v16  ;;  %4473 = vst [vmem:[#allocation2 + $0x60] sm:$0x1] %v4472_v45 }
 0x291   : > { %v4288_v27 = vadd.f32 3.0, %v4256_v32  ;;  %v5081_v25 = vor.u32 %v5080_v35, %v5077_v17  ;;  %v5531_v17 = vrot.slane %v12653_v38, 5 }
 0x292   : > { %v4674_v31 = vsel %vm12303_vm15, %v4666_v43, %v4673_v2  ;;  %v4947_v40 = vsel %vm12089_vm9, %v4675_v49, %v4946_v55  ;;  %v4567_v59 = vpack.c.bf16 %v4415_v5, %v4415_v5  ;;  %v3811_v46 = vadd.f32 %v12540_v7, %v3145_v57  ;;  %v5028_v2 = vld [vmem:[#allocation2 + $0xc] sm:$0xf] }
 0x293   : > { %4945 = vst [vmem:[#allocation2 + $0x40] sm:$0xf] %v4674_v31  ;;  %v4320_v16 = vmax.f32 %v4288_v27, 0.0  ;;  %v6996_v7 = vunpack.c.l.b16 %v5528_v19  ;;  %v10430_v19 = vld [vmem:[%s10819_s7 + $0xcc] sm:$0xff]  ;;  %v5082_v57 = vrot.slane %v5081_v25, 4  ;;  %v5533_v30 = vrot.slane %v5531_v17, 4 }
 0x294   : > { %4948 = vst [vmem:[#allocation2 + $0x44] sm:$0x1] %v4947_v40  ;;  %v4677_v48 = vshrl.u32 %v4567_v59, 16  ;;  %v4221_v41 = vadd.f32 %v12569_v28, %v3811_v46  ;;  %v4680_v61 = vshll.u32 %v4567_v59, 16  ;;  %v5094_v28 = vshll.u32 %v12596_v50, 16 }
 0x295   : > { %v4352_v63 = vmin.f32 %v4320_v16, 6.0  ;;  %v7027_v5 = vpack.c.b16 %v6996_v7, %v6995_v15  ;;  %v5092_v50 = vrot.slane %v5091_v39, 4  ;;  %v12665_v27 = vld [vmem:[#allocation2 + $0x14] sm:$0x1]  ;;  %v4527_v40 = vld [vmem:[#allocation2 + $0x68] sm:$0x1]  ;;  %v5087_v39 = vsel %vm10843_vm3, %v5082_v57, %v12638_v11 }
 0x296   : > { %v12650_v26 = vpop.f32.mrf.mxu0  ;;  %v12655_v20 = vrot.slane %v4677_v48, 7  ;;  %v4257_v52 = vadd.f32 %v12630_v37, %v4221_v41  ;;  %v12659_v12 = vpop.f32.mrf.mxu3  ;;  %v5096_v59 = vrot.slane %v5094_v28, 5  ;;  %v4528_v44 = vsel %vm12131_vm11, 0, %v4527_v40 }
 0x297   : > { %v4384_v6 = vmul.f32 %v4352_v63, %v4256_v32  ;;  %v3085_v18 = vpop.f32.mrf.mxu2  ;;  %v5102_v16 = vshll.u32 %v5028_v2, 16  ;;  %4529 = vst [vmem:[#allocation2 + $0x68] sm:$0x1] %v4528_v44  ;;  %v12676_v41 = vsel %vm11069_vm6, %v9842_v47, %v5531_v17  ;;  %v5534_v63 = vrot.slane %v12665_v27, 5 }
 0x298   : > { %v4682_v43 = vor.u32 %v4680_v61, %v12655_v20  ;;  %v4289_v55 = vadd.f32 3.0, %v4257_v52  ;;  %v3146_v33 = vadd.f32 %v3085_v18, %v2847_v14  ;;  %v5099_v14 = vshrl.u32 %v5028_v2, 16 }
 0x299   : > { %9840 = vmatmul.msk.bf16.gmra.mxu0 %vm727_vm0, %v4059_v51  ;;  %v4416_v49 = vmul.f32 0.16666667, %v4384_v6  ;;  %v5112_v7 = vshrl.u32 %v12653_v38, 16  ;;  %v5097_v61 = vsel %vm10843_vm3, %v5092_v50, %v5096_v59  ;;  %v4683_v17 = vrot.slane %v12655_v20, 4 }
 0x29a   : > { %v4950_v32 = vsel %vm12260_vm13, %v4682_v43, %v4949_v8  ;;  %v4321_v35 = vmax.f32 %v4289_v55, 0.0  ;;  %v3812_v3 = vadd.f32 %v12587_v58, %v3146_v33  ;;  %v10442_v31 = vld [vmem:[#allocation2 + $0x3c] sm:$0xff]  ;;  %v5108_v58 = vshll.u32 %v12653_v38, 16  ;;  %v4953_v55 = vld [vmem:[#allocation2 + $0x50] sm:$0x1] }
 0x29b   : > { %4951 = vst [vmem:[#allocation2 + $0x48] sm:$0xf] %v4950_v32  ;;  %v4568_v46 = vpack.c.bf16 %v4416_v49, %v4416_v49  ;;  %8241 = vmatmul.bf16.vlgmr.msrb.gmra.mxu3 %v7027_v5  ;;  %v5101_v47 = vrot.slane %v5099_v14, 4  ;;  %v5104_v43 = vrot.slane %v5102_v16, 5  ;;  %v5114_v49 = vrot.slane %v5112_v7, 4 }
 0x29c   : > { %v4353_v45 = vmin.f32 %v4321_v35, 6.0  ;;  %v4222_v48 = vadd.f32 %v12620_v62, %v3812_v3  ;;  %9704 = vmatmul.msk.bf16.gmra.mxu2 %vm727_vm0, %v10430_v19  ;;  %8088 = vmatmul.bf16.gmra.mxu1 %v10442_v31  ;;  %v12692_v19 = vrot.slane %v5108_v58, 5  ;;  %v6931_v32 = vunpack.c.l.b16 %v5087_v39  ;;  %v4474_v35 = vld [vmem:[#allocation2 + $0x6c] sm:$0x1]  ;;  %v12696_v3 = vld [vmem:[#allocation2 + $0x1c] sm:$0xf] }
 0x29d   : > { %v4685_v51 = vshrl.u32 %v4568_v46, 16  ;;  %v4688_v8 = vshll.u32 %v4568_v46, 16  ;;  %v6932_v40 = vunpack.c.l.b16 %v5097_v61  ;;  %v4475_v20 = vsel %vm12089_vm9, 0, %v4474_v35  ;;  %v12707_v14 = vld [vmem:[#allocation2 + $0x18] sm:$0xe]  ;;  %v10453_v39 = vld [vmem:[#allocation2 + $0xc] sm:$0xff] }
 0x29e   : > { %v12679_v15 = vpop.f32.mrf.mxu0  ;;  %v4385_v62 = vmul.f32 %v4353_v45, %v4257_v52  ;;  %v4258_v25 = vadd.f32 %v12630_v37, %v4222_v48  ;;  %v12689_v18 = vpop.f32.mrf.mxu3  ;;  %v10521_v45 = vld [vmem:[%s14803_s3 + $0x120] sm:$0xff]  ;;  %v5105_v48 = vor.u32 %v5104_v43, %v5101_v47  ;;  %v5115_v58 = vor.u32 %v5114_v49, %v12692_v19  ;;  %4476 = vst [vmem:[#allocation2 + $0x6c] sm:$0x1] %v4475_v20 }
 0x29f   : > { %v4687_v28 = vrot.slane %v4685_v51, 7  ;;  %v3088_v6 = vpop.f32.mrf.mxu2  ;;  %v5118_v51 = vshll.u32 %v12665_v27, 16  ;;  %v5538_v7 = vrot.slane %v12696_v3, 5  ;;  %v2849_v61 = vadd.f32 %v11757_v24, %v11812_v1  ;;  %8414 = vmatpush.bf16.msrb.mxu1 %v10521_v45 }
 0x2a0   : > { %v4417_v33 = vmul.f32 0.16666667, %v4385_v62  ;;  %v4290_v38 = vadd.f32 3.0, %v4258_v25  ;;  %v3147_v52 = vadd.f32 %v3088_v6, %v11799_v0  ;;  %v6963_v47 = vpack.c.b16 %v6932_v40, %v6931_v32 }
 0x2a1   : > { %v4690_v11 = vor.u32 %v4688_v8, %v4687_v28  ;;  %v4692_v2 = vrot.slane %v4687_v28, 4  ;;  %v4956_v28 = vld [vmem:[#allocation2 + $0x54] sm:$0xf]  ;;  %v6997_v27 = vunpack.c.l.b16 %v12676_v41  ;;  %v5120_v24 = vrot.slane %v5118_v51, 5 }
 0x2a2   : > { %v4569_v5 = vpack.c.bf16 %v4417_v33, %v4417_v33  ;;  %v4322_v57 = vmax.f32 %v4290_v38, 0.0  ;;  %v3813_v50 = vadd.f32 %v12633_v22, %v3147_v52  ;;  %v5535_v22 = vsel %vm11069_vm6, %v5533_v30, %v5534_v63  ;;  %v5030_v52 = vld [vmem:[#allocation2 + $0x18] sm:$0xf] }
 0x2a3   : > { %v4691_v31 = vsel %vm12303_vm15, %v4683_v17, %v4690_v11  ;;  %v4954_v0 = vsel %vm12089_vm9, %v4692_v2, %v4953_v55  ;;  %v6998_v43 = vunpack.c.l.b16 %v5535_v22  ;;  %v9843_v38 = vrot.slane %v12707_v14, 9 }
 0x2a4   : > { %4952 = vst [vmem:[#allocation2 + $0x4c] sm:$0xf] %v4691_v31  ;;  %v4694_v59 = vshrl.u32 %v4569_v5, 16  ;;  %v4354_v46 = vmin.f32 %v4322_v57, 6.0  ;;  %v4223_v44 = vadd.f32 %v12650_v26, %v3813_v50  ;;  %v4697_v62 = vshll.u32 %v4569_v5, 16 }
 0x2a5   : > { %4955 = vst [vmem:[#allocation2 + $0x50] sm:$0x1] %v4954_v0  ;;  %v5106_v11 = vrot.slane %v5105_v48, 4  ;;  %v5540_v1 = vrot.slane %v5538_v7, 4  ;;  %v5116_v5 = vrot.slane %v5115_v58, 4  ;;  %v7028_v35 = vpack.c.b16 %v6998_v43, %v6997_v27 }
 0x2a6   : > { %v12709_v16 = vpop.f32.mrf.mxu0  ;;  %v12717_v26 = vrot.slane %v4694_v59, 7  ;;  %v4386_v30 = vmul.f32 %v4354_v46, %v4258_v25  ;;  %v4259_v63 = vadd.f32 %v12630_v37, %v4223_v44  ;;  %v12722_v6 = vpop.f32.mrf.mxu3  ;;  %v12731_v57 = vld [vmem:[#allocation2 + $0x20] sm:$0x1]  ;;  %v4530_v31 = vld [vmem:[#allocation2 + $0x74] sm:$0x1]  ;;  %v5123_v0 = vshrl.u32 %v5030_v52, 16 }
 0x2a7   : > { %v3090_v8 = vpop.f32.mrf.mxu2  ;;  %v4531_v59 = vsel %vm12131_vm11, 0, %v4530_v31  ;;  %v5111_v46 = vsel %vm10843_vm3, %v5106_v11, %v12692_v19  ;;  %v5132_v14 = vshll.u32 %v12696_v3, 16  ;;  %v5136_v45 = vshrl.u32 %v12696_v3, 16  ;;  %v4960_v19 = vld [vmem:[#allocation2 + $0x5c] sm:$0x1] }
 0x2a8   : > { %v4699_v55 = vor.u32 %v4697_v62, %v12717_v26  ;;  %v4418_v33 = vmul.f32 0.16666667, %v4386_v30  ;;  %v4291_v25 = vadd.f32 3.0, %v4259_v63  ;;  %v3148_v17 = vadd.f32 %v3090_v8, %v2849_v61  ;;  %4532 = vst [vmem:[#allocation2 + $0x74] sm:$0x1] %v4531_v59 }
 0x2a9   : > { %8330 = vmatmul.bf16.vlgmr.msrb.gmra.mxu0 %v10453_v39  ;;  %v5541_v62 = vrot.slane %v12731_v57, 5  ;;  %v4700_v30 = vrot.slane %v12717_v26, 4  ;;  %v5125_v8 = vrot.slane %v5123_v0, 4  ;;  %v5138_v26 = vrot.slane %v5136_v45, 4  ;;  %v12777_v59 = vld [vmem:[#allocation2 + $0x28] sm:$0xf] }
 0x2aa   : > { %v4957_v2 = vsel %vm12260_vm13, %v4699_v55, %v4956_v28  ;;  %v4570_v49 = vpack.c.bf16 %v4418_v33, %v4418_v33  ;;  %v4323_v41 = vmax.f32 %v4291_v25, 0.0  ;;  %v3814_v50 = vadd.f32 %v12659_v12, %v3148_v17 }
 0x2ab   : > { %4958 = vst [vmem:[#allocation2 + $0x54] sm:$0xf] %v4957_v2  ;;  %v10443_v32 = vld [vmem:[#allocation2 + $0x48] sm:$0xff]  ;;  %8246 = vmatmul.bf16.gmra.mxu3 %v7028_v35  ;;  %v5126_v12 = vshll.u32 %v5030_v52, 16  ;;  %v5121_v28 = vsel %vm10843_vm3, %v5116_v5, %v5120_v24  ;;  %v12752_v25 = vrot.slane %v5132_v14, 5  ;;  %v2851_v2 = vadd.f32 %v11796_v54, %v11857_v36 }
 0x2ac   : > { %v4702_v40 = vshrl.u32 %v4570_v49, 16  ;;  %v4355_v20 = vmin.f32 %v4323_v41, 6.0  ;;  %8152 = vmatmul.bf16.vlgmr.msrb.gmra.mxu2 %v6963_v47  ;;  %v4224_v44 = vadd.f32 %v12679_v15, %v3814_v50  ;;  %8093 = vmatmul.bf16.gmra.mxu1 %v10443_v32  ;;  %v4705_v58 = vshll.u32 %v4570_v49, 16  ;;  %v4477_v54 = vld [vmem:[#allocation2 + $0x78] sm:$0x1] }
 0x2ad   : > { %v5128_v33 = vrot.slane %v5126_v12, 5  ;;  %v5539_v41 = vsel %vm11069_vm6, %v9843_v38, %v5538_v7  ;;  %v6934_v32 = vunpack.c.l.b16 %v5121_v28  ;;  %v5542_v35 = vsel %vm11069_vm6, %v5540_v1, %v5541_v62  ;;  %v4963_v1 = vld [vmem:[#allocation2 + $0x60] sm:$0xf]  ;;  %v5032_v62 = vld [vmem:[#allocation2 + $0x24] sm:$0xf] }
 0x2ae   : > { %v12740_v22 = vpop.f32.mrf.mxu0  ;;  %v4704_v48 = vrot.slane %v4702_v40, 7  ;;  %v4387_v51 = vmul.f32 %v4355_v20, %v4259_v63  ;;  %v4260_v15 = vadd.f32 %v12630_v37, %v4224_v44  ;;  %v12747_v61 = vpop.f32.mrf.mxu3  ;;  %v5139_v0 = vor.u32 %v5138_v26, %v12752_v25  ;;  %v10454_v20 = vld [vmem:[#allocation2 + $0x18] sm:$0xff]  ;;  %v4533_v26 = vld [vmem:[#allocation2 + $0x80] sm:$0x1] }
 0x2af   : > { %v3093_v39 = vpop.f32.mrf.mxu2  ;;  %v5129_v36 = vor.u32 %v5128_v33, %v5125_v8  ;;  %v5142_v3 = vshll.u32 %v12731_v57, 16  ;;  %v6999_v14 = vunpack.c.l.b16 %v5539_v41  ;;  %v7000_v45 = vunpack.c.l.b16 %v5542_v35 }
 0x2b0   : > { %v4707_v47 = vor.u32 %v4705_v58, %v4704_v48  ;;  %v4709_v27 = vrot.slane %v4704_v48, 4  ;;  %v4419_v43 = vmul.f32 0.16666667, %v4387_v51  ;;  %v3149_v55 = vadd.f32 %v3093_v39, %v11844_v9 }
 0x2b1   : > { %v4292_v63 = vadd.f32 3.0, %v4260_v15  ;;  %v6933_v9 = vunpack.c.l.b16 %v5111_v46  ;;  %v5144_v39 = vrot.slane %v5142_v3, 5  ;;  %v5545_v28 = vrot.slane %v12777_v59, 5 }
 0x2b2   : > { %v4708_v52 = vsel %vm12303_vm15, %v4700_v30, %v4707_v47  ;;  %v4961_v17 = vsel %vm12089_vm9, %v4709_v27, %v4960_v19  ;;  %v4571_v11 = vpack.c.bf16 %v4419_v43, %v4419_v43  ;;  %v3815_v24 = vadd.f32 %v12689_v18, %v3149_v55  ;;  %v5461_v55 = vld [vmem:[#allocation2 + $0x24] sm:$0xe] }
 0x2b3   : > { %4959 = vst [vmem:[#allocation2 + $0x58] sm:$0xf] %v4708_v52  ;;  %v4324_v49 = vmax.f32 %v4292_v63, 0.0  ;;  %v6964_v51 = vpack.c.b16 %v6934_v32, %v6933_v9  ;;  %v12782_v19 = vrot.slane %v5129_v36, 4  ;;  %v5140_v43 = vrot.slane %v5139_v0, 4 }
 0x2b4   : > { %4962 = vst [vmem:[#allocation2 + $0x5c] sm:$0x1] %v4961_v17  ;;  %v4711_v5 = vshrl.u32 %v4571_v11, 16  ;;  %v4225_v50 = vadd.f32 %v12709_v16, %v3815_v24  ;;  %v4714_v7 = vshll.u32 %v4571_v11, 16  ;;  %v4478_v16 = vsel %vm12089_vm9, 0, %v4477_v54 }
 0x2b5   : > { %v4356_v18 = vmin.f32 %v4324_v49, 6.0  ;;  %4479 = vst [vmem:[#allocation2 + $0x78] sm:$0x1] %v4478_v16  ;;  %v7029_v33 = vpack.c.b16 %v7000_v45, %v6999_v14  ;;  %v5147_v52 = vshrl.u32 %v5032_v62, 16  ;;  %v5150_v17 = vshll.u32 %v5032_v62, 16 }
 0x2b6   : > { %v12768_v31 = vpop.f32.mrf.mxu0  ;;  %v12772_v40 = vrot.slane %v4711_v5, 7  ;;  %v4261_v38 = vadd.f32 %v12630_v37, %v4225_v50  ;;  %v12779_v12 = vpop.f32.mrf.mxu3  ;;  %v5156_v49 = vshll.u32 %v12777_v59, 16  ;;  %v5135_v41 = vsel %vm10843_vm3, %v12782_v19, %v12752_v25 }
 0x2b7   : > { %v4388_v46 = vmul.f32 %v4356_v18, %v4260_v15  ;;  %v3095_v44 = vpop.f32.mrf.mxu2  ;;  %v9844_v5 = vrot.slane %v5461_v55, 9  ;;  %v12799_v50 = vpop.f32.mrf.mxu1  ;;  %v5145_v18 = vsel %vm10843_vm3, %v5140_v43, %v5144_v39  ;;  %v5547_v54 = vrot.slane %v5545_v28, 4  ;;  %v10455_v55 = vld [vmem:[#allocation2 + $0x24] sm:$0xff] }
 0x2b8   : > { %v4716_v57 = vor.u32 %v4714_v7, %v12772_v40  ;;  %v4293_v48 = vadd.f32 3.0, %v4261_v38  ;;  %v3150_v58 = vadd.f32 %v3095_v44, %v2851_v2  ;;  %v4534_v2 = vsel %vm12131_vm11, 0, %v4533_v26 }
 0x2b9   : > { %8335 = vmatmul.bf16.gmra.mxu0 %v10454_v20  ;;  %v4420_v30 = vmul.f32 0.16666667, %v4388_v46  ;;  %4535 = vst [vmem:[#allocation2 + $0x80] sm:$0x1] %v4534_v2  ;;  %v5061_v20 = vld [vmem:[#allocation2 + $0x2c] sm:$0x1]  ;;  %v6935_v43 = vunpack.c.l.b16 %v5135_v41 }
 0x2ba   : > { %v4964_v15 = vsel %vm12260_vm13, %v4716_v57, %v4963_v1  ;;  %v4325_v8 = vmax.f32 %v4293_v48, 0.0  ;;  %v3816_v47 = vadd.f32 %v12722_v6, %v3150_v58  ;;  %v10444_v27 = vld [vmem:[#allocation2 + $0x54] sm:$0xff]  ;;  %v5149_v16 = vrot.slane %v5147_v52, 4  ;;  %v4967_v1 = vld [vmem:[#allocation2 + $0x68] sm:$0x1] }
 0x2bb   : > { %4965 = vst [vmem:[#allocation2 + $0x60] sm:$0xf] %v4964_v15  ;;  %v4572_v63 = vpack.c.bf16 %v4420_v30, %v4420_v30  ;;  %8251 = vmatmul.bf16.gmra.mxu3 %v7029_v33  ;;  %v5152_v25 = vrot.slane %v5150_v17, 5  ;;  %v4717_v14 = vrot.slane %v12772_v40, 4  ;;  %v5548_v30 = vrot.slane %v5061_v20, 5 }
 0x2bc   : > { %v4357_v11 = vmin.f32 %v4325_v8, 6.0  ;;  %v4226_v24 = vadd.f32 %v12740_v22, %v3816_v47  ;;  %8157 = vmatmul.bf16.gmra.mxu2 %v6964_v51  ;;  %8098 = vmatmul.bf16.gmra.mxu1 %v10444_v27  ;;  %v5160_v22 = vshrl.u32 %v12777_v59, 16  ;;  %v6936_v15 = vunpack.c.l.b16 %v5145_v18  ;;  %v4480_v2 = vld [vmem:[#allocation2 + $0x84] sm:$0x1]  ;;  %v4970_v41 = vld [vmem:[#allocation2 + $0x6c] sm:$0xf] }
 0x2bd   : > { %v4719_v9 = vshrl.u32 %v4572_v63, 16  ;;  %v4722_v0 = vshll.u32 %v4572_v63, 16  ;;  %v5549_v27 = vsel %vm11069_vm6, %v5547_v54, %v5548_v30  ;;  %v10520_v63 = vld [vmem:[%s14803_s3 + $0x118] sm:$0xff]  ;;  %v5153_v33 = vor.u32 %v5152_v25, %v5149_v16  ;;  %v12839_v54 = vld [vmem:[#allocation2 + $0x34] sm:$0xf] }
 0x2be   : > { %v12792_v6 = vpop.f32.mrf.mxu0  ;;  %v4389_v32 = vmul.f32 %v4357_v11, %v4261_v38  ;;  %v4262_v35 = vadd.f32 %v12630_v37, %v4226_v24  ;;  %v12804_v7 = vpop.f32.mrf.mxu3  ;;  %v12807_v38 = vrot.slane %v5156_v49, 5  ;;  %v5162_v48 = vrot.slane %v5160_v22, 4  ;;  %v12831_v49 = vld [vmem:[#allocation2 + $0x30] sm:$0xf]  ;;  %8415 = vmatpush.bf16.msrb.mxu1 %v10520_v63  ;;  %v4974_v63 = vld [vmem:[#allocation2 + $0x74] sm:$0x1] }
 0x2bf   : > { %v4721_v36 = vrot.slane %v4719_v9, 7  ;;  %v3098_v3 = vpop.f32.mrf.mxu2  ;;  %v5166_v26 = vshll.u32 %v5061_v20, 16  ;;  %v12829_v24 = vpop.f32.mrf.mxu1  ;;  %v2853_v9 = vadd.f32 %v11841_v13, %v11895_v53  ;;  %v6965_v20 = vpack.c.b16 %v6936_v15, %v6935_v43 }
 0x2c0   : > { %v4421_v46 = vmul.f32 0.16666667, %v4389_v32  ;;  %v4294_v59 = vadd.f32 3.0, %v4262_v35  ;;  %v3151_v44 = vadd.f32 %v3098_v3, %v11879_v4  ;;  %v5546_v4 = vsel %vm11069_vm6, %v9844_v5, %v5545_v28 }
 0x2c1   : > { %v4724_v45 = vor.u32 %v4722_v0, %v4721_v36  ;;  %v4726_v57 = vrot.slane %v4721_v36, 4  ;;  %v5163_v28 = vor.u32 %v5162_v48, %v12807_v38  ;;  %v4481_v32 = vsel %vm12089_vm9, 0, %v4480_v2 }
 0x2c2   : > { %v4573_v58 = vpack.c.bf16 %v4421_v46, %v4421_v46  ;;  %v4326_v51 = vmax.f32 %v4294_v59, 0.0  ;;  %v3817_v62 = vadd.f32 %v12747_v61, %v3151_v44  ;;  %v7001_v18 = vunpack.c.l.b16 %v5546_v4  ;;  %4482 = vst [vmem:[#allocation2 + $0x84] sm:$0x1] %v4481_v32  ;;  %v12844_v44 = vld [vmem:[#allocation2 + $0x38] sm:$0x1] }
 0x2c3   : > { %v4725_v19 = vsel %vm12303_vm15, %v4717_v14, %v4724_v45  ;;  %v4968_v39 = vsel %vm12089_vm9, %v4726_v57, %v4967_v1  ;;  %v5154_v53 = vrot.slane %v5153_v33, 4  ;;  %v5164_v16 = vrot.slane %v5163_v28, 4  ;;  %v5462_v14 = vld [vmem:[#allocation2 + $0x30] sm:$0xe] }
 0x2c4   : > { %4966 = vst [vmem:[#allocation2 + $0x64] sm:$0xf] %v4725_v19  ;;  %v4728_v40 = vshrl.u32 %v4573_v58, 16  ;;  %v4358_v8 = vmin.f32 %v4326_v51, 6.0  ;;  %v4227_v47 = vadd.f32 %v12768_v31, %v3817_v62  ;;  %v4731_v17 = vshll.u32 %v4573_v58, 16 }
 0x2c5   : > { %4969 = vst [vmem:[#allocation2 + $0x68] sm:$0x1] %v4968_v39  ;;  %v5168_v25 = vrot.slane %v5166_v26, 5  ;;  %v5552_v45 = vrot.slane %v12839_v54, 5  ;;  %v12849_v57 = vadd.f32 %v11887_v56, %v11931_v42  ;;  %v4536_v62 = vld [vmem:[#allocation2 + $0x8c] sm:$0x1]  ;;  %v5159_v4 = vsel %vm10843_vm3, %v5154_v53, %v12807_v38 }
 0x2c6   : > { %v12820_v61 = vpop.f32.mrf.mxu0  ;;  %v12826_v52 = vrot.slane %v4728_v40, 7  ;;  %v4390_v31 = vmul.f32 %v4358_v8, %v4262_v35  ;;  %v4263_v11 = vadd.f32 %v12630_v37, %v4227_v47  ;;  %v12835_v22 = vpop.f32.mrf.mxu3  ;;  %v7002_v35 = vunpack.c.l.b16 %v5549_v27 }
 0x2c7   : > { %v3100_v5 = vpop.f32.mrf.mxu2  ;;  %v5171_v30 = vshrl.u32 %v12831_v49, 16  ;;  %v4537_v15 = vsel %vm12131_vm11, 0, %v4536_v62  ;;  %v9845_v40 = vrot.slane %v5462_v14, 9  ;;  %v5174_v8 = vshll.u32 %v12831_v49, 16  ;;  %v12870_v32 = vpop.f32.mrf.mxu1 }
 0x2c8   : > { %v4733_v36 = vor.u32 %v4731_v17, %v12826_v52  ;;  %v4422_v0 = vmul.f32 0.16666667, %v4390_v31  ;;  %v4295_v3 = vadd.f32 3.0, %v4263_v11  ;;  %v3152_v13 = vadd.f32 %v3100_v5, %v2853_v9  ;;  %4538 = vst [vmem:[#allocation2 + $0x8c] sm:$0x1] %v4537_v15  ;;  %v14863_v15 = vld [vmem:[#allocation18_spill] sm:$0xff] }
 0x2c9   : > { %8340 = vmatmul.bf16.gmra.mxu0 %v10455_v55  ;;  %v7030_v51 = vpack.c.b16 %v7002_v35, %v7001_v18  ;;  %v5555_v55 = vrot.slane %v12844_v44, 5  ;;  %v4734_v38 = vrot.slane %v12826_v52, 4  ;;  %v5554_v26 = vrot.slane %v5552_v45, 4 }
 0x2ca   : > { %v4971_v1 = vsel %vm12260_vm13, %v4733_v36, %v4970_v41  ;;  %v4574_v46 = vpack.c.bf16 %v4422_v0, %v4422_v0  ;;  %v4327_v59 = vmax.f32 %v4295_v3, 0.0  ;;  %v3818_v48 = vadd.f32 %v12779_v12, %v3152_v13  ;;  %v14861_v41 = vld [vmem:[#allocation17_spill] sm:$0xff] }
 0x2cb   : > { %4972 = vst [vmem:[#allocation2 + $0x6c] sm:$0xf] %v4971_v1  ;;  %v10445_v58 = vld [vmem:[#allocation2 + $0x60] sm:$0xff]  ;;  %8256 = vmatmul.bf16.gmra.mxu3 %v7030_v51  ;;  %v5169_v12 = vsel %vm10843_vm3, %v5164_v16, %v5168_v25  ;;  %v5173_v17 = vrot.slane %v5171_v30, 4  ;;  %v5180_v18 = vshll.u32 %v12839_v54, 16  ;;  %v5184_v52 = vshrl.u32 %v12839_v54, 16 }
 0x2cc   : > { %v4736_v19 = vshrl.u32 %v4574_v46, 16  ;;  %v4359_v39 = vmin.f32 %v4327_v59, 6.0  ;;  %8162 = vmatmul.bf16.gmra.mxu2 %v6965_v20  ;;  %v4228_v56 = vadd.f32 %v12792_v6, %v3818_v48  ;;  %8103 = vmatmul.bf16.gmra.mxu1 %v10445_v58  ;;  %v4739_v27 = vshll.u32 %v4574_v46, 16 }
 0x2cd   : > { %v6937_v13 = vunpack.c.l.b16 %v5159_v4  ;;  %v6938_v53 = vunpack.c.l.b16 %v5169_v12  ;;  %v5553_v16 = vsel %vm11069_vm6, %v9845_v40, %v5552_v45  ;;  %v5556_v1 = vsel %vm11069_vm6, %v5554_v26, %v5555_v55  ;;  %v5036_v26 = vld [vmem:[#allocation2 + $0x3c] sm:$0xf] }
 0x2ce   : > { %v12859_v42 = vpop.f32.mrf.mxu0  ;;  %v4738_v47 = vrot.slane %v4736_v19, 7  ;;  %v4391_v43 = vmul.f32 %v4359_v39, %v4263_v11  ;;  %v4264_v6 = vadd.f32 %v12630_v37, %v4228_v56  ;;  %v12867_v28 = vpop.f32.mrf.mxu3  ;;  %v5176_v11 = vrot.slane %v5174_v8, 5  ;;  %v10456_v19 = vld [vmem:[#allocation2 + $0x30] sm:$0xff]  ;;  %v12894_v39 = vld [vmem:[#allocation2 + $0x40] sm:$0xf] }
 0x2cf   : > { %v3103_v33 = vpop.f32.mrf.mxu2  ;;  %v5190_v46 = vshll.u32 %v12844_v44, 16  ;;  %v12887_v58 = vrot.slane %v5180_v18, 5  ;;  %v5186_v51 = vrot.slane %v5184_v52, 4  ;;  %v14862_v44 = vld [vmem:[#allocation20_spill] sm:$0xff]  ;;  %v4977_v56 = vld [vmem:[#allocation2 + $0x78] sm:$0xf] }
 0x2d0   : > { %v4741_v31 = vor.u32 %v4739_v27, %v4738_v47  ;;  %v4743_v2 = vrot.slane %v4738_v47, 4  ;;  %v4423_v9 = vmul.f32 0.16666667, %v4391_v43  ;;  %v3153_v49 = vadd.f32 %v3103_v33, %v14861_v41  ;;  %v5463_v33 = vld [vmem:[#allocation2 + $0x3c] sm:$0xe] }
 0x2d1   : > { %v4296_v5 = vadd.f32 3.0, %v4264_v6  ;;  %v5177_v48 = vor.u32 %v5176_v11, %v5173_v17  ;;  %v12898_v4 = vadd.f32 %v14863_v15, %v14862_v44  ;;  %v6966_v47 = vpack.c.b16 %v6938_v53, %v6937_v13  ;;  %v12913_v18 = vld [vmem:[#allocation2 + $0x44] sm:$0x1] }
 0x2d2   : > { %v4742_v35 = vsel %vm12303_vm15, %v4734_v38, %v4741_v31  ;;  %v4975_v36 = vsel %vm12089_vm9, %v4743_v2, %v4974_v63  ;;  %v4575_v0 = vpack.c.bf16 %v4423_v9, %v4423_v9  ;;  %v3819_v3 = vadd.f32 %v12804_v7, %v3153_v49  ;;  %v4483_v7 = vld [vmem:[#allocation2 + $0x90] sm:$0x1] }
 0x2d3   : > { %4973 = vst [vmem:[#allocation2 + $0x70] sm:$0xf] %v4742_v35  ;;  %v4328_v20 = vmax.f32 %v4296_v5, 0.0  ;;  %v7004_v27 = vunpack.c.l.b16 %v5556_v1  ;;  %v7003_v63 = vunpack.c.l.b16 %v5553_v16  ;;  %v12906_v2 = vrot.slane %v5177_v48, 4 }
 0x2d4   : > { %4976 = vst [vmem:[#allocation2 + $0x74] sm:$0x1] %v4975_v36  ;;  %v4745_v25 = vshrl.u32 %v4575_v0, 16  ;;  %v4229_v54 = vadd.f32 %v12820_v61, %v3819_v3  ;;  %v4748_v45 = vshll.u32 %v4575_v0, 16  ;;  %v4484_v61 = vsel %vm12089_vm9, 0, %v4483_v7 }
 0x2d5   : > { %v4360_v59 = vmin.f32 %v4328_v20, 6.0  ;;  %4485 = vst [vmem:[#allocation2 + $0x90] sm:$0x1] %v4484_v61  ;;  %v5559_v9 = vrot.slane %v12894_v39, 5  ;;  %v7031_v35 = vpack.c.b16 %v7004_v27, %v7003_v63  ;;  %v4539_v36 = vld [vmem:[#allocation2 + $0x98] sm:$0x1] }
 0x2d6   : > { %v12885_v14 = vpop.f32.mrf.mxu0  ;;  %v12889_v62 = vrot.slane %v4745_v25, 7  ;;  %v4265_v30 = vadd.f32 %v12630_v37, %v4229_v54  ;;  %v12900_v8 = vpop.f32.mrf.mxu3  ;;  %v5195_v0 = vshrl.u32 %v5036_v26, 16  ;;  %v5198_v3 = vshll.u32 %v5036_v26, 16 }
 0x2d7   : > { %v4392_v12 = vmul.f32 %v4360_v59, %v4264_v6  ;;  %v3105_v40 = vpop.f32.mrf.mxu2  ;;  %v5192_v6 = vrot.slane %v5190_v46, 5  ;;  %v4540_v53 = vsel %vm12131_vm11, 0, %v4539_v36  ;;  %v9846_v16 = vrot.slane %v5463_v33, 9 }
 0x2d8   : > { %v4750_v43 = vor.u32 %v4748_v45, %v12889_v62  ;;  %v4297_v55 = vadd.f32 3.0, %v4265_v30  ;;  %v3154_v38 = vadd.f32 %v3105_v40, %v12849_v57  ;;  %v12904_v31 = vpop.f32.mrf.mxu1  ;;  %v5187_v57 = vor.u32 %v5186_v51, %v12887_v58  ;;  %4541 = vst [vmem:[#allocation2 + $0x98] sm:$0x1] %v4540_v53 }
 0x2d9   : > { %8345 = vmatmul.bf16.gmra.mxu0 %v10456_v19  ;;  %v4424_v17 = vmul.f32 0.16666667, %v4392_v12  ;;  %v5562_v54 = vrot.slane %v12913_v18, 5  ;;  %v5204_v1 = vshll.u32 %v12894_v39, 16  ;;  %v5208_v46 = vshrl.u32 %v12894_v39, 16 }
 0x2da   : > { %v4978_v41 = vsel %vm12260_vm13, %v4750_v43, %v4977_v56  ;;  %v4329_v49 = vmax.f32 %v4297_v55, 0.0  ;;  %v3820_v5 = vadd.f32 %v12835_v22, %v3154_v38  ;;  %v10446_v11 = vld [vmem:[#allocation2 + $0x6c] sm:$0xff]  ;;  %v5188_v7 = vrot.slane %v5187_v57, 4  ;;  %v4981_v56 = vld [vmem:[#allocation2 + $0x80] sm:$0x1] }
 0x2db   : > { %4979 = vst [vmem:[#allocation2 + $0x78] sm:$0xf] %v4978_v41  ;;  %v4576_v52 = vpack.c.bf16 %v4424_v17, %v4424_v17  ;;  %8261 = vmatmul.bf16.gmra.mxu3 %v7031_v35  ;;  %v5561_v48 = vrot.slane %v5559_v9, 4  ;;  %v5197_v61 = vrot.slane %v5195_v0, 4  ;;  %v5200_v44 = vrot.slane %v5198_v3, 5  ;;  %v10519_v0 = vld [vmem:[%s14803_s3 + $0x110] sm:$0xff] }
 0x2dc   : > { %v4361_v20 = vmin.f32 %v4329_v49, 6.0  ;;  %v4230_v13 = vadd.f32 %v12859_v42, %v3820_v5  ;;  %8167 = vmatmul.bf16.gmra.mxu2 %v6966_v47  ;;  %8108 = vmatmul.bf16.gmra.mxu1 %v10446_v11  ;;  %v4751_v15 = vrot.slane %v12889_v62, 4  ;;  %v14864_v47 = vld [vmem:[#allocation19_spill] sm:$0xff]  ;;  %v12930_v38 = vrot.slane %v5204_v1, 5  ;;  %v12955_v3 = vld [vmem:[#allocation2 + $0x4c] sm:$0xf] }
 0x2dd   : > { %v4753_v22 = vshrl.u32 %v4576_v52, 16  ;;  %v4756_v45 = vshll.u32 %v4576_v52, 16  ;;  %v5210_v63 = vrot.slane %v5208_v46, 4  ;;  %v5193_v62 = vsel %vm10843_vm3, %v5188_v7, %v5192_v6  ;;  %8416 = vmatpush.bf16.msrb.mxu1 %v10519_v0 }
 0x2de   : > { %v12918_v25 = vpop.f32.mrf.mxu0  ;;  %v4393_v59 = vmul.f32 %v4361_v20, %v4265_v30  ;;  %v4266_v42 = vadd.f32 %v12630_v37, %v4230_v13  ;;  %v12926_v43 = vpop.f32.mrf.mxu3  ;;  %v5183_v5 = vsel %vm10843_vm3, %v12906_v2, %v12887_v58  ;;  %v5560_v11 = vsel %vm11069_vm6, %v9846_v16, %v5559_v9  ;;  %v10457_v16 = vld [vmem:[#allocation2 + $0x3c] sm:$0xff] }
 0x2df   : > { %v4755_v51 = vrot.slane %v4753_v22, 7  ;;  %v3108_v19 = vpop.f32.mrf.mxu2  ;;  %v5563_v6 = vsel %vm11069_vm6, %v5561_v48, %v5562_v54  ;;  %v6940_v36 = vunpack.c.l.b16 %v5193_v62  ;;  %v5201_v58 = vor.u32 %v5200_v44, %v5197_v61  ;;  %v4486_v22 = vld [vmem:[#allocation2 + $0x9c] sm:$0x1]  ;;  %v4984_v54 = vld [vmem:[#allocation2 + $0x84] sm:$0xf] }
 0x2e0   : > { %v4425_v12 = vmul.f32 0.16666667, %v4393_v59  ;;  %v4298_v40 = vadd.f32 3.0, %v4266_v42  ;;  %v3155_v27 = vadd.f32 %v3108_v19, %v14864_v47  ;;  %v12928_v55 = vpop.f32.mrf.mxu1  ;;  %v5211_v2 = vor.u32 %v5210_v63, %v12930_v38  ;;  %v5038_v63 = vld [vmem:[#allocation2 + $0x48] sm:$0xf] }
 0x2e1   : > { %v4758_v39 = vor.u32 %v4756_v45, %v4755_v51  ;;  %v4760_v30 = vrot.slane %v4755_v51, 4  ;;  %v5214_v9 = vshll.u32 %v12913_v18, 16  ;;  %v6939_v46 = vunpack.c.l.b16 %v5183_v5  ;;  %v12962_v18 = vld [vmem:[#allocation2 + $0x48] sm:$0xe] }
 0x2e2   : > { %v4577_v33 = vpack.c.bf16 %v4425_v12, %v4425_v12  ;;  %v4330_v26 = vmax.f32 %v4298_v40, 0.0  ;;  %v3821_v17 = vadd.f32 %v12867_v28, %v3155_v27  ;;  %v4487_v59 = vsel %vm12089_vm9, 0, %v4486_v22 }
 0x2e3   : > { %v4759_v41 = vsel %vm12303_vm15, %v4751_v15, %v4758_v39  ;;  %v4982_v49 = vsel %vm12089_vm9, %v4760_v30, %v4981_v56  ;;  %v7005_v7 = vunpack.c.l.b16 %v5560_v11  ;;  %v7006_v48 = vunpack.c.l.b16 %v5563_v6  ;;  %4488 = vst [vmem:[#allocation2 + $0x9c] sm:$0x1] %v4487_v59  ;;  %v12975_v30 = vld [vmem:[#allocation2 + $0x50] sm:$0x1]  ;;  %v14865_v59 = vld [vmem:[#allocation22_spill] sm:$0xff] }
 0x2e4   : > { %4980 = vst [vmem:[#allocation2 + $0x7c] sm:$0xf] %v4759_v41  ;;  %v4762_v57 = vshrl.u32 %v4577_v33, 16  ;;  %v4362_v28 = vmin.f32 %v4330_v26, 6.0  ;;  %v4231_v52 = vadd.f32 %v12885_v14, %v3821_v17  ;;  %v4765_v14 = vshll.u32 %v4577_v33, 16 }
 0x2e5   : > { %4983 = vst [vmem:[#allocation2 + $0x80] sm:$0x1] %v4982_v49  ;;  %v6967_v44 = vpack.c.b16 %v6940_v36, %v6939_v46  ;;  %v12969_v15 = vrot.slane %v5201_v58, 4  ;;  %v5216_v56 = vrot.slane %v5214_v9, 5  ;;  %v5212_v39 = vrot.slane %v5211_v2, 4 }
 0x2e6   : > { %v12948_v35 = vpop.f32.mrf.mxu0  ;;  %v12957_v20 = vrot.slane %v4762_v57, 7  ;;  %v4394_v13 = vmul.f32 %v4362_v28, %v4266_v42  ;;  %v4267_v53 = vadd.f32 %v12630_v37, %v4231_v52  ;;  %v12965_v42 = vpop.f32.mrf.mxu3  ;;  %v5566_v37 = vrot.slane %v12955_v3, 5  ;;  %v4542_v17 = vld [vmem:[#allocation2 + $0xa4] sm:$0x1] }
 0x2e7   : > { %v3110_v1 = vpop.f32.mrf.mxu2  ;;  %v5207_v62 = vsel %vm10843_vm3, %v12969_v15, %v12930_v38  ;;  %v9847_v41 = vrot.slane %v12962_v18, 9  ;;  %v4543_v11 = vsel %vm12131_vm11, 0, %v4542_v17  ;;  %v5569_v38 = vrot.slane %v12975_v30, 5 }
 0x2e8   : > { %v4767_v51 = vor.u32 %v4765_v14, %v12957_v20  ;;  %v4426_v45 = vmul.f32 0.16666667, %v4394_v13  ;;  %v4299_v19 = vadd.f32 3.0, %v4267_v53  ;;  %v3156_v61 = vadd.f32 %v3110_v1, %v12898_v4  ;;  %4544 = vst [vmem:[#allocation2 + $0xa4] sm:$0x1] %v4543_v11 }
 0x2e9   : > { %8350 = vmatmul.bf16.gmra.mxu0 %v10457_v16  ;;  %v12973_v27 = vpop.f32.mrf.mxu1  ;;  %v7032_v4 = vpack.c.b16 %v7006_v48, %v7005_v7  ;;  %v5568_v57 = vrot.slane %v5566_v37, 4  ;;  %v5219_v52 = vshrl.u32 %v5038_v63, 16  ;;  %v5222_v6 = vshll.u32 %v5038_v63, 16  ;;  %v4988_v14 = vld [vmem:[#allocation2 + $0x8c] sm:$0x1]  ;;  %v14866_v63 = vld [vmem:[#allocation23_spill] sm:$0xff] }
 0x2ea   : > { %v4985_v12 = vsel %vm12260_vm13, %v4767_v51, %v4984_v54  ;;  %v4578_v40 = vpack.c.bf16 %v4426_v45, %v4426_v45  ;;  %v4331_v47 = vmax.f32 %v4299_v19, 0.0  ;;  %v3822_v33 = vadd.f32 %v12900_v8, %v3156_v61 }
 0x2eb   : > { %4986 = vst [vmem:[#allocation2 + $0x84] sm:$0xf] %v4985_v12  ;;  %v10447_v26 = vld [vmem:[#allocation2 + $0x78] sm:$0xff]  ;;  %8266 = vmatmul.bf16.gmra.mxu3 %v7032_v4  ;;  %v5217_v2 = vsel %vm10843_vm3, %v5212_v39, %v5216_v56  ;;  %v4768_v9 = vrot.slane %v12957_v20, 4  ;;  %v5228_v22 = vshll.u32 %v12955_v3, 16  ;;  %v5232_v54 = vshrl.u32 %v12955_v3, 16 }
 0x2ec   : > { %v4770_v49 = vshrl.u32 %v4578_v40, 16  ;;  %v4363_v5 = vmin.f32 %v4331_v47, 6.0  ;;  %8172 = vmatmul.bf16.gmra.mxu2 %v6967_v44  ;;  %v4232_v8 = vadd.f32 %v12918_v25, %v3822_v33  ;;  %8113 = vmatmul.bf16.gmra.mxu1 %v10447_v26  ;;  %v4773_v0 = vshll.u32 %v4578_v40, 16  ;;  %v12997_v25 = vld [vmem:[%s14802_s2] ss:$0 sm:$0xff]  ;;  %v14867_v33 = vld [vmem:[#allocation21_spill] sm:$0xff] }
 0x2ed   : > { %v5570_v18 = vsel %vm11069_vm6, %v5568_v57, %v5569_v38  ;;  %v5221_v51 = vrot.slane %v5219_v52, 4  ;;  %v5224_v45 = vrot.slane %v5222_v6, 5  ;;  %v6942_v40 = vunpack.c.l.b16 %v5217_v2  ;;  %v4489_v57 = vld [vmem:[#allocation2 + $0xa8] sm:$0x1]  ;;  %v13030_v3 = vld [vmem:[#allocation2 + $0x54] sm:$0xe] }
 0x2ee   : > { %v12988_v28 = vpop.f32.mrf.mxu0  ;;  %v4772_v36 = vrot.slane %v4770_v49, 7  ;;  %v4395_v58 = vmul.f32 %v4363_v5, %v4267_v53  ;;  %v4268_v13 = vadd.f32 %v12997_v25, %v4232_v8  ;;  %v13003_v48 = vpop.f32.mrf.mxu3  ;;  %v13014_v47 = vrot.slane %v5228_v22, 5 }
 0x2ef   : > { %v3113_v16 = vpop.f32.mrf.mxu2  ;;  %v5234_v39 = vrot.slane %v5232_v54, 4  ;;  %v2859_v26 = vadd.f32 %v14867_v33, %v14866_v63  ;;  %v6941_v11 = vunpack.c.l.b16 %v5207_v62  ;;  %v7008_v8 = vunpack.c.l.b16 %v5570_v18 }
 0x2f0   : > { %v4775_v1 = vor.u32 %v4773_v0, %v4772_v36  ;;  %v4777_v53 = vrot.slane %v4772_v36, 4  ;;  %v4427_v46 = vmul.f32 0.16666667, %v4395_v58  ;;  %v3157_v7 = vadd.f32 %v3113_v16, %v14865_v59  ;;  %v10458_v0 = vld [vmem:[#allocation2 + $0x48] sm:$0xff]  ;;  %v4991_v58 = vld [vmem:[#allocation2 + $0x90] sm:$0xf] }
 0x2f1   : > { %v4300_v20 = vadd.f32 3.0, %v4268_v13  ;;  %v13012_v56 = vpop.f32.mrf.mxu1  ;;  %v5225_v38 = vor.u32 %v5224_v45, %v5221_v51  ;;  %v6968_v2 = vpack.c.b16 %v6942_v40, %v6941_v11  ;;  %vm9016_vm0 = vcmask 523264  }
 0x2f2   : > { %v4776_v19 = vsel %vm12303_vm15, %v4768_v9, %v4775_v1  ;;  %v4989_v61 = vsel %vm12089_vm9, %v4777_v53, %v4988_v14  ;;  %v4579_v44 = vpack.c.bf16 %v4427_v46, %v4427_v46  ;;  %v3823_v15 = vadd.f32 %v12926_v43, %v3157_v7  ;;  %v13033_v14 = vld [vmem:[#allocation2 + $0x58] sm:$0xf] }
 0x2f3   : > { %4987 = vst [vmem:[#allocation2 + $0x88] sm:$0xf] %v4776_v19  ;;  %v4332_v12 = vmax.f32 %v4300_v20, 0.0  ;;  %v5567_v43 = vsel %vm11069_vm6, %v9847_v41, %v5566_v37  ;;  %v5235_v9 = vor.u32 %v5234_v39, %v13014_v47  ;;  %v5238_v53 = vshll.u32 %v12975_v30, 16  ;;  %v5040_v20 = vld [vmem:[#allocation2 + $0x54] sm:$0xf] }
 0x2f4   : > { %4990 = vst [vmem:[#allocation2 + $0x8c] sm:$0x1] %v4989_v61  ;;  %v4779_v4 = vshrl.u32 %v4579_v44, 16  ;;  %v4233_v17 = vadd.f32 %v12948_v35, %v3823_v15  ;;  %v4782_v6 = vshll.u32 %v4579_v44, 16  ;;  %v4490_v35 = vsel %vm12089_vm9, 0, %v4489_v57 }
 0x2f5   : > { %v4364_v49 = vmin.f32 %v4332_v12, 6.0  ;;  %4491 = vst [vmem:[#allocation2 + $0xa8] sm:$0x1] %v4490_v35  ;;  %v7007_v62 = vunpack.c.l.b16 %v5567_v43  ;;  %v9848_v7 = vrot.slane %v13030_v3, 9  ;;  %v13047_v44 = vld [vmem:[#allocation2 + $0x5c] sm:$0x1] }
 0x2f6   : > { %v13023_v5 = vpop.f32.mrf.mxu0  ;;  %v13025_v52 = vrot.slane %v4779_v4, 7  ;;  %v4269_v36 = vadd.f32 %v12997_v25, %v4233_v17  ;;  %v13036_v1 = vpop.f32.mrf.mxu3  ;;  %v5573_v30 = vrot.slane %v13033_v14, 5  ;;  %v4545_v12 = vld [vmem:[#allocation2 + $0xb0] sm:$0x1]  ;;  %v5236_v39 = vrot.slane %v5235_v9, 4 }
 0x2f7   : > { %v4396_v37 = vmul.f32 %v4364_v49, %v4268_v13  ;;  %v3115_v41 = vpop.f32.mrf.mxu2  ;;  %v7033_v59 = vpack.c.b16 %v7008_v8, %v7007_v62  ;;  %v13039_v13 = vrot.slane %v5225_v38, 4  ;;  %v5252_v63 = vshll.u32 %v13033_v14, 16  ;;  %v14868_v9 = vld [vmem:[#allocation24_spill] sm:$0xff] }
 0x2f8   : > { %v4784_v16 = vor.u32 %v4782_v6, %v13025_v52  ;;  %v4301_v22 = vadd.f32 3.0, %v4269_v36  ;;  %v3158_v54 = vadd.f32 %v3115_v41, %v2859_v26  ;;  %v4546_v26 = vsel %vm12131_vm11, 0, %v4545_v12  ;;  %v4995_v41 = vld [vmem:[#allocation2 + $0x98] sm:$0x1] }
 0x2f9   : > { %8355 = vmatmul.bf16.gmra.mxu0 %v10458_v0  ;;  %v4428_v46 = vmul.f32 0.16666667, %v4396_v37  ;;  %v13045_v19 = vpop.f32.mrf.mxu1  ;;  %v5231_v40 = vsel %vm10843_vm3, %v13039_v13, %v13014_v47  ;;  %v5240_v4 = vrot.slane %v5238_v53, 5  ;;  %4547 = vst [vmem:[#allocation2 + $0xb0] sm:$0x1] %v4546_v26  ;;  %v5243_v49 = vshrl.u32 %v5040_v20, 16 }
 0x2fa   : > { %v4992_v18 = vsel %vm12260_vm13, %v4784_v16, %v4991_v58  ;;  %v4333_v51 = vmax.f32 %v4301_v22, 0.0  ;;  %v3824_v45 = vadd.f32 %v12965_v42, %v3158_v54  ;;  %v10448_v61 = vld [vmem:[#allocation2 + $0x84] sm:$0xff]  ;;  %v5246_v11 = vshll.u32 %v5040_v20, 16  ;;  %v14870_v26 = vld [vmem:[#allocation6_spill] sm:$0xff] }
 0x2fb   : > { %4993 = vst [vmem:[#allocation2 + $0x90] sm:$0xf] %v4992_v18  ;;  %v4580_v15 = vpack.c.bf16 %v4428_v46, %v4428_v46  ;;  %8271 = vmatmul.bf16.gmra.mxu3 %v7033_v59  ;;  %v5256_v57 = vshrl.u32 %v13033_v14, 16  ;;  %v5575_v6 = vrot.slane %v5573_v30, 4  ;;  %v4785_v0 = vrot.slane %v13025_v52, 4 }
 0x2fc   : > { %v4365_v33 = vmin.f32 %v4333_v51, 6.0  ;;  %v4234_v42 = vadd.f32 %v12988_v28, %v3824_v45  ;;  %8177 = vmatmul.bf16.gmra.mxu2 %v6968_v2  ;;  %8118 = vmatmul.bf16.gmra.mxu1 %v10448_v61  ;;  %v5576_v28 = vrot.slane %v13047_v44, 5  ;;  %v13064_v37 = vrot.slane %v5252_v63, 5 }
 0x2fd   : > { %v4787_v17 = vshrl.u32 %v4580_v15, 16  ;;  %v4790_v3 = vshll.u32 %v4580_v15, 16  ;;  %v5245_v53 = vrot.slane %v5243_v49, 4  ;;  %v5248_v46 = vrot.slane %v5246_v11, 5  ;;  %v10459_v11 = vld [vmem:[#allocation2 + $0x54] sm:$0xff] }
 0x2fe   : > { %v13058_v43 = vpop.f32.mrf.mxu0  ;;  %v4397_v8 = vmul.f32 %v4365_v33, %v4269_v36  ;;  %v4270_v38 = vadd.f32 %v12997_v25, %v4234_v42  ;;  %v13067_v22 = vpop.f32.mrf.mxu3  ;;  %v5258_v36 = vrot.slane %v5256_v57, 4  ;;  %v5241_v51 = vsel %vm10843_vm3, %v5236_v39, %v5240_v4  ;;  %v14869_v39 = vld [vmem:[#allocation7_spill] sm:$0xff] }
 0x2ff   : > { %v4789_v35 = vrot.slane %v4787_v17, 7  ;;  %v3118_v58 = vpop.f32.mrf.mxu2  ;;  %v5574_v15 = vsel %vm11069_vm6, %v9848_v7, %v5573_v30  ;;  %v5577_v12 = vsel %vm11069_vm6, %v5575_v6, %v5576_v28  ;;  %v2861_v4 = vadd.f32 %v14870_v26, %v14869_v39  ;;  %v10518_v7 = vld [vmem:[%s14803_s3 + $0x108] sm:$0xff] }
 0x300   : > { %v4429_v2 = vmul.f32 0.16666667, %v4397_v8  ;;  %v4302_v62 = vadd.f32 3.0, %v4270_v38  ;;  %v3159_v16 = vadd.f32 %v3118_v58, %v14868_v9  ;;  %v5259_v42 = vor.u32 %v5258_v36, %v13064_v37  ;;  %8417 = vmatpush.bf16.msrb.mxu1 %v10518_v7 }
 0x301   : > { %v4792_v14 = vor.u32 %v4790_v3, %v4789_v35  ;;  %v4794_v54 = vrot.slane %v4789_v35, 4  ;;  %v13070_v18 = vpop.f32.mrf.mxu1  ;;  %v6944_v49 = vunpack.c.l.b16 %v5241_v51  ;;  %v5249_v30 = vor.u32 %v5248_v46, %v5245_v53  ;;  %v13095_v35 = vld [vmem:[#allocation2 + $0x64] sm:$0xf]  ;;  %v4998_v3 = vld [vmem:[#allocation2 + $0x9c] sm:$0xf] }
 0x302   : > { %v4581_v59 = vpack.c.bf16 %v4429_v2, %v4429_v2  ;;  %v4334_v20 = vmax.f32 %v4302_v62, 0.0  ;;  %v3825_v52 = vadd.f32 %v13003_v48, %v3159_v16  ;;  %v5262_v57 = vshll.u32 %v13047_v44, 16 }
 0x303   : > { %v4793_v45 = vsel %vm12303_vm15, %v4785_v0, %v4792_v14  ;;  %v4996_v61 = vsel %vm12089_vm9, %v4794_v54, %v4995_v41  ;;  %v4492_v0 = vld [vmem:[#allocation2 + $0xb4] sm:$0x1]  ;;  %v6943_v41 = vunpack.c.l.b16 %v5231_v40  ;;  %v7009_v2 = vunpack.c.l.b16 %v5574_v15 }
 0x304   : > { %4994 = vst [vmem:[#allocation2 + $0x94] sm:$0xf] %v4793_v45  ;;  %v4796_v63 = vshrl.u32 %v4581_v59, 16  ;;  %v4366_v48 = vmin.f32 %v4334_v20, 6.0  ;;  %v4235_v33 = vadd.f32 %v13023_v5, %v3825_v52  ;;  %v4799_v5 = vshll.u32 %v4581_v59, 16 }
 0x305   : > { %4997 = vst [vmem:[#allocation2 + $0x98] sm:$0x1] %v4996_v61  ;;  %v4493_v44 = vsel %vm12089_vm9, 0, %v4492_v0  ;;  %v7010_v62 = vunpack.c.l.b16 %v5577_v12  ;;  %v13109_v54 = vrot.slane %v5259_v42, 4  ;;  %v6969_v13 = vpack.c.b16 %v6944_v49, %v6943_v41  ;;  %v13118_v45 = vld [vmem:[#allocation2 + $0x68] sm:$0x1] }
 0x306   : > { %v13086_v17 = vpop.f32.mrf.mxu0  ;;  %v13092_v8 = vrot.slane %v4796_v63, 7  ;;  %v4398_v6 = vmul.f32 %v4366_v48, %v4270_v38  ;;  %v4271_v28 = vadd.f32 %v12997_v25, %v4235_v33  ;;  %v13104_v38 = vld [vmem:[#allocation2 + $0x60] sm:$0xe]  ;;  %v13107_v14 = vpop.f32.mrf.mxu3  ;;  %4494 = vst [vmem:[#allocation2 + $0xb4] sm:$0x1] %v4493_v44  ;;  %v13111_v40 = vrot.slane %v5249_v30, 4 }
 0x307   : > { %v3120_v58 = vpop.f32.mrf.mxu2  ;;  %v5580_v53 = vrot.slane %v13095_v35, 5  ;;  %v5264_v51 = vrot.slane %v5262_v57, 5  ;;  %v5042_v61 = vld [vmem:[#allocation2 + $0x60] sm:$0xf]  ;;  %v7034_v63 = vpack.c.b16 %v7010_v62, %v7009_v2  ;;  %v4548_v48 = vld [vmem:[#allocation2 + $0xbc] sm:$0x1] }
 0x308   : > { %v4801_v9 = vor.u32 %v4799_v5, %v13092_v8  ;;  %v4430_v16 = vmul.f32 0.16666667, %v4398_v6  ;;  %v4303_v36 = vadd.f32 3.0, %v4271_v28  ;;  %v3160_v47 = vadd.f32 %v3120_v58, %v2861_v4  ;;  %v5002_v58 = vld [vmem:[#allocation2 + $0xa4] sm:$0x1] }
 0x309   : > { %8360 = vmatmul.bf16.gmra.mxu0 %v10459_v11  ;;  %v13116_v52 = vpop.f32.mrf.mxu1  ;;  %v5255_v33 = vsel %vm10843_vm3, %v13111_v40, %v13064_v37  ;;  %v9849_v42 = vrot.slane %v13104_v38, 9  ;;  %v4549_v4 = vsel %vm12131_vm11, 0, %v4548_v48  ;;  %v5582_v37 = vrot.slane %v5580_v53, 4 }
 0x30a   : > { %v4999_v46 = vsel %vm12260_vm13, %v4801_v9, %v4998_v3  ;;  %v4582_v59 = vpack.c.bf16 %v4430_v16, %v4430_v16  ;;  %v4335_v20 = vmax.f32 %v4303_v36, 0.0  ;;  %v3826_v15 = vadd.f32 %v13036_v1, %v3160_v47  ;;  %4550 = vst [vmem:[#allocation2 + $0xbc] sm:$0x1] %v4549_v4  ;;  %v14871_v16 = vld [vmem:[#allocation8_spill] sm:$0xff] }
 0x30b   : > { %5000 = vst [vmem:[#allocation2 + $0x9c] sm:$0xf] %v4999_v46  ;;  %v10449_v12 = vld [vmem:[#allocation2 + $0x90] sm:$0xff]  ;;  %v5265_v1 = vsel %vm10843_vm3, %v13109_v54, %v5264_v51  ;;  %8276 = vmatmul.bf16.gmra.mxu3 %v7034_v63  ;;  %v5267_v7 = vshrl.u32 %v5042_v61, 16  ;;  %v5270_v30 = vshll.u32 %v5042_v61, 16  ;;  %v5583_v0 = vrot.slane %v13118_v45, 5 }
 0x30c   : > { %v4804_v39 = vshrl.u32 %v4582_v59, 16  ;;  %v4367_v26 = vmin.f32 %v4335_v20, 6.0  ;;  %8182 = vmatmul.bf16.gmra.mxu2 %v6969_v13  ;;  %v4236_v49 = vadd.f32 %v13058_v43, %v3826_v15  ;;  %8123 = vmatmul.bf16.gmra.mxu1 %v10449_v12  ;;  %v4807_v5 = vshll.u32 %v4582_v59, 16  ;;  %v14872_v51 = vld [vmem:[#allocation26_spill] sm:$0xff]  ;;  %v14873_v61 = vld [vmem:[#allocation9_spill] sm:$0xff] }
 0x30d   : > { %v4802_v3 = vrot.slane %v13092_v8, 4  ;;  %v5276_v43 = vshll.u32 %v13095_v35, 16  ;;  %v5280_v2 = vshrl.u32 %v13095_v35, 16  ;;  %v5584_v47 = vsel %vm11069_vm6, %v5582_v37, %v5583_v0 }
 0x30e   : > { %v13132_v11 = vpop.f32.mrf.mxu0  ;;  %v4806_v57 = vrot.slane %v4804_v39, 7  ;;  %v4399_v6 = vmul.f32 %v4367_v26, %v4271_v28  ;;  %v4272_v41 = vadd.f32 %v12997_v25, %v4236_v49  ;;  %v13140_v54 = vpop.f32.mrf.mxu3  ;;  %v5269_v8 = vrot.slane %v5267_v7, 4 }
 0x30f   : > { %v3123_v44 = vpop.f32.mrf.mxu2  ;;  %v5272_v13 = vrot.slane %v5270_v30, 5  ;;  %v2863_v15 = vadd.f32 %v14873_v61, %v14872_v51  ;;  %v13153_v63 = vrot.slane %v5276_v43, 5  ;;  %v5282_v48 = vrot.slane %v5280_v2, 4  ;;  %v4495_v30 = vld [vmem:[#allocation2 + $0xc0] sm:$0x1] }
 0x310   : > { %v4809_v62 = vor.u32 %v4807_v5, %v4806_v57  ;;  %v4811_v38 = vrot.slane %v4806_v57, 4  ;;  %v4431_v9 = vmul.f32 0.16666667, %v4399_v6  ;;  %v3161_v36 = vadd.f32 %v3123_v44, %v14871_v16  ;;  %v13160_v6 = vld [vmem:[#allocation2 + $0x6c] sm:$0xe] }
 0x311   : > { %v4304_v28 = vadd.f32 3.0, %v4272_v41  ;;  %v13149_v20 = vpop.f32.mrf.mxu1  ;;  %v6946_v4 = vunpack.c.l.b16 %v5265_v1  ;;  %v5581_v49 = vsel %vm11069_vm6, %v9849_v42, %v5580_v53  ;;  %v6945_v7 = vunpack.c.l.b16 %v5255_v33 }
 0x312   : > { %v4810_v40 = vsel %vm12303_vm15, %v4802_v3, %v4809_v62  ;;  %v5003_v46 = vsel %vm12089_vm9, %v4811_v38, %v5002_v58  ;;  %v4583_v35 = vpack.c.bf16 %v4431_v9, %v4431_v9  ;;  %v3827_v59 = vadd.f32 %v13067_v22, %v3161_v36  ;;  %v5005_v58 = vld [vmem:[#allocation2 + $0xa8] sm:$0xf]  ;;  %v13169_v62 = vld [vmem:[#allocation2 + $0x70] sm:$0xf] }
 0x313   : > { %5001 = vst [vmem:[#allocation2 + $0xa0] sm:$0xf] %v4810_v40  ;;  %v4336_v12 = vmax.f32 %v4304_v28, 0.0  ;;  %v7012_v57 = vunpack.c.l.b16 %v5584_v47  ;;  %v5273_v5 = vor.u32 %v5272_v13, %v5269_v8  ;;  %v4496_v1 = vsel %vm12089_vm9, 0, %v4495_v30  ;;  %v13176_v13 = vld [vmem:[#allocation2 + $0x74] sm:$0x1] }
 0x314   : > { %5004 = vst [vmem:[#allocation2 + $0xa4] sm:$0x1] %v5003_v46  ;;  %v4813_v39 = vshrl.u32 %v4583_v35, 16  ;;  %v4237_v26 = vadd.f32 %v13086_v17, %v3827_v59  ;;  %v4816_v3 = vshll.u32 %v4583_v35, 16  ;;  %v10460_v17 = vld [vmem:[#allocation2 + $0x60] sm:$0xff]  ;;  %v7011_v43 = vunpack.c.l.b16 %v5581_v49 }
 0x315   : > { %v4368_v37 = vmin.f32 %v4336_v12, 6.0  ;;  %4497 = vst [vmem:[#allocation2 + $0xc0] sm:$0x1] %v4496_v1  ;;  %v5283_v33 = vor.u32 %v5282_v48, %v13153_v63  ;;  %v5286_v2 = vshll.u32 %v13118_v45, 16  ;;  %v6970_v28 = vpack.c.b16 %v6946_v4, %v6945_v7  ;;  %v4551_v48 = vld [vmem:[#allocation2 + $0xc8] sm:$0x1] }
 0x316   : > { %v13158_v22 = vpop.f32.mrf.mxu0  ;;  %v13162_v0 = vrot.slane %v4813_v39, 7  ;;  %v4273_v44 = vadd.f32 %v12997_v25, %v4237_v26  ;;  %v13172_v36 = vpop.f32.mrf.mxu3  ;;  %v7035_v8 = vpack.c.b16 %v7012_v57, %v7011_v43  ;;  %v9850_v40 = vrot.slane %v13160_v6, 9 }
 0x317   : > { %v4400_v53 = vmul.f32 %v4368_v37, %v4272_v41  ;;  %v3125_v42 = vpop.f32.mrf.mxu2  ;;  %v13174_v41 = vrot.slane %v5273_v5, 4  ;;  %v5587_v61 = vrot.slane %v13169_v62, 5  ;;  %v5284_v26 = vrot.slane %v5283_v33, 4 }
 0x318   : > { %v4818_v38 = vor.u32 %v4816_v3, %v13162_v0  ;;  %v4305_v9 = vadd.f32 3.0, %v4273_v44  ;;  %v3162_v16 = vadd.f32 %v3125_v42, %v2863_v15  ;;  %v5044_v15 = vld [vmem:[#allocation2 + $0x6c] sm:$0xf]  ;;  %v5288_v4 = vrot.slane %v5286_v2, 5 }
 0x319   : > { %8365 = vmatmul.bf16.gmra.mxu0 %v10460_v17  ;;  %v4432_v47 = vmul.f32 0.16666667, %v4400_v53  ;;  %v13182_v59 = vpop.f32.mrf.mxu1  ;;  %v5279_v39 = vsel %vm10843_vm3, %v13174_v41, %v13153_v63  ;;  %v5590_v7 = vrot.slane %v13176_v13, 5  ;;  %v5291_v5 = vshrl.u32 %v5044_v15, 16 }
 0x31a   : > { %v5006_v45 = vsel %vm12260_vm13, %v4818_v38, %v5005_v58  ;;  %v4337_v46 = vmax.f32 %v4305_v9, 0.0  ;;  %v3828_v35 = vadd.f32 %v13107_v14, %v3162_v16  ;;  %v10450_v51 = vld [vmem:[#allocation2 + $0x9c] sm:$0xff]  ;;  %v4552_v14 = vsel %vm12131_vm11, 0, %v4551_v48  ;;  %v5009_v38 = vld [vmem:[#allocation2 + $0xb0] sm:$0x1] }
 0x31b   : > { %5007 = vst [vmem:[#allocation2 + $0xa8] sm:$0xf] %v5006_v45  ;;  %v4584_v12 = vpack.c.bf16 %v4432_v47, %v4432_v47  ;;  %8281 = vmatmul.bf16.gmra.mxu3 %v7035_v8  ;;  %v5294_v6 = vshll.u32 %v5044_v15, 16  ;;  %v5300_v3 = vshll.u32 %v13169_v62, 16  ;;  %v5304_v1 = vshrl.u32 %v13169_v62, 16  ;;  %v10465_v60 = vld [vmem:[#allocation2 + $0x9c] sm:$0xff] }
 0x31c   : > { %v4369_v49 = vmin.f32 %v4337_v46, 6.0  ;;  %v4238_v37 = vadd.f32 %v13132_v11, %v3828_v35  ;;  %8187 = vmatmul.bf16.gmra.mxu2 %v6970_v28  ;;  %8128 = vmatmul.bf16.gmra.mxu1 %v10450_v51  ;;  %4553 = vst [vmem:[#allocation2 + $0xc8] sm:$0x1] %v4552_v14  ;;  %v5589_v11 = vrot.slane %v5587_v61, 4  ;;  %v4819_v53 = vrot.slane %v13162_v0, 4  ;;  %v14874_v28 = vld [vmem:[#allocation10_spill] sm:$0xff] }
 0x31d   : > { %v4821_v30 = vshrl.u32 %v4584_v12, 16  ;;  %v4824_v43 = vshll.u32 %v4584_v12, 16  ;;  %v13199_v2 = vrot.slane %v5300_v3, 5  ;;  %v5293_v35 = vrot.slane %v5291_v5, 4  ;;  %v14875_v3 = vld [vmem:[#allocation11_spill] sm:$0xff] }
 0x31e   : > { %v13193_v57 = vpop.f32.mrf.mxu0  ;;  %v4401_v58 = vmul.f32 %v4369_v49, %v4273_v44  ;;  %v4274_v17 = vadd.f32 %v12997_v25, %v4238_v37  ;;  %v13202_v8 = vpop.f32.mrf.mxu3  ;;  %v5306_v44 = vrot.slane %v5304_v1, 4  ;;  %v5296_v51 = vrot.slane %v5294_v6, 5  ;;  %v13212_v49 = vld [vmem:[%s14804_s4] ss:$0 sm:$0xff] }
 0x31f   : > { %v4823_v42 = vrot.slane %v4821_v30, 7  ;;  %v3128_v33 = vpop.f32.mrf.mxu2  ;;  %v5289_v48 = vsel %vm10843_vm3, %v5284_v26, %v5288_v4  ;;  %v5588_v30 = vsel %vm11069_vm6, %v9850_v40, %v5587_v61  ;;  %v10517_v40 = vld [vmem:[%s14803_s3 + $0x100] sm:$0xff] }
 0x320   : > { %v4433_v9 = vmul.f32 0.16666667, %v4401_v58  ;;  %v4306_v16 = vadd.f32 3.0, %v4274_v17  ;;  %v3163_v47 = vadd.f32 %v3128_v33, %v14874_v28  ;;  %v5307_v6 = vor.u32 %v5306_v44, %v13199_v2  ;;  %8418 = vmatpush.bf16.msrb.mxu1 %v10517_v40 }
 0x321   : > { %v4826_v45 = vor.u32 %v4824_v43, %v4823_v42  ;;  %v4828_v46 = vrot.slane %v4823_v42, 4  ;;  %v13205_v12 = vpop.f32.mrf.mxu1  ;;  %v2865_v58 = vadd.f32 %v12799_v50, %v14875_v3  ;;  %v10461_v42 = vld [vmem:[#allocation2 + $0x6c] sm:$0xff]  ;;  %v5297_v61 = vor.u32 %v5296_v51, %v5293_v35  ;;  %v10532_v50 = vld [vmem:[%s14803_s3 + $0x178] sm:$0xff] }
 0x322   : > { %v4585_v62 = vpack.c.bf16 %v4433_v9, %v4433_v9  ;;  %v4338_v15 = vmax.f32 %v4306_v16, 0.0  ;;  %v3829_v0 = vadd.f32 %v13140_v54, %v3163_v47  ;;  %v5591_v54 = vsel %vm11069_vm6, %v5589_v11, %v5590_v7  ;;  %v10540_v9 = vld [vmem:[%s14803_s3 + $0x1b8] sm:$0xff]  ;;  %8500 = vmatpush.bf16.msra.mxu2 %v10532_v50 }
 0x323   : > { %v4827_v37 = vsel %vm12303_vm15, %v4819_v53, %v4826_v45  ;;  %v5010_v14 = vsel %vm12089_vm9, %v4828_v46, %v5009_v38  ;;  %v6948_v53 = vunpack.c.l.b16 %v5289_v48  ;;  %v5310_v7 = vshll.u32 %v13176_v13, 16  ;;  %v13235_v38 = vld [vmem:[#allocation2 + $0x7c] sm:$0xf]  ;;  %v5012_v13 = vld [vmem:[#allocation2 + $0xb4] sm:$0xf]  ;;  %8589 = vmatpush.bf16.msra.mxu3 %v10540_v9 }
 0x324   : > { %5008 = vst [vmem:[#allocation2 + $0xac] sm:$0xf] %v4827_v37  ;;  %v4830_v5 = vshrl.u32 %v4585_v62, 16  ;;  %v4370_v26 = vmin.f32 %v4338_v15, 6.0  ;;  %v4239_v4 = vadd.f32 %v13158_v22, %v3829_v0  ;;  %v4833_v22 = vshll.u32 %v4585_v62, 16 }
 0x325   : > { %5011 = vst [vmem:[#allocation2 + $0xb0] sm:$0x1] %v5010_v14  ;;  %v8065_v16 = vadd.f32 %v13212_v49, %v12829_v24  ;;  %v7013_v47 = vunpack.c.l.b16 %v5588_v30  ;;  %v7014_v44 = vunpack.c.l.b16 %v5591_v54  ;;  %v13253_v62 = vrot.slane %v5307_v6, 4  ;;  %v13255_v24 = vld [vmem:[#allocation2 + $0x78] sm:$0xe] }
 0x326   : > { %v13226_v1 = vpop.f32.mrf.mxu0  ;;  %v13232_v11 = vrot.slane %v4830_v5, 7  ;;  %v4402_v43 = vmul.f32 %v4370_v26, %v4274_v17  ;;  %v4275_v33 = vadd.f32 %v12997_v25, %v4239_v4  ;;  %v6947_v17 = vunpack.c.l.b16 %v5279_v39  ;;  %v13251_v51 = vpop.f32.mrf.mxu3  ;;  %v13264_v54 = vld [vmem:[#allocation2 + $0x80] sm:$0x1] }
 0x327   : > { %v3130_v28 = vpop.f32.mrf.mxu2  ;;  %v13257_v48 = vrot.slane %v5310_v7, 5  ;;  %v5594_v63 = vrot.slane %v13235_v38, 5  ;;  %v5298_v30 = vrot.slane %v5297_v61, 4  ;;  %v13268_v5 = vadd.f32 %v13212_v49, %v12870_v32 }
 0x328   : > { %v4835_v45 = vor.u32 %v4833_v22, %v13232_v11  ;;  %v4434_v46 = vmul.f32 0.16666667, %v4402_v43  ;;  %v4307_v35 = vadd.f32 3.0, %v4275_v33  ;;  %v3164_v15 = vadd.f32 %v3130_v28, %v2865_v58  ;;  %v10548_v58 = vld [vmem:[%s14803_s3 + $0x1f8] sm:$0xff] }
 0x329   : > { %8370 = vmatmul.bf16.gmra.mxu0 %v10461_v42  ;;  %v6971_v0 = vpack.c.b16 %v6948_v53, %v6947_v17  ;;  %v13262_v14 = vpop.f32.mrf.mxu1  ;;  %v7036_v6 = vpack.c.b16 %v7014_v44, %v7013_v47  ;;  %v9851_v3 = vrot.slane %v13255_v24, 9  ;;  %v5303_v40 = vsel %vm10843_vm3, %v5298_v30, %v13199_v2  ;;  %v10556_v2 = vld [vmem:[%s14803_s3 + $0x238] sm:$0xff] }
 0x32a   : > { %v5013_v41 = vsel %vm12260_vm13, %v4835_v45, %v5012_v13  ;;  %v4586_v39 = vpack.c.bf16 %v4434_v46, %v4434_v46  ;;  %v4339_v37 = vmax.f32 %v4307_v35, 0.0  ;;  %v3830_v26 = vadd.f32 %v13172_v36, %v3164_v15  ;;  %v5046_v36 = vld [vmem:[#allocation2 + $0x78] sm:$0xf]  ;;  %8678 = vmatpush.bf16.msra.mxu0 %v10548_v58  ;;  %v5016_v47 = vld [vmem:[#allocation2 + $0xbc] sm:$0x1]  ;;  %8767 = vmatpush.bf16.msra.mxu1 %v10556_v2 }
 0x32b   : > { %5014 = vst [vmem:[#allocation2 + $0xb4] sm:$0xf] %v5013_v41  ;;  %v10451_v4 = vld [vmem:[#allocation2 + $0xa8] sm:$0xff]  ;;  %v5313_v32 = vsel %vm10843_vm3, %v13253_v62, %v13257_v48  ;;  %8286 = vmatmul.bf16.gmra.mxu3 %v7036_v6  ;;  %v5596_v22 = vrot.slane %v5594_v63, 4  ;;  %v5597_v43 = vrot.slane %v13264_v54, 5  ;;  %v5324_v50 = vshll.u32 %v13235_v38, 16 }
 0x32c   : > { %v4838_v53 = vshrl.u32 %v4586_v39, 16  ;;  %v4371_v42 = vmin.f32 %v4339_v37, 6.0  ;;  %8192 = vmatmul.bf16.gmra.mxu2 %v6971_v0  ;;  %v4240_v61 = vadd.f32 %v13193_v57, %v3830_v26  ;;  %8133 = vmatmul.bf16.gmra.mxu1 %v10451_v4  ;;  %v4841_v13 = vshll.u32 %v4586_v39, 16  ;;  %v5634_v37 = vld [vmem:[#allocation2 + $0xc] sm:$0xf] }
 0x32d   : > { %v5328_v57 = vshrl.u32 %v13235_v38, 16  ;;  %v4836_v17 = vrot.slane %v13232_v11, 4  ;;  %v5315_v46 = vshrl.u32 %v5046_v36, 16  ;;  %v5318_v35 = vshll.u32 %v5046_v36, 16  ;;  %v5635_v6 = vld [vmem:[#allocation2 + $0x10] sm:$0xf] }
 0x32e   : > { %v13283_v7 = vpop.f32.mrf.mxu0  ;;  %v4840_v9 = vrot.slane %v4838_v53, 7  ;;  %v4403_v28 = vmul.f32 %v4371_v42, %v4275_v33  ;;  %v4276_v44 = vadd.f32 %v12997_v25, %v4240_v61  ;;  %v13295_v48 = vpop.f32.mrf.mxu3  ;;  %v5598_v33 = vsel %vm11069_vm6, %v5596_v22, %v5597_v43 }
 0x32f   : > { %v8153_v45 = vpop.f32.mrf.mxu2  ;;  %v13299_v39 = vrot.slane %v5324_v50, 5  ;;  %v5330_v11 = vrot.slane %v5328_v57, 4  ;;  %v6949_v53 = vunpack.c.l.b16 %v5303_v40  ;;  %v5317_v42 = vrot.slane %v5315_v46, 4 }
 0x330   : > { %v4843_v62 = vor.u32 %v4841_v13, %v4840_v9  ;;  %v4845_v24 = vrot.slane %v4840_v9, 4  ;;  %v4435_v15 = vmul.f32 0.16666667, %v4403_v28  ;;  %v8154_v0 = vadd.f32 %v8153_v45, %v8065_v16  ;;  %v5019_v45 = vld [vmem:[#allocation2 + $0xc0] sm:$0xf] }
 0x331   : > { %v4308_v41 = vadd.f32 3.0, %v4276_v44  ;;  %v13308_v16 = vpop.f32.mrf.mxu1  ;;  %v5320_v36 = vrot.slane %v5318_v35, 5  ;;  %v6950_v22 = vunpack.c.l.b16 %v5313_v32  ;;  %v5683_v43 = vshrl.u32 %v5634_v37, 16 }
 0x332   : > { %v4844_v25 = vsel %vm12303_vm15, %v4836_v17, %v4843_v62  ;;  %v5017_v30 = vsel %vm12089_vm9, %v4845_v24, %v5016_v47  ;;  %v4587_v26 = vpack.c.bf16 %v4435_v15, %v4435_v15  ;;  %v13306_v4 = vadd.f32 %v13202_v8, %v8154_v0  ;;  %v10462_v17 = vld [vmem:[#allocation2 + $0x78] sm:$0xff]  ;;  %v5666_v0 = vld [vmem:[#allocation2 + $0x14] sm:$0x1] }
 0x333   : > { %5015 = vst [vmem:[#allocation2 + $0xb8] sm:$0xf] %v4844_v25  ;;  %v4340_v58 = vmax.f32 %v4308_v41, 0.0  ;;  %v5686_v50 = vshll.u32 %v5634_v37, 16  ;;  %v5595_v8 = vsel %vm11069_vm6, %v9851_v3, %v5594_v63  ;;  %v7016_v13 = vunpack.c.l.b16 %v5598_v33  ;;  %v13326_v25 = vld [vmem:[#allocation2 + $0x88] sm:$0xf] }
 0x334   : > { %5018 = vst [vmem:[#allocation2 + $0xbc] sm:$0x1] %v5017_v30  ;;  %v4847_v61 = vshrl.u32 %v4587_v26, 16  ;;  %v5692_v28 = vshll.u32 %v5635_v6, 16  ;;  %v4850_v40 = vshll.u32 %v4587_v26, 16  ;;  %v5331_v47 = vor.u32 %v5330_v11, %v13299_v39 }
 0x335   : > { %v4372_v2 = vmin.f32 %v4340_v58, 6.0  ;;  %v5334_v32 = vshll.u32 %v13264_v54, 16  ;;  %v5321_v62 = vor.u32 %v5320_v36, %v5317_v42  ;;  %v5696_v38 = vshrl.u32 %v5635_v6, 16 }
 0x336   : > { %v13310_v9 = vpop.f32.mrf.mxu0  ;;  %v13316_v57 = vrot.slane %v4847_v61, 7  ;;  %v13320_v24 = vrot.slane %v5692_v28, 5  ;;  %v13324_v3 = vpop.f32.mrf.mxu3  ;;  %v5685_v41 = vrot.slane %v5683_v43, 4  ;;  %v5688_v33 = vrot.slane %v5686_v50, 5 }
 0x337   : > { %v4404_v46 = vmul.f32 %v4372_v2, %v4276_v44  ;;  %v8155_v35 = vpop.f32.mrf.mxu2  ;;  %v7015_v37 = vunpack.c.l.b16 %v5595_v8  ;;  %v5698_v54 = vrot.slane %v5696_v38, 4  ;;  %v5332_v58 = vrot.slane %v5331_v47, 4 }
 0x338   : > { %v4852_v15 = vor.u32 %v4850_v40, %v13316_v57  ;;  %v8156_v63 = vadd.f32 %v8155_v35, %v13268_v5  ;;  %v6972_v5 = vpack.c.b16 %v6950_v22, %v6949_v53  ;;  %v5702_v43 = vshll.u32 %v5666_v0, 16  ;;  %v13341_v40 = vld [vmem:[#allocation2 + $0x8c] sm:$0x1] }
 0x339   : > { %8375 = vmatmul.bf16.gmra.mxu0 %v10462_v17  ;;  %v4436_v11 = vmul.f32 0.16666667, %v4404_v46  ;;  %v13333_v26 = vpop.f32.mrf.mxu1  ;;  %v7037_v36 = vpack.c.b16 %v7016_v13, %v7015_v37  ;;  %v5699_v61 = vor.u32 %v5698_v54, %v13320_v24  ;;  %v5322_v50 = vrot.slane %v5321_v62, 4  ;;  %v5469_v13 = vld [vmem:[#allocation2 + $0x84] sm:$0xe] }
 0x33a   : > { %v5020_v44 = vsel %vm12260_vm13, %v4852_v15, %v5019_v45  ;;  %v13331_v30 = vadd.f32 %v13251_v51, %v8156_v63  ;;  %v10452_v6 = vld [vmem:[#allocation2 + $0xb4] sm:$0xff]  ;;  %v5336_v2 = vrot.slane %v5334_v32, 5  ;;  %v5689_v8 = vor.u32 %v5688_v33, %v5685_v41  ;;  %v5048_v15 = vld [vmem:[#allocation2 + $0x84] sm:$0xf]  ;;  %v5023_v63 = vld [vmem:[#allocation2 + $0xc8] sm:$0x1] }
 0x33b   : > { %5021 = vst [vmem:[#allocation2 + $0xc0] sm:$0xf] %v5020_v44  ;;  %v4588_v42 = vpack.c.bf16 %v4436_v11, %v4436_v11  ;;  %v5601_v29 = vrot.slane %v13326_v25, 5  ;;  %v8070_v51 = vadd.f32 %v13212_v49, %v12904_v31  ;;  %8291 = vmatmul.bf16.gmra.mxu3 %v7037_v36  ;;  %v5700_v22 = vrot.slane %v5699_v61, 4  ;;  %v5637_v36 = vld [vmem:[#allocation2 + $0x1c] sm:$0xf] }
 0x33c   : > { %8197 = vmatmul.bf16.gmra.mxu2 %v6972_v5  ;;  %8138 = vmatmul.bf16.gmra.mxu1 %v10452_v6  ;;  %v8072_v17 = vadd.f32 %v13212_v49, %v12928_v55  ;;  %v4853_v47 = vrot.slane %v13316_v57, 4  ;;  %v5327_v32 = vsel %vm10843_vm3, %v5322_v50, %v13299_v39  ;;  %v5337_v31 = vsel %vm10843_vm3, %v5332_v58, %v5336_v2  ;;  %v10531_v2 = vld [vmem:[%s14803_s3 + $0x170] sm:$0xff] }
 0x33d   : > { %v4855_v28 = vshrl.u32 %v4588_v42, 16  ;;  %v4858_v46 = vshll.u32 %v4588_v42, 16  ;;  %v5704_v62 = vrot.slane %v5702_v43, 5  ;;  %v5603_v38 = vrot.slane %v5601_v29, 4  ;;  %8501 = vmatpush.bf16.msra.mxu2 %v10531_v2 }
 0x33e   : > { %v13339_v53 = vpop.f32.mrf.mxu0  ;;  %v13351_v41 = vpop.f32.mrf.mxu3  ;;  %v5690_v55 = vrot.slane %v5689_v8, 4  ;;  %v9852_v33 = vrot.slane %v5469_v13, 9  ;;  %v5604_v57 = vrot.slane %v13341_v40, 5  ;;  %v5348_v54 = vshll.u32 %v13326_v25, 16 }
 0x33f   : > { %14876 = vst [vmem:[#allocation12_spill] sm:$0xff] %v13339_v53  ;;  %v4857_v45 = vrot.slane %v4855_v28, 7  ;;  %v8158_v35 = vpop.f32.mrf.mxu2  ;;  %v5705_v39 = vsel %vm10843_vm3, %v5700_v22, %v5704_v62  ;;  %v5339_v6 = vshrl.u32 %v5048_v15, 16  ;;  %v5342_v58 = vshll.u32 %v5048_v15, 16  ;;  %v5636_v22 = vld [vmem:[#allocation2 + $0x18] sm:$0xf] }
 0x340   : > { %v8159_v0 = vadd.f32 %v8158_v35, %v8070_v51  ;;  %v5352_v42 = vshrl.u32 %v13326_v25, 16  ;;  %v5695_v50 = vsel %vm10843_vm3, %v5690_v55, %v13320_v24  ;;  %v10539_v25 = vld [vmem:[%s14803_s3 + $0x1b0] sm:$0xff]  ;;  %v6951_v10 = vunpack.c.l.b16 %v5327_v32  ;;  %v10463_v35 = vld [vmem:[#allocation2 + $0x84] sm:$0xff] }
 0x341   : > { %v4860_v11 = vor.u32 %v4858_v46, %v4857_v45  ;;  %v4862_v37 = vrot.slane %v4857_v45, 4  ;;  %v13360_v5 = vpop.f32.mrf.mxu1  ;;  %v6952_v8 = vunpack.c.l.b16 %v5337_v31  ;;  %v7140_v51 = vunpack.c.l.b16 %v5705_v39  ;;  %8590 = vmatpush.bf16.msra.mxu3 %v10539_v25  ;;  %v13676_v53 = vld [vmem:[#allocation2 + $0x50] sm:$0x1] }
 0x342   : > { %v13358_v44 = vadd.f32 %v13295_v48, %v8159_v0  ;;  %v5605_v48 = vsel %vm11069_vm6, %v5603_v38, %v5604_v57  ;;  %v5602_v28 = vsel %vm11069_vm6, %v9852_v33, %v5601_v29  ;;  %v13382_v13 = vrot.slane %v5348_v54, 5 }
 0x343   : > { %v4861_v61 = vsel %vm12303_vm15, %v4853_v47, %v4860_v11  ;;  %v5024_v43 = vsel %vm12089_vm9, %v4862_v37, %v5023_v63  ;;  %v5354_v47 = vrot.slane %v5352_v42, 4  ;;  %v5716_v45 = vshll.u32 %v5637_v36, 16  ;;  %v5667_v37 = vld [vmem:[#allocation2 + $0x20] sm:$0x1] }
 0x344   : > { %5022 = vst [vmem:[#allocation2 + $0xc4] sm:$0xf] %v4861_v61  ;;  %v5720_v46 = vshrl.u32 %v5637_v36, 16  ;;  %v7139_v62 = vunpack.c.l.b16 %v5695_v50  ;;  %v7018_v38 = vunpack.c.l.b16 %v5605_v48  ;;  %v5341_v32 = vrot.slane %v5339_v6, 4  ;;  %v5051_v36 = vld [vmem:[#allocation2 + $0x94] sm:$0xf] }
 0x345   : > { %5025 = vst [vmem:[#allocation2 + $0xc8] sm:$0x1] %v5024_v43  ;;  %v5344_v31 = vrot.slane %v5342_v58, 5  ;;  %v5707_v63 = vshrl.u32 %v5636_v22, 16  ;;  %v5710_v0 = vshll.u32 %v5636_v22, 16  ;;  %v13384_v29 = vrot.slane %v5716_v45, 5 }
 0x346   : > { %v13380_v24 = vpop.f32.mrf.mxu0  ;;  %v5722_v55 = vrot.slane %v5720_v46, 4  ;;  %v13386_v57 = vpop.f32.mrf.mxu3  ;;  %v7017_v11 = vunpack.c.l.b16 %v5602_v28  ;;  %v6973_v39 = vpack.c.b16 %v6952_v8, %v6951_v10  ;;  %v7171_v54 = vpack.c.b16 %v7140_v51, %v7139_v62  ;;  %v10547_v10 = vld [vmem:[%s14803_s3 + $0x1f0] sm:$0xff]  ;;  %v13401_v28 = vld [vmem:[#allocation2 + $0x28] sm:$0xf]  ;;  %v13408_v45 = vld [vmem:[#allocation2 + $0x98] sm:$0x1] }
 0x347   : > { %14877 = vst [vmem:[#allocation16_spill] sm:$0xff] %v13380_v24  ;;  %v8160_v15 = vpop.f32.mrf.mxu2  ;;  %v5355_v42 = vor.u32 %v5354_v47, %v13382_v13  ;;  %v5345_v43 = vor.u32 %v5344_v31, %v5341_v32  ;;  %v5358_v50 = vshll.u32 %v13341_v40, 16  ;;  %v5712_v48 = vrot.slane %v5710_v0, 5  ;;  %v10555_v40 = vld [vmem:[%s14803_s3 + $0x230] sm:$0xff]  ;;  %8679 = vmatpush.bf16.msra.mxu0 %v10547_v10 }
 0x348   : > { %v8161_v33 = vadd.f32 %v8160_v15, %v8072_v17  ;;  %v7038_v61 = vpack.c.b16 %v7018_v38, %v7017_v11  ;;  %v5709_v17 = vrot.slane %v5707_v63, 4  ;;  %v5723_v2 = vor.u32 %v5722_v55, %v13384_v29  ;;  %v5470_v46 = vld [vmem:[#allocation2 + $0x90] sm:$0xe]  ;;  %8768 = vmatpush.bf16.msra.mxu1 %v10555_v40 }
 0x349   : > { %8380 = vmatmul.bf16.gmra.mxu0 %v10463_v35  ;;  %v13392_v58 = vpop.f32.mrf.mxu1  ;;  %v5726_v25 = vshll.u32 %v5667_v37, 16  ;;  %v5608_v8 = vrot.slane %v5051_v36, 5  ;;  %v5356_v51 = vrot.slane %v5355_v42, 4  ;;  %v8075_v22 = vadd.f32 %v13212_v49, %v12973_v27  ;;  %v5050_v15 = vld [vmem:[#allocation2 + $0x90] sm:$0xf] }
 0x34a   : > { %v13390_v6 = vadd.f32 %v13324_v3, %v8161_v33  ;;  %v5346_v47 = vrot.slane %v5345_v43, 4  ;;  %v5360_v62 = vrot.slane %v5358_v50, 5  ;;  %v5713_v38 = vor.u32 %v5712_v48, %v5709_v17  ;;  %v5638_v37 = vld [vmem:[#allocation2 + $0x24] sm:$0xf] }
 0x34b   : > { %8296 = vmatmul.bf16.gmra.mxu3 %v7038_v61  ;;  %v5724_v32 = vrot.slane %v5723_v2, 4  ;;  %v5728_v31 = vrot.slane %v5726_v25, 5  ;;  %v5610_v55 = vrot.slane %v5608_v8, 4  ;;  %v5372_v33 = vshll.u32 %v5051_v36, 16 }
 0x34c   : > { %14878 = vst [vmem:[#allocation13_spill] sm:$0xff] %v13390_v6  ;;  %8202 = vmatmul.bf16.gmra.mxu2 %v6973_v39  ;;  %8419 = vmatmul.bf16.vlgmr.msrb.gmra.mxu1 %v7171_v54  ;;  %v5376_v11 = vshrl.u32 %v5051_v36, 16  ;;  %v5351_v27 = vsel %vm10843_vm3, %v5346_v47, %v13382_v13  ;;  %v5361_v39 = vsel %vm10843_vm3, %v5356_v51, %v5360_v62  ;;  %v9853_v54 = vrot.slane %v5470_v46, 9 }
 0x34d   : > { %v5611_v42 = vrot.slane %v13408_v45, 5  ;;  %v5363_v50 = vshrl.u32 %v5050_v15, 16  ;;  %v5366_v17 = vshll.u32 %v5050_v15, 16  ;;  %v5740_v36 = vshll.u32 %v13401_v28, 16 }
 0x34e   : > { %v13399_v3 = vpop.f32.mrf.mxu0  ;;  %v13410_v0 = vpop.f32.mrf.mxu3  ;;  %v5714_v48 = vrot.slane %v5713_v38, 4  ;;  %v5609_v2 = vsel %vm11069_vm6, %v9853_v54, %v5608_v8  ;;  %v5731_v13 = vshrl.u32 %v5638_v37, 16  ;;  %v5744_v25 = vshrl.u32 %v13401_v28, 16 }
 0x34f   : > { %14879 = vst [vmem:[#allocation15_spill] sm:$0xff] %v13399_v3  ;;  %v8163_v35 = vpop.f32.mrf.mxu2  ;;  %v5729_v10 = vsel %vm10843_vm3, %v5724_v32, %v5728_v31  ;;  %v13431_v51 = vrot.slane %v5372_v33, 5  ;;  %v5378_v40 = vrot.slane %v5376_v11, 4  ;;  %v5734_v46 = vshll.u32 %v5638_v37, 16  ;;  %v10464_v32 = vld [vmem:[#allocation2 + $0x90] sm:$0xff] }
 0x350   : > { %v8164_v63 = vadd.f32 %v8163_v35, %v8075_v22  ;;  %v5719_v47 = vsel %vm10843_vm3, %v5714_v48, %v13384_v29  ;;  %v13438_v8 = vrot.slane %v5740_v36, 5  ;;  %v5746_v35 = vrot.slane %v5744_v25, 4  ;;  %v13447_v48 = vld [vmem:[#allocation2 + $0x2c] sm:$0x1] }
 0x351   : > { %v13421_v43 = vpop.f32.mrf.mxu1  ;;  %v8077_v62 = vadd.f32 %v13212_v49, %v13012_v56  ;;  %v6954_v38 = vunpack.c.l.b16 %v5361_v39  ;;  %v5365_v31 = vrot.slane %v5363_v50, 4  ;;  %v5368_v15 = vrot.slane %v5366_v17, 5 }
 0x352   : > { %v13419_v61 = vadd.f32 %v13351_v41, %v8164_v63  ;;  %v5612_v41 = vsel %vm11069_vm6, %v5610_v55, %v5611_v42  ;;  %v13442_v63 = vld [vmem:[#allocation2 + $0xa0] sm:$0xf]  ;;  %v6953_v33 = vunpack.c.l.b16 %v5351_v27  ;;  %v7142_v11 = vunpack.c.l.b16 %v5729_v10 }
 0x353   : > { %v7020_v54 = vunpack.c.l.b16 %v5612_v41  ;;  %v7141_v29 = vunpack.c.l.b16 %v5719_v47  ;;  %v7019_v37 = vunpack.c.l.b16 %v5609_v2  ;;  %v5379_v36 = vor.u32 %v5378_v40, %v13431_v51 }
 0x354   : > { %14880 = vst [vmem:[#allocation14_spill] sm:$0xff] %v13419_v61  ;;  %v5733_v56 = vrot.slane %v5731_v13, 4  ;;  %v5736_v39 = vrot.slane %v5734_v46, 5  ;;  %v5747_v50 = vor.u32 %v5746_v35, %v13438_v8  ;;  %v5615_v17 = vrot.slane %v13442_v63, 5  ;;  %v13458_v46 = vld [vmem:[#allocation2 + $0xa4] sm:$0x1] }
 0x355   : > { %v6974_v10 = vpack.c.b16 %v6954_v38, %v6953_v33  ;;  %v5369_v41 = vor.u32 %v5368_v15, %v5365_v31  ;;  %v5382_v47 = vshll.u32 %v13408_v45, 16  ;;  %v7172_v2 = vpack.c.b16 %v7142_v11, %v7141_v29  ;;  %v5640_v15 = vld [vmem:[#allocation2 + $0x30] sm:$0xf]  ;;  %v5052_v29 = vld [vmem:[#allocation2 + $0x9c] sm:$0xf] }
 0x356   : > { %v13433_v22 = vpop.f32.mrf.mxu0  ;;  %v13444_v21 = vpop.f32.mrf.mxu3  ;;  %v5750_v40 = vshll.u32 %v13447_v48, 16  ;;  %v5380_v13 = vrot.slane %v5379_v36, 4  ;;  %v8080_v38 = vadd.f32 %v13212_v49, %v13045_v19  ;;  %v13472_v19 = vld [vmem:[#allocation2 + $0x34] sm:$0xf] }
 0x357   : > { %14881 = vst [vmem:[#allocation17_spill] sm:$0xff] %v13433_v22  ;;  %v8165_v55 = vpop.f32.mrf.mxu2  ;;  %v5370_v45 = vrot.slane %v5369_v41, 4  ;;  %v5384_v31 = vrot.slane %v5382_v47, 5 }
 0x358   : > { %v8166_v42 = vadd.f32 %v8165_v55, %v8077_v62  ;;  %v7039_v62 = vpack.c.b16 %v7020_v54, %v7019_v37  ;;  %v5471_v55 = vld [vmem:[#allocation2 + $0x9c] sm:$0xe]  ;;  %v5752_v11 = vrot.slane %v5750_v40, 5  ;;  %v5618_v54 = vrot.slane %v13458_v46, 5 }
 0x359   : > { %8385 = vmatmul.bf16.gmra.mxu0 %v10464_v32  ;;  %v13454_v25 = vpop.f32.mrf.mxu1  ;;  %v5748_v32 = vrot.slane %v5747_v50, 4  ;;  %v9854_v50 = vrot.slane %v5471_v55, 9  ;;  %v5390_v55 = vshll.u32 %v5052_v29, 16 }
 0x35a   : > { %v13452_v27 = vadd.f32 %v13386_v57, %v8166_v42  ;;  %v5737_v57 = vor.u32 %v5736_v39, %v5733_v56  ;;  %v5617_v42 = vrot.slane %v5615_v17, 4  ;;  %v5375_v56 = vsel %vm10843_vm3, %v5370_v45, %v13431_v51 }
 0x35b   : > { %8301 = vmatmul.bf16.gmra.mxu3 %v7039_v62  ;;  %v5385_v39 = vsel %vm10843_vm3, %v5380_v13, %v5384_v31  ;;  %v5753_v41 = vsel %vm10843_vm3, %v5748_v32, %v5752_v11  ;;  %v5387_v51 = vshrl.u32 %v5052_v29, 16  ;;  %v5400_v13 = vshrl.u32 %v13442_v63, 16 }
 0x35c   : > { %14882 = vst [vmem:[#allocation20_spill] sm:$0xff] %v13452_v27  ;;  %8207 = vmatmul.bf16.gmra.mxu2 %v6974_v10  ;;  %8424 = vmatmul.bf16.gmra.mxu1 %v7172_v2  ;;  %v5738_v10 = vrot.slane %v5737_v57, 4  ;;  %v5619_v47 = vsel %vm11069_vm6, %v5617_v42, %v5618_v54  ;;  %v5755_v2 = vshrl.u32 %v5640_v15, 16  ;;  %v10530_v57 = vld [vmem:[%s14803_s3 + $0x168] sm:$0xff]  ;;  %v5758_v32 = vshll.u32 %v5640_v15, 16 }
 0x35d   : > { %v5764_v45 = vshll.u32 %v13472_v19, 16  ;;  %v5768_v42 = vshrl.u32 %v13472_v19, 16  ;;  %v6955_v31 = vunpack.c.l.b16 %v5375_v56  ;;  %8502 = vmatpush.bf16.msra.mxu2 %v10530_v57  ;;  %v6956_v54 = vunpack.c.l.b16 %v5385_v39 }
 0x35e   : > { %v13460_v35 = vpop.f32.mrf.mxu0  ;;  %v13465_v36 = vpop.f32.mrf.mxu3  ;;  %v5743_v15 = vsel %vm10843_vm3, %v5738_v10, %v13438_v8  ;;  %v7144_v29 = vunpack.c.l.b16 %v5753_v41  ;;  %v5392_v57 = vrot.slane %v5390_v55, 5  ;;  %v5760_v22 = vrot.slane %v5758_v32, 5  ;;  %v13508_v41 = vld [vmem:[#allocation2 + $0xac] sm:$0xf]  ;;  %v13516_v32 = vld [vmem:[#allocation2 + $0x38] sm:$0x1] }
 0x35f   : > { %14883 = vst [vmem:[#allocation18_spill] sm:$0xff] %v13460_v35  ;;  %v8168_v33 = vpop.f32.mrf.mxu2  ;;  %v5402_v35 = vrot.slane %v5400_v13, 4  ;;  %v7143_v8 = vunpack.c.l.b16 %v5743_v15 }
 0x360   : > { %v8169_v37 = vadd.f32 %v8168_v33, %v8080_v38  ;;  %v5396_v38 = vshll.u32 %v13442_v63, 16  ;;  %v5616_v33 = vsel %vm11069_vm6, %v9854_v50, %v5615_v17  ;;  %v10538_v63 = vld [vmem:[%s14803_s3 + $0x1a8] sm:$0xff]  ;;  %v5757_v17 = vrot.slane %v5755_v2, 4 }
 0x361   : > { %v13481_v40 = vpop.f32.mrf.mxu1  ;;  %8591 = vmatpush.bf16.msra.mxu3 %v10538_v63  ;;  %v7021_v10 = vunpack.c.l.b16 %v5616_v33  ;;  %v5642_v63 = vld [vmem:[#allocation2 + $0x3c] sm:$0xf] }
 0x362   : > { %v13479_v62 = vadd.f32 %v13410_v0, %v8169_v37  ;;  %v8082_v0 = vadd.f32 %v13212_v49, %v13070_v18  ;;  %v7022_v37 = vunpack.c.l.b16 %v5619_v47  ;;  %v5389_v18 = vrot.slane %v5387_v51, 4 }
 0x363   : > { %v13502_v56 = vrot.slane %v5396_v38, 5  ;;  %v6975_v47 = vpack.c.b16 %v6956_v54, %v6955_v31  ;;  %v7173_v38 = vpack.c.b16 %v7144_v29, %v7143_v8  ;;  %v10546_v31 = vld [vmem:[%s14803_s3 + $0x1e8] sm:$0xff]  ;;  %v8085_v54 = vadd.f32 %v13212_v49, %v13116_v52 }
 0x364   : > { %14884 = vst [vmem:[#allocation19_spill] sm:$0xff] %v13479_v62  ;;  %v13504_v62 = vrot.slane %v5764_v45, 5  ;;  %v7040_v13 = vpack.c.b16 %v7022_v37, %v7021_v10  ;;  %v5393_v45 = vor.u32 %v5392_v57, %v5389_v18  ;;  %8680 = vmatpush.bf16.msra.mxu0 %v10546_v31 }
 0x365   : > { %v5403_v55 = vor.u32 %v5402_v35, %v13502_v56  ;;  %v5774_v35 = vshll.u32 %v13516_v32, 16 }
 0x366   : > { %v13497_v11 = vpop.f32.mrf.mxu0  ;;  %v13506_v3 = vpop.f32.mrf.mxu3  ;;  %v5394_v37 = vrot.slane %v5393_v45, 4  ;;  %v13546_v45 = vld [vmem:[#allocation2 + $0x40] sm:$0xf] }
 0x367   : > { %14885 = vst [vmem:[#allocation22_spill] sm:$0xff] %v13497_v11  ;;  %v8170_v50 = vpop.f32.mrf.mxu2  ;;  %v5770_v11 = vrot.slane %v5768_v42, 4  ;;  %v5761_v42 = vor.u32 %v5760_v22, %v5757_v17  ;;  %v10554_v22 = vld [vmem:[%s14803_s3 + $0x228] sm:$0xff]  ;;  %v5404_v15 = vrot.slane %v5403_v55, 4 }
 0x368   : > { %v8171_v39 = vadd.f32 %v8170_v50, %v8082_v0  ;;  %v5622_v0 = vrot.slane %v13508_v41, 5  ;;  %v5472_v50 = vld [vmem:[#allocation2 + $0xa8] sm:$0xe]  ;;  %8769 = vmatpush.bf16.msra.mxu1 %v10554_v22  ;;  %v5399_v52 = vsel %vm10843_vm3, %v5394_v37, %v13502_v56  ;;  %v5782_v22 = vshll.u32 %v5642_v63, 16 }
 0x369   : > { %8390 = vmatmul.bf16.gmra.mxu0 %v10465_v60  ;;  %v13513_v2 = vpop.f32.mrf.mxu1  ;;  %v5771_v60 = vor.u32 %v5770_v11, %v13504_v62  ;;  %v10537_v11 = vld [vmem:[%s14803_s3 + $0x1a0] sm:$0xff]  ;;  %v5762_v18 = vrot.slane %v5761_v42, 4  ;;  %v6957_v37 = vunpack.c.l.b16 %v5399_v52 }
 0x36a   : > { %v13511_v51 = vadd.f32 %v13444_v21, %v8171_v39  ;;  %v5406_v21 = vshll.u32 %v13458_v46, 16  ;;  %v13535_v46 = vld [vmem:[#allocation2 + $0xb0] sm:$0x1]  ;;  %v5624_v57 = vrot.slane %v5622_v0, 4  ;;  %8592 = vmatpush.bf16.msra.mxu3 %v10537_v11  ;;  %v5424_v11 = vshrl.u32 %v13508_v41, 16 }
 0x36b   : > { %8306 = vmatmul.bf16.gmra.mxu3 %v7040_v13  ;;  %v5772_v17 = vrot.slane %v5771_v60, 4  ;;  %v5776_v13 = vrot.slane %v5774_v35, 5  ;;  %v5625_v55 = vrot.slane %v13535_v46, 5  ;;  %v5420_v35 = vshll.u32 %v13508_v41, 16  ;;  %v10535_v41 = vld [vmem:[%s14803_s3 + $0x190] sm:$0xff] }
 0x36c   : > { %14886 = vst [vmem:[#allocation23_spill] sm:$0xff] %v13511_v51  ;;  %8212 = vmatmul.bf16.gmra.mxu2 %v6975_v47  ;;  %8429 = vmatmul.bf16.gmra.mxu1 %v7173_v38  ;;  %v5408_v10 = vrot.slane %v5406_v21, 5  ;;  %v5779_v47 = vshrl.u32 %v5642_v63, 16  ;;  %v5767_v38 = vsel %vm10843_vm3, %v5762_v18, %v13504_v62  ;;  %v9855_v21 = vrot.slane %v5472_v50, 9 }
 0x36d   : > { %v5777_v56 = vsel %vm10843_vm3, %v5772_v17, %v5776_v13  ;;  %v5626_v62 = vsel %vm11069_vm6, %v5624_v57, %v5625_v55  ;;  %v5788_v63 = vshll.u32 %v13546_v45, 16  ;;  %v7145_v17 = vunpack.c.l.b16 %v5767_v38 }
 0x36e   : > { %v13524_v33 = vpop.f32.mrf.mxu0  ;;  %v13537_v8 = vpop.f32.mrf.mxu3  ;;  %v5409_v31 = vsel %vm10843_vm3, %v5404_v15, %v5408_v10  ;;  %v5054_v15 = vld [vmem:[#allocation2 + $0xa8] sm:$0xf]  ;;  %v5623_v50 = vsel %vm11069_vm6, %v9855_v21, %v5622_v0  ;;  %v7024_v10 = vunpack.c.l.b16 %v5626_v62  ;;  %v5781_v13 = vrot.slane %v5779_v47, 4 }
 0x36f   : > { %14887 = vst [vmem:[#allocation21_spill] sm:$0xff] %v13524_v33  ;;  %v8173_v29 = vpop.f32.mrf.mxu2  ;;  %v6958_v18 = vunpack.c.l.b16 %v5409_v31  ;;  %v5784_v55 = vrot.slane %v5782_v22, 5  ;;  %v5414_v52 = vshll.u32 %v5054_v15, 16  ;;  %v13575_v31 = vrot.slane %v5420_v35, 5 }
 0x370   : > { %v8174_v39 = vadd.f32 %v8173_v29, %v8085_v54  ;;  %v8087_v54 = vadd.f32 %v13212_v49, %v13149_v20  ;;  %v5792_v29 = vshrl.u32 %v13546_v45, 16  ;;  %v7146_v20 = vunpack.c.l.b16 %v5777_v56 }
 0x371   : > { %v13551_v60 = vpop.f32.mrf.mxu1  ;;  %v5426_v38 = vrot.slane %v5424_v11, 4  ;;  %v7023_v21 = vunpack.c.l.b16 %v5623_v50  ;;  %v6976_v56 = vpack.c.b16 %v6958_v18, %v6957_v37  ;;  %v13588_v11 = vld [vmem:[#allocation2 + $0x44] sm:$0x1]  ;;  %v13604_v50 = vld [vmem:[#allocation2 + $0x4c] sm:$0xf] }
 0x372   : > { %v13549_v42 = vadd.f32 %v13465_v36, %v8174_v39  ;;  %v10536_v36 = vld [vmem:[%s14803_s3 + $0x198] sm:$0xff]  ;;  %v10466_v39 = vld [vmem:[#allocation2 + $0xa8] sm:$0xff]  ;;  %v5794_v27 = vrot.slane %v5792_v29, 4  ;;  %v7174_v62 = vpack.c.b16 %v7146_v20, %v7145_v17  ;;  %v5430_v17 = vshll.u32 %v13535_v46, 16  ;;  %v10533_v46 = vld [vmem:[%s14803_s3 + $0x180] sm:$0xff] }
 0x373   : > { %8593 = vmatpush.bf16.msra.mxu3 %v10536_v36  ;;  %v13579_v36 = vrot.slane %v5788_v63, 5  ;;  %v7041_v35 = vpack.c.b16 %v7024_v10, %v7023_v21  ;;  %v5416_v63 = vrot.slane %v5414_v52, 5  ;;  %v10534_v29 = vld [vmem:[%s14803_s3 + $0x188] sm:$0xff]  ;;  %v10528_v20 = vld [vmem:[%s14803_s3 + $0x158] sm:$0xff] }
 0x374   : > { %14888 = vst [vmem:[#allocation24_spill] sm:$0xff] %v13549_v42  ;;  %v5411_v42 = vshrl.u32 %v5054_v15, 16 }
 0x375   : > { %v5795_v37 = vor.u32 %v5794_v27, %v13579_v36  ;;  %v13611_v27 = vld [vmem:[#allocation2 + $0x48] sm:$0xf] }
 0x376   : > { %v13573_v57 = vpop.f32.mrf.mxu0  ;;  %v13577_v0 = vpop.f32.mrf.mxu3  ;;  %v5413_v15 = vrot.slane %v5411_v42, 4  ;;  %v5798_v42 = vshll.u32 %v13588_v11, 16 }
 0x377   : > { %14889 = vst [vmem:[#allocation7_spill] sm:$0xff] %v13573_v57  ;;  %v8175_v33 = vpop.f32.mrf.mxu2  ;;  %v13581_v57 = vld [vmem:[#allocation2 + $0xb8] sm:$0xf]  ;;  %8594 = vmatpush.bf16.msra.mxu3 %v10535_v41 }
 0x378   : > { %v8176_v51 = vadd.f32 %v8175_v33, %v8087_v54  ;;  %v10529_v33 = vld [vmem:[%s14803_s3 + $0x160] sm:$0xff]  ;;  %v5629_v18 = vrot.slane %v13581_v57, 5  ;;  %v10544_v41 = vld [vmem:[%s14803_s3 + $0x1d8] sm:$0xff] }
 0x379   : > { %8395 = vmatmul.bf16.gmra.mxu0 %v10466_v39  ;;  %v13586_v22 = vpop.f32.mrf.mxu1  ;;  %v10545_v54 = vld [vmem:[%s14803_s3 + $0x1e0] sm:$0xff]  ;;  %v8090_v39 = vadd.f32 %v13212_v49, %v13182_v59  ;;  %8503 = vmatpush.bf16.msra.mxu2 %v10529_v33  ;;  %v5432_v33 = vrot.slane %v5430_v17, 5  ;;  %v5806_v17 = vshll.u32 %v13611_v27, 16 }
 0x37a   : > { %v13584_v47 = vadd.f32 %v13506_v3, %v8176_v51  ;;  %v5427_v3 = vor.u32 %v5426_v38, %v13575_v31  ;;  %v5785_v51 = vor.u32 %v5784_v55, %v5781_v13  ;;  %8681 = vmatpush.bf16.msra.mxu0 %v10545_v54  ;;  %v5417_v13 = vor.u32 %v5416_v63, %v5413_v15  ;;  %v13619_v38 = vld [vmem:[#allocation2 + $0xbc] sm:$0x1] }
 0x37b   : > { %8311 = vmatmul.bf16.gmra.mxu3 %v7041_v35  ;;  %v5812_v35 = vshll.u32 %v13604_v50, 16  ;;  %v5800_v54 = vrot.slane %v5798_v42, 5  ;;  %v5816_v15 = vshrl.u32 %v13604_v50, 16  ;;  %v10527_v42 = vld [vmem:[%s14803_s3 + $0x150] sm:$0xff] }
 0x37c   : > { %14890 = vst [vmem:[#allocation6_spill] sm:$0xff] %v13584_v47  ;;  %8217 = vmatmul.bf16.gmra.mxu2 %v6976_v56  ;;  %8434 = vmatmul.bf16.gmra.mxu1 %v7174_v62  ;;  %v5428_v55 = vrot.slane %v5427_v3, 4  ;;  %v5786_v52 = vrot.slane %v5785_v51, 4  ;;  %v5796_v56 = vrot.slane %v5795_v37, 4  ;;  %v5631_v62 = vrot.slane %v5629_v18, 4 }
 0x37d   : > { %8595 = vmatpush.bf16.msra.mxu3 %v10534_v29  ;;  %v5473_v29 = vld [vmem:[#allocation2 + $0xb4] sm:$0xe]  ;;  %v5803_v47 = vshrl.u32 %v13611_v27, 16  ;;  %v5632_v37 = vrot.slane %v13619_v38, 5  ;;  %8504 = vmatpush.bf16.msra.mxu2 %v10528_v20 }
 0x37e   : > { %v13621_v59 = vpop.f32.mrf.mxu0  ;;  %v13623_v49 = vpop.f32.mrf.mxu3  ;;  %8682 = vmatpush.bf16.msra.mxu0 %v10544_v41  ;;  %v5791_v51 = vsel %vm10843_vm3, %v5786_v52, %v13579_v36  ;;  %v5418_v41 = vrot.slane %v5417_v13, 4  ;;  %v5444_v36 = vshll.u32 %v13581_v57, 16  ;;  %v5448_v52 = vshrl.u32 %v13581_v57, 16  ;;  %v10542_v57 = vld [vmem:[%s14803_s3 + $0x1c8] sm:$0xff] }
 0x37f   : > { %v8178_v10 = vpop.f32.mrf.mxu2  ;;  %14891 = vst [vmem:[#allocation8_spill] sm:$0xff] %v13621_v59  ;;  %v5801_v27 = vsel %vm10843_vm3, %v5796_v56, %v5800_v54  ;;  %v9856_v20 = vrot.slane %v5473_v29, 9  ;;  %v13663_v56 = vld [vmem:[%s14804_s4] ss:$0 sm:$0xff]  ;;  %v10467_v54 = vld [vmem:[#allocation2 + $0xb4] sm:$0xff]  ;;  %v5805_v29 = vrot.slane %v5803_v47, 4 }
 0x380   : > { %v8179_v21 = vadd.f32 %v8178_v10, %v8090_v39  ;;  %v5056_v39 = vld [vmem:[#allocation2 + $0xb4] sm:$0xf]  ;;  %v5433_v10 = vsel %vm10843_vm3, %v5428_v55, %v5432_v33  ;;  %v5423_v13 = vsel %vm10843_vm3, %v5418_v41, %v13575_v31  ;;  %v5818_v33 = vrot.slane %v5816_v15, 4  ;;  %v10526_v15 = vld [vmem:[%s14803_s3 + $0x148] sm:$0xff] }
 0x381   : > { %v13631_v3 = vpop.f32.mrf.mxu1  ;;  %8596 = vmatpush.bf16.msra.mxu3 %v10533_v46  ;;  %v5633_v46 = vsel %vm11069_vm6, %v5631_v62, %v5632_v37  ;;  %v5435_v59 = vshrl.u32 %v5056_v39, 16  ;;  %v5438_v55 = vshll.u32 %v5056_v39, 16  ;;  %v8092_v62 = vadd.f32 %v13663_v56, %v13205_v12  ;;  %8505 = vmatpush.bf16.msra.mxu2 %v10527_v42 }
 0x382   : > { %v13629_v63 = vadd.f32 %v13537_v8, %v8179_v21  ;;  %v10543_v8 = vld [vmem:[%s14803_s3 + $0x1d0] sm:$0xff]  ;;  %v13652_v21 = vrot.slane %v5812_v35, 5  ;;  %v6960_v35 = vunpack.c.l.b16 %v5433_v10  ;;  %v5630_v31 = vsel %vm11069_vm6, %v9856_v20, %v5629_v18 }
 0x383   : > { %8683 = vmatpush.bf16.msra.mxu0 %v10543_v8  ;;  %v7148_v39 = vunpack.c.l.b16 %v5801_v27  ;;  %v7026_v8 = vunpack.c.l.b16 %v5633_v46  ;;  %v13672_v41 = vrot.slane %v5444_v36, 5  ;;  %v6959_v61 = vunpack.c.l.b16 %v5423_v13 }
 0x384   : > { %14892 = vst [vmem:[#allocation26_spill] sm:$0xff] %v13629_v63  ;;  %v5450_v63 = vrot.slane %v5448_v52, 4  ;;  %v7147_v10 = vunpack.c.l.b16 %v5791_v51  ;;  %v5808_v47 = vrot.slane %v5806_v17, 5  ;;  %v7025_v18 = vunpack.c.l.b16 %v5630_v31  ;;  %v10525_v51 = vld [vmem:[%s14803_s3 + $0x140] sm:$0xff] }
 0x385   : > { %v5437_v42 = vrot.slane %v5435_v59, 4  ;;  %v5440_v20 = vrot.slane %v5438_v55, 5  ;;  %v5819_v6 = vor.u32 %v5818_v33, %v13652_v21  ;;  %v6977_v46 = vpack.c.b16 %v6960_v35, %v6959_v61  ;;  %8506 = vmatpush.bf16.msra.mxu2 %v10526_v15  ;;  %v10541_v59 = vld [vmem:[%s14803_s3 + $0x1c0] sm:$0xff] }
 0x386   : > { %v13674_v12 = vpop.f32.mrf.mxu3  ;;  %v13682_v36 = vpop.f32.mrf.mxu0  ;;  %v7175_v17 = vpack.c.b16 %v7148_v39, %v7147_v10  ;;  %v7042_v13 = vpack.c.b16 %v7026_v8, %v7025_v18  ;;  %v5451_v55 = vor.u32 %v5450_v63, %v13672_v41  ;;  %v5454_v33 = vshll.u32 %v13619_v38, 16  ;;  %v10553_v35 = vld [vmem:[%s14803_s3 + $0x220] sm:$0xff]  ;;  %v6243_v63 = vld [vmem:[#allocation2 + $0x18] sm:$0xf] }
 0x387   : > { %v8180_v37 = vpop.f32.mrf.mxu2  ;;  %8684 = vmatpush.bf16.msra.mxu0 %v10542_v57  ;;  %14894 = vst [vmem:[#allocation10_spill] sm:$0xff] %v13682_v36  ;;  %v5809_v61 = vor.u32 %v5808_v47, %v5805_v29  ;;  %v5441_v57 = vor.u32 %v5440_v20, %v5437_v42  ;;  %8770 = vmatpush.bf16.msra.mxu1 %v10553_v35  ;;  %v6068_v29 = vld [vmem:[#allocation2 + $0x24] sm:$0xe]  ;;  %v13702_v18 = vld [vmem:[#allocation2 + $0x58] sm:$0xf]  ;;  %v6292_v20 = vshrl.u32 %v6243_v63, 16 }
 0x388   : > { %v8181_v24 = vadd.f32 %v8180_v37, %v8092_v62  ;;  %v5820_v62 = vrot.slane %v5819_v6, 4  ;;  %v5452_v37 = vrot.slane %v5451_v55, 4  ;;  %v5456_v6 = vrot.slane %v5454_v33, 5 }
 0x389   : > { %8400 = vmatmul.bf16.gmra.mxu0 %v10467_v54  ;;  %v13684_v52 = vpop.f32.mrf.mxu1  ;;  %v8095_v54 = vadd.f32 %v13663_v56, %v13262_v14  ;;  %8507 = vmatpush.bf16.msra.mxu2 %v10525_v51  ;;  %v5810_v47 = vrot.slane %v5809_v61, 4  ;;  %v5442_v42 = vrot.slane %v5441_v57, 4  ;;  %v6146_v55 = vrot.slane %v13401_v28, 5 }
 0x38a   : > { %v13680_v27 = vadd.f32 %v13577_v0, %v8181_v24  ;;  %v5822_v24 = vshll.u32 %v13676_v53, 16  ;;  %v6244_v0 = vld [vmem:[#allocation2 + $0x1c] sm:$0xf]  ;;  %v5836_v61 = vshll.u32 %v13702_v18, 16  ;;  %v6149_v28 = vrot.slane %v13447_v48, 5 }
 0x38b   : > { %8316 = vmatmul.bf16.gmra.mxu3 %v7042_v13  ;;  %8685 = vmatpush.bf16.msra.mxu0 %v10541_v59  ;;  %v6301_v31 = vshll.u32 %v6244_v0, 16  ;;  %v6305_v38 = vshrl.u32 %v6244_v0, 16  ;;  %v9859_v13 = vrot.slane %v6068_v29, 9  ;;  %v5457_v0 = vsel %vm10843_vm3, %v5452_v37, %v5456_v6  ;;  %v6275_v29 = vld [vmem:[#allocation2 + $0x20] sm:$0x1] }
 0x38c   : > { %14893 = vst [vmem:[#allocation9_spill] sm:$0xff] %v13680_v27  ;;  %8222 = vmatmul.bf16.gmra.mxu2 %v6977_v46  ;;  %8439 = vmatmul.bf16.gmra.mxu1 %v7175_v17  ;;  %v5824_v39 = vrot.slane %v5822_v24, 5  ;;  %v6295_v46 = vshll.u32 %v6243_v63, 16  ;;  %v5447_v24 = vsel %vm10843_vm3, %v5442_v42, %v13672_v41  ;;  %v8097_v41 = vadd.f32 %v13663_v56, %v13308_v16 }
 0x38d   : > { %v13711_v17 = vrot.slane %v6301_v31, 5  ;;  %v6307_v33 = vrot.slane %v6305_v38, 4  ;;  %v6147_v35 = vsel %vm11069_vm6, %v9859_v13, %v6146_v55  ;;  %v5815_v63 = vsel %vm10843_vm3, %v5810_v47, %v13652_v21  ;;  %v10468_v38 = vld [vmem:[#allocation2 + $0xc0] sm:$0xff] }
 0x38e   : > { %v13700_v10 = vpop.f32.mrf.mxu3  ;;  %v5825_v14 = vsel %vm10843_vm3, %v5820_v62, %v5824_v39  ;;  %v13720_v57 = vpop.f32.mrf.mxu0  ;;  %v5840_v62 = vshrl.u32 %v13702_v18, 16  ;;  %v6961_v37 = vunpack.c.l.b16 %v5447_v24  ;;  %v6962_v39 = vunpack.c.l.b16 %v5457_v0  ;;  %v10623_v24 = vld [vmem:[#allocation2 + $0x10] sm:$0xf] }
 0x38f   : > { %v8183_v15 = vpop.f32.mrf.mxu2  ;;  %14896 = vst [vmem:[#allocation28_spill] sm:$0xff] %v13720_v57  ;;  %v7150_v31 = vunpack.c.l.b16 %v5825_v14  ;;  %v6308_v48 = vor.u32 %v6307_v33, %v13711_v17  ;;  %v13736_v47 = vrot.slane %v5836_v61, 5  ;;  %v6311_v0 = vshll.u32 %v6275_v29, 16  ;;  %v13745_v61 = vld [vmem:[#allocation2 + $0x5c] sm:$0x1] }
 0x390   : > { %v8184_v8 = vadd.f32 %v8183_v15, %v8095_v54  ;;  %v6148_v54 = vrot.slane %v6146_v55, 4  ;;  %v6294_v15 = vrot.slane %v6292_v20, 4  ;;  %v7207_v55 = vunpack.c.l.b16 %v6147_v35 }
 0x391   : > { %v13709_v59 = vpop.f32.mrf.mxu1  ;;  %v5842_v14 = vrot.slane %v5840_v62, 4  ;;  %v7149_v20 = vunpack.c.l.b16 %v5815_v63  ;;  %v6978_v35 = vpack.c.b16 %v6962_v39, %v6961_v37  ;;  %v8100_v37 = vadd.f32 %v13663_v56, %v13333_v26 }
 0x392   : > { %v13707_v51 = vadd.f32 %v13623_v49, %v8184_v8  ;;  %v5646_v49 = vld [vmem:[#allocation2 + $0x54] sm:$0xf]  ;;  %v6297_v8 = vrot.slane %v6295_v46, 5  ;;  %v6150_v6 = vsel %vm11069_vm6, %v6148_v54, %v6149_v28  ;;  %v6132_v46 = vrot.slane %v10623_v24, 5 }
 0x393   : > { %v5827_v13 = vshrl.u32 %v5646_v49, 16  ;;  %v7208_v16 = vunpack.c.l.b16 %v6150_v6  ;;  %v5830_v21 = vshll.u32 %v5646_v49, 16  ;;  %v10469_v6 = vld [vmem:[#allocation2 + $0x18] sm:$0xff]  ;;  %v6309_v49 = vrot.slane %v6308_v48, 4 }
 0x394   : > { %14895 = vst [vmem:[#allocation11_spill] sm:$0xff] %v13707_v51  ;;  %v6298_v28 = vor.u32 %v6297_v8, %v6294_v15  ;;  %v5843_v29 = vor.u32 %v5842_v14, %v13736_v47  ;;  %v5846_v8 = vshll.u32 %v13745_v61, 16 }
 0x395   : > { %v13738_v51 = vpack.c.b16 %v7208_v16, %v7207_v55  ;;  %v5829_v62 = vrot.slane %v5827_v13, 4  ;;  %v5832_v63 = vrot.slane %v5830_v21, 5  ;;  %v10624_v55 = vld [vmem:[#allocation2 + $0x14] sm:$0x1]  ;;  %v6245_v21 = vld [vmem:[#allocation2 + $0x24] sm:$0xf] }
 0x396   : > { %v13734_v36 = vpop.f32.mrf.mxu3  ;;  %v13750_v15 = vpop.f32.mrf.mxu0  ;;  %v6299_v39 = vrot.slane %v6298_v28, 4  ;;  %v6135_v13 = vrot.slane %v10624_v55, 5  ;;  %v5844_v28 = vrot.slane %v5843_v29, 4 }
 0x397   : > { %v8185_v42 = vpop.f32.mrf.mxu2  ;;  %14898 = vst [vmem:[#allocation30_spill] sm:$0xff] %v13750_v15 }
 0x398   : > { %v8186_v57 = vadd.f32 %v8185_v42, %v8097_v41  ;;  %v7176_v41 = vpack.c.b16 %v7150_v31, %v7149_v20  ;;  %v6246_v42 = vld [vmem:[#allocation2 + $0x28] sm:$0xf]  ;;  %v6304_v26 = vsel %vm10843_vm3, %v6299_v39, %v13711_v17  ;;  %v6319_v17 = vshll.u32 %v6245_v21, 16 }
 0x399   : > { %8405 = vmatmul.bf16.gmra.mxu0 %v10468_v38  ;;  %v13743_v33 = vpop.f32.mrf.mxu1  ;;  %v6066_v38 = vld [vmem:[#allocation2 + $0xc] sm:$0xe]  ;;  %v6325_v14 = vshll.u32 %v6246_v42, 16  ;;  %v6329_v20 = vshrl.u32 %v6246_v42, 16  ;;  %v7347_v55 = vunpack.c.l.b16 %v6304_v26  ;;  %v8102_v39 = vadd.f32 %v13663_v56, %v13360_v5 }
 0x39a   : > { %v13741_v54 = vadd.f32 %v13674_v12, %v8186_v57  ;;  %v6134_v12 = vrot.slane %v6132_v46, 4  ;;  %v6313_v57 = vrot.slane %v6311_v0, 5  ;;  %v9857_v31 = vrot.slane %v6066_v38, 9  ;;  %v13764_v38 = vld [vmem:[#allocation2 + $0x64] sm:$0xf] }
 0x39b   : > { %8597 = vmatmul.bf16.vlgmr.msra.gmra.mxu3 %v10469_v6 }
 0x39c   : > { %14897 = vst [vmem:[#allocation29_spill] sm:$0xff] %v13741_v54  ;;  %8227 = vmatmul.bf16.gmra.mxu2 %v6978_v35  ;;  %8444 = vmatmul.bf16.gmra.mxu1 %v7176_v41  ;;  %v6314_v16 = vsel %vm10843_vm3, %v6309_v49, %v6313_v57  ;;  %v5833_v35 = vor.u32 %v5832_v63, %v5829_v62  ;;  %v13771_v62 = vrot.slane %v6325_v14, 5  ;;  %v6331_v63 = vrot.slane %v6329_v20, 4  ;;  %v6276_v14 = vld [vmem:[#allocation2 + $0x2c] sm:$0x1] }
 0x39d   : > { %v6133_v41 = vsel %vm11069_vm6, %v9857_v31, %v6132_v46  ;;  %v6136_v6 = vsel %vm11069_vm6, %v6134_v12, %v6135_v13  ;;  %v7348_v57 = vunpack.c.l.b16 %v6314_v16  ;;  %v5648_v12 = vld [vmem:[#allocation2 + $0x60] sm:$0xf]  ;;  %v5860_v31 = vshll.u32 %v13764_v38, 16 }
 0x39e   : > { %v13755_v0 = vpop.f32.mrf.mxu3  ;;  %v5834_v29 = vrot.slane %v5833_v35, 4  ;;  %v7203_v13 = vunpack.c.l.b16 %v6133_v41  ;;  %v6321_v35 = vrot.slane %v6319_v17, 5  ;;  %v13783_v15 = vpop.f32.mrf.mxu0  ;;  %v5854_v5 = vshll.u32 %v5648_v12, 16 }
 0x39f   : > { %v8188_v48 = vpop.f32.mrf.mxu2  ;;  %v7379_v16 = vpack.c.b16 %v7348_v57, %v7347_v55  ;;  %14900 = vst [vmem:[#allocation32_spill] sm:$0xff] %v13783_v15  ;;  %v13787_v41 = vrot.slane %v5860_v31, 5 }
 0x3a0   : > { %v8189_v24 = vadd.f32 %v8188_v48, %v8100_v37  ;;  %v5848_v37 = vrot.slane %v5846_v8, 5  ;;  %v6316_v48 = vshrl.u32 %v6245_v21, 16  ;;  %v7204_v8 = vunpack.c.l.b16 %v6136_v6 }
 0x3a1   : > { %v13769_v42 = vpop.f32.mrf.mxu1  ;;  %v5839_v21 = vsel %vm10843_vm3, %v5834_v29, %v13736_v47  ;;  %v6335_v47 = vshll.u32 %v6276_v14, 16  ;;  %v5856_v31 = vrot.slane %v5854_v5, 5  ;;  %v8105_v14 = vadd.f32 %v13663_v56, %v13392_v58  ;;  %v13807_v58 = vld [vmem:[#allocation2 + $0x70] sm:$0xf] }
 0x3a2   : > { %v13767_v49 = vadd.f32 %v13700_v10, %v8189_v24  ;;  %v5849_v46 = vsel %vm10843_vm3, %v5844_v28, %v5848_v37  ;;  %v5864_v10 = vshrl.u32 %v13764_v38, 16  ;;  %v6318_v20 = vrot.slane %v6316_v48, 4 }
 0x3a3   : > { %v7152_v26 = vunpack.c.l.b16 %v5849_v46  ;;  %v6332_v28 = vor.u32 %v6331_v63, %v13771_v62  ;;  %v5851_v37 = vshrl.u32 %v5648_v12, 16  ;;  %v7151_v57 = vunpack.c.l.b16 %v5839_v21  ;;  %v10625_v63 = vld [vmem:[#allocation2 + $0x1c] sm:$0xf]  ;;  %v6248_v46 = vld [vmem:[#allocation2 + $0x34] sm:$0xf] }
 0x3a4   : > { %14899 = vst [vmem:[#allocation31_spill] sm:$0xff] %v13767_v49  ;;  %v5866_v6 = vrot.slane %v5864_v10, 4  ;;  %v7235_v17 = vpack.c.b16 %v7204_v8, %v7203_v13  ;;  %v6139_v29 = vrot.slane %v10625_v63, 5  ;;  %v6247_v21 = vld [vmem:[#allocation2 + $0x30] sm:$0xf]  ;;  %v6353_v13 = vshrl.u32 %v6248_v46, 16 }
 0x3a5   : > { %v7177_v15 = vpack.c.b16 %v7152_v26, %v7151_v57  ;;  %v6333_v27 = vrot.slane %v6332_v28, 4  ;;  %v5853_v12 = vrot.slane %v5851_v37, 4  ;;  %v10552_v8 = vld [vmem:[%s14803_s3 + $0x218] sm:$0xff]  ;;  %v6340_v5 = vshrl.u32 %v6247_v21, 16 }
 0x3a6   : > { %v13785_v54 = vpop.f32.mrf.mxu3  ;;  %v5867_v10 = vor.u32 %v5866_v6, %v13787_v41  ;;  %v6141_v26 = vrot.slane %v6139_v29, 4  ;;  %v6343_v6 = vshll.u32 %v6247_v21, 16  ;;  %8771 = vmatpush.bf16.msra.mxu1 %v10552_v8 }
 0x3a7   : > { %v8190_v24 = vpop.f32.mrf.mxu2 }
 0x3a8   : > { %v8191_v49 = vadd.f32 %v8190_v24, %v8102_v39  ;;  %v10470_v39 = vld [vmem:[#allocation2 + $0x24] sm:$0xff]  ;;  %v6322_v24 = vor.u32 %v6321_v35, %v6318_v20  ;;  %v6067_v20 = vld [vmem:[#allocation2 + $0x18] sm:$0xe] }
 0x3a9   : > { %8686 = vmatmul.bf16.vlgmr.msra.gmra.mxu0 %v7379_v16  ;;  %v13792_v55 = vpop.f32.mrf.mxu1  ;;  %v13794_v16 = vld [vmem:[#allocation2 + $0x68] sm:$0x1] }
 0x3aa   : > { %v13790_v48 = vadd.f32 %v13734_v36, %v8191_v49  ;;  %14902 = vst [vmem:[#allocation34_spill] sm:$0xff] %v13792_v55  ;;  %v6337_v36 = vrot.slane %v6335_v47, 5  ;;  %v6349_v49 = vshll.u32 %v6248_v46, 16  ;;  %v5870_v35 = vshll.u32 %v13794_v16, 16 }
 0x3ab   : > { %8602 = vmatmul.bf16.gmra.mxu3 %v10470_v39  ;;  %v6323_v37 = vrot.slane %v6322_v24, 4  ;;  %v5857_v46 = vor.u32 %v5856_v31, %v5853_v12  ;;  %v5868_v39 = vrot.slane %v5867_v10, 4 }
 0x3ac   : > { %14901 = vst [vmem:[#allocation33_spill] sm:$0xff] %v13790_v48  ;;  %8508 = vmatmul.bf16.vlgmr.msra.gmra.mxu2 %v7235_v17  ;;  %8449 = vmatmul.bf16.gmra.mxu1 %v7177_v15  ;;  %v6338_v15 = vsel %vm10843_vm3, %v6333_v27, %v6337_v36  ;;  %v10626_v17 = vld [vmem:[#allocation2 + $0x20] sm:$0x1]  ;;  %v9858_v48 = vrot.slane %v6067_v20, 9  ;;  %v13812_v55 = vrot.slane %v6349_v49, 5  ;;  %v6355_v27 = vrot.slane %v6353_v13, 4  ;;  %v13814_v36 = vpop.f32.mrf.mxu0 }
 0x3ad   : > { %v6142_v63 = vrot.slane %v10626_v17, 5  ;;  %v6328_v24 = vsel %vm10843_vm3, %v6323_v37, %v13771_v62  ;;  %14903 = vst [vmem:[#allocation35_spill] sm:$0xff] %v13814_v36  ;;  %v7350_v31 = vunpack.c.l.b16 %v6338_v15  ;;  %v5872_v10 = vrot.slane %v5870_v35, 5  ;;  %v5650_v15 = vld [vmem:[#allocation2 + $0x6c] sm:$0xf] }
 0x3ae   : > { %v13805_v47 = vpop.f32.mrf.mxu3  ;;  %v6342_v20 = vrot.slane %v6340_v5, 4  ;;  %v5884_v62 = vshll.u32 %v13807_v58, 16  ;;  %v5888_v49 = vshrl.u32 %v13807_v58, 16  ;;  %v7349_v13 = vunpack.c.l.b16 %v6328_v24 }
 0x3af   : > { %v8193_v28 = vpop.f32.mrf.mxu2  ;;  %v6143_v12 = vsel %vm11069_vm6, %v6141_v26, %v6142_v63  ;;  %v5858_v37 = vrot.slane %v5857_v46, 4  ;;  %v6140_v26 = vsel %vm11069_vm6, %v9858_v48, %v6139_v29  ;;  %v6356_v35 = vor.u32 %v6355_v27, %v13812_v55 }
 0x3b0   : > { %v8194_v57 = vadd.f32 %v8193_v28, %v8105_v14  ;;  %v6277_v14 = vld [vmem:[#allocation2 + $0x38] sm:$0x1]  ;;  %v6345_v28 = vrot.slane %v6343_v6, 5  ;;  %v7206_v5 = vunpack.c.l.b16 %v6143_v12  ;;  %v7380_v6 = vpack.c.b16 %v7350_v31, %v7349_v13 }
 0x3b1   : > { %v13819_v8 = vpop.f32.mrf.mxu1  ;;  %v5863_v17 = vsel %vm10843_vm3, %v5858_v37, %v13787_v41  ;;  %v6359_v63 = vshll.u32 %v6277_v14, 16  ;;  %v7205_v48 = vunpack.c.l.b16 %v6140_v26  ;;  %v5875_v29 = vshrl.u32 %v5650_v15, 16  ;;  %v6250_v26 = vld [vmem:[#allocation2 + $0x40] sm:$0xf] }
 0x3b2   : > { %v13817_v21 = vadd.f32 %v13755_v0, %v8194_v57  ;;  %v5873_v0 = vsel %vm10843_vm3, %v5868_v39, %v5872_v10  ;;  %v8107_v57 = vadd.f32 %v13663_v56, %v13421_v43  ;;  %v6346_v36 = vor.u32 %v6345_v28, %v6342_v20  ;;  %v13845_v28 = vld [vmem:[#allocation2 + $0x74] sm:$0x1] }
 0x3b3   : > { %v7154_v24 = vunpack.c.l.b16 %v5873_v0  ;;  %v13835_v39 = vrot.slane %v5884_v62, 5  ;;  %v5890_v10 = vrot.slane %v5888_v49, 4  ;;  %v5878_v27 = vshll.u32 %v5650_v15, 16  ;;  %v10471_v49 = vld [vmem:[#allocation2 + $0x30] sm:$0xff] }
 0x3b4   : > { %14904 = vst [vmem:[#allocation36_spill] sm:$0xff] %v13817_v21  ;;  %v7153_v12 = vunpack.c.l.b16 %v5863_v17  ;;  %v6357_v31 = vrot.slane %v6356_v35, 4  ;;  %v6153_v13 = vrot.slane %v13472_v19, 5  ;;  %v7236_v20 = vpack.c.b16 %v7206_v5, %v7205_v48  ;;  %v13848_v15 = vpop.f32.mrf.mxu0 }
 0x3b5   : > { %v6347_v37 = vrot.slane %v6346_v36, 4  ;;  %v6361_v0 = vrot.slane %v6359_v63, 5  ;;  %14906 = vst [vmem:[#allocation38_spill] sm:$0xff] %v13848_v15  ;;  %v5877_v35 = vrot.slane %v5875_v29, 4  ;;  %v5880_v19 = vrot.slane %v5878_v27, 5 }
 0x3b6   : > { %v13837_v21 = vpop.f32.mrf.mxu3  ;;  %v7178_v62 = vpack.c.b16 %v7154_v24, %v7153_v12  ;;  %v5894_v36 = vshll.u32 %v13845_v28, 16  ;;  %v6155_v17 = vrot.slane %v6153_v13, 4  ;;  %v8110_v63 = vadd.f32 %v13663_v56, %v13454_v25  ;;  %v13861_v12 = vld [vmem:[#allocation2 + $0x7c] sm:$0xf] }
 0x3b7   : > { %v8195_v46 = vpop.f32.mrf.mxu2  ;;  %v6362_v5 = vsel %vm10843_vm3, %v6357_v31, %v6361_v0  ;;  %v6373_v24 = vshll.u32 %v6250_v26, 16 }
 0x3b8   : > { %v8196_v43 = vadd.f32 %v8195_v46, %v8107_v57  ;;  %v5891_v57 = vor.u32 %v5890_v10, %v13835_v39  ;;  %v6249_v46 = vld [vmem:[#allocation2 + $0x3c] sm:$0xf]  ;;  %v6377_v10 = vshrl.u32 %v6250_v26, 16  ;;  %v5896_v25 = vrot.slane %v5894_v36, 5  ;;  %v6278_v26 = vld [vmem:[#allocation2 + $0x44] sm:$0x1] }
 0x3b9   : > { %8691 = vmatmul.bf16.gmra.mxu0 %v7380_v6  ;;  %v13843_v14 = vpop.f32.mrf.mxu1  ;;  %v6069_v6 = vld [vmem:[#allocation2 + $0x30] sm:$0xe]  ;;  %v6367_v15 = vshll.u32 %v6249_v46, 16 }
 0x3ba   : > { %v13841_v41 = vadd.f32 %v13785_v54, %v8196_v43  ;;  %v6352_v54 = vsel %vm10843_vm3, %v6347_v37, %v13812_v55  ;;  %v8112_v43 = vadd.f32 %v13663_v56, %v13481_v40  ;;  %v5892_v29 = vrot.slane %v5891_v57, 4 }
 0x3bb   : > { %8607 = vmatmul.bf16.gmra.mxu3 %v10471_v49  ;;  %v9860_v27 = vrot.slane %v6069_v6, 9  ;;  %v6156_v55 = vrot.slane %v13516_v32, 5  ;;  %v7352_v49 = vunpack.c.l.b16 %v6362_v5  ;;  %v5881_v37 = vor.u32 %v5880_v19, %v5877_v35  ;;  %v6072_v5 = vld [vmem:[#allocation2 + $0x54] sm:$0xe] }
 0x3bc   : > { %14905 = vst [vmem:[#allocation37_spill] sm:$0xff] %v13841_v41  ;;  %8513 = vmatmul.bf16.gmra.mxu2 %v7236_v20  ;;  %8454 = vmatmul.bf16.gmra.mxu1 %v7178_v62  ;;  %v7351_v62 = vunpack.c.l.b16 %v6352_v54  ;;  %v6364_v40 = vshrl.u32 %v6249_v46, 16  ;;  %v13874_v6 = vrot.slane %v6373_v24, 5  ;;  %v5908_v54 = vshll.u32 %v13861_v12, 16  ;;  %v13890_v41 = vpop.f32.mrf.mxu0 }
 0x3bd   : > { %v13867_v0 = vsel %vm11069_vm6, %v6155_v17, %v6156_v55  ;;  %v13879_v35 = vadd.f32 %v13663_v56, %v13513_v2  ;;  %v5897_v19 = vsel %vm10843_vm3, %v5892_v29, %v5896_v25  ;;  %v13885_v36 = vsel %vm11069_vm6, %v9860_v27, %v6153_v13  ;;  %v5652_v2 = vld [vmem:[#allocation2 + $0x78] sm:$0xf]  ;;  %14908 = vst [vmem:[#allocation40_spill] sm:$0xff] %v13890_v41 }
 0x3be   : > { %v13863_v20 = vpop.f32.mrf.mxu3  ;;  %v7381_v17 = vpack.c.b16 %v7352_v49, %v7351_v62  ;;  %v5882_v46 = vrot.slane %v5881_v37, 4  ;;  %v7210_v24 = vunpack.c.l.b16 %v13867_v0  ;;  %v6369_v55 = vrot.slane %v6367_v15, 5 }
 0x3bf   : > { %v8198_v48 = vpop.f32.mrf.mxu2  ;;  %v7156_v29 = vunpack.c.l.b16 %v5897_v19  ;;  %v13896_v62 = vrot.slane %v5908_v54, 5  ;;  %v6177_v25 = vrot.slane %v13745_v61, 5 }
 0x3c0   : > { %v8199_v31 = vadd.f32 %v8198_v48, %v8110_v63  ;;  %v6379_v63 = vrot.slane %v6377_v10, 4  ;;  %v6174_v10 = vrot.slane %v13702_v18, 5  ;;  %v6366_v48 = vrot.slane %v6364_v40, 4 }
 0x3c1   : > { %v13872_v32 = vpop.f32.mrf.mxu1  ;;  %v5887_v13 = vsel %vm10843_vm3, %v5882_v46, %v13835_v39  ;;  %v5899_v40 = vshrl.u32 %v5652_v2, 16  ;;  %v13911_v46 = vld [vmem:[#allocation2 + $0x80] sm:$0x1] }
 0x3c2   : > { %v13870_v57 = vadd.f32 %v13805_v47, %v8199_v31  ;;  %v5912_v47 = vshrl.u32 %v13861_v12, 16  ;;  %v6383_v31 = vshll.u32 %v6278_v26, 16  ;;  %v6380_v27 = vor.u32 %v6379_v63, %v13874_v6  ;;  %v10472_v39 = vld [vmem:[#allocation2 + $0x3c] sm:$0xff] }
 0x3c3   : > { %v6176_v15 = vrot.slane %v6174_v10, 4  ;;  %v8332_v63 = vadd.f32 %v13226_v1, %v13306_v4  ;;  %v7155_v54 = vunpack.c.l.b16 %v5887_v13  ;;  %v6370_v19 = vor.u32 %v6369_v55, %v6366_v48  ;;  %v6070_v4 = vld [vmem:[#allocation2 + $0x3c] sm:$0xe]  ;;  %v6252_v48 = vld [vmem:[#allocation2 + $0x4c] sm:$0xf] }
 0x3c4   : > { %14907 = vst [vmem:[#allocation39_spill] sm:$0xff] %v13870_v57  ;;  %v9863_v57 = vrot.slane %v6072_v5, 9  ;;  %v5914_v37 = vrot.slane %v5912_v47, 4  ;;  %v5902_v5 = vshll.u32 %v5652_v2, 16  ;;  %v6385_v41 = vrot.slane %v6383_v31, 5 }
 0x3c5   : > { %v6178_v47 = vsel %vm11069_vm6, %v6176_v15, %v6177_v25  ;;  %v5901_v55 = vrot.slane %v5899_v40, 4  ;;  %v14909_v13 = vrot.slane %v13546_v45, 5  ;;  %v6251_v15 = vld [vmem:[#allocation2 + $0x48] sm:$0xf]  ;;  %v7209_v31 = vunpack.c.l.b16 %v13885_v36 }
 0x3c6   : > { %v6175_v18 = vsel %vm11069_vm6, %v9863_v57, %v6174_v10  ;;  %v13901_v26 = vpop.f32.mrf.mxu3  ;;  %v7216_v10 = vunpack.c.l.b16 %v6178_v47  ;;  %v5915_v1 = vor.u32 %v5914_v37, %v13896_v62  ;;  %v6163_v37 = vrot.slane %v13588_v11, 5  ;;  %v13935_v11 = vpop.f32.mrf.mxu0 }
 0x3c7   : > { %v8200_v49 = vpop.f32.mrf.mxu2  ;;  %v9861_v47 = vrot.slane %v6070_v4, 9  ;;  %v6388_v36 = vshrl.u32 %v6251_v15, 16  ;;  %v6391_v4 = vshll.u32 %v6251_v15, 16  ;;  %v14910_v15 = vrot.slane %v13546_v45, 5 }
 0x3c8   : > { %v8201_v0 = vadd.f32 %v8200_v49, %v8112_v43  ;;  %v6381_v43 = vrot.slane %v6380_v27, 4  ;;  %v7179_v49 = vpack.c.b16 %v7156_v29, %v7155_v54  ;;  %v6162_v27 = vrot.slane %v14909_v13, 4 }
 0x3c9   : > { %8696 = vmatmul.bf16.gmra.mxu0 %v7381_v17  ;;  %v8420_v61 = vpop.f32.mrf.mxu1  ;;  %v7215_v17 = vunpack.c.l.b16 %v6175_v18  ;;  %v8117_v18 = vadd.f32 %v13663_v56, %v13551_v60  ;;  %v5918_v29 = vshll.u32 %v13911_v46, 16  ;;  %v13931_v60 = vpack.c.b16 %v7210_v24, %v7209_v31 }
 0x3ca   : > { %v13909_v57 = vadd.f32 %v13837_v21, %v8201_v0  ;;  %v13913_v2 = vadd.f32 %v8420_v61, %v8332_v63  ;;  %v5904_v21 = vrot.slane %v5902_v5, 5  ;;  %v6371_v0 = vrot.slane %v6370_v19, 4  ;;  %v13933_v61 = vld [vmem:[#allocation2 + $0x88] sm:$0xf] }
 0x3cb   : > { %v13919_v25 = vpack.c.b16 %v7216_v10, %v7215_v17  ;;  %8612 = vmatmul.bf16.gmra.mxu3 %v10472_v39  ;;  %v6386_v40 = vsel %vm10843_vm3, %v6381_v43, %v6385_v41  ;;  %v6397_v5 = vshll.u32 %v6252_v48, 16  ;;  %v6401_v63 = vshrl.u32 %v6252_v48, 16 }
 0x3cc   : > { %8518 = vmatmul.bf16.gmra.mxu2 %v13738_v51  ;;  %8459 = vmatmul.bf16.gmra.mxu1 %v7179_v49  ;;  %v10551_v51 = vld [vmem:[%s14803_s3 + $0x210] sm:$0xff]  ;;  %v5916_v39 = vrot.slane %v5915_v1, 4  ;;  %v6376_v41 = vsel %vm10843_vm3, %v6371_v0, %v13874_v6  ;;  %v5905_v19 = vor.u32 %v5904_v21, %v5901_v55  ;;  %v13945_v24 = vsel %vm11069_vm6, %v6162_v27, %v6163_v37  ;;  %v6073_v55 = vld [vmem:[#allocation2 + $0x60] sm:$0xe] }
 0x3cd   : > { %8772 = vmatpush.bf16.msra.mxu1 %v10551_v51  ;;  %v8334_v43 = vadd.f32 %v13283_v7, %v13331_v30  ;;  %v7354_v49 = vunpack.c.l.b16 %v6386_v40  ;;  %v5920_v1 = vrot.slane %v5918_v29, 5  ;;  %v13952_v13 = vrot.slane %v6397_v5, 5  ;;  %v6279_v51 = vld [vmem:[#allocation2 + $0x50] sm:$0x1] }
 0x3ce   : > { %v13938_v10 = vpop.f32.mrf.mxu3  ;;  %v6403_v31 = vrot.slane %v6401_v63, 4  ;;  %v5932_v6 = vshll.u32 %v13933_v61, 16  ;;  %v7353_v27 = vunpack.c.l.b16 %v6376_v41  ;;  %v5936_v7 = vshrl.u32 %v13933_v61, 16 }
 0x3cf   : > { %v8203_v54 = vpop.f32.mrf.mxu2  ;;  %v5921_v37 = vsel %vm10843_vm3, %v5916_v39, %v5920_v1  ;;  %v5906_v30 = vrot.slane %v5905_v19, 4  ;;  %v7212_v29 = vunpack.c.l.b16 %v13945_v24  ;;  %v6181_v0 = vrot.slane %v13764_v38, 5 }
 0x3d0   : > { %v8204_v17 = vadd.f32 %v8203_v54, %v13879_v35  ;;  %v7382_v40 = vpack.c.b16 %v7354_v49, %v7353_v27  ;;  %v6390_v5 = vrot.slane %v6388_v36, 4  ;;  %v6393_v63 = vrot.slane %v6391_v4, 5  ;;  %v5654_v54 = vld [vmem:[#allocation2 + $0x84] sm:$0xf] }
 0x3d1   : > { %v8422_v35 = vpop.f32.mrf.mxu1  ;;  %v5911_v39 = vsel %vm10843_vm3, %v5906_v30, %v13896_v62  ;;  %v7158_v41 = vunpack.c.l.b16 %v5921_v37  ;;  %v6404_v45 = vor.u32 %v6403_v31, %v13952_v13  ;;  %v13970_v19 = vrot.slane %v5932_v6, 5  ;;  %v13981_v37 = vpop.f32.mrf.mxu0  ;;  %v13986_v30 = vld [vmem:[#allocation2 + $0x8c] sm:$0x1] }
 0x3d2   : > { %v13950_v48 = vadd.f32 %v13863_v20, %v8204_v17  ;;  %v13955_v21 = vadd.f32 %v8422_v35, %v8334_v43  ;;  %v6161_v20 = vsel %vm11069_vm6, %v9861_v47, %v14910_v15  ;;  %v9864_v17 = vrot.slane %v6073_v55, 9 }
 0x3d3   : > { %v5938_v43 = vrot.slane %v5936_v7, 4  ;;  %v6183_v38 = vrot.slane %v6181_v0, 4  ;;  %v6184_v36 = vrot.slane %v13794_v16, 5  ;;  %v6407_v4 = vshll.u32 %v6279_v51, 16 }
 0x3d4   : > { %v6182_v24 = vsel %vm11069_vm6, %v9864_v17, %v6181_v0  ;;  %v5923_v35 = vshrl.u32 %v5654_v54, 16  ;;  %v5926_v62 = vshll.u32 %v5654_v54, 16  ;;  %v8337_v31 = vadd.f32 %v13310_v9, %v13358_v44  ;;  %v10473_v9 = vld [vmem:[#allocation2 + $0x48] sm:$0xff] }
 0x3d5   : > { %v7157_v6 = vunpack.c.l.b16 %v5911_v39  ;;  %v6394_v55 = vor.u32 %v6393_v63, %v6390_v5  ;;  %v6185_v27 = vsel %vm11069_vm6, %v6183_v38, %v6184_v36  ;;  %v7217_v15 = vunpack.c.l.b16 %v6182_v24  ;;  %v6254_v63 = vld [vmem:[#allocation2 + $0x58] sm:$0xf]  ;;  %v6071_v39 = vld [vmem:[#allocation2 + $0x48] sm:$0xe]  ;;  %v6253_v24 = vld [vmem:[#allocation2 + $0x54] sm:$0xf] }
 0x3d6   : > { %v13975_v1 = vpop.f32.mrf.mxu3  ;;  %v7218_v51 = vunpack.c.l.b16 %v6185_v27  ;;  %v5939_v44 = vor.u32 %v5938_v43, %v13970_v19  ;;  %v6167_v5 = vrot.slane %v13604_v50, 5  ;;  %v6409_v54 = vrot.slane %v6407_v4, 5 }
 0x3d7   : > { %v8205_v47 = vpop.f32.mrf.mxu2  ;;  %v5928_v17 = vrot.slane %v5926_v62, 5  ;;  %v7211_v43 = vunpack.c.l.b16 %v6161_v20  ;;  %v5942_v50 = vshll.u32 %v13986_v30, 16  ;;  %v6395_v38 = vrot.slane %v6394_v55, 4 }
 0x3d8   : > { %v8206_v49 = vadd.f32 %v8205_v47, %v8117_v18  ;;  %v6405_v18 = vrot.slane %v6404_v45, 4  ;;  %v13993_v45 = vpack.c.b16 %v7218_v51, %v7217_v15  ;;  %v8120_v47 = vadd.f32 %v13663_v56, %v13586_v22 }
 0x3d9   : > { %8701 = vmatmul.bf16.gmra.mxu0 %v7382_v40  ;;  %v8425_v16 = vpop.f32.mrf.mxu1  ;;  %v7180_v40 = vpack.c.b16 %v7158_v41, %v7157_v6  ;;  %v8122_v41 = vadd.f32 %v13663_v56, %v13631_v3  ;;  %v6421_v36 = vshll.u32 %v6254_v63, 16  ;;  %v5940_v62 = vrot.slane %v5939_v44, 4  ;;  %v14004_v6 = vld [vmem:[#allocation2 + $0x94] sm:$0xf] }
 0x3da   : > { %v13984_v7 = vadd.f32 %v13901_v26, %v8206_v49  ;;  %v13988_v0 = vadd.f32 %v8425_v16, %v8337_v31  ;;  %v5925_v26 = vrot.slane %v5923_v35, 4  ;;  %v6425_v49 = vshrl.u32 %v6254_v63, 16  ;;  %v14911_v16 = vld [vmem:[#allocation13_spill] sm:$0xff] }
 0x3db   : > { %8617 = vmatmul.bf16.gmra.mxu3 %v10473_v9  ;;  %v14002_v35 = vpack.c.b16 %v7212_v29, %v7211_v43  ;;  %v9862_v22 = vrot.slane %v6071_v39, 9  ;;  %v6169_v31 = vrot.slane %v6167_v5, 4  ;;  %v6400_v20 = vsel %vm10843_vm3, %v6395_v38, %v13952_v13 }
 0x3dc   : > { %8523 = vmatmul.bf16.gmra.mxu2 %v13931_v60  ;;  %8464 = vmatmul.bf16.gmra.mxu1 %v7180_v40  ;;  %v6410_v60 = vsel %vm10843_vm3, %v6405_v18, %v6409_v54  ;;  %v5929_v55 = vor.u32 %v5928_v17, %v5925_v26  ;;  %v6412_v27 = vshrl.u32 %v6253_v24, 16  ;;  %v14912_v18 = vld [vmem:[#allocation12_spill] sm:$0xff]  ;;  %v5944_v29 = vrot.slane %v5942_v50, 5  ;;  %v14024_v50 = vpop.f32.mrf.mxu0 }
 0x3dd   : > { %v8339_v15 = vadd.f32 %v14912_v18, %v14911_v16  ;;  %v7356_v51 = vunpack.c.l.b16 %v6410_v60  ;;  %v6415_v40 = vshll.u32 %v6253_v24, 16  ;;  %v14016_v63 = vrot.slane %v6421_v36, 5 }
 0x3de   : > { %v14006_v56 = vpop.f32.mrf.mxu3  ;;  %v6427_v54 = vrot.slane %v6425_v49, 4  ;;  %v5956_v39 = vshll.u32 %v14004_v6, 16  ;;  %v7355_v13 = vunpack.c.l.b16 %v6400_v20  ;;  %v5945_v26 = vsel %vm10843_vm3, %v5940_v62, %v5944_v29  ;;  %v5656_v20 = vld [vmem:[#allocation2 + $0x90] sm:$0xf] }
 0x3df   : > { %v8208_v4 = vpop.f32.mrf.mxu2  ;;  %v5960_v17 = vshrl.u32 %v14004_v6, 16  ;;  %v5930_v24 = vrot.slane %v5929_v55, 4  ;;  %v6414_v38 = vrot.slane %v6412_v27, 4  ;;  %v6188_v60 = vrot.slane %v13807_v58, 5 }
 0x3e0   : > { %v8209_v3 = vadd.f32 %v8208_v4, %v8120_v47  ;;  %v6074_v47 = vld [vmem:[#allocation2 + $0x6c] sm:$0xe]  ;;  %v7383_v36 = vpack.c.b16 %v7356_v51, %v7355_v13  ;;  %v14030_v49 = vsel %vm11069_vm6, %v9862_v22, %v6167_v5  ;;  %v6280_v4 = vld [vmem:[#allocation2 + $0x5c] sm:$0x1]  ;;  %v7160_v18 = vunpack.c.l.b16 %v5945_v26 }
 0x3e1   : > { %v8427_v44 = vpop.f32.mrf.mxu1  ;;  %v9865_v16 = vrot.slane %v6074_v47, 9  ;;  %v5935_v62 = vsel %vm10843_vm3, %v5930_v24, %v13970_v19  ;;  %v6428_v55 = vor.u32 %v6427_v54, %v14016_v63  ;;  %v5962_v58 = vrot.slane %v5960_v17, 4  ;;  %v14913_v47 = vld [vmem:[#allocation14_spill] sm:$0xff]  ;;  %v14914_v13 = vld [vmem:[#allocation16_spill] sm:$0xff] }
 0x3e2   : > { %v14014_v9 = vadd.f32 %v13938_v10, %v8209_v3  ;;  %v14019_v43 = vadd.f32 %v8427_v44, %v8339_v15  ;;  %v6170_v10 = vrot.slane %v13676_v53, 5  ;;  %v6417_v3 = vrot.slane %v6415_v40, 5 }
 0x3e3   : > { %v14036_v53 = vrot.slane %v5956_v39, 5  ;;  %v6189_v15 = vsel %vm11069_vm6, %v9865_v16, %v6188_v60  ;;  %v6190_v5 = vrot.slane %v6188_v60, 4  ;;  %v6191_v22 = vrot.slane %v13845_v28, 5 }
 0x3e4   : > { %v6431_v40 = vshll.u32 %v6280_v4, 16  ;;  %v5947_v44 = vshrl.u32 %v5656_v20, 16  ;;  %v5950_v19 = vshll.u32 %v5656_v20, 16  ;;  %v8342_v54 = vadd.f32 %v14914_v13, %v14913_v47 }
 0x3e5   : > { %v7159_v39 = vunpack.c.l.b16 %v5935_v62  ;;  %v6418_v26 = vor.u32 %v6417_v3, %v6414_v38  ;;  %v6192_v17 = vsel %vm11069_vm6, %v6190_v5, %v6191_v22  ;;  %v6429_v28 = vrot.slane %v6428_v55, 4  ;;  %v6256_v3 = vld [vmem:[#allocation2 + $0x64] sm:$0xf] }
 0x3e6   : > { %v14041_v29 = vpop.f32.mrf.mxu3  ;;  %v7219_v16 = vunpack.c.l.b16 %v6189_v15  ;;  %v6171_v62 = vsel %vm11069_vm6, %v6169_v31, %v6170_v10  ;;  %v5963_v38 = vor.u32 %v5962_v58, %v14036_v53  ;;  %v5949_v5 = vrot.slane %v5947_v44, 4  ;;  %v14063_v15 = vld [vmem:[%s14804_s4] ss:$0 sm:$0xff]  ;;  %v14071_v58 = vpop.f32.mrf.mxu0 }
 0x3e7   : > { %v8210_v27 = vpop.f32.mrf.mxu2  ;;  %v7181_v20 = vpack.c.b16 %v7160_v18, %v7159_v39  ;;  %v5952_v22 = vrot.slane %v5950_v19, 5  ;;  %v8125_v18 = vadd.f32 %v14063_v15, %v13684_v52  ;;  %v6255_v10 = vld [vmem:[#allocation2 + $0x60] sm:$0xf]  ;;  %14916 = vst [vmem:[#allocation12_spill] sm:$0xff] %v14071_v58  ;;  %v6445_v44 = vshll.u32 %v6256_v3, 16 }
 0x3e8   : > { %v8211_v51 = vadd.f32 %v8210_v27, %v8122_v41  ;;  %v14050_v41 = vld [vmem:[#allocation2 + $0x98] sm:$0x1]  ;;  %v6449_v19 = vshrl.u32 %v6256_v3, 16  ;;  %v7213_v52 = vunpack.c.l.b16 %v14030_v49  ;;  %v7214_v13 = vunpack.c.l.b16 %v6171_v62  ;;  %v14076_v39 = vld [vmem:[#allocation2 + $0xa0] sm:$0xf] }
 0x3e9   : > { %8706 = vmatmul.bf16.gmra.mxu0 %v7383_v36  ;;  %v8430_v60 = vpop.f32.mrf.mxu1  ;;  %v7220_v36 = vunpack.c.l.b16 %v6192_v17  ;;  %v10474_v27 = vld [vmem:[#allocation2 + $0x54] sm:$0xff]  ;;  %v5966_v31 = vshll.u32 %v14050_v41, 16  ;;  %v6439_v49 = vshll.u32 %v6255_v10, 16 }
 0x3ea   : > { %v14048_v24 = vadd.f32 %v13975_v1, %v8211_v51  ;;  %v14052_v4 = vadd.f32 %v8430_v60, %v8342_v54  ;;  %v6433_v1 = vrot.slane %v6431_v40, 5  ;;  %v6419_v51 = vrot.slane %v6418_v26, 4 }
 0x3eb   : > { %v14058_v55 = vpack.c.b16 %v7220_v36, %v7219_v16  ;;  %8622 = vmatmul.bf16.gmra.mxu3 %v10474_v27  ;;  %v5964_v54 = vrot.slane %v5963_v38, 4  ;;  %v5953_v16 = vor.u32 %v5952_v22, %v5949_v5  ;;  %v6436_v36 = vshrl.u32 %v6255_v10, 16 }
 0x3ec   : > { %14915 = vst [vmem:[#allocation13_spill] sm:$0xff] %v14048_v24  ;;  %8528 = vmatmul.bf16.gmra.mxu2 %v14002_v35  ;;  %8469 = vmatmul.bf16.gmra.mxu1 %v7181_v20  ;;  %v10550_v35 = vld [vmem:[%s14803_s3 + $0x208] sm:$0xff]  ;;  %v6434_v40 = vsel %vm10843_vm3, %v6429_v28, %v6433_v1  ;;  %v6424_v26 = vsel %vm10843_vm3, %v6419_v51, %v14016_v63  ;;  %v5968_v1 = vrot.slane %v5966_v31, 5  ;;  %v6075_v24 = vld [vmem:[#allocation2 + $0x78] sm:$0xe]  ;;  %v5984_v22 = vshrl.u32 %v14076_v39, 16 }
 0x3ed   : > { %8773 = vmatpush.bf16.msra.mxu1 %v10550_v35  ;;  %v14917_v28 = vld [vmem:[#allocation20_spill] sm:$0xff]  ;;  %v14918_v20 = vld [vmem:[#allocation15_spill] sm:$0xff]  ;;  %v7358_v3 = vunpack.c.l.b16 %v6434_v40  ;;  %v14088_v35 = vrot.slane %v6445_v44, 5  ;;  %v7357_v63 = vunpack.c.l.b16 %v6424_v26  ;;  %v8127_v31 = vadd.f32 %v14063_v15, %v13709_v59 }
 0x3ee   : > { %v14078_v60 = vpop.f32.mrf.mxu3  ;;  %v8344_v27 = vadd.f32 %v14918_v20, %v14917_v28  ;;  %v5969_v5 = vsel %vm10843_vm3, %v5964_v54, %v5968_v1  ;;  %v6438_v10 = vrot.slane %v6436_v36, 4  ;;  %v6195_v51 = vrot.slane %v13861_v12, 5  ;;  %v5658_v28 = vld [vmem:[#allocation2 + $0x9c] sm:$0xf]  ;;  %v14108_v36 = vpop.f32.mrf.mxu0 }
 0x3ef   : > { %v8213_v47 = vpop.f32.mrf.mxu2  ;;  %v7240_v40 = vpack.c.b16 %v7214_v13, %v7213_v52  ;;  %v7384_v44 = vpack.c.b16 %v7358_v3, %v7357_v63  ;;  %v9866_v20 = vrot.slane %v6075_v24, 9  ;;  %v7162_v54 = vunpack.c.l.b16 %v5969_v5  ;;  %14920 = vst [vmem:[#allocation16_spill] sm:$0xff] %v14108_v36  ;;  %v10475_v36 = vld [vmem:[#allocation2 + $0x60] sm:$0xff] }
 0x3f0   : > { %v8214_v17 = vadd.f32 %v8213_v47, %v8125_v18  ;;  %v6451_v18 = vrot.slane %v6449_v19, 4  ;;  %v5980_v47 = vshll.u32 %v14076_v39, 16  ;;  %v6281_v19 = vld [vmem:[#allocation2 + $0x68] sm:$0x1]  ;;  %v6197_v52 = vrot.slane %v6195_v51, 4 }
 0x3f1   : > { %v8432_v38 = vpop.f32.mrf.mxu1  ;;  %v6196_v12 = vsel %vm11069_vm6, %v9866_v20, %v6195_v51  ;;  %v6198_v13 = vrot.slane %v13911_v46, 5 }
 0x3f2   : > { %v14086_v62 = vadd.f32 %v14006_v56, %v8214_v17  ;;  %v14091_v58 = vadd.f32 %v8432_v38, %v8344_v27  ;;  %v5954_v56 = vrot.slane %v5953_v16, 4  ;;  %v6441_v17 = vrot.slane %v6439_v49, 5 }
 0x3f3   : > { %v6452_v27 = vor.u32 %v6451_v18, %v14088_v35  ;;  %v14103_v1 = vrot.slane %v5980_v47, 5  ;;  %v5986_v16 = vrot.slane %v5984_v22, 4  ;;  %v5971_v49 = vshrl.u32 %v5658_v28, 16  ;;  %v14921_v18 = vld [vmem:[#allocation19_spill] sm:$0xff]  ;;  %v14922_v47 = vld [vmem:[#allocation17_spill] sm:$0xff] }
 0x3f4   : > { %14919 = vst [vmem:[#allocation14_spill] sm:$0xff] %v14086_v62  ;;  %v5959_v26 = vsel %vm10843_vm3, %v5954_v56, %v14036_v53  ;;  %v6455_v53 = vshll.u32 %v6281_v19, 16  ;;  %v5974_v38 = vshll.u32 %v5658_v28, 16  ;;  %v8347_v63 = vadd.f32 %v14922_v47, %v14921_v18 }
 0x3f5   : > { %v7161_v5 = vunpack.c.l.b16 %v5959_v26  ;;  %v6442_v22 = vor.u32 %v6441_v17, %v6438_v10  ;;  %v6199_v56 = vsel %vm11069_vm6, %v6197_v52, %v6198_v13  ;;  %v6453_v20 = vrot.slane %v6452_v27, 4  ;;  %v6258_v10 = vld [vmem:[#allocation2 + $0x70] sm:$0xf] }
 0x3f6   : > { %v14110_v3 = vpop.f32.mrf.mxu3  ;;  %v7222_v19 = vunpack.c.l.b16 %v6199_v56  ;;  %v5987_v26 = vor.u32 %v5986_v16, %v14103_v1  ;;  %v6457_v17 = vrot.slane %v6455_v53, 5  ;;  %v5973_v52 = vrot.slane %v5971_v49, 4 }
 0x3f7   : > { %v8215_v59 = vpop.f32.mrf.mxu2  ;;  %v7182_v28 = vpack.c.b16 %v7162_v54, %v7161_v5  ;;  %v5976_v13 = vrot.slane %v5974_v38, 5  ;;  %v8130_v27 = vadd.f32 %v14063_v15, %v13743_v33  ;;  %v6469_v47 = vshll.u32 %v6258_v10, 16  ;;  %v14924_v5 = vld [vmem:[#allocation23_spill] sm:$0xff] }
 0x3f8   : > { %v8216_v24 = vadd.f32 %v8215_v59, %v8127_v31  ;;  %v14119_v31 = vld [vmem:[#allocation2 + $0xa4] sm:$0x1]  ;;  %v6257_v59 = vld [vmem:[#allocation2 + $0x6c] sm:$0xf]  ;;  %v6458_v54 = vsel %vm10843_vm3, %v6453_v20, %v6457_v17  ;;  %v5988_v49 = vrot.slane %v5987_v26, 4 }
 0x3f9   : > { %8711 = vmatmul.bf16.gmra.mxu0 %v7384_v44  ;;  %v8435_v46 = vpop.f32.mrf.mxu1  ;;  %v7221_v44 = vunpack.c.l.b16 %v6196_v12  ;;  %v6443_v12 = vrot.slane %v6442_v22, 4  ;;  %v6460_v18 = vshrl.u32 %v6257_v59, 16  ;;  %v6463_v16 = vshll.u32 %v6257_v59, 16  ;;  %v14925_v22 = vld [vmem:[#allocation18_spill] sm:$0xff]  ;;  %v14138_v20 = vld [vmem:[#allocation2 + $0xac] sm:$0xf]  ;;  %v14140_v59 = vpop.f32.mrf.mxu0 }
 0x3fa   : > { %v14117_v51 = vadd.f32 %v14041_v29, %v8216_v24  ;;  %v14121_v62 = vadd.f32 %v8435_v46, %v8347_v63  ;;  %v5990_v24 = vshll.u32 %v14119_v31, 16  ;;  %v8349_v56 = vadd.f32 %v14925_v22, %v14924_v5  ;;  %14926 = vst [vmem:[#allocation15_spill] sm:$0xff] %v14140_v59  ;;  %v6282_v5 = vld [vmem:[#allocation2 + $0x74] sm:$0x1] }
 0x3fb   : > { %v14124_v29 = vpack.c.b16 %v7222_v19, %v7221_v44  ;;  %8627 = vmatmul.bf16.gmra.mxu3 %v10475_v36  ;;  %v6448_v33 = vsel %vm10843_vm3, %v6443_v12, %v14088_v35  ;;  %v5977_v36 = vor.u32 %v5976_v13, %v5973_v52  ;;  %v7360_v46 = vunpack.c.l.b16 %v6458_v54  ;;  %v6076_v35 = vld [vmem:[#allocation2 + $0x84] sm:$0xe] }
 0x3fc   : > { %14923 = vst [vmem:[#allocation20_spill] sm:$0xff] %v14117_v51  ;;  %8533 = vmatmul.bf16.gmra.mxu2 %v7240_v40  ;;  %8474 = vmatmul.bf16.gmra.mxu1 %v7182_v28  ;;  %v6473_v40 = vshrl.u32 %v6258_v10, 16  ;;  %v5992_v44 = vrot.slane %v5990_v24, 5  ;;  %v6462_v19 = vrot.slane %v6460_v18, 4  ;;  %v6465_v10 = vrot.slane %v6463_v16, 5 }
 0x3fd   : > { %v14145_v17 = vrot.slane %v6469_v47, 5  ;;  %v7359_v13 = vunpack.c.l.b16 %v6448_v33  ;;  %v5978_v24 = vrot.slane %v5977_v36, 4  ;;  %v5660_v18 = vld [vmem:[#allocation2 + $0xa8] sm:$0xf]  ;;  %v6004_v54 = vshll.u32 %v14138_v20, 16 }
 0x3fe   : > { %v14131_v63 = vpop.f32.mrf.mxu3  ;;  %v5993_v12 = vsel %vm10843_vm3, %v5988_v49, %v5992_v44  ;;  %v8132_v16 = vadd.f32 %v14063_v15, %v13769_v42  ;;  %v6466_v49 = vor.u32 %v6465_v10, %v6462_v19  ;;  %v14929_v19 = vld [vmem:[#allocation22_spill] sm:$0xff]  ;;  %v14176_v51 = vld [vmem:[#allocation2 + $0xb0] sm:$0x1] }
 0x3ff   : > { %v8218_v53 = vpop.f32.mrf.mxu2  ;;  %v7385_v47 = vpack.c.b16 %v7360_v46, %v7359_v13  ;;  %v7164_v33 = vunpack.c.l.b16 %v5993_v12  ;;  %v14165_v13 = vrot.slane %v6004_v54, 5  ;;  %v14928_v12 = vld [vmem:[#allocation24_spill] sm:$0xff] }
 0x400   : > { %v8219_v38 = vadd.f32 %v8218_v53, %v8130_v27  ;;  %v6475_v27 = vrot.slane %v6473_v40, 4  ;;  %v6008_v53 = vshrl.u32 %v14138_v20, 16  ;;  %v9867_v40 = vrot.slane %v6076_v35, 9 }
 0x401   : > { %v8437_v26 = vpop.f32.mrf.mxu1  ;;  %v5998_v35 = vshll.u32 %v5660_v18, 16  ;;  %v8352_v10 = vadd.f32 %v14929_v19, %v14928_v12  ;;  %v6467_v54 = vrot.slane %v6466_v49, 4  ;;  %v6259_v12 = vld [vmem:[#allocation2 + $0x78] sm:$0xf] }
 0x402   : > { %v14143_v28 = vadd.f32 %v14078_v60, %v8219_v38  ;;  %v14147_v52 = vadd.f32 %v8437_v26, %v8349_v56  ;;  %v6202_v60 = vrot.slane %v13933_v61, 5  ;;  %v5983_v38 = vsel %vm10843_vm3, %v5978_v24, %v14103_v1  ;;  %v14932_v49 = vld [vmem:[#allocation34_spill] sm:$0xff] }
 0x403   : > { %v6476_v36 = vor.u32 %v6475_v27, %v14145_v17  ;;  %v5995_v56 = vshrl.u32 %v5660_v18, 16  ;;  %v6205_v26 = vrot.slane %v13986_v30, 5  ;;  %v6010_v1 = vrot.slane %v6008_v53, 4 }
 0x404   : > { %14927 = vst [vmem:[#allocation19_spill] sm:$0xff] %v14143_v28  ;;  %v6203_v44 = vsel %vm11069_vm6, %v9867_v40, %v6202_v60  ;;  %v6204_v61 = vrot.slane %v6202_v60, 4  ;;  %v7163_v27 = vunpack.c.l.b16 %v5983_v38  ;;  %v6479_v24 = vshll.u32 %v6282_v5, 16  ;;  %v14178_v38 = vpop.f32.mrf.mxu0 }
 0x405   : > { %v7223_v40 = vunpack.c.l.b16 %v6203_v44  ;;  %v6477_v53 = vrot.slane %v6476_v36, 4  ;;  %14931 = vst [vmem:[#allocation23_spill] sm:$0xff] %v14178_v38  ;;  %v5997_v5 = vrot.slane %v5995_v56, 4  ;;  %v8135_v36 = vadd.f32 %v14063_v15, %v14932_v49 }
 0x406   : > { %v14163_v46 = vpop.f32.mrf.mxu3  ;;  %v6206_v28 = vsel %vm11069_vm6, %v6204_v61, %v6205_v26  ;;  %v7183_v18 = vpack.c.b16 %v7164_v33, %v7163_v27  ;;  %v6000_v61 = vrot.slane %v5998_v35, 5  ;;  %v6260_v26 = vld [vmem:[#allocation2 + $0x7c] sm:$0xf]  ;;  %v10549_v33 = vld [vmem:[%s14803_s3 + $0x200] sm:$0xff]  ;;  %v6014_v56 = vshll.u32 %v14176_v51, 16 }
 0x407   : > { %v8220_v22 = vpop.f32.mrf.mxu2  ;;  %v6484_v44 = vshrl.u32 %v6259_v12, 16  ;;  %v6487_v19 = vshll.u32 %v6259_v12, 16  ;;  %v6497_v27 = vshrl.u32 %v6260_v26, 16  ;;  %8774 = vmatpush.bf16.msra.mxu1 %v10549_v33 }
 0x408   : > { %v8221_v42 = vadd.f32 %v8220_v22, %v8132_v16  ;;  %v10476_v16 = vld [vmem:[#allocation2 + $0x6c] sm:$0xff]  ;;  %v7224_v22 = vunpack.c.l.b16 %v6206_v28  ;;  %v6481_v28 = vrot.slane %v6479_v24, 5  ;;  %v6016_v12 = vrot.slane %v6014_v56, 5 }
 0x409   : > { %8716 = vmatmul.bf16.gmra.mxu0 %v7385_v47  ;;  %v8440_v30 = vpop.f32.mrf.mxu1  ;;  %v6489_v33 = vrot.slane %v6487_v19, 5 }
 0x40a   : > { %v14172_v60 = vadd.f32 %v14110_v3, %v8221_v42  ;;  %v14174_v47 = vadd.f32 %v8440_v30, %v8352_v10  ;;  %v6011_v3 = vor.u32 %v6010_v1, %v14165_v13  ;;  %v14182_v42 = vpack.c.b16 %v7224_v22, %v7223_v40  ;;  %v14933_v22 = vld [vmem:[#allocation6_spill] sm:$0xff] }
 0x40b   : > { %8632 = vmatmul.bf16.gmra.mxu3 %v10476_v16  ;;  %v6482_v1 = vsel %vm10843_vm3, %v6477_v53, %v6481_v28  ;;  %v6493_v10 = vshll.u32 %v6260_v26, 16  ;;  %v6001_v16 = vor.u32 %v6000_v61, %v5997_v5  ;;  %v6486_v28 = vrot.slane %v6484_v44, 4  ;;  %v6283_v44 = vld [vmem:[#allocation2 + $0x80] sm:$0x1] }
 0x40c   : > { %14930 = vst [vmem:[#allocation17_spill] sm:$0xff] %v14172_v60  ;;  %8538 = vmatmul.bf16.gmra.mxu2 %v13919_v25  ;;  %8479 = vmatmul.bf16.gmra.mxu1 %v7183_v18  ;;  %v6472_v25 = vsel %vm10843_vm3, %v6467_v54, %v14145_v17  ;;  %v6012_v40 = vrot.slane %v6011_v3, 4  ;;  %v14934_v18 = vld [vmem:[#allocation21_spill] sm:$0xff]  ;;  %v7362_v53 = vunpack.c.l.b16 %v6482_v1  ;;  %v14212_v1 = vpop.f32.mrf.mxu0  ;;  %v6503_v59 = vshll.u32 %v6283_v44, 16 }
 0x40d   : > { %v8354_v49 = vadd.f32 %v14934_v18, %v14933_v22  ;;  %v7361_v17 = vunpack.c.l.b16 %v6472_v25  ;;  %v14199_v54 = vld [vmem:[#allocation2 + $0xb8] sm:$0xf]  ;;  %v6002_v5 = vrot.slane %v6001_v16, 4  ;;  %v5662_v3 = vld [vmem:[#allocation2 + $0xb4] sm:$0xf]  ;;  %14936 = vst [vmem:[#allocation24_spill] sm:$0xff] %v14212_v1 }
 0x40e   : > { %v14195_v30 = vpop.f32.mrf.mxu3  ;;  %v6017_v61 = vsel %vm10843_vm3, %v6012_v40, %v6016_v12  ;;  %v6028_v25 = vshll.u32 %v14199_v54, 16  ;;  %v6032_v22 = vshrl.u32 %v14199_v54, 16  ;;  %v6019_v16 = vshrl.u32 %v5662_v3, 16 }
 0x40f   : > { %v8223_v35 = vpop.f32.mrf.mxu2  ;;  %v7386_v56 = vpack.c.b16 %v7362_v53, %v7361_v17  ;;  %v14938_v17 = vld [vmem:[#allocation7_spill] sm:$0xff] }
 0x410   : > { %v8224_v24 = vadd.f32 %v8223_v35, %v8135_v36  ;;  %v6495_v36 = vrot.slane %v6493_v10, 5  ;;  %v6499_v35 = vrot.slane %v6497_v27, 4  ;;  %v7166_v10 = vunpack.c.l.b16 %v6017_v61 }
 0x411   : > { %v8442_v38 = vpop.f32.mrf.mxu1  ;;  %v6490_v27 = vor.u32 %v6489_v33, %v6486_v28  ;;  %v14219_v12 = vrot.slane %v6028_v25, 5  ;;  %v6021_v25 = vrot.slane %v6019_v16, 4 }
 0x412   : > { %v14202_v60 = vadd.f32 %v14131_v63, %v8224_v24  ;;  %v14204_v26 = vadd.f32 %v8442_v38, %v8354_v49  ;;  %v8137_v63 = vadd.f32 %v14063_v15, %v13819_v8  ;;  %v6007_v38 = vsel %vm10843_vm3, %v6002_v5, %v14165_v13 }
 0x413   : > { %v6500_v24 = vor.u32 %v6499_v35, %v6495_v36  ;;  %v6022_v49 = vshll.u32 %v5662_v3, 16  ;;  %v6034_v8 = vrot.slane %v6032_v22, 4  ;;  %v7165_v1 = vunpack.c.l.b16 %v6007_v38  ;;  %v10477_v35 = vld [vmem:[#allocation2 + $0x78] sm:$0xff] }
 0x414   : > { %14935 = vst [vmem:[#allocation18_spill] sm:$0xff] %v14202_v60  ;;  %v14937_v60 = vld [vmem:[#allocation26_spill] sm:$0xff]  ;;  %v6491_v3 = vrot.slane %v6490_v27, 4  ;;  %v8140_v38 = vadd.f32 %v14063_v15, %v13843_v14  ;;  %v14239_v16 = vpop.f32.mrf.mxu0  ;;  %v14941_v14 = vld [vmem:[#allocation9_spill] sm:$0xff] }
 0x415   : > { %v8357_v53 = vadd.f32 %v14938_v17, %v14937_v60  ;;  %v7184_v33 = vpack.c.b16 %v7166_v10, %v7165_v1  ;;  %v6501_v61 = vrot.slane %v6500_v24, 4  ;;  %v6024_v22 = vrot.slane %v6022_v49, 5  ;;  %v6261_v10 = vld [vmem:[#allocation2 + $0x84] sm:$0xf]  ;;  %14940 = vst [vmem:[#allocation34_spill] sm:$0xff] %v14239_v16  ;;  %v14942_v17 = vld [vmem:[#allocation8_spill] sm:$0xff] }
 0x416   : > { %v14217_v18 = vpop.f32.mrf.mxu3  ;;  %v6035_v60 = vor.u32 %v6034_v8, %v14219_v12  ;;  %v6496_v1 = vsel %vm10843_vm3, %v6491_v3, %v6495_v36 }
 0x417   : > { %v8225_v19 = vpop.f32.mrf.mxu2  ;;  %v7363_v36 = vunpack.c.l.b16 %v6496_v1  ;;  %v5664_v1 = vld [vmem:[#allocation2 + $0xc0] sm:$0xf] }
 0x418   : > { %v8226_v40 = vadd.f32 %v8225_v19, %v8137_v63  ;;  %v14228_v63 = vld [vmem:[#allocation2 + $0xbc] sm:$0x1]  ;;  %v6036_v8 = vrot.slane %v6035_v60, 4 }
 0x419   : > { %8721 = vmatmul.bf16.gmra.mxu0 %v7386_v56  ;;  %v8445_v5 = vpop.f32.mrf.mxu1  ;;  %v6262_v56 = vld [vmem:[#allocation2 + $0x88] sm:$0xf]  ;;  %v6038_v44 = vshll.u32 %v14228_v63, 16 }
 0x41a   : > { %v14224_v13 = vadd.f32 %v14163_v46, %v8226_v40  ;;  %v14226_v28 = vadd.f32 %v8445_v5, %v8357_v53  ;;  %v6505_v46 = vrot.slane %v6503_v59, 5  ;;  %v6517_v27 = vshll.u32 %v6262_v56, 16  ;;  %v14245_v5 = vld [vmem:[#allocation2 + $0xc4] sm:$0xf] }
 0x41b   : > { %8637 = vmatmul.bf16.gmra.mxu3 %v10477_v35  ;;  %v6521_v24 = vshrl.u32 %v6262_v56, 16  ;;  %v6025_v59 = vor.u32 %v6024_v22, %v6021_v25  ;;  %v8359_v53 = vadd.f32 %v14942_v17, %v14941_v14  ;;  %v6040_v3 = vrot.slane %v6038_v44, 5 }
 0x41c   : > { %14939 = vst [vmem:[#allocation22_spill] sm:$0xff] %v14224_v13  ;;  %8543 = vmatmul.bf16.gmra.mxu2 %v13993_v45  ;;  %8484 = vmatmul.bf16.gmra.mxu1 %v7184_v33  ;;  %v6506_v45 = vsel %vm10843_vm3, %v6501_v61, %v6505_v46  ;;  %v6508_v56 = vshrl.u32 %v6261_v10, 16  ;;  %v6052_v14 = vshll.u32 %v14245_v5, 16 }
 0x41d   : > { %v7364_v61 = vunpack.c.l.b16 %v6506_v45  ;;  %v6523_v25 = vrot.slane %v6521_v24, 4  ;;  %v6026_v22 = vrot.slane %v6025_v59, 4  ;;  %v6041_v60 = vsel %vm10843_vm3, %v6036_v8, %v6040_v3 }
 0x41e   : > { %v14241_v49 = vpop.f32.mrf.mxu3  ;;  %v8142_v45 = vadd.f32 %v14063_v15, %v13872_v32  ;;  %v7168_v59 = vunpack.c.l.b16 %v6041_v60  ;;  %v6054_v13 = vrot.slane %v6052_v14, 5  ;;  %v14944_v15 = vld [vmem:[#allocation11_spill] sm:$0xff] }
 0x41f   : > { %v8228_v19 = vpop.f32.mrf.mxu2  ;;  %v7387_v44 = vpack.c.b16 %v7364_v61, %v7363_v36  ;;  %v14945_v36 = vld [vmem:[#allocation10_spill] sm:$0xff] }
 0x420   : > { %v8229_v40 = vadd.f32 %v8228_v19, %v8140_v38  ;;  %v6511_v38 = vshll.u32 %v6261_v10, 16  ;;  %v14252_v19 = vrot.slane %v6517_v27, 5  ;;  %v6031_v10 = vsel %vm10843_vm3, %v6026_v22, %v14219_v12  ;;  %v6284_v27 = vld [vmem:[#allocation2 + $0x8c] sm:$0x1]  ;;  %v14268_v22 = vpop.f32.mrf.mxu0 }
 0x421   : > { %v8447_v35 = vpop.f32.mrf.mxu1  ;;  %v8362_v61 = vadd.f32 %v14945_v36, %v14944_v15  ;;  %v7167_v16 = vunpack.c.l.b16 %v6031_v10  ;;  %v6527_v12 = vshll.u32 %v6284_v27, 16  ;;  %v6264_v27 = vld [vmem:[#allocation2 + $0x94] sm:$0xf] }
 0x422   : > { %v14248_v33 = vadd.f32 %v14195_v30, %v8229_v40  ;;  %v14250_v46 = vadd.f32 %v8447_v35, %v8359_v53  ;;  %v6056_v30 = vshrl.u32 %v14245_v5, 16  ;;  %v6510_v40 = vrot.slane %v6508_v56, 4 }
 0x423   : > { %v6513_v17 = vrot.slane %v6511_v38, 5  ;;  %v6524_v8 = vor.u32 %v6523_v25, %v14252_v19  ;;  %v6043_v53 = vshrl.u32 %v5664_v1, 16  ;;  %v7185_v60 = vpack.c.b16 %v7168_v59, %v7167_v16 }
 0x424   : > { %14943 = vst [vmem:[#allocation6_spill] sm:$0xff] %v14248_v33  ;;  %v6046_v33 = vshll.u32 %v5664_v1, 16  ;;  %v6058_v32 = vrot.slane %v6056_v30, 4  ;;  %v14275_v1 = vld [vmem:[#allocation2 + $0xc8] sm:$0x1]  ;;  %v6529_v15 = vrot.slane %v6527_v12, 5 }
 0x425   : > { %v6045_v14 = vrot.slane %v6043_v53, 4  ;;  %v6541_v59 = vshll.u32 %v6264_v27, 16 }
 0x426   : > { %v14264_v3 = vpop.f32.mrf.mxu3  ;;  %v6048_v30 = vrot.slane %v6046_v33, 5  ;;  %v6059_v10 = vor.u32 %v6058_v32, %v6054_v13  ;;  %v14947_v32 = vld [vmem:[#allocation29_spill] sm:$0xff] }
 0x427   : > { %v8230_v24 = vpop.f32.mrf.mxu2 }
 0x428   : > { %v8231_v35 = vadd.f32 %v8230_v24, %v8142_v45  ;;  %v10478_v45 = vld [vmem:[#allocation2 + $0x84] sm:$0xff]  ;;  %v6514_v24 = vor.u32 %v6513_v17, %v6510_v40  ;;  %v6263_v40 = vld [vmem:[#allocation2 + $0x90] sm:$0xf]  ;;  %v6545_v17 = vshrl.u32 %v6264_v27, 16  ;;  %v6049_v53 = vor.u32 %v6048_v30, %v6045_v14  ;;  %v14292_v30 = vpop.f32.mrf.mxu0 }
 0x429   : > { %8726 = vmatmul.bf16.gmra.mxu0 %v7387_v44  ;;  %v8450_v38 = vpop.f32.mrf.mxu1  ;;  %v6525_v44 = vrot.slane %v6524_v8, 4  ;;  %v6060_v33 = vrot.slane %v6059_v10, 4  ;;  %14950 = vst [vmem:[#allocation7_spill] sm:$0xff] %v14292_v30 }
 0x42a   : > { %v14271_v56 = vadd.f32 %v14217_v18, %v8231_v35  ;;  %v14273_v25 = vadd.f32 %v8450_v38, %v8362_v61  ;;  %v6062_v18 = vshll.u32 %v14275_v1, 16  ;;  %v6515_v36 = vrot.slane %v6514_v24, 4  ;;  %v14948_v61 = vld [vmem:[#allocation28_spill] sm:$0xff] }
 0x42b   : > { %8642 = vmatmul.bf16.gmra.mxu3 %v10478_v45  ;;  %v6530_v16 = vsel %vm10843_vm3, %v6525_v44, %v6529_v15  ;;  %v8364_v38 = vadd.f32 %v14948_v61, %v14947_v32  ;;  %v6532_v15 = vshrl.u32 %v6263_v40, 16  ;;  %v6547_v14 = vrot.slane %v6545_v17, 4  ;;  %v14951_v17 = vld [vmem:[#allocation31_spill] sm:$0xff] }
 0x42c   : > { %14946 = vst [vmem:[#allocation21_spill] sm:$0xff] %v14271_v56  ;;  %8548 = vmatmul.bf16.gmra.mxu2 %v14058_v55  ;;  %8489 = vmatmul.bf16.gmra.mxu1 %v7185_v60  ;;  %v6520_v12 = vsel %vm10843_vm3, %v6515_v36, %v14252_v19  ;;  %v7366_v24 = vunpack.c.l.b16 %v6530_v16  ;;  %v6064_v44 = vrot.slane %v6062_v18, 5  ;;  %v6050_v32 = vrot.slane %v6049_v53, 4  ;;  %v6285_v36 = vld [vmem:[#allocation2 + $0x98] sm:$0x1] }
 0x42d   : > { %v7365_v10 = vunpack.c.l.b16 %v6520_v12  ;;  %v14952_v12 = vld [vmem:[#allocation30_spill] sm:$0xff]  ;;  %v6551_v56 = vshll.u32 %v6285_v36, 16 }
 0x42e   : > { %v8603_v55 = vpop.f32.mrf.mxu3  ;;  %v6065_v61 = vsel %vm10843_vm3, %v6060_v33, %v6064_v44  ;;  %v8367_v53 = vadd.f32 %v14952_v12, %v14951_v17  ;;  %v6675_v12 = vld [vmem:[#allocation2 + $0x18] sm:$0xe] }
 0x42f   : > { %v8509_v35 = vpop.f32.mrf.mxu2  ;;  %v7388_v19 = vpack.c.b16 %v7366_v24, %v7365_v10  ;;  %v7170_v18 = vunpack.c.l.b16 %v6065_v61  ;;  %v10479_v10 = vld [vmem:[#allocation2 + $0x90] sm:$0xff]  ;;  %v6553_v61 = vrot.slane %v6551_v56, 5 }
 0x430   : > { %v8510_v8 = vadd.f32 %v8509_v35, %v13913_v2  ;;  %v6535_v2 = vshll.u32 %v6263_v40, 16  ;;  %v6543_v35 = vrot.slane %v6541_v59, 5 }
 0x431   : > { %v8452_v45 = vpop.f32.mrf.mxu1 }
 0x432   : > { %v14288_v60 = vadd.f32 %v14241_v49, %v8510_v8  ;;  %v14290_v27 = vadd.f32 %v8452_v45, %v8364_v38  ;;  %v6055_v49 = vsel %vm10843_vm3, %v6050_v32, %v6054_v13  ;;  %v6534_v8 = vrot.slane %v6532_v15, 4  ;;  %v14307_v32 = vld [vmem:[#allocation2 + $0xa0] sm:$0xf] }
 0x433   : > { %v6537_v38 = vrot.slane %v6535_v2, 5  ;;  %v6548_v45 = vor.u32 %v6547_v14, %v6543_v35 }
 0x434   : > { %14949 = vst [vmem:[#allocation26_spill] sm:$0xff] %v14288_v60  ;;  %v7169_v60 = vunpack.c.l.b16 %v6055_v49 }
 0x435   : > { %v6538_v15 = vor.u32 %v6537_v38, %v6534_v8  ;;  %v6549_v2 = vrot.slane %v6548_v45, 4  ;;  %v14955_v45 = vld [vmem:[#allocation33_spill] sm:$0xff] }
 0x436   : > { %v8605_v59 = vpop.f32.mrf.mxu3  ;;  %v7186_v44 = vpack.c.b16 %v7170_v18, %v7169_v60  ;;  %v6265_v60 = vld [vmem:[#allocation2 + $0x9c] sm:$0xf]  ;;  %v6569_v18 = vshrl.u32 %v14307_v32, 16 }
 0x437   : > { %v8511_v16 = vpop.f32.mrf.mxu2  ;;  %v6539_v49 = vrot.slane %v6538_v15, 4  ;;  %v6554_v36 = vsel %vm10843_vm3, %v6549_v2, %v6553_v61  ;;  %v6556_v2 = vshrl.u32 %v6265_v60, 16 }
 0x438   : > { %v8512_v40 = vadd.f32 %v8511_v16, %v13955_v21  ;;  %v10628_v21 = vld [vmem:[#allocation2 + $0x1c] sm:$0xf]  ;;  %v6565_v16 = vshll.u32 %v14307_v32, 16 }
 0x439   : > { %8731 = vmatmul.bf16.gmra.mxu0 %v7388_v19  ;;  %v8455_v24 = vpop.f32.mrf.mxu1  ;;  %v6741_v14 = vrot.slane %v10628_v21, 5  ;;  %v14309_v19 = vpop.f32.mrf.mxu0  ;;  %v6544_v17 = vsel %vm10843_vm3, %v6539_v49, %v6543_v35  ;;  %v14332_v49 = vld [vmem:[#allocation2 + $0xa4] sm:$0x1] }
 0x43a   : > { %v14302_v33 = vadd.f32 %v14264_v3, %v8512_v40  ;;  %v14304_v13 = vadd.f32 %v8455_v24, %v8367_v53  ;;  %14954 = vst [vmem:[#allocation8_spill] sm:$0xff] %v14309_v19  ;;  %v14956_v40 = vld [vmem:[#allocation32_spill] sm:$0xff]  ;;  %v14326_v61 = vrot.slane %v6565_v16, 5  ;;  %v9873_v19 = vrot.slane %v6675_v12, 9 }
 0x43b   : > { %8647 = vmatmul.bf16.gmra.mxu3 %v10479_v10  ;;  %v6743_v38 = vrot.slane %v6741_v14, 4  ;;  %v8369_v56 = vadd.f32 %v14956_v40, %v14955_v45  ;;  %v10629_v10 = vld [vmem:[#allocation2 + $0x20] sm:$0x1]  ;;  %v6558_v40 = vrot.slane %v6556_v2, 4 }
 0x43c   : > { %14953 = vst [vmem:[#allocation9_spill] sm:$0xff] %v14302_v33  ;;  %8553 = vmatmul.bf16.gmra.mxu2 %v14124_v29  ;;  %8494 = vmatmul.bf16.gmra.mxu1 %v7186_v44  ;;  %v7368_v44 = vunpack.c.l.b16 %v6554_v36  ;;  %v6744_v15 = vrot.slane %v10629_v10, 5  ;;  %v7367_v33 = vunpack.c.l.b16 %v6544_v17  ;;  %v6209_v10 = vrot.slane %v14004_v6, 5 }
 0x43e   : > { %v14316_v8 = vpop.f32.mrf.mxu3  ;;  %v6745_v45 = vsel %vm11069_vm6, %v6743_v38, %v6744_v15  ;;  %v7389_v35 = vpack.c.b16 %v7368_v44, %v7367_v33  ;;  %v14959_v38 = vld [vmem:[#allocation36_spill] sm:$0xff]  ;;  %v14960_v33 = vld [vmem:[#allocation35_spill] sm:$0xff] }
 0x43f   : > { %v8514_v3 = vpop.f32.mrf.mxu2  ;;  %v8372_v12 = vadd.f32 %v14960_v33, %v14959_v38 }
 0x440   : > { %v8515_v29 = vadd.f32 %v8514_v3, %v13988_v0  ;;  %v6559_v0 = vshll.u32 %v6265_v60, 16  ;;  %v6571_v3 = vrot.slane %v6569_v18, 4 }
 0x441   : > { %v8457_v24 = vpop.f32.mrf.mxu1  ;;  %v14335_v16 = vpop.f32.mrf.mxu0 }
 0x442   : > { %v14322_v53 = vadd.f32 %v8603_v55, %v8515_v29  ;;  %v14324_v21 = vadd.f32 %v8457_v24, %v8369_v56  ;;  %v6742_v55 = vsel %vm11069_vm6, %v9873_v19, %v6741_v14  ;;  %v7412_v29 = vunpack.c.l.b16 %v6745_v45  ;;  %14958 = vst [vmem:[#allocation10_spill] sm:$0xff] %v14335_v16  ;;  %v10630_v45 = vld [vmem:[#allocation2 + $0x28] sm:$0xf] }
 0x443   : > { %v6561_v56 = vrot.slane %v6559_v0, 5  ;;  %v6572_v60 = vor.u32 %v6571_v3, %v14326_v61  ;;  %v7411_v24 = vunpack.c.l.b16 %v6742_v55  ;;  %v6575_v14 = vshll.u32 %v14332_v49, 16  ;;  %v10480_v0 = vld [vmem:[#allocation2 + $0x9c] sm:$0xff] }
 0x444   : > { %14957 = vst [vmem:[#allocation11_spill] sm:$0xff] %v14322_v53 }
 0x445   : > { %v7443_v2 = vpack.c.b16 %v7412_v29, %v7411_v24  ;;  %v6562_v3 = vor.u32 %v6561_v56, %v6558_v40  ;;  %v6577_v55 = vrot.slane %v6575_v14, 5  ;;  %v6267_v29 = vld [vmem:[#allocation2 + $0xa8] sm:$0xf]  ;;  %v14962_v14 = vld [vmem:[#allocation37_spill] sm:$0xff] }
 0x446   : > { %v14338_v17 = vpop.f32.mrf.mxu3  ;;  %v6580_v16 = vshrl.u32 %v6267_v29, 16 }
 0x447   : > { %v8516_v36 = vpop.f32.mrf.mxu2  ;;  %v6563_v33 = vrot.slane %v6562_v3, 4 }
 0x448   : > { %v8517_v18 = vadd.f32 %v8516_v36, %v14019_v43  ;;  %v6573_v43 = vrot.slane %v6572_v60, 4  ;;  %v14349_v36 = vld [vmem:[#allocation2 + $0xac] sm:$0xf] }
 0x449   : > { %8736 = vmatmul.bf16.gmra.mxu0 %v7389_v35  ;;  %v8460_v44 = vpop.f32.mrf.mxu1  ;;  %v6748_v35 = vrot.slane %v10630_v45, 5  ;;  %v6589_v40 = vshll.u32 %v14349_v36, 16  ;;  %v6593_v56 = vshrl.u32 %v14349_v36, 16  ;;  %v6568_v3 = vsel %vm10843_vm3, %v6563_v33, %v14326_v61  ;;  %v10631_v45 = vld [vmem:[#allocation2 + $0x2c] sm:$0x1] }
 0x44a   : > { %v14343_v19 = vadd.f32 %v8605_v59, %v8517_v18  ;;  %v14346_v15 = vadd.f32 %v8460_v44, %v8372_v12  ;;  %v6077_v59 = vld [vmem:[#allocation2 + $0x90] sm:$0xe]  ;;  %v6211_v18 = vrot.slane %v6209_v10, 4  ;;  %v6578_v6 = vsel %vm10843_vm3, %v6573_v43, %v6577_v55  ;;  %v14963_v44 = vld [vmem:[#allocation38_spill] sm:$0xff]  ;;  %v6676_v43 = vld [vmem:[#allocation2 + $0x24] sm:$0xe] }
 0x44b   : > { %8652 = vmatmul.bf16.gmra.mxu3 %v10480_v0  ;;  %v6212_v12 = vrot.slane %v14050_v41, 5  ;;  %v6750_v24 = vrot.slane %v6748_v35, 4  ;;  %v9868_v0 = vrot.slane %v6077_v59, 9  ;;  %v6751_v55 = vrot.slane %v10631_v45, 5 }
 0x44c   : > { %14961 = vst [vmem:[#allocation29_spill] sm:$0xff] %v14343_v19  ;;  %8558 = vmatmul.bf16.gmra.mxu2 %v14182_v42  ;;  %8775 = vmatmul.bf16.vlgmr.msra.gmra.mxu1 %v7443_v2  ;;  %v8374_v2 = vadd.f32 %v14963_v44, %v14962_v14  ;;  %v14364_v19 = vpop.f32.mrf.mxu0  ;;  %v7370_v53 = vunpack.c.l.b16 %v6578_v6  ;;  %v6583_v59 = vshll.u32 %v6267_v29, 16  ;;  %v14373_v44 = vrot.slane %v6589_v40, 5  ;;  %v14381_v6 = vld [vmem:[#allocation2 + $0xb0] sm:$0x1] }
 0x44d   : > { %v6213_v41 = vsel %vm11069_vm6, %v6211_v18, %v6212_v12  ;;  %v6595_v61 = vrot.slane %v6593_v56, 4  ;;  %v7369_v33 = vunpack.c.l.b16 %v6568_v3  ;;  %v9874_v30 = vrot.slane %v6676_v43, 9 }
 0x44e   : > { %v14356_v60 = vpop.f32.mrf.mxu3  ;;  %v6752_v45 = vsel %vm11069_vm6, %v6750_v24, %v6751_v55  ;;  %v6582_v40 = vrot.slane %v6580_v16, 4 }
 0x44f   : > { %v8519_v38 = vpop.f32.mrf.mxu2  ;;  %v6749_v18 = vsel %vm11069_vm6, %v9874_v30, %v6748_v35  ;;  %v7414_v29 = vunpack.c.l.b16 %v6752_v45  ;;  %v6596_v56 = vor.u32 %v6595_v61, %v14373_v44  ;;  %v6599_v30 = vshll.u32 %v14381_v6, 16  ;;  %v10481_v61 = vld [vmem:[#allocation2 + $0xa8] sm:$0xff] }
 0x450   : > { %v8520_v42 = vadd.f32 %v8519_v38, %v14052_v4  ;;  %v7413_v55 = vunpack.c.l.b16 %v6749_v18 }
 0x451   : > { %v8462_v38 = vpop.f32.mrf.mxu1  ;;  %v6597_v45 = vrot.slane %v6596_v56, 4 }
 0x452   : > { %v14367_v4 = vadd.f32 %v14316_v8, %v8520_v42  ;;  %v14371_v14 = vadd.f32 %v8462_v38, %v8374_v2  ;;  %v6210_v8 = vsel %vm11069_vm6, %v9868_v0, %v6209_v10  ;;  %v7226_v42 = vunpack.c.l.b16 %v6213_v41  ;;  %v14965_v10 = vld [vmem:[#allocation39_spill] sm:$0xff]  ;;  %v14966_v0 = vld [vmem:[#allocation40_spill] sm:$0xff] }
 0x453   : > { %v6585_v2 = vrot.slane %v6583_v59, 5  ;;  %v7225_v43 = vunpack.c.l.b16 %v6210_v8  ;;  %v6216_v41 = vrot.slane %v14076_v39, 5  ;;  %v10632_v8 = vld [vmem:[#allocation2 + $0x34] sm:$0xf] }
 0x454   : > { %14964 = vst [vmem:[#allocation28_spill] sm:$0xff] %v14367_v4  ;;  %v7390_v4 = vpack.c.b16 %v7370_v53, %v7369_v33  ;;  %v8377_v53 = vadd.f32 %v14966_v0, %v14965_v10  ;;  %v6755_v18 = vrot.slane %v10632_v8, 5  ;;  %v6269_v10 = vld [vmem:[#allocation2 + $0xb4] sm:$0xf] }
 0x455   : > { %v7246_v16 = vpack.c.b16 %v7226_v42, %v7225_v43  ;;  %v6586_v33 = vor.u32 %v6585_v2, %v6582_v40  ;;  %v6218_v42 = vrot.slane %v6216_v41, 4 }
 0x456   : > { %v14385_v24 = vpop.f32.mrf.mxu3 }
 0x457   : > { %v8521_v12 = vpop.f32.mrf.mxu2  ;;  %v6587_v39 = vrot.slane %v6586_v33, 4 }
 0x458   : > { %v8522_v3 = vadd.f32 %v8521_v12, %v14091_v58  ;;  %v7444_v58 = vpack.c.b16 %v7414_v29, %v7413_v55  ;;  %v14398_v12 = vld [vmem:[#allocation2 + $0xb8] sm:$0xf]  ;;  %v6757_v55 = vrot.slane %v6755_v18, 4 }
 0x459   : > { %8741 = vmatmul.bf16.gmra.mxu0 %v7390_v4  ;;  %v8465_v38 = vpop.f32.mrf.mxu1  ;;  %v14396_v4 = vpop.f32.mrf.mxu0  ;;  %v6613_v40 = vshll.u32 %v14398_v12, 16  ;;  %v6617_v2 = vshrl.u32 %v14398_v12, 16 }
 0x45a   : > { %v14391_v35 = vadd.f32 %v14338_v17, %v8522_v3  ;;  %v14394_v59 = vadd.f32 %v8465_v38, %v8377_v53  ;;  %v6601_v17 = vrot.slane %v6599_v30, 5  ;;  %v6078_v3 = vld [vmem:[#allocation2 + $0x9c] sm:$0xe]  ;;  %v6219_v53 = vrot.slane %v14119_v31, 5 }
 0x45b   : > { %8657 = vmatmul.bf16.gmra.mxu3 %v10481_v61  ;;  %v8379_v30 = vadd.f32 %v13935_v11, %v13909_v57  ;;  %v9869_v38 = vrot.slane %v6078_v3, 9  ;;  %v10633_v61 = vld [vmem:[#allocation2 + $0x38] sm:$0x1]  ;;  %v6607_v57 = vshll.u32 %v6269_v10, 16  ;;  %v14420_v11 = vrot.slane %v6613_v40, 5 }
 0x45c   : > { %14967 = vst [vmem:[#allocation31_spill] sm:$0xff] %v14391_v35  ;;  %8563 = vmatmul.bf16.gmra.mxu2 %v7246_v16  ;;  %8780 = vmatmul.bf16.gmra.mxu1 %v7444_v58  ;;  %v6602_v29 = vsel %vm10843_vm3, %v6597_v45, %v6601_v17  ;;  %v6592_v16 = vsel %vm10843_vm3, %v6587_v39, %v14373_v44  ;;  %v6677_v58 = vld [vmem:[#allocation2 + $0x30] sm:$0xe]  ;;  %v6758_v33 = vrot.slane %v10633_v61, 5  ;;  %v6604_v17 = vshrl.u32 %v6269_v10, 16 }
 0x45d   : > { %v6220_v8 = vsel %vm11069_vm6, %v6218_v42, %v6219_v53  ;;  %v7372_v31 = vunpack.c.l.b16 %v6602_v29  ;;  %v6619_v3 = vrot.slane %v6617_v2, 4  ;;  %v7371_v35 = vunpack.c.l.b16 %v6592_v16  ;;  %v14430_v53 = vld [vmem:[#allocation2 + $0xbc] sm:$0x1] }
 0x45e   : > { %v14405_v0 = vpop.f32.mrf.mxu3  ;;  %v9875_v44 = vrot.slane %v6677_v58, 9  ;;  %v6759_v39 = vsel %vm11069_vm6, %v6757_v55, %v6758_v33  ;;  %v7228_v61 = vunpack.c.l.b16 %v6220_v8  ;;  %v6606_v2 = vrot.slane %v6604_v17, 4 }
 0x45f   : > { %v8524_v43 = vpop.f32.mrf.mxu2  ;;  %v7391_v42 = vpack.c.b16 %v7372_v31, %v7371_v35  ;;  %v7416_v40 = vunpack.c.l.b16 %v6759_v39  ;;  %v6620_v16 = vor.u32 %v6619_v3, %v14420_v11  ;;  %v8382_v35 = vadd.f32 %v13981_v37, %v13950_v48  ;;  %v14445_v48 = vld [vmem:[#allocation2 + $0xc4] sm:$0xf] }
 0x460   : > { %v8525_v56 = vadd.f32 %v8524_v43, %v14121_v62  ;;  %v6756_v29 = vsel %vm11069_vm6, %v9875_v44, %v6755_v18  ;;  %v6623_v18 = vshll.u32 %v14430_v53, 16  ;;  %v10482_v44 = vld [vmem:[#allocation2 + $0xb4] sm:$0xff] }
 0x461   : > { %v8467_v62 = vpop.f32.mrf.mxu1 }
 0x462   : > { %v14414_v45 = vadd.f32 %v14356_v60, %v8525_v56  ;;  %v14418_v43 = vadd.f32 %v8467_v62, %v8379_v30  ;;  %v6217_v60 = vsel %vm11069_vm6, %v9869_v38, %v6216_v41  ;;  %v14426_v56 = vpop.f32.mrf.mxu0  ;;  %v6609_v30 = vrot.slane %v6607_v57, 5  ;;  %v10634_v38 = vld [vmem:[#allocation2 + $0x40] sm:$0xf] }
 0x463   : > { %v7227_v58 = vunpack.c.l.b16 %v6217_v60  ;;  %v7415_v41 = vunpack.c.l.b16 %v6756_v29  ;;  %v6762_v62 = vrot.slane %v10634_v38, 5  ;;  %v6223_v57 = vrot.slane %v14138_v20, 5 }
 0x464   : > { %v6610_v39 = vor.u32 %v6609_v30, %v6606_v2  ;;  %v6621_v60 = vrot.slane %v6620_v16, 4  ;;  %v6625_v37 = vrot.slane %v6623_v18, 5  ;;  %v6637_v2 = vshll.u32 %v14445_v48, 16 }
 0x465   : > { %v7247_v17 = vpack.c.b16 %v7228_v61, %v7227_v58  ;;  %v7445_v3 = vpack.c.b16 %v7416_v40, %v7415_v41  ;;  %v6764_v29 = vrot.slane %v6762_v62, 4  ;;  %v6641_v30 = vshrl.u32 %v14445_v48, 16 }
 0x466   : > { %v14434_v33 = vpop.f32.mrf.mxu3  ;;  %v6611_v20 = vrot.slane %v6610_v39, 4  ;;  %v6626_v40 = vsel %vm10843_vm3, %v6621_v60, %v6625_v37  ;;  %v6226_v38 = vrot.slane %v14176_v51, 5 }
 0x467   : > { %v8526_v10 = vpop.f32.mrf.mxu2  ;;  %v7374_v51 = vunpack.c.l.b16 %v6626_v40 }
 0x468   : > { %v8527_v55 = vadd.f32 %v8526_v10, %v14147_v52  ;;  %v6225_v10 = vrot.slane %v6223_v57, 4 }
 0x469   : > { %8746 = vmatmul.bf16.gmra.mxu0 %v7391_v42  ;;  %v8470_v31 = vpop.f32.mrf.mxu1  ;;  %v6678_v42 = vld [vmem:[#allocation2 + $0x3c] sm:$0xe] }
 0x46a   : > { %v14440_v8 = vadd.f32 %v14385_v24, %v8527_v55  ;;  %v14443_v52 = vadd.f32 %v8470_v31, %v8382_v35  ;;  %v6079_v24 = vld [vmem:[#allocation2 + $0xa8] sm:$0xe]  ;;  %v10635_v55 = vld [vmem:[#allocation2 + $0x44] sm:$0x1]  ;;  %v6271_v35 = vld [vmem:[#allocation2 + $0xc0] sm:$0xf]  ;;  %v14451_v16 = vpop.f32.mrf.mxu0  ;;  %v6227_v37 = vsel %vm11069_vm6, %v6225_v10, %v6226_v38 }
 0x46b   : > { %8662 = vmatmul.bf16.gmra.mxu3 %v10482_v44  ;;  %v6765_v61 = vrot.slane %v10635_v55, 5  ;;  %v9876_v31 = vrot.slane %v6678_v42, 9  ;;  %v6616_v44 = vsel %vm10843_vm3, %v6611_v20, %v14420_v11  ;;  %v6628_v42 = vshrl.u32 %v6271_v35, 16 }
 0x46c   : > { %8568 = vmatmul.bf16.gmra.mxu2 %v7247_v17  ;;  %8785 = vmatmul.bf16.gmra.mxu1 %v7445_v3  ;;  %v8384_v17 = vadd.f32 %v14024_v50, %v13984_v7  ;;  %v9870_v3 = vrot.slane %v6079_v24, 9  ;;  %v6631_v7 = vshll.u32 %v6271_v35, 16  ;;  %v14471_v50 = vrot.slane %v6637_v2, 5 }
 0x46d   : > { %v6766_v39 = vsel %vm11069_vm6, %v6764_v29, %v6765_v61  ;;  %v6643_v24 = vrot.slane %v6641_v30, 4  ;;  %v7230_v29 = vunpack.c.l.b16 %v6227_v37  ;;  %v6630_v40 = vrot.slane %v6628_v42, 4 }
 0x46e   : > { %v14454_v18 = vpop.f32.mrf.mxu3  ;;  %v6224_v11 = vsel %vm11069_vm6, %v9870_v3, %v6223_v57  ;;  %v7418_v20 = vunpack.c.l.b16 %v6766_v39  ;;  %v6633_v38 = vrot.slane %v6631_v7, 5  ;;  %v14968_v3 = vld [vmem:[#allocation12_spill] sm:$0xff] }
 0x46f   : > { %v8529_v58 = vpop.f32.mrf.mxu2  ;;  %v6644_v35 = vor.u32 %v6643_v24, %v14471_v50  ;;  %v7229_v30 = vunpack.c.l.b16 %v6224_v11  ;;  %v6230_v11 = vrot.slane %v14199_v54, 5  ;;  %v6821_v54 = vrot.slane %v14332_v49, 5 }
 0x470   : > { %v8530_v41 = vadd.f32 %v8529_v58, %v14174_v47  ;;  %v7373_v58 = vunpack.c.l.b16 %v6616_v44  ;;  %v10636_v44 = vld [vmem:[#allocation2 + $0x4c] sm:$0xf] }
 0x471   : > { %v8472_v47 = vpop.f32.mrf.mxu1  ;;  %v6769_v39 = vrot.slane %v10636_v44, 5 }
 0x472   : > { %v14465_v60 = vadd.f32 %v14405_v0, %v8530_v41  ;;  %v14469_v55 = vadd.f32 %v8472_v47, %v8384_v17  ;;  %v6763_v0 = vsel %vm11069_vm6, %v9876_v31, %v6762_v62  ;;  %v7392_v61 = vpack.c.b16 %v7374_v51, %v7373_v58  ;;  %v14477_v41 = vld [vmem:[#allocation2 + $0xc8] sm:$0x1]  ;;  %v6686_v47 = vld [vmem:[#allocation2 + $0x9c] sm:$0xe]  ;;  %v14486_v37 = vpop.f32.mrf.mxu0  ;;  %v10483_v58 = vld [vmem:[#allocation2 + $0xc0] sm:$0xff] }
 0x473   : > { %v7417_v57 = vunpack.c.l.b16 %v6763_v0  ;;  %v8387_v62 = vadd.f32 %v14968_v3, %v14014_v9  ;;  %v6647_v31 = vshll.u32 %v14477_v41, 16  ;;  %v6634_v0 = vor.u32 %v6633_v38, %v6630_v40 }
 0x474   : > { %v6645_v9 = vrot.slane %v6644_v35, 4  ;;  %v6771_v44 = vrot.slane %v6769_v39, 4  ;;  %v6232_v38 = vrot.slane %v6230_v11, 4 }
 0x475   : > { %v7446_v7 = vpack.c.b16 %v7418_v20, %v7417_v57  ;;  %v6649_v3 = vrot.slane %v6647_v31, 5  ;;  %v6635_v35 = vrot.slane %v6634_v0, 4  ;;  %v6679_v57 = vld [vmem:[#allocation2 + $0x48] sm:$0xe]  ;;  %v14971_v31 = vld [vmem:[#allocation13_spill] sm:$0xff]  ;;  %v6233_v0 = vrot.slane %v14228_v63, 5 }
 0x476   : > { %v14481_v17 = vpop.f32.mrf.mxu3 }
 0x477   : > { %v8531_v10 = vpop.f32.mrf.mxu2  ;;  %v6234_v63 = vsel %vm11069_vm6, %v6232_v38, %v6233_v0 }
 0x478   : > { %v8532_v2 = vadd.f32 %v8531_v10, %v14204_v26  ;;  %v7248_v26 = vpack.c.b16 %v7230_v29, %v7229_v30  ;;  %v6818_v10 = vrot.slane %v14307_v32, 5  ;;  %v6650_v32 = vsel %vm10843_vm3, %v6645_v9, %v6649_v3 }
 0x479   : > { %8751 = vmatmul.bf16.gmra.mxu0 %v7392_v61  ;;  %v8475_v42 = vpop.f32.mrf.mxu1  ;;  %v9884_v61 = vrot.slane %v6686_v47, 9  ;;  %v14972_v47 = vld [vmem:[#allocation16_spill] sm:$0xff]  ;;  %v6640_v9 = vsel %vm10843_vm3, %v6635_v35, %v14471_v50 }
 0x47a   : > { %v14489_v51 = vadd.f32 %v14434_v33, %v8532_v2  ;;  %v14491_v24 = vadd.f32 %v8475_v42, %v8387_v62  ;;  %v4498_v33 = vld [vmem:[#allocation2 + $0xcc] sm:$0x1]  ;;  %v6820_v30 = vrot.slane %v6818_v10, 4  ;;  %v8389_v42 = vadd.f32 %v14972_v47, %v14971_v31  ;;  %v4554_v31 = vld [vmem:[#allocation2 + $0xd4] sm:$0x1] }
 0x47b   : > { %8667 = vmatmul.bf16.gmra.mxu3 %v10483_v58  ;;  %v4499_v29 = vsel %vm12089_vm9, 0, %v4498_v33  ;;  %v6819_v20 = vsel %vm11069_vm6, %v9884_v61, %v6818_v10  ;;  %v7376_v2 = vunpack.c.l.b16 %v6650_v32  ;;  %v14522_v47 = vld [vmem:[#allocation2 + $0xd0] sm:$0xf]  ;;  %v4555_v32 = vsel %vm12131_vm11, 0, %v4554_v31 }
 0x47c   : > { %14969 = vst [vmem:[#allocation30_spill] sm:$0xff] %v14491_v24  ;;  %8573 = vmatmul.bf16.gmra.mxu2 %v7248_v26  ;;  %8790 = vmatmul.bf16.gmra.mxu1 %v7446_v7  ;;  %v6080_v26 = vld [vmem:[#allocation2 + $0xb4] sm:$0xe]  ;;  %v10637_v7 = vld [vmem:[#allocation2 + $0x50] sm:$0x1]  ;;  %v6822_v61 = vsel %vm11069_vm6, %v6820_v30, %v6821_v54  ;;  %v7433_v10 = vunpack.c.l.b16 %v6819_v20  ;;  %v14526_v20 = vpop.f32.mrf.mxu0 }
 0x47d   : > { %4500 = vst [vmem:[#allocation2 + $0xcc] sm:$0x1] %v4499_v29  ;;  %v6772_v58 = vrot.slane %v10637_v7, 5  ;;  %v7434_v3 = vunpack.c.l.b16 %v6822_v61  ;;  %v9877_v29 = vrot.slane %v6679_v57, 9  ;;  %v9871_v54 = vrot.slane %v6080_v26, 9 }
 0x47e   : > { %v14507_v49 = vpop.f32.mrf.mxu3  ;;  %v6661_v57 = vshll.u32 %v14522_v47, 16  ;;  %4556 = vst [vmem:[#allocation2 + $0xd4] sm:$0x1] %v4555_v32  ;;  %v7232_v26 = vunpack.c.l.b16 %v6234_v63  ;;  %v6687_v63 = vld [vmem:[#allocation2 + $0xa8] sm:$0xe] }
 0x47f   : > { %v8534_v40 = vpop.f32.mrf.mxu2  ;;  %v14524_v50 = vpack.c.b16 %v7434_v3, %v7433_v10  ;;  %v6770_v38 = vsel %vm11069_vm6, %v9877_v29, %v6769_v39 }
 0x480   : > { %v8535_v62 = vadd.f32 %v8534_v40, %v14226_v28  ;;  %v6773_v40 = vsel %vm11069_vm6, %v6771_v44, %v6772_v58  ;;  %v6665_v44 = vshrl.u32 %v14522_v47, 16  ;;  %v6663_v61 = vrot.slane %v6661_v57, 5 }
 0x481   : > { %v8477_v33 = vpop.f32.mrf.mxu1  ;;  %v7419_v35 = vunpack.c.l.b16 %v6770_v38  ;;  %v10638_v38 = vld [vmem:[#allocation2 + $0x58] sm:$0xf] }
 0x482   : > { %v14514_v28 = vadd.f32 %v14454_v18, %v8535_v62  ;;  %v14518_v30 = vadd.f32 %v8477_v33, %v8389_v42  ;;  %v7375_v18 = vunpack.c.l.b16 %v6640_v9  ;;  %v6231_v62 = vsel %vm11069_vm6, %v9871_v54, %v6230_v11  ;;  %v14976_v11 = vld [vmem:[#allocation15_spill] sm:$0xff] }
 0x483   : > { %v7420_v42 = vunpack.c.l.b16 %v6773_v40  ;;  %v6667_v0 = vrot.slane %v6665_v44, 4  ;;  %v7231_v31 = vunpack.c.l.b16 %v6231_v62  ;;  %v6237_v62 = vrot.slane %v14245_v5, 5 }
 0x484   : > { %14973 = vst [vmem:[#allocation33_spill] sm:$0xff] %v14518_v30  ;;  %v7393_v7 = vpack.c.b16 %v7376_v2, %v7375_v18  ;;  %v6273_v58 = vld [vmem:[#allocation2 + $0xcc] sm:$0xf]  ;;  %v14975_v30 = vld [vmem:[#allocation14_spill] sm:$0xff] }
 0x485   : > { %v6652_v10 = vshrl.u32 %v6273_v58, 16  ;;  %v6655_v3 = vshll.u32 %v6273_v58, 16  ;;  %v8392_v54 = vadd.f32 %v14976_v11, %v14975_v30  ;;  %v10484_v24 = vld [vmem:[#allocation2 + $0xcc] sm:$0xff]  ;;  %v6668_v40 = vor.u32 %v6667_v0, %v6663_v61  ;;  %v14545_v30 = vld [vmem:[#allocation2 + $0xd4] sm:$0x1] }
 0x486   : > { %v7249_v32 = vpack.c.b16 %v7232_v26, %v7231_v31  ;;  %v7447_v57 = vpack.c.b16 %v7420_v42, %v7419_v35  ;;  %v6825_v0 = vrot.slane %v14349_v36, 5  ;;  %v6671_v42 = vshll.u32 %v14545_v30, 16  ;;  %v14549_v26 = vpop.f32.mrf.mxu0 }
 0x487   : > { %v8536_v9 = vpop.f32.mrf.mxu2  ;;  %v6654_v39 = vrot.slane %v6652_v10, 4  ;;  %v6657_v29 = vrot.slane %v6655_v3, 5  ;;  %v6669_v10 = vrot.slane %v6668_v40, 4  ;;  %v6239_v35 = vrot.slane %v6237_v62, 4 }
 0x488   : > { %v8537_v33 = vadd.f32 %v8536_v9, %v14250_v46  ;;  %v8630_v46 = vpop.f32.mrf.mxu3  ;;  %v9885_v9 = vrot.slane %v6687_v63, 9  ;;  %v6827_v3 = vrot.slane %v6825_v0, 4  ;;  %v6081_v63 = vld [vmem:[#allocation2 + $0xc0] sm:$0xe] }
 0x489   : > { %8756 = vmatmul.bf16.gmra.mxu0 %v7393_v7  ;;  %v8480_v18 = vpop.f32.mrf.mxu1  ;;  %v6776_v7 = vrot.slane %v10638_v38, 5  ;;  %v6658_v58 = vor.u32 %v6657_v29, %v6654_v39  ;;  %v14977_v39 = vld [vmem:[#allocation20_spill] sm:$0xff]  ;;  %v14978_v29 = vld [vmem:[#allocation23_spill] sm:$0xff] }
 0x48a   : > { %v14540_v2 = vadd.f32 %v14481_v17, %v8537_v33  ;;  %v14542_v44 = vadd.f32 %v8480_v18, %v8392_v54  ;;  %v6826_v5 = vsel %vm11069_vm6, %v9885_v9, %v6825_v0  ;;  %v6828_v33 = vrot.slane %v14381_v6, 5  ;;  %v6680_v6 = vld [vmem:[#allocation2 + $0x54] sm:$0xe]  ;;  %v10639_v0 = vld [vmem:[#allocation2 + $0x5c] sm:$0x1] }
 0x48b   : > { %8672 = vmatmul.bf16.gmra.mxu3 %v10484_v24  ;;  %v6659_v17 = vrot.slane %v6658_v58, 4  ;;  %v6778_v11 = vrot.slane %v6776_v7, 4  ;;  %v6673_v54 = vrot.slane %v6671_v42, 5  ;;  %v8394_v40 = vadd.f32 %v14978_v29, %v14977_v39 }
 0x48c   : > { %8578 = vmatmul.bf16.gmra.mxu2 %v7249_v32  ;;  %8795 = vmatmul.bf16.gmra.mxu1 %v7447_v57  ;;  %v6829_v32 = vsel %vm11069_vm6, %v6827_v3, %v6828_v33  ;;  %v6240_v57 = vrot.slane %v14275_v1, 5  ;;  %v7435_v58 = vunpack.c.l.b16 %v6826_v5  ;;  %v9878_v33 = vrot.slane %v6680_v6, 9  ;;  %v6688_v6 = vld [vmem:[#allocation2 + $0xb4] sm:$0xe] }
 0x48d   : > { %v6664_v36 = vsel %vm10843_vm3, %v6659_v17, %v6663_v61  ;;  %v6674_v38 = vsel %vm10843_vm3, %v6669_v10, %v6673_v54  ;;  %v7436_v9 = vunpack.c.l.b16 %v6829_v32  ;;  %v6779_v17 = vrot.slane %v10639_v0, 5  ;;  %v14979_v32 = vld [vmem:[#allocation19_spill] sm:$0xff] }
 0x48e   : > { %v7377_v18 = vunpack.c.l.b16 %v6664_v36  ;;  %v7378_v42 = vunpack.c.l.b16 %v6674_v38  ;;  %v9872_v36 = vrot.slane %v6081_v63, 9  ;;  %v6241_v3 = vsel %vm11069_vm6, %v6239_v35, %v6240_v57  ;;  %v14980_v57 = vld [vmem:[#allocation24_spill] sm:$0xff] }
 0x48f   : > { %v8539_v31 = vpop.f32.mrf.mxu2  ;;  %v14571_v1 = vpack.c.b16 %v7436_v9, %v7435_v58  ;;  %v6780_v34 = vsel %vm11069_vm6, %v6778_v11, %v6779_v17  ;;  %v7234_v54 = vunpack.c.l.b16 %v6241_v3  ;;  %v8397_v11 = vadd.f32 %v14980_v57, %v14979_v32  ;;  %v10641_v57 = vld [vmem:[#allocation2 + $0x68] sm:$0x1] }
 0x490   : > { %v8540_v24 = vadd.f32 %v8539_v31, %v14273_v25  ;;  %v7394_v10 = vpack.c.b16 %v7378_v42, %v7377_v18  ;;  %v8633_v5 = vpop.f32.mrf.mxu3  ;;  %v7422_v29 = vunpack.c.l.b16 %v6780_v34  ;;  %v9886_v17 = vrot.slane %v6688_v6, 9 }
 0x491   : > { %v8482_v25 = vpop.f32.mrf.mxu1  ;;  %v6835_v3 = vrot.slane %v14430_v53, 5 }
 0x492   : > { %v14565_v61 = vadd.f32 %v14507_v49, %v8540_v24  ;;  %v14567_v31 = vadd.f32 %v8482_v25, %v8394_v40  ;;  %v6238_v49 = vsel %vm11069_vm6, %v9872_v36, %v6237_v62  ;;  %v6777_v24 = vsel %vm11069_vm6, %v9878_v33, %v6776_v7  ;;  %v14579_v40 = vpop.f32.mrf.mxu0  ;;  %v10640_v25 = vld [vmem:[#allocation2 + $0x64] sm:$0xf] }
 0x493   : > { %v7233_v63 = vunpack.c.l.b16 %v6238_v49  ;;  %v7421_v18 = vunpack.c.l.b16 %v6777_v24  ;;  %v6783_v0 = vrot.slane %v10640_v25, 5  ;;  %v14982_v24 = vld [vmem:[#allocation34_spill] sm:$0xff] }
 0x495   : > { %v7250_v58 = vpack.c.b16 %v7234_v54, %v7233_v63  ;;  %v7448_v7 = vpack.c.b16 %v7422_v29, %v7421_v18  ;;  %v14981_v54 = vld [vmem:[#allocation17_spill] sm:$0xff]  ;;  %v6681_v29 = vld [vmem:[#allocation2 + $0x60] sm:$0xe] }
 0x497   : > { %v8541_v39 = vpop.f32.mrf.mxu2 }
 0x498   : > { %v8542_v35 = vadd.f32 %v8541_v39, %v14290_v27  ;;  %v6832_v27 = vrot.slane %v14398_v12, 5  ;;  %v8399_v39 = vadd.f32 %v14982_v24, %v14981_v54 }
 0x499   : > { %8761 = vmatmul.bf16.gmra.mxu0 %v7394_v10  ;;  %v8485_v62 = vpop.f32.mrf.mxu1  ;;  %v6785_v10 = vrot.slane %v6783_v0, 4 }
 0x49a   : > { %v14584_v38 = vadd.f32 %v8630_v46, %v8542_v35  ;;  %v14586_v9 = vadd.f32 %v8485_v62, %v8397_v11  ;;  %v6833_v42 = vsel %vm11069_vm6, %v9886_v17, %v6832_v27  ;;  %v6834_v36 = vrot.slane %v6832_v27, 4  ;;  %v8635_v46 = vpop.f32.mrf.mxu3  ;;  %v14983_v17 = vld [vmem:[#allocation18_spill] sm:$0xff] }
 0x49b   : > { %v7437_v12 = vunpack.c.l.b16 %v6833_v42  ;;  %v6786_v11 = vrot.slane %v10641_v57, 5  ;;  %v8402_v27 = vadd.f32 %v14268_v22, %v14983_v17  ;;  %v6842_v22 = vrot.slane %v14477_v41, 5  ;;  %v14985_v57 = vld [vmem:[#allocation7_spill] sm:$0xff] }
 0x49c   : > { %8583 = vmatmul.bf16.gmra.mxu2 %v7250_v58  ;;  %8800 = vmatmul.bf16.gmra.mxu1 %v7448_v7  ;;  %v6836_v49 = vsel %vm11069_vm6, %v6834_v36, %v6835_v3  ;;  %v6689_v36 = vld [vmem:[#allocation2 + $0xc0] sm:$0xe] }
 0x49d   : > { %v7438_v35 = vunpack.c.l.b16 %v6836_v49  ;;  %v6787_v6 = vsel %vm11069_vm6, %v6785_v10, %v6786_v11  ;;  %v10642_v10 = vld [vmem:[#allocation2 + $0x70] sm:$0xf]  ;;  %v9887_v24 = vrot.slane %v6689_v36, 9 }
 0x49e   : > { %v7424_v7 = vunpack.c.l.b16 %v6787_v6  ;;  %v6790_v54 = vrot.slane %v10642_v10, 5  ;;  %v14986_v10 = vld [vmem:[#allocation6_spill] sm:$0xff] }
 0x49f   : > { %v8544_v33 = vpop.f32.mrf.mxu2  ;;  %v14601_v18 = vpack.c.b16 %v7438_v35, %v7437_v12 }
 0x4a0   : > { %v8545_v34 = vadd.f32 %v8544_v33, %v14304_v13  ;;  %v9879_v13 = vrot.slane %v6681_v29, 9  ;;  %v6792_v12 = vrot.slane %v6790_v54, 4 }
 0x4a1   : > { %v8487_v32 = vpop.f32.mrf.mxu1 }
 0x4a2   : > { %v14597_v63 = vadd.f32 %v8633_v5, %v8545_v34  ;;  %v14599_v53 = vadd.f32 %v8487_v32, %v8399_v39  ;;  %v6784_v62 = vsel %vm11069_vm6, %v9879_v13, %v6783_v0  ;;  %v8638_v5 = vpop.f32.mrf.mxu3  ;;  %v6839_v0 = vrot.slane %v14445_v48, 5  ;;  %v14984_v32 = vld [vmem:[#allocation22_spill] sm:$0xff]  ;;  %v6682_v13 = vld [vmem:[#allocation2 + $0x6c] sm:$0xe] }
 0x4a3   : > { %v7423_v42 = vunpack.c.l.b16 %v6784_v62  ;;  %v8404_v11 = vadd.f32 %v14985_v57, %v14984_v32 }
 0x4a4   : > { %v6841_v39 = vrot.slane %v6839_v0, 4 }
 0x4a5   : > { %v7449_v49 = vpack.c.b16 %v7424_v7, %v7423_v42  ;;  %v10643_v7 = vld [vmem:[#allocation2 + $0x74] sm:$0x1] }
 0x4a6   : > { %v6843_v35 = vsel %vm11069_vm6, %v6841_v39, %v6842_v22 }
 0x4a7   : > { %v8546_v58 = vpop.f32.mrf.mxu2  ;;  %v7440_v48 = vunpack.c.l.b16 %v6843_v35  ;;  %v10644_v35 = vld [vmem:[#allocation2 + $0x7c] sm:$0xf] }
 0x4a8   : > { %v8547_v25 = vadd.f32 %v8546_v58, %v14324_v21  ;;  %v6840_v21 = vsel %vm11069_vm6, %v9887_v24, %v6839_v0  ;;  %v14987_v24 = vld [vmem:[#allocation8_spill] sm:$0xff]  ;;  %v6797_v32 = vrot.slane %v10644_v35, 5 }
 0x4a9   : > { %v8490_v33 = vpop.f32.mrf.mxu1  ;;  %v7439_v6 = vunpack.c.l.b16 %v6840_v21  ;;  %v8407_v0 = vadd.f32 %v14987_v24, %v14986_v10  ;;  %v14990_v24 = vld [vmem:[#allocation26_spill] sm:$0xff] }
 0x4aa   : > { %v14610_v3 = vadd.f32 %v8635_v46, %v8547_v25  ;;  %v14612_v34 = vadd.f32 %v8490_v33, %v8402_v27  ;;  %v6793_v25 = vrot.slane %v10643_v7, 5  ;;  %v8640_v17 = vpop.f32.mrf.mxu3 }
 0x4ab   : > { %v14627_v27 = vpack.c.b16 %v7440_v48, %v7439_v6  ;;  %v6683_v48 = vld [vmem:[#allocation2 + $0x78] sm:$0xe] }
 0x4ac   : > { %8805 = vmatmul.bf16.gmra.mxu1 %v7449_v49  ;;  %v6794_v42 = vsel %vm11069_vm6, %v6792_v12, %v6793_v25  ;;  %v10645_v25 = vld [vmem:[#allocation2 + $0x80] sm:$0x1] }
 0x4ad   : > { %v7426_v49 = vunpack.c.l.b16 %v6794_v42  ;;  %v9881_v42 = vrot.slane %v6683_v48, 9 }
 0x4af   : > { %v8549_v29 = vpop.f32.mrf.mxu2 }
 0x4b0   : > { %v8550_v46 = vadd.f32 %v8549_v29, %v14346_v15  ;;  %v9880_v15 = vrot.slane %v6682_v13, 9  ;;  %v14988_v13 = vld [vmem:[#allocation21_spill] sm:$0xff] }
 0x4b1   : > { %v8492_v58 = vpop.f32.mrf.mxu1 }
 0x4b2   : > { %v14623_v62 = vadd.f32 %v8638_v5, %v8550_v46  ;;  %v14625_v41 = vadd.f32 %v8492_v58, %v8404_v11  ;;  %v6791_v36 = vsel %vm11069_vm6, %v9880_v15, %v6790_v54  ;;  %v8643_v12 = vpop.f32.mrf.mxu3  ;;  %v6799_v11 = vrot.slane %v6797_v32, 4 }
 0x4b3   : > { %v7425_v21 = vunpack.c.l.b16 %v6791_v36 }
 0x4b5   : > { %v7450_v46 = vpack.c.b16 %v7426_v49, %v7425_v21 }
 0x4b7   : > { %v8551_v33 = vpop.f32.mrf.mxu2 }
 0x4b8   : > { %v8552_v5 = vadd.f32 %v8551_v33, %v14371_v14  ;;  %v14989_v14 = vld [vmem:[#allocation10_spill] sm:$0xff]  ;;  %v6798_v33 = vsel %vm11069_vm6, %v9881_v42, %v6797_v32  ;;  %v10647_v42 = vld [vmem:[#allocation2 + $0x8c] sm:$0x1] }
 0x4b9   : > { %v8495_v22 = vpop.f32.mrf.mxu1  ;;  %v8409_v6 = vadd.f32 %v14989_v14, %v14988_v13  ;;  %v7427_v21 = vunpack.c.l.b16 %v6798_v33 }
 0x4ba   : > { %v14636_v39 = vadd.f32 %v8640_v17, %v8552_v5  ;;  %v14638_v29 = vadd.f32 %v8495_v22, %v8407_v0  ;;  %v6800_v17 = vrot.slane %v10645_v25, 5  ;;  %v8688_v0 = vadd.f32 %v14364_v19, %v14990_v24  ;;  %v6684_v19 = vld [vmem:[#allocation2 + $0x84] sm:$0xe]  ;;  %v14665_v24 = vpop.f32.mrf.mxu0 }
 0x4bc   : > { %8810 = vmatmul.bf16.gmra.mxu1 %v7450_v46  ;;  %v6801_v36 = vsel %vm11069_vm6, %v6799_v11, %v6800_v17 }
 0x4bd   : > { %v7428_v5 = vunpack.c.l.b16 %v6801_v36  ;;  %v6807_v36 = vrot.slane %v10647_v42, 5 }
 0x4bf   : > { %v8554_v57 = vpop.f32.mrf.mxu2 }
 0x4c0   : > { %v8555_v54 = vadd.f32 %v8554_v57, %v14394_v59  ;;  %v8645_v59 = vpop.f32.mrf.mxu3  ;;  %v10646_v57 = vld [vmem:[#allocation2 + $0x88] sm:$0xf] }
 0x4c1   : > { %v8497_v7 = vpop.f32.mrf.mxu1 }
 0x4c2   : > { %v14643_v58 = vadd.f32 %v8643_v12, %v8555_v54  ;;  %v14645_v15 = vadd.f32 %v8497_v7, %v8409_v6  ;;  %v7451_v12 = vpack.c.b16 %v7428_v5, %v7427_v21  ;;  %v6804_v54 = vrot.slane %v10646_v57, 5 }
 0x4c4   : > { %v6806_v6 = vrot.slane %v6804_v54, 4 }
 0x4c6   : > { %v6808_v5 = vsel %vm11069_vm6, %v6806_v6, %v6807_v36  ;;  %v10648_v6 = vld [vmem:[#allocation2 + $0x94] sm:$0xf] }
 0x4c7   : > { %v8556_v49 = vpop.f32.mrf.mxu2  ;;  %v7430_v21 = vunpack.c.l.b16 %v6808_v5  ;;  %v14993_v5 = vld [vmem:[#allocation29_spill] sm:$0xff] }
 0x4c8   : > { %v8557_v10 = vadd.f32 %v8556_v49, %v14418_v43  ;;  %v8648_v48 = vpop.f32.mrf.mxu3  ;;  %v14991_v43 = vld [vmem:[#allocation9_spill] sm:$0xff]  ;;  %v9882_v49 = vrot.slane %v6684_v19, 9 }
 0x4c9   : > { %v8776_v46 = vpop.f32.mrf.mxu1  ;;  %v8690_v7 = vadd.f32 %v14396_v4, %v14991_v43 }
 0x4ca   : > { %v14654_v22 = vadd.f32 %v8645_v59, %v8557_v10  ;;  %v8777_v35 = vadd.f32 %v8776_v46, %v8688_v0 }
 0x4cc   : > { %v8856_v11 = vadd.f32 3.0, %v8777_v35  ;;  %8815 = vmatmul.bf16.gmra.mxu1 %v7451_v12  ;;  %v14992_v12 = vld [vmem:[#allocation11_spill] sm:$0xff] }
 0x4cd   : > { %v8693_v57 = vadd.f32 %v14426_v56, %v14992_v12  ;;  %v14671_v56 = vpop.f32.mrf.mxu0 }
 0x4ce   : > { %v8888_v13 = vmax.f32 %v8856_v11, 0.0 }
 0x4cf   : > { %v8559_v32 = vpop.f32.mrf.mxu2 }
 0x4d0   : > { %v8560_v14 = vadd.f32 %v8559_v32, %v14443_v52  ;;  %v8920_v33 = vmin.f32 %v8888_v13, 6.0  ;;  %v6805_v52 = vsel %vm11069_vm6, %v9882_v49, %v6804_v54 }
 0x4d1   : > { %v8778_v17 = vpop.f32.mrf.mxu1  ;;  %v7429_v11 = vunpack.c.l.b16 %v6805_v52 }
 0x4d2   : > { %v14659_v25 = vadd.f32 %v8648_v48, %v8560_v14  ;;  %v8779_v59 = vadd.f32 %v8778_v17, %v8690_v7  ;;  %v8952_v0 = vmul.f32 %v8920_v33, %v8777_v35  ;;  %v6811_v7 = vrot.slane %v10648_v6, 5 }
 0x4d3   : > { %v7452_v43 = vpack.c.b16 %v7430_v21, %v7429_v11 }
 0x4d4   : > { %v8857_v10 = vadd.f32 3.0, %v8779_v59  ;;  %v8984_v32 = vmul.f32 0.16666667, %v8952_v0  ;;  %v6813_v33 = vrot.slane %v6811_v7, 4  ;;  %v10649_v0 = vld [vmem:[#allocation2 + $0x98] sm:$0x1] }
 0x4d6   : > { %v8889_v4 = vmax.f32 %v8857_v10, 0.0  ;;  %v9017_v35 = vsel %vm9016_vm0, %v8984_v32, -inf  ;;  %v6685_v10 = vld [vmem:[#allocation2 + $0x90] sm:$0xe] }
 0x4d7   : > { %v9883_v12 = vrot.slane %v6685_v10, 9 }
 0x4d8   : > { %v8921_v46 = vmin.f32 %v8889_v4, 6.0  ;;  %v6814_v4 = vrot.slane %v10649_v0, 5 }
 0x4d9   : > { %v8781_v13 = vpop.f32.mrf.mxu1  ;;  %v6812_v32 = vsel %vm11069_vm6, %v9883_v12, %v6811_v7 }
 0x4da   : > { %v8953_v14 = vmul.f32 %v8921_v46, %v8779_v59  ;;  %v8782_v48 = vadd.f32 %v8781_v13, %v8693_v57  ;;  %v8695_v59 = vadd.f32 %v14451_v16, %v14993_v5  ;;  %v6815_v57 = vsel %vm11069_vm6, %v6813_v33, %v6814_v4 }
 0x4db   : > { %v7432_v6 = vunpack.c.l.b16 %v6815_v57 }
 0x4dc   : > { %v8985_v19 = vmul.f32 0.16666667, %v8953_v14  ;;  %v8858_v54 = vadd.f32 3.0, %v8782_v48  ;;  %8820 = vmatmul.bf16.gmra.mxu1 %v7452_v43 }
 0x4de   : > { %v9018_v17 = vsel %vm9016_vm0, %v8985_v19, -inf  ;;  %v8890_v42 = vmax.f32 %v8858_v54, 0.0  ;;  %v14994_v54 = vld [vmem:[#allocation28_spill] sm:$0xff] }
 0x4df   : > { %v9022_v36 = vmax.f32 %v9017_v35, %v9018_v17  ;;  %v8698_v35 = vadd.f32 %v14486_v37, %v14994_v54 }
 0x4e0   : > { %v8922_v49 = vmin.f32 %v8890_v42, 6.0  ;;  %v14682_v42 = vpop.f32.mrf.mxu0 }
 0x4e1   : > { %v8783_v52 = vpop.f32.mrf.mxu1 }
 0x4e2   : > { %v8954_v21 = vmul.f32 %v8922_v49, %v8782_v48  ;;  %v8784_v46 = vadd.f32 %v8783_v52, %v8695_v59  ;;  %v7431_v48 = vunpack.c.l.b16 %v6812_v32 }
 0x4e4   : > { %v8986_v11 = vmul.f32 0.16666667, %v8954_v21  ;;  %v8859_v13 = vadd.f32 3.0, %v8784_v46  ;;  %v7453_v5 = vpack.c.b16 %v7432_v6, %v7431_v48 }
 0x4e6   : > { %v9019_v14 = vsel %vm9016_vm0, %v8986_v11, -inf  ;;  %v8891_v43 = vmax.f32 %v8859_v13, 0.0 }
 0x4e7   : > { %v9024_v16 = vmax.f32 %v9019_v14, %v9022_v36  ;;  %v14995_v36 = vld [vmem:[#allocation31_spill] sm:$0xff] }
 0x4e8   : > { %v8923_v19 = vmin.f32 %v8891_v43, 6.0  ;;  %v8700_v21 = vadd.f32 %v14526_v20, %v14995_v36  ;;  %v14687_v11 = vpop.f32.mrf.mxu0 }
 0x4e9   : > { %v8786_v17 = vpop.f32.mrf.mxu1 }
 0x4ea   : > { %v8955_v49 = vmul.f32 %v8923_v19, %v8784_v46  ;;  %v8787_v33 = vadd.f32 %v8786_v17, %v8698_v35  ;;  %v8703_v19 = vadd.f32 %v14549_v26, %v14414_v45 }
 0x4ec   : > { %v8987_v59 = vmul.f32 0.16666667, %v8955_v49  ;;  %v8860_v10 = vadd.f32 3.0, %v8787_v33  ;;  %8825 = vmatmul.bf16.gmra.mxu1 %v7453_v5 }
 0x4ee   : > { %v9020_v7 = vsel %vm9016_vm0, %v8987_v59, -inf  ;;  %v8892_v52 = vmax.f32 %v8860_v10, 0.0  ;;  %v8705_v10 = vadd.f32 %v14579_v40, %v14440_v8 }
 0x4ef   : > { %v9026_v0 = vmax.f32 %v9020_v7, %v9024_v16 }
 0x4f0   : > { %v8924_v4 = vmin.f32 %v8892_v52, 6.0  ;;  %v8717_v17 = vpop.f32.mrf.mxu0 }
 0x4f1   : > { %v8788_v12 = vpop.f32.mrf.mxu1 }
 0x4f2   : > { %v8956_v37 = vmul.f32 %v8924_v4, %v8787_v33  ;;  %v8789_v57 = vadd.f32 %v8788_v12, %v8700_v21 }
 0x4f4   : > { %v8988_v13 = vmul.f32 0.16666667, %v8956_v37  ;;  %v8861_v46 = vadd.f32 3.0, %v8789_v57  ;;  %v8708_v37 = vadd.f32 %v14665_v24, %v14465_v60 }
 0x4f6   : > { %v9021_v32 = vsel %vm9016_vm0, %v8988_v13, -inf  ;;  %v8893_v14 = vmax.f32 %v8861_v46, 0.0 }
 0x4f7   : > { %v9028_v43 = vmax.f32 %v9021_v32, %v9026_v0 }
 0x4f8   : > { %v8925_v6 = vmin.f32 %v8893_v14, 6.0  ;;  %v14697_v12 = vpop.f32.mrf.mxu0 }
 0x4f9   : > { %v8791_v16 = vpop.f32.mrf.mxu1 }
 0x4fa   : > { %v8957_v54 = vmul.f32 %v8925_v6, %v8789_v57  ;;  %v8792_v35 = vadd.f32 %v8791_v16, %v8703_v19  ;;  %v8710_v19 = vadd.f32 %v14671_v56, %v14489_v51 }
 0x4fc   : > { %v8989_v48 = vmul.f32 0.16666667, %v8957_v54  ;;  %v8862_v20 = vadd.f32 3.0, %v8792_v35  ;;  %8830 = vmatmul.bf16.gmra.mxu1 %v14524_v50 }
 0x4fe   : > { %v9023_v49 = vsel %vm9016_vm0, %v8989_v48, -inf  ;;  %v8894_v33 = vmax.f32 %v8862_v20, 0.0 }
 0x4ff   : > { %v9030_v5 = vmax.f32 %v9023_v49, %v9028_v43 }
 0x500   : > { %v8926_v59 = vmin.f32 %v8894_v33, 6.0  ;;  %v14705_v54 = vpop.f32.mrf.mxu0 }
 0x501   : > { %v8793_v7 = vpop.f32.mrf.mxu1 }
 0x502   : > { %v8958_v52 = vmul.f32 %v8926_v59, %v8792_v35  ;;  %v8794_v0 = vadd.f32 %v8793_v7, %v8705_v10 }
 0x504   : > { %v8990_v45 = vmul.f32 0.16666667, %v8958_v52  ;;  %v8863_v26 = vadd.f32 3.0, %v8794_v0 }
 0x506   : > { %v9025_v4 = vsel %vm9016_vm0, %v8990_v45, -inf  ;;  %v8895_v36 = vmax.f32 %v8863_v26, 0.0 }
 0x507   : > { %v9032_v21 = vmax.f32 %v9025_v4, %v9030_v5  ;;  %v8713_v5 = vadd.f32 %v14682_v42, %v14514_v28 }
 0x508   : > { %v8927_v50 = vmin.f32 %v8895_v36, 6.0  ;;  %v14710_v52 = vpop.f32.mrf.mxu0  ;;  %v8715_v36 = vadd.f32 %v14687_v11, %v14540_v2 }
 0x509   : > { %v8796_v57 = vpop.f32.mrf.mxu1 }
 0x50a   : > { %v8959_v13 = vmul.f32 %v8927_v50, %v8794_v0  ;;  %v8797_v46 = vadd.f32 %v8796_v57, %v8708_v37 }
 0x50c   : > { %v8991_v32 = vmul.f32 0.16666667, %v8959_v13  ;;  %v8864_v8 = vadd.f32 3.0, %v8797_v46  ;;  %8835 = vmatmul.bf16.gmra.mxu1 %v14571_v1 }
 0x50e   : > { %v9027_v40 = vsel %vm9016_vm0, %v8991_v32, -inf  ;;  %v8896_v14 = vmax.f32 %v8864_v8, 0.0 }
 0x50f   : > { %v9034_v43 = vmax.f32 %v9027_v40, %v9032_v21 }
 0x510   : > { %v8928_v6 = vmin.f32 %v8896_v14, 6.0  ;;  %v8727_v57 = vpop.f32.mrf.mxu0  ;;  %v6846_v14 = vrot.slane %v14522_v47, 5  ;;  %v8720_v47 = vadd.f32 %v14697_v12, %v14584_v38  ;;  %v8723_v38 = vadd.f32 %v14705_v54, %v14597_v63 }
 0x511   : > { %v8798_v16 = vpop.f32.mrf.mxu1 }
 0x512   : > { %v8960_v35 = vmul.f32 %v8928_v6, %v8797_v46  ;;  %v8799_v60 = vadd.f32 %v8798_v16, %v8710_v19  ;;  %v6690_v19 = vld [vmem:[#allocation2 + $0xcc] sm:$0xe] }
 0x513   : > { %v9888_v16 = vrot.slane %v6690_v19, 9 }
 0x514   : > { %v8992_v24 = vmul.f32 0.16666667, %v8960_v35  ;;  %v8865_v48 = vadd.f32 3.0, %v8799_v60  ;;  %v6848_v35 = vrot.slane %v6846_v14, 4 }
 0x516   : > { %v9029_v20 = vsel %vm9016_vm0, %v8992_v24, -inf  ;;  %v8897_v49 = vmax.f32 %v8865_v48, 0.0 }
 0x517   : > { %v9036_v33 = vmax.f32 %v9029_v20, %v9034_v43 }
 0x518   : > { %v8929_v1 = vmin.f32 %v8897_v49, 6.0  ;;  %v8729_v49 = vpop.f32.mrf.mxu0 }
 0x519   : > { %v8801_v59 = vpop.f32.mrf.mxu1 }
 0x51a   : > { %v8961_v10 = vmul.f32 %v8929_v1, %v8799_v60  ;;  %v8802_v7 = vadd.f32 %v8801_v59, %v8713_v5  ;;  %v6849_v60 = vrot.slane %v14545_v30, 5 }
 0x51c   : > { %v8993_v51 = vmul.f32 0.16666667, %v8961_v10  ;;  %v8866_v56 = vadd.f32 3.0, %v8802_v7  ;;  %8840 = vmatmul.bf16.gmra.mxu1 %v14601_v18  ;;  %v8718_v18 = vadd.f32 %v8717_v17, %v14565_v61 }
 0x51e   : > { %v9031_v0 = vsel %vm9016_vm0, %v8993_v51, -inf  ;;  %v8898_v45 = vmax.f32 %v8866_v56, 0.0 }
 0x51f   : > { %v9038_v26 = vmax.f32 %v9031_v0, %v9036_v33  ;;  %v6847_v33 = vsel %vm11069_vm6, %v9888_v16, %v6846_v14 }
 0x520   : > { %v8930_v4 = vmin.f32 %v8898_v45, 6.0  ;;  %v7441_v10 = vunpack.c.l.b16 %v6847_v33  ;;  %v8561_v33 = vpop.f32.mrf.mxu2 }
 0x521   : > { %v8803_v21 = vpop.f32.mrf.mxu1 }
 0x522   : > { %v8962_v50 = vmul.f32 %v8930_v4, %v8802_v7  ;;  %v8804_v28 = vadd.f32 %v8803_v21, %v8715_v36  ;;  %v8732_v4 = vpop.f32.mrf.mxu0 }
 0x524   : > { %v8994_v42 = vmul.f32 0.16666667, %v8962_v50  ;;  %v8867_v37 = vadd.f32 3.0, %v8804_v28 }
 0x526   : > { %v9033_v13 = vsel %vm9016_vm0, %v8994_v42, -inf  ;;  %v8899_v46 = vmax.f32 %v8867_v37, 0.0 }
 0x527   : > { %v9040_v32 = vmax.f32 %v9033_v13, %v9038_v26 }
 0x528   : > { %v8931_v8 = vmin.f32 %v8899_v46, 6.0  ;;  %v8725_v46 = vadd.f32 %v14710_v52, %v14610_v3 }
 0x529   : > { %v8806_v40 = vpop.f32.mrf.mxu1 }
 0x52a   : > { %v8963_v43 = vmul.f32 %v8931_v8, %v8804_v28  ;;  %v8807_v6 = vadd.f32 %v8806_v40, %v8718_v18  ;;  %v8734_v63 = vpop.f32.mrf.mxu0 }
 0x52c   : > { %v8995_v2 = vmul.f32 0.16666667, %v8963_v43  ;;  %v8868_v11 = vadd.f32 3.0, %v8807_v6  ;;  %8845 = vmatmul.bf16.gmra.mxu1 %v14627_v27  ;;  %v6850_v27 = vsel %vm11069_vm6, %v6848_v35, %v6849_v60 }
 0x52d   : > { %v7442_v7 = vunpack.c.l.b16 %v6850_v27 }
 0x52e   : > { %v9035_v24 = vsel %vm9016_vm0, %v8995_v2, -inf  ;;  %v8900_v48 = vmax.f32 %v8868_v11, 0.0  ;;  %v8728_v2 = vadd.f32 %v8727_v57, %v14623_v62 }
 0x52f   : > { %v9042_v20 = vmax.f32 %v9035_v24, %v9040_v32  ;;  %v7458_v12 = vpack.c.b16 %v7442_v7, %v7441_v10  ;;  %v8650_v10 = vpop.f32.mrf.mxu3 }
 0x530   : > { %v8932_v61 = vmin.f32 %v8900_v48, 6.0 }
 0x531   : > { %v8808_v17 = vpop.f32.mrf.mxu1 }
 0x532   : > { %v8964_v1 = vmul.f32 %v8932_v61, %v8807_v6  ;;  %v8809_v5 = vadd.f32 %v8808_v17, %v8720_v47  ;;  %v8737_v48 = vpop.f32.mrf.mxu0  ;;  %v8730_v17 = vadd.f32 %v8729_v49, %v14636_v39 }
 0x533   : > { %v8738_v61 = vadd.f32 %v8737_v48, %v14659_v25 }
 0x534   : > { %v8996_v59 = vmul.f32 0.16666667, %v8964_v1  ;;  %v8869_v30 = vadd.f32 3.0, %v8809_v5 }
 0x536   : > { %v9037_v51 = vsel %vm9016_vm0, %v8996_v59, -inf  ;;  %v8901_v56 = vmax.f32 %v8869_v30, 0.0 }
 0x537   : > { %v9044_v0 = vmax.f32 %v9037_v51, %v9042_v20 }
 0x538   : > { %v8933_v45 = vmin.f32 %v8901_v56, 6.0  ;;  %v8733_v56 = vadd.f32 %v8732_v4, %v14643_v58 }
 0x539   : > { %v8811_v26 = vpop.f32.mrf.mxu1 }
 0x53a   : > { %v8965_v36 = vmul.f32 %v8933_v45, %v8809_v5  ;;  %v8812_v23 = vadd.f32 %v8811_v26, %v8723_v38  ;;  %v8739_v45 = vpop.f32.mrf.mxu0 }
 0x53c   : > { %v8997_v21 = vmul.f32 0.16666667, %v8965_v36  ;;  %v8870_v50 = vadd.f32 3.0, %v8812_v23  ;;  %8850 = vmatmul.bf16.gmra.mxu1 %v7458_v12  ;;  %v8564_v12 = vpop.f32.mrf.mxu2 }
 0x53e   : > { %v9039_v28 = vsel %vm9016_vm0, %v8997_v21, -inf  ;;  %v8902_v42 = vmax.f32 %v8870_v50, 0.0  ;;  %v8735_v50 = vadd.f32 %v8734_v63, %v14654_v22 }
 0x53f   : > { %v9046_v37 = vmax.f32 %v9039_v28, %v9044_v0  ;;  %v8653_v28 = vpop.f32.mrf.mxu3 }
 0x540   : > { %v8934_v13 = vmin.f32 %v8902_v42, 6.0 }
 0x541   : > { %v8813_v32 = vpop.f32.mrf.mxu1 }
 0x542   : > { %v8966_v8 = vmul.f32 %v8934_v13, %v8812_v23  ;;  %v8814_v18 = vadd.f32 %v8813_v32, %v8725_v46  ;;  %v8742_v46 = vpop.f32.mrf.mxu0 }
 0x544   : > { %v8998_v54 = vmul.f32 0.16666667, %v8966_v8  ;;  %v8871_v40 = vadd.f32 3.0, %v8814_v18  ;;  %v8566_v32 = vpop.f32.mrf.mxu2 }
 0x546   : > { %v9041_v14 = vsel %vm9016_vm0, %v8998_v54, -inf  ;;  %v8903_v43 = vmax.f32 %v8871_v40, 0.0  ;;  %v8562_v40 = vadd.f32 %v8561_v33, %v14469_v55 }
 0x547   : > { %v9048_v6 = vmax.f32 %v9041_v14, %v9046_v37 }
 0x548   : > { %v8935_v19 = vmin.f32 %v8903_v43, 6.0  ;;  %v8651_v22 = vadd.f32 %v8650_v10, %v8562_v40 }
 0x549   : > { %v8816_v11 = vpop.f32.mrf.mxu1 }
 0x54a   : > { %v8967_v16 = vmul.f32 %v8935_v19, %v8814_v18  ;;  %v8817_v35 = vadd.f32 %v8816_v11, %v8728_v2  ;;  %v8655_v2 = vpop.f32.mrf.mxu3 }
 0x54c   : > { %v8999_v60 = vmul.f32 0.16666667, %v8967_v16  ;;  %v8872_v24 = vadd.f32 3.0, %v8817_v35  ;;  %v8744_v16 = vpop.f32.mrf.mxu0 }
 0x54e   : > { %v9043_v3 = vsel %vm9016_vm0, %v8999_v60, -inf  ;;  %v8904_v52 = vmax.f32 %v8872_v24, 0.0  ;;  %v8569_v24 = vpop.f32.mrf.mxu2 }
 0x54f   : > { %v9050_v20 = vmax.f32 %v9043_v3, %v9048_v6  ;;  %v14996_v3 = vld [vmem:[#allocation30_spill] sm:$0xff] }
 0x550   : > { %v8936_v47 = vmin.f32 %v8904_v52, 6.0  ;;  %v8565_v52 = vadd.f32 %v8564_v12, %v14996_v3 }
 0x551   : > { %v8818_v27 = vpop.f32.mrf.mxu1 }
 0x552   : > { %v8968_v1 = vmul.f32 %v8936_v47, %v8817_v35  ;;  %v8819_v5 = vadd.f32 %v8818_v27, %v8730_v17  ;;  %v8740_v47 = vadd.f32 %v8739_v45, %v8651_v22  ;;  %v8654_v27 = vadd.f32 %v8653_v28, %v8565_v52 }
 0x554   : > { %v9000_v62 = vmul.f32 0.16666667, %v8968_v1  ;;  %v8873_v57 = vadd.f32 3.0, %v8819_v5 }
 0x556   : > { %v9045_v59 = vsel %vm9016_vm0, %v9000_v62, -inf  ;;  %v8905_v30 = vmax.f32 %v8873_v57, 0.0 }
 0x557   : > { %v9052_v7 = vmax.f32 %v9045_v59, %v9050_v20 }
 0x558   : > { %v8937_v51 = vmin.f32 %v8905_v30, 6.0  ;;  %v14997_v30 = vld [vmem:[#allocation33_spill] sm:$0xff] }
 0x559   : > { %v8821_v0 = vpop.f32.mrf.mxu1  ;;  %v8567_v10 = vadd.f32 %v8566_v32, %v14997_v30 }
 0x55a   : > { %v8969_v25 = vmul.f32 %v8937_v51, %v8819_v5  ;;  %v8822_v38 = vadd.f32 %v8821_v0, %v8733_v56  ;;  %v8658_v5 = vpop.f32.mrf.mxu3  ;;  %v8743_v56 = vadd.f32 %v8742_v46, %v8654_v27  ;;  %v8571_v0 = vpop.f32.mrf.mxu2 }
 0x55b   : > { %v8656_v12 = vadd.f32 %v8655_v2, %v8567_v10 }
 0x55c   : > { %v9001_v39 = vmul.f32 0.16666667, %v8969_v25  ;;  %v8874_v49 = vadd.f32 3.0, %v8822_v38 }
 0x55e   : > { %v9047_v26 = vsel %vm9016_vm0, %v9001_v39, -inf  ;;  %v8906_v36 = vmax.f32 %v8874_v49, 0.0 }
 0x55f   : > { %v9054_v23 = vmax.f32 %v9047_v26, %v9052_v7  ;;  %v8747_v7 = vpop.f32.mrf.mxu0 }
 0x560   : > { %v8938_v21 = vmin.f32 %v8906_v36, 6.0 }
 0x561   : > { %v8823_v42 = vpop.f32.mrf.mxu1 }
 0x562   : > { %v8970_v37 = vmul.f32 %v8938_v21, %v8822_v38  ;;  %v8824_v13 = vadd.f32 %v8823_v42, %v8735_v50  ;;  %v8570_v50 = vadd.f32 %v8569_v24, %v14542_v44  ;;  %v8745_v42 = vadd.f32 %v8744_v16, %v8656_v12 }
 0x564   : > { %v9002_v58 = vmul.f32 0.16666667, %v8970_v37  ;;  %v8875_v4 = vadd.f32 3.0, %v8824_v13  ;;  %v8659_v32 = vadd.f32 %v8658_v5, %v8570_v50 }
 0x566   : > { %v9049_v8 = vsel %vm9016_vm0, %v9002_v58, -inf  ;;  %v8907_v18 = vmax.f32 %v8875_v4, 0.0  ;;  %v8574_v4 = vpop.f32.mrf.mxu2 }
 0x567   : > { %v9056_v54 = vmax.f32 %v9049_v8, %v9054_v23  ;;  %v8660_v23 = vpop.f32.mrf.mxu3 }
 0x568   : > { %v8939_v14 = vmin.f32 %v8907_v18, 6.0 }
 0x569   : > { %v8826_v43 = vpop.f32.mrf.mxu1 }
 0x56a   : > { %v8971_v6 = vmul.f32 %v8939_v14, %v8824_v13  ;;  %v8827_v19 = vadd.f32 %v8826_v43, %v8738_v61  ;;  %v8749_v13 = vpop.f32.mrf.mxu0  ;;  %v8572_v43 = vadd.f32 %v8571_v0, %v14567_v31 }
 0x56c   : > { %v9003_v63 = vmul.f32 0.16666667, %v8971_v6  ;;  %v8876_v11 = vadd.f32 3.0, %v8827_v19 }
 0x56e   : > { %v9051_v35 = vsel %vm9016_vm0, %v9003_v63, -inf  ;;  %v8908_v60 = vmax.f32 %v8876_v11, 0.0  ;;  %v8661_v11 = vadd.f32 %v8660_v23, %v8572_v43  ;;  %v8576_v24 = vpop.f32.mrf.mxu2 }
 0x56f   : > { %v9058_v48 = vmax.f32 %v9051_v35, %v9056_v54  ;;  %v8663_v2 = vpop.f32.mrf.mxu3 }
 0x570   : > { %v8940_v20 = vmin.f32 %v8908_v60, 6.0 }
 0x571   : > { %v8828_v17 = vpop.f32.mrf.mxu1 }
 0x572   : > { %v8972_v55 = vmul.f32 %v8940_v20, %v8827_v19  ;;  %v8829_v33 = vadd.f32 %v8828_v17, %v8740_v47  ;;  %v8748_v19 = vadd.f32 %v8747_v7, %v8659_v32  ;;  %v8752_v16 = vpop.f32.mrf.mxu0  ;;  %v8575_v20 = vadd.f32 %v8574_v4, %v14586_v9 }
 0x573   : > { %v8750_v17 = vadd.f32 %v8749_v13, %v8661_v11  ;;  %v8577_v7 = vadd.f32 %v8576_v24, %v14599_v53 }
 0x574   : > { %v9004_v1 = vmul.f32 0.16666667, %v8972_v55  ;;  %v8877_v61 = vadd.f32 3.0, %v8829_v33 }
 0x576   : > { %v9053_v62 = vsel %vm9016_vm0, %v9004_v1, -inf  ;;  %v8909_v57 = vmax.f32 %v8877_v61, 0.0  ;;  %v8664_v1 = vadd.f32 %v8663_v2, %v8575_v20  ;;  %v8579_v30 = vpop.f32.mrf.mxu2 }
 0x577   : > { %v9060_v59 = vmax.f32 %v9053_v62, %v9058_v48  ;;  %v8665_v27 = vpop.f32.mrf.mxu3 }
 0x578   : > { %v8941_v51 = vmin.f32 %v8909_v57, 6.0 }
 0x579   : > { %v8831_v25 = vpop.f32.mrf.mxu1 }
 0x57a   : > { %v8973_v38 = vmul.f32 %v8941_v51, %v8829_v33  ;;  %v8832_v45 = vadd.f32 %v8831_v25, %v8743_v56  ;;  %v8754_v62 = vpop.f32.mrf.mxu0  ;;  %v8753_v56 = vadd.f32 %v8752_v16, %v8664_v1 }
 0x57c   : > { %v9005_v39 = vmul.f32 0.16666667, %v8973_v38  ;;  %v8878_v49 = vadd.f32 3.0, %v8832_v45  ;;  %v8666_v38 = vadd.f32 %v8665_v27, %v8577_v7 }
 0x57e   : > { %v9055_v26 = vsel %vm9016_vm0, %v9005_v39, -inf  ;;  %v8910_v36 = vmax.f32 %v8878_v49, 0.0 }
 0x57f   : > { %v9062_v21 = vmax.f32 %v9055_v26, %v9060_v59  ;;  %v8668_v39 = vpop.f32.mrf.mxu3 }
 0x580   : > { %v8942_v28 = vmin.f32 %v8910_v36, 6.0 }
 0x581   : > { %v8833_v37 = vpop.f32.mrf.mxu1 }
 0x582   : > { %v8974_v58 = vmul.f32 %v8942_v28, %v8832_v45  ;;  %v8834_v46 = vadd.f32 %v8833_v37, %v8745_v42  ;;  %v8757_v23 = vpop.f32.mrf.mxu0  ;;  %v8755_v28 = vadd.f32 %v8754_v62, %v8666_v38  ;;  %v8581_v42 = vpop.f32.mrf.mxu2 }
 0x584   : > { %v9006_v8 = vmul.f32 0.16666667, %v8974_v58  ;;  %v8879_v18 = vadd.f32 3.0, %v8834_v46 }
 0x586   : > { %v9057_v54 = vsel %vm9016_vm0, %v9006_v8, -inf  ;;  %v8911_v40 = vmax.f32 %v8879_v18, 0.0 }
 0x587   : > { %v9064_v14 = vmax.f32 %v9057_v54, %v9062_v21  ;;  %v8580_v21 = vadd.f32 %v8579_v30, %v14612_v34  ;;  %v8670_v18 = vpop.f32.mrf.mxu3 }
 0x588   : > { %v8943_v6 = vmin.f32 %v8911_v40, 6.0  ;;  %v8582_v40 = vadd.f32 %v8581_v42, %v14625_v41 }
 0x589   : > { %v8836_v44 = vpop.f32.mrf.mxu1  ;;  %v8669_v58 = vadd.f32 %v8668_v39, %v8580_v21 }
 0x58a   : > { %v8975_v22 = vmul.f32 %v8943_v6, %v8834_v46  ;;  %v8837_v63 = vadd.f32 %v8836_v44, %v8748_v19  ;;  %v8759_v2 = vpop.f32.mrf.mxu0  ;;  %v8584_v44 = vpop.f32.mrf.mxu2 }
 0x58b   : > { %v8758_v43 = vadd.f32 %v8757_v23, %v8669_v58 }
 0x58c   : > { %v9007_v35 = vmul.f32 0.16666667, %v8975_v22  ;;  %v8880_v60 = vadd.f32 3.0, %v8837_v63  ;;  %v8671_v22 = vadd.f32 %v8670_v18, %v8582_v40 }
 0x58e   : > { %v9059_v48 = vsel %vm9016_vm0, %v9007_v35, -inf  ;;  %v8912_v3 = vmax.f32 %v8880_v60, 0.0 }
 0x58f   : > { %v9066_v52 = vmax.f32 %v9059_v48, %v9064_v14  ;;  %v8673_v60 = vpop.f32.mrf.mxu3  ;;  %v8585_v48 = vadd.f32 %v8584_v44, %v14638_v29 }
 0x590   : > { %v8944_v47 = vmin.f32 %v8912_v3, 6.0 }
 0x591   : > { %v8838_v31 = vpop.f32.mrf.mxu1 }
 0x592   : > { %v8976_v55 = vmul.f32 %v8944_v47, %v8837_v63  ;;  %v8839_v33 = vadd.f32 %v8838_v31, %v8750_v17  ;;  %v8762_v17 = vpop.f32.mrf.mxu0  ;;  %v8674_v31 = vadd.f32 %v8673_v60, %v8585_v48  ;;  %v8586_v27 = vpop.f32.mrf.mxu2 }
 0x594   : > { %v9008_v61 = vmul.f32 0.16666667, %v8976_v55  ;;  %v8881_v5 = vadd.f32 3.0, %v8839_v33  ;;  %v8763_v62 = vadd.f32 %v8762_v17, %v8674_v31 }
 0x596   : > { %v9061_v57 = vsel %vm9016_vm0, %v9008_v61, -inf  ;;  %v8913_v59 = vmax.f32 %v8881_v5, 0.0 }
 0x597   : > { %v9068_v10 = vmax.f32 %v9061_v57, %v9066_v52  ;;  %v8760_v52 = vadd.f32 %v8759_v2, %v8671_v22  ;;  %v8587_v57 = vadd.f32 %v8586_v27, %v14645_v15  ;;  %v8675_v30 = vpop.f32.mrf.mxu3 }
 0x598   : > { %v8945_v51 = vmin.f32 %v8913_v59, 6.0 }
 0x599   : > { %v8841_v9 = vpop.f32.mrf.mxu1 }
 0x59a   : > { %v8977_v0 = vmul.f32 %v8945_v51, %v8839_v33  ;;  %v8842_v25 = vadd.f32 %v8841_v9, %v8753_v56  ;;  %v8676_v51 = vadd.f32 %v8675_v30, %v8587_v57 }
 0x59c   : > { %v9009_v45 = vmul.f32 0.16666667, %v8977_v0  ;;  %v8882_v12 = vadd.f32 3.0, %v8842_v25  ;;  %v8764_v0 = vpop.f32.mrf.mxu0 }
 0x59e   : > { %v9063_v49 = vsel %vm9016_vm0, %v9009_v45, -inf  ;;  %v8914_v26 = vmax.f32 %v8882_v12, 0.0  ;;  %v8765_v12 = vadd.f32 %v8764_v0, %v8676_v51 }
 0x59f   : > { %v9070_v36 = vmax.f32 %v9063_v49, %v9068_v10 }
 0x5a0   : > { %v8946_v50 = vmin.f32 %v8914_v26, 6.0 }
 0x5a1   : > { %v8843_v53 = vpop.f32.mrf.mxu1 }
 0x5a2   : > { %v8978_v37 = vmul.f32 %v8946_v50, %v8842_v25  ;;  %v8844_v13 = vadd.f32 %v8843_v53, %v8755_v28 }
 0x5a4   : > { %v9010_v46 = vmul.f32 0.16666667, %v8978_v37  ;;  %v8883_v4 = vadd.f32 3.0, %v8844_v13 }
 0x5a6   : > { %v9065_v32 = vsel %vm9016_vm0, %v9010_v46, -inf  ;;  %v8915_v8 = vmax.f32 %v8883_v4, 0.0 }
 0x5a7   : > { %v9072_v54 = vmax.f32 %v9065_v32, %v9070_v36 }
 0x5a8   : > { %v8947_v14 = vmin.f32 %v8915_v8, 6.0 }
 0x5a9   : > { %v8846_v6 = vpop.f32.mrf.mxu1 }
 0x5aa   : > { %v8979_v34 = vmul.f32 %v8947_v14, %v8844_v13  ;;  %v8847_v19 = vadd.f32 %v8846_v6, %v8758_v43 }
 0x5ac   : > { %v9011_v63 = vmul.f32 0.16666667, %v8979_v34  ;;  %v8884_v11 = vadd.f32 3.0, %v8847_v19 }
 0x5ae   : > { %v9067_v16 = vsel %vm9016_vm0, %v9011_v63, -inf  ;;  %v8916_v35 = vmax.f32 %v8884_v11, 0.0 }
 0x5af   : > { %v9077_v24 = vmax.f32 %v9067_v16, %v9072_v54 }
 0x5b0   : > { %v8948_v3 = vmin.f32 %v8916_v35, 6.0 }
 0x5b1   : > { %v8848_v41 = vpop.f32.mrf.mxu1 }
 0x5b2   : > { %v8980_v20 = vmul.f32 %v8948_v3, %v8847_v19  ;;  %v8849_v47 = vadd.f32 %v8848_v41, %v8760_v52 }
 0x5b4   : > { %v9012_v55 = vmul.f32 0.16666667, %v8980_v20  ;;  %v8885_v33 = vadd.f32 3.0, %v8849_v47 }
 0x5b6   : > { %v9069_v1 = vsel %vm9016_vm0, %v9012_v55, -inf  ;;  %v8917_v61 = vmax.f32 %v8885_v33, 0.0 }
 0x5b7   : > { %v9074_v5 = vmax.f32 %v9069_v1, %v9077_v24 }
 0x5b8   : > { %v8949_v59 = vmin.f32 %v8917_v61, 6.0 }
 0x5b9   : > { %v8851_v29 = vpop.f32.mrf.mxu1 }
 0x5ba   : > { %v8981_v10 = vmul.f32 %v8949_v59, %v8849_v47  ;;  %v8852_v7 = vadd.f32 %v8851_v29, %v8763_v62 }
 0x5bc   : > { %v9013_v56 = vmul.f32 0.16666667, %v8981_v10  ;;  %v8886_v9 = vadd.f32 3.0, %v8852_v7 }
 0x5be   : > { %v9071_v25 = vsel %vm9016_vm0, %v9013_v56, -inf  ;;  %v8918_v38 = vmax.f32 %v8886_v9, 0.0 }
 0x5bf   : > { %v9076_v45 = vmax.f32 %v9071_v25, %v9074_v5 }
 0x5c0   : > { %v8950_v39 = vmin.f32 %v8918_v38, 6.0 }
 0x5c1   : > { %v8853_v49 = vpop.f32.mrf.mxu1 }
 0x5c2   : > { %v8982_v26 = vmul.f32 %v8950_v39, %v8852_v7  ;;  %v8854_v15 = vadd.f32 %v8853_v49, %v8765_v12 }
 0x5c4   : > { %v9014_v36 = vmul.f32 0.16666667, %v8982_v26  ;;  %v8887_v23 = vadd.f32 3.0, %v8854_v15 }
 0x5c6   : > { %v9073_v21 = vsel %vm9016_vm0, %v9014_v36, -inf  ;;  %v8919_v50 = vmax.f32 %v8887_v23, 0.0 }
 0x5c7   : > { %v9078_v28 = vmax.f32 %v9073_v21, %v9076_v45 }
 0x5c8   : > { %v8951_v42 = vmin.f32 %v8919_v50, 6.0 }
 0x5ca   : > { %v8983_v53 = vmul.f32 %v8951_v42, %v8854_v15 }
 0x5cc   : > { %v9015_v37 = vmul.f32 0.16666667, %v8983_v53 }
 0x5ce   : > { %v9075_v13 = vsel %vm9016_vm0, %v9015_v37, -inf }
 0x5cf   : > { %v9079_v58 = vmax.f32 %v9075_v13, %v9078_v28 }
 0x5d1   : > { %v9080_v46 = vrot.slane %v9079_v58, 4 }
 0x5d3   : > { %v9081_v4 = vmax.f32 %v9079_v58, %v9080_v46 }
 0x5d5   : > { %v9082_v32 = vrot.slane %v9081_v4, 2 }
 0x5d7   : > { %v9083_v8 = vmax.f32 %v9081_v4, %v9082_v32 }
 0x5d9   : > { %v9084_v18 = vrot.slane %v9083_v8, 1 }
 0x5db   : > { %v9085_v54 = vmax.f32 %v9083_v8, %v9084_v18 }
 0x5dd   : > { %9087 = vst.msk [vmem:[%s216_s25] sm:$0x1] %vm9086_vm1, %v9085_v54 }
 0x5de   : > { %10677 = shalt.err (!%p10674_p3)
}
 0x5df   : > { %10562 = dma.vmem_to_hbm [thread:$0]  (%p10783_p5), %s9100_s26, 16, %s9102_s30, %s9089_s6  }
 0x5e0 PF: > { %p10568_p4 = scmp.ge.s32.totalorder %s10712_s21, 2  ;;  %s9113_s7 = sand.u32 1, %s10700_s18  }
 0x5e1   : > { %s9114_s14 = scalar_lea.sflag [#allocation4], %s9113_s7 }
 0x5e2   : > { %p10565_p7 = pnand %p10568_p4, %p10787_p6 }
 0x5e4   : > { %p10566_p8 = pneg %p10565_p7 }
 0x5e6   : > { %10695 = dma.done.wait (%p10566_p8), %s9114_s14, 16  }
 0x5e7   : > { %10697 = vsyncadd (%p10566_p8), %s9114_s14, 4294967280  ;;  %p15_p9 = scmp.ge.s32.totalorder %s10770_s24, 4   ;;  %s14998_s18 = smov %s10704_s19 }
 0x5e8   : > { %s14999_s19 = smov %s10708_s20  ;;  %s15000_s20 = smov %s10781_s27 }
 0x5e9   : > { %s15001_s21 = smov %s10770_s24  ;;  %17 = sbr.rel (!%p15_p9) target bundleno = 3 (0x3), region = 88 }
 0x5ee   :  { %9119 = vsyncpa [#allocation4], 1 }
 0x5ef   :  { %9121 = vsyncpa [#allocation4 + $0x1], 1 }

</bundles_post_ra>
